<compile_context>
chip_gen: v7x
topology: tpu7x:2x2x1
jax: 0.10.0
libtpu: 0.0.40
codegen_flags: <defaults>
</compile_context>

<pallas_src>
import numpy as np
import jax
import jax.numpy as jnp
from jax.experimental import pallas as pl
from jax.experimental.pallas import tpu as pltpu

EMB_DIM = 100
C1, K1 = 256, 7
P1_OUT = 128
C2, K2 = 128, 5
P2_OUT = 64
C3, K3 = 64, 3
P3_OUT = 32
FC1_OUT = 64


def _adaptive_avg_pool_matrix(in_size, out_size):
    """(in_size, out_size) matrix implementing torch AdaptiveAvgPool1d."""
    P = np.zeros((in_size, out_size), dtype=np.float32)
    for o in range(out_size):
        start = (o * in_size) // out_size
        end = -(-((o + 1) * in_size) // out_size)  # ceil
        P[start:end, o] = 1.0 / float(end - start)
    return P


def _cnn_kernel(x_ref, w1_ref, b1_ref, p1_ref,
                w2_ref, b2_ref, p2_ref,
                w3_ref, b3_ref, p3_ref,
                fc1w_ref, fc1b_ref, fc2w_ref, fc2b_ref,
                out_ref):
    bblk = x_ref.shape[0]
    l2 = P1_OUT - (K2 - 1)          # 124
    l3 = P2_OUT - (K3 - 1)          # 62
    ngrp = C3 // 8                  # 8 sublane-groups of channels

    for b in range(bblk):
        xc = x_ref[b]                                        # (700, l1) bf16

        # ---- conv1: single K-concatenated MXU matmul + bias + relu + pool1
        h = jnp.dot(w1_ref[...], xc, preferred_element_type=jnp.float32)
        h = jnp.maximum(h + b1_ref[...], 0.0).astype(jnp.bfloat16)
        h = jnp.dot(h, p1_ref[...], preferred_element_type=jnp.float32)
        h = h.astype(jnp.bfloat16)                           # (C1, 128)

        # ---- conv2 (5 shifted taps, K=256 fills the MXU) + relu + pool2
        h2 = jnp.dot(w2_ref[0], h[:, 0:l2], preferred_element_type=jnp.float32)
        for k in range(1, K2):
            h2 = h2 + jnp.dot(w2_ref[k], h[:, k:k + l2],
                              preferred_element_type=jnp.float32)
        h2 = jnp.maximum(h2 + b2_ref[...], 0.0).astype(jnp.bfloat16)
        h2 = jnp.dot(h2, p2_ref[...], preferred_element_type=jnp.float32)
        h2 = h2.astype(jnp.bfloat16)                         # (C2, 64)

        # ---- conv3 (3 shifted taps) + relu + pool3
        h3 = jnp.dot(w3_ref[0], h2[:, 0:l3], preferred_element_type=jnp.float32)
        for k in range(1, K3):
            h3 = h3 + jnp.dot(w3_ref[k], h2[:, k:k + l3],
                              preferred_element_type=jnp.float32)
        h3 = jnp.maximum(h3 + b3_ref[...], 0.0).astype(jnp.bfloat16)
        h3 = jnp.dot(h3, p3_ref[...], preferred_element_type=jnp.float32)  # (C3, 32) f32

        # ---- fc1 on the MXU: regroup (64, 32) -> (8, 256) by concatenating
        # the 8 sublane-groups of channels along lanes; the fc1 weight was
        # re-laid out in the wrapper to match (fc1w_ref is (8, 256, FC1_OUT)).
        g = jnp.concatenate([h3[8 * i:8 * i + 8, :] for i in range(ngrp)],
                            axis=1).astype(jnp.bfloat16)     # (8, 256)
        y = fc1b_ref[...]                                    # (1, FC1_OUT) f32
        for r in range(8):
            y = y + jnp.dot(g[r:r + 1, :], fc1w_ref[r],
                            preferred_element_type=jnp.float32)
        y = jnp.maximum(y, 0.0).astype(jnp.bfloat16)         # (1, FC1_OUT)

        # ---- fc2
        logits = jnp.dot(y, fc2w_ref[...],
                         preferred_element_type=jnp.float32) + fc2b_ref[...]
        out_ref[b] = logits                                  # (1, num_lang)


def language_classifier_forward(tokens, params, block_b=2):
    B, L = tokens.shape
    assert L >= K1, "sequence length must be >= conv1 kernel size"
    num_lang = params["fc2w"].shape[0]
    l1 = L - (K1 - 1)
    l2 = P1_OUT - (K2 - 1)
    l3 = P2_OUT - (K3 - 1)
    bf16 = jnp.bfloat16

    # --- glue: embedding gather, NLC->NCL, bf16 cast, conv1 im2col ---
    x_cl = jnp.transpose(params["emb"][tokens], (0, 2, 1)).astype(bf16)      # (B, 100, L)
    x_cat = jnp.concatenate([x_cl[:, :, k:k + l1] for k in range(K1)],
                            axis=1)                                          # (B, 700, l1)

    bblk = int(max(1, min(block_b, B)))
    b_pad = -(-B // bblk) * bblk
    if b_pad != B:
        x_cat = jnp.pad(x_cat, ((0, b_pad - B), (0, 0), (0, 0)))

    # --- glue: parameter re-layouts, bf16 for MXU operands, f32 biases ---
    w1c = jnp.transpose(params["w1"], (0, 2, 1)).reshape(C1, K1 * EMB_DIM).astype(bf16)
    w2k = jnp.transpose(params["w2"], (2, 0, 1)).astype(bf16)                # (K2, C2, C1)
    w3k = jnp.transpose(params["w3"], (2, 0, 1)).astype(bf16)                # (K3, C3, C2)
    b1c = params["b1"][:, None].astype(jnp.float32)
    b2c = params["b2"][:, None].astype(jnp.float32)
    b3c = params["b3"][:, None].astype(jnp.float32)
    P1 = jnp.asarray(_adaptive_avg_pool_matrix(l1, P1_OUT)).astype(bf16)
    P2 = jnp.asarray(_adaptive_avg_pool_matrix(l2, P2_OUT)).astype(bf16)
    P3 = jnp.asarray(_adaptive_avg_pool_matrix(l3, P3_OUT)).astype(bf16)
    # fc1w8[r, i*32 + t, o] = fc1w[o, (8*i + r)*32 + t]  (matches in-kernel regrouping)
    fc1w8 = (params["fc1w"].reshape(FC1_OUT, C3 // 8, 8, P3_OUT)
             .transpose(2, 1, 3, 0)
             .reshape(8, (C3 // 8) * P3_OUT, FC1_OUT)
             .astype(bf16))                                                  # (8, 256, 64)
    fc1b_r = params["fc1b"][None, :].astype(jnp.float32)
    fc2w_t = params["fc2w"].T.astype(bf16)                                   # (64, num_lang)
    fc2b_r = params["fc2b"][None, :].astype(jnp.float32)

    c2 = lambda a: pl.BlockSpec(a.shape, lambda b: (0, 0))
    c3 = lambda a: pl.BlockSpec(a.shape, lambda b: (0, 0, 0))

    out = pl.pallas_call(
        _cnn_kernel,
        out_shape=jax.ShapeDtypeStruct((b_pad, 1, num_lang), jnp.float32),
        grid_spec=pltpu.PrefetchScalarGridSpec(
            num_scalar_prefetch=0,
            grid=(b_pad // bblk,),
            in_specs=[
                pl.BlockSpec((bblk, K1 * EMB_DIM, l1), lambda b: (b, 0, 0)),
                c2(w1c), c2(b1c), c2(P1),
                c3(w2k), c2(b2c), c2(P2),
                c3(w3k), c2(b3c), c2(P3),
                c3(fc1w8), c2(fc1b_r), c2(fc2w_t), c2(fc2b_r),
            ],
            out_specs=pl.BlockSpec((bblk, 1, num_lang), lambda b: (b, 0, 0)),
        ),
        compiler_params=pltpu.CompilerParams(
            dimension_semantics=("parallel",)),
    )(x_cat, w1c, b1c, P1, w2k, b2c, P2, w3k, b3c, P3,
      fc1w8, fc1b_r, fc2w_t, fc2b_r)
    return out[:B].reshape(B, num_lang)


def reference_forward(tokens, params):
    """Pure-JAX f32 reference matching the PyTorch forward."""
    hi = jax.lax.Precision.HIGHEST
    x = params["emb"][tokens]                     # (B, L, 100)
    x = jnp.transpose(x, (0, 2, 1))               # (B, 100, L)

    def conv1d(x, w, b):
        y = jax.lax.conv_general_dilated(
            x, w, window_strides=(1,), padding="VALID",
            dimension_numbers=("NCH", "OIH", "NCH"), precision=hi)
        return y + b[None, :, None]

    def apool(x, out_size):
        P = jnp.asarray(_adaptive_avg_pool_matrix(x.shape[-1], out_size))
        return jnp.einsum("bcl,lo->bco", x, P, precision=hi)

    h = apool(jax.nn.relu(conv1d(x, params["w1"], params["b1"])), P1_OUT)
    h = apool(jax.nn.relu(conv1d(h, params["w2"], params["b2"])), P2_OUT)
    h = apool(jax.nn.relu(conv1d(h, params["w3"], params["b3"])), P3_OUT)
    h = h.reshape(h.shape[0], -1)
    h = jax.nn.relu(jnp.dot(h, params["fc1w"].T, precision=hi) + params["fc1b"])
    return jnp.dot(h, params["fc2w"].T, precision=hi) + params["fc2b"]


if __name__ == "__main__":
    key = jax.random.PRNGKey(0)
    B, L, VOCAB, NUM_LANG = 4, 200, 50, 10
    ks = jax.random.split(key, 12)
    tokens = jax.random.randint(ks[0], (B, L), 0, VOCAB, dtype=jnp.int32)
    params = dict(
        emb=0.1 * jax.random.normal(ks[1], (VOCAB, EMB_DIM), jnp.float32),
        w1=0.05 * jax.random.normal(ks[2], (C1, EMB_DIM, K1), jnp.float32),
        b1=0.05 * jax.random.normal(ks[3], (C1,), jnp.float32),
        w2=0.05 * jax.random.normal(ks[4], (C2, C1, K2), jnp.float32),
        b2=0.05 * jax.random.normal(ks[5], (C2,), jnp.float32),
        w3=0.05 * jax.random.normal(ks[6], (C3, C2, K3), jnp.float32),
        b3=0.05 * jax.random.normal(ks[7], (C3,), jnp.float32),
        fc1w=0.05 * jax.random.normal(ks[8], (FC1_OUT, C3 * P3_OUT), jnp.float32),
        fc1b=0.05 * jax.random.normal(ks[9], (FC1_OUT,), jnp.float32),
        fc2w=0.05 * jax.random.normal(ks[10], (NUM_LANG, FC1_OUT), jnp.float32),
        fc2b=0.05 * jax.random.normal(ks[11], (NUM_LANG,), jnp.float32),
    )

    out = jax.block_until_ready(
        language_classifier_forward(tokens, params, block_b=2))
    ref = jax.block_until_ready(reference_forward(tokens, params))

    assert out.shape == (B, NUM_LANG)
    max_err = float(jnp.max(jnp.abs(out - ref)))
    scale = float(jnp.max(jnp.abs(ref)))
    tol = 2e-2 * (1.0 + scale)   # bf16 MXU operands vs f32 reference
    if max_err > tol:
        raise AssertionError(
            f"kernel/reference mismatch: max abs err {max_err} > tol {tol}")
    print("KERNEL_OK")
</pallas_src>

<mosaic_0001>
module attributes {stable_mosaic.version = 11 : i64} {
  func.func @_cnn_kernel(%arg0: i32, %arg1: memref<2x700x194xbf16, #tpu.memory_space<vmem>>, %arg2: memref<256x700xbf16, #tpu.memory_space<vmem>>, %arg3: memref<256x1xf32, #tpu.memory_space<vmem>>, %arg4: memref<194x128xbf16, #tpu.memory_space<vmem>>, %arg5: memref<5x128x256xbf16, #tpu.memory_space<vmem>>, %arg6: memref<128x1xf32, #tpu.memory_space<vmem>>, %arg7: memref<124x64xbf16, #tpu.memory_space<vmem>>, %arg8: memref<3x64x128xbf16, #tpu.memory_space<vmem>>, %arg9: memref<64x1xf32, #tpu.memory_space<vmem>>, %arg10: memref<62x32xbf16, #tpu.memory_space<vmem>>, %arg11: memref<8x256x64xbf16, #tpu.memory_space<vmem>>, %arg12: memref<1x64xf32, #tpu.memory_space<vmem>>, %arg13: memref<64x10xbf16, #tpu.memory_space<vmem>>, %arg14: memref<1x10xf32, #tpu.memory_space<vmem>>, %arg15: memref<2x1x10xf32, #tpu.memory_space<vmem>>) attributes {dimension_semantics = [#tpu.dimension_semantics<parallel>], iteration_bounds = array<i64: 2>, scalar_prefetch = 0 : i64, scratch_operands = 0 : i64, tpu.core_type = #tpu.core_type<tc>, window_params = [{transform_indices = @transform_0, window_bounds = array<i64: 2, 700, 194>}, {pipeline_mode = #tpu.pipeline_mode<synchronous>, transform_indices = @transform_1, window_bounds = array<i64: 256, 700>}, {pipeline_mode = #tpu.pipeline_mode<synchronous>, transform_indices = @transform_2, window_bounds = array<i64: 256, 1>}, {pipeline_mode = #tpu.pipeline_mode<synchronous>, transform_indices = @transform_3, window_bounds = array<i64: 194, 128>}, {pipeline_mode = #tpu.pipeline_mode<synchronous>, transform_indices = @transform_4, window_bounds = array<i64: 5, 128, 256>}, {pipeline_mode = #tpu.pipeline_mode<synchronous>, transform_indices = @transform_5, window_bounds = array<i64: 128, 1>}, {pipeline_mode = #tpu.pipeline_mode<synchronous>, transform_indices = @transform_6, window_bounds = array<i64: 124, 64>}, {pipeline_mode = #tpu.pipeline_mode<synchronous>, transform_indices = @transform_7, window_bounds = array<i64: 3, 64, 128>}, {pipeline_mode = #tpu.pipeline_mode<synchronous>, transform_indices = @transform_8, window_bounds = array<i64: 64, 1>}, {pipeline_mode = #tpu.pipeline_mode<synchronous>, transform_indices = @transform_9, window_bounds = array<i64: 62, 32>}, {pipeline_mode = #tpu.pipeline_mode<synchronous>, transform_indices = @transform_10, window_bounds = array<i64: 8, 256, 64>}, {pipeline_mode = #tpu.pipeline_mode<synchronous>, transform_indices = @transform_11, window_bounds = array<i64: 1, 64>}, {pipeline_mode = #tpu.pipeline_mode<synchronous>, transform_indices = @transform_12, window_bounds = array<i64: 64, 10>}, {pipeline_mode = #tpu.pipeline_mode<synchronous>, transform_indices = @transform_13, window_bounds = array<i64: 1, 10>}, {transform_indices = @transform_14, window_bounds = array<i64: 2, 1, 10>}]} {
    %c0 = arith.constant 0 : index
    %c0_0 = arith.constant 0 : index
    %c0_1 = arith.constant 0 : index
    %0 = vector.load %arg1[%c0, %c0_0, %c0_1] : memref<2x700x194xbf16, #tpu.memory_space<vmem>>, vector<1x700x194xbf16>
    %1 = vector.shape_cast %0 : vector<1x700x194xbf16> to vector<700x194xbf16>
    %c0_2 = arith.constant 0 : index
    %c0_3 = arith.constant 0 : index
    %2 = vector.load %arg2[%c0_2, %c0_3] : memref<256x700xbf16, #tpu.memory_space<vmem>>, vector<256x700xbf16>
    %cst = arith.constant dense<0.000000e+00> : vector<256x194xf32>
    %3 = tpu.matmul %2, %1, %cst {dimension_numbers = #tpu.dot_dimension_numbers<[1], [0], [0], [1], [0, 0, 1, 1], [], []>} : vector<256x700xbf16>, vector<700x194xbf16>, vector<256x194xf32> -> vector<256x194xf32>
    %c0_4 = arith.constant 0 : index
    %c0_5 = arith.constant 0 : index
    %4 = vector.load %arg3[%c0_4, %c0_5] : memref<256x1xf32, #tpu.memory_space<vmem>>, vector<256x1xf32>
    %5 = vector.broadcast %4 : vector<256x1xf32> to vector<256x194xf32>
    %6 = arith.addf %3, %5 : vector<256x194xf32>
    %cst_6 = arith.constant 0.000000e+00 : f32
    %7 = vector.broadcast %cst_6 : f32 to vector<256x194xf32>
    %8 = arith.maximumf %6, %7 : vector<256x194xf32>
    %9 = arith.truncf %8 : vector<256x194xf32> to vector<256x194xbf16>
    %c0_7 = arith.constant 0 : index
    %c0_8 = arith.constant 0 : index
    %10 = vector.load %arg4[%c0_7, %c0_8] : memref<194x128xbf16, #tpu.memory_space<vmem>>, vector<194x128xbf16>
    %cst_9 = arith.constant dense<0.000000e+00> : vector<256x128xf32>
    %11 = tpu.matmul %9, %10, %cst_9 {dimension_numbers = #tpu.dot_dimension_numbers<[1], [0], [0], [1], [0, 0, 1, 1], [], []>} : vector<256x194xbf16>, vector<194x128xbf16>, vector<256x128xf32> -> vector<256x128xf32>
    %12 = arith.truncf %11 : vector<256x128xf32> to vector<256x128xbf16>
    %c0_10 = arith.constant 0 : index
    %c0_11 = arith.constant 0 : index
    %c0_12 = arith.constant 0 : index
    %13 = vector.load %arg5[%c0_10, %c0_11, %c0_12] : memref<5x128x256xbf16, #tpu.memory_space<vmem>>, vector<1x128x256xbf16>
    %14 = vector.shape_cast %13 : vector<1x128x256xbf16> to vector<128x256xbf16>
    %15 = vector.extract_strided_slice %12 {offsets = [0, 0], sizes = [256, 124], strides = [1, 1]} : vector<256x128xbf16> to vector<256x124xbf16>
    %cst_13 = arith.constant dense<0.000000e+00> : vector<128x124xf32>
    %16 = tpu.matmul %14, %15, %cst_13 {dimension_numbers = #tpu.dot_dimension_numbers<[1], [0], [0], [1], [0, 0, 1, 1], [], []>} : vector<128x256xbf16>, vector<256x124xbf16>, vector<128x124xf32> -> vector<128x124xf32>
    %c1 = arith.constant 1 : index
    %c0_14 = arith.constant 0 : index
    %c0_15 = arith.constant 0 : index
    %17 = vector.load %arg5[%c1, %c0_14, %c0_15] : memref<5x128x256xbf16, #tpu.memory_space<vmem>>, vector<1x128x256xbf16>
    %18 = vector.shape_cast %17 : vector<1x128x256xbf16> to vector<128x256xbf16>
    %19 = vector.extract_strided_slice %12 {offsets = [0, 1], sizes = [256, 124], strides = [1, 1]} : vector<256x128xbf16> to vector<256x124xbf16>
    %cst_16 = arith.constant dense<0.000000e+00> : vector<128x124xf32>
    %20 = tpu.matmul %18, %19, %cst_16 {dimension_numbers = #tpu.dot_dimension_numbers<[1], [0], [0], [1], [0, 0, 1, 1], [], []>} : vector<128x256xbf16>, vector<256x124xbf16>, vector<128x124xf32> -> vector<128x124xf32>
    %21 = arith.addf %16, %20 : vector<128x124xf32>
    %c2 = arith.constant 2 : index
    %c0_17 = arith.constant 0 : index
    %c0_18 = arith.constant 0 : index
    %22 = vector.load %arg5[%c2, %c0_17, %c0_18] : memref<5x128x256xbf16, #tpu.memory_space<vmem>>, vector<1x128x256xbf16>
    %23 = vector.shape_cast %22 : vector<1x128x256xbf16> to vector<128x256xbf16>
    %24 = vector.extract_strided_slice %12 {offsets = [0, 2], sizes = [256, 124], strides = [1, 1]} : vector<256x128xbf16> to vector<256x124xbf16>
    %cst_19 = arith.constant dense<0.000000e+00> : vector<128x124xf32>
    %25 = tpu.matmul %23, %24, %cst_19 {dimension_numbers = #tpu.dot_dimension_numbers<[1], [0], [0], [1], [0, 0, 1, 1], [], []>} : vector<128x256xbf16>, vector<256x124xbf16>, vector<128x124xf32> -> vector<128x124xf32>
    %26 = arith.addf %21, %25 : vector<128x124xf32>
    %c3 = arith.constant 3 : index
    %c0_20 = arith.constant 0 : index
    %c0_21 = arith.constant 0 : index
    %27 = vector.load %arg5[%c3, %c0_20, %c0_21] : memref<5x128x256xbf16, #tpu.memory_space<vmem>>, vector<1x128x256xbf16>
    %28 = vector.shape_cast %27 : vector<1x128x256xbf16> to vector<128x256xbf16>
    %29 = vector.extract_strided_slice %12 {offsets = [0, 3], sizes = [256, 124], strides = [1, 1]} : vector<256x128xbf16> to vector<256x124xbf16>
    %cst_22 = arith.constant dense<0.000000e+00> : vector<128x124xf32>
    %30 = tpu.matmul %28, %29, %cst_22 {dimension_numbers = #tpu.dot_dimension_numbers<[1], [0], [0], [1], [0, 0, 1, 1], [], []>} : vector<128x256xbf16>, vector<256x124xbf16>, vector<128x124xf32> -> vector<128x124xf32>
    %31 = arith.addf %26, %30 : vector<128x124xf32>
    %c4 = arith.constant 4 : index
    %c0_23 = arith.constant 0 : index
    %c0_24 = arith.constant 0 : index
    %32 = vector.load %arg5[%c4, %c0_23, %c0_24] : memref<5x128x256xbf16, #tpu.memory_space<vmem>>, vector<1x128x256xbf16>
    %33 = vector.shape_cast %32 : vector<1x128x256xbf16> to vector<128x256xbf16>
    %34 = vector.extract_strided_slice %12 {offsets = [0, 4], sizes = [256, 124], strides = [1, 1]} : vector<256x128xbf16> to vector<256x124xbf16>
    %cst_25 = arith.constant dense<0.000000e+00> : vector<128x124xf32>
    %35 = tpu.matmul %33, %34, %cst_25 {dimension_numbers = #tpu.dot_dimension_numbers<[1], [0], [0], [1], [0, 0, 1, 1], [], []>} : vector<128x256xbf16>, vector<256x124xbf16>, vector<128x124xf32> -> vector<128x124xf32>
    %36 = arith.addf %31, %35 : vector<128x124xf32>
    %c0_26 = arith.constant 0 : index
    %c0_27 = arith.constant 0 : index
    %37 = vector.load %arg6[%c0_26, %c0_27] : memref<128x1xf32, #tpu.memory_space<vmem>>, vector<128x1xf32>
    %38 = vector.broadcast %37 : vector<128x1xf32> to vector<128x124xf32>
    %39 = arith.addf %36, %38 : vector<128x124xf32>
    %cst_28 = arith.constant 0.000000e+00 : f32
    %40 = vector.broadcast %cst_28 : f32 to vector<128x124xf32>
    %41 = arith.maximumf %39, %40 : vector<128x124xf32>
    %42 = arith.truncf %41 : vector<128x124xf32> to vector<128x124xbf16>
    %c0_29 = arith.constant 0 : index
    %c0_30 = arith.constant 0 : index
    %43 = vector.load %arg7[%c0_29, %c0_30] : memref<124x64xbf16, #tpu.memory_space<vmem>>, vector<124x64xbf16>
    %cst_31 = arith.constant dense<0.000000e+00> : vector<128x64xf32>
    %44 = tpu.matmul %42, %43, %cst_31 {dimension_numbers = #tpu.dot_dimension_numbers<[1], [0], [0], [1], [0, 0, 1, 1], [], []>} : vector<128x124xbf16>, vector<124x64xbf16>, vector<128x64xf32> -> vector<128x64xf32>
    %45 = arith.truncf %44 : vector<128x64xf32> to vector<128x64xbf16>
    %c0_32 = arith.constant 0 : index
    %c0_33 = arith.constant 0 : index
    %c0_34 = arith.constant 0 : index
    %46 = vector.load %arg8[%c0_32, %c0_33, %c0_34] : memref<3x64x128xbf16, #tpu.memory_space<vmem>>, vector<1x64x128xbf16>
    %47 = vector.shape_cast %46 : vector<1x64x128xbf16> to vector<64x128xbf16>
    %48 = vector.extract_strided_slice %45 {offsets = [0, 0], sizes = [128, 62], strides = [1, 1]} : vector<128x64xbf16> to vector<128x62xbf16>
    %cst_35 = arith.constant dense<0.000000e+00> : vector<64x62xf32>
    %49 = tpu.matmul %47, %48, %cst_35 {dimension_numbers = #tpu.dot_dimension_numbers<[1], [0], [0], [1], [0, 0, 1, 1], [], []>} : vector<64x128xbf16>, vector<128x62xbf16>, vector<64x62xf32> -> vector<64x62xf32>
    %c1_36 = arith.constant 1 : index
    %c0_37 = arith.constant 0 : index
    %c0_38 = arith.constant 0 : index
    %50 = vector.load %arg8[%c1_36, %c0_37, %c0_38] : memref<3x64x128xbf16, #tpu.memory_space<vmem>>, vector<1x64x128xbf16>
    %51 = vector.shape_cast %50 : vector<1x64x128xbf16> to vector<64x128xbf16>
    %52 = vector.extract_strided_slice %45 {offsets = [0, 1], sizes = [128, 62], strides = [1, 1]} : vector<128x64xbf16> to vector<128x62xbf16>
    %cst_39 = arith.constant dense<0.000000e+00> : vector<64x62xf32>
    %53 = tpu.matmul %51, %52, %cst_39 {dimension_numbers = #tpu.dot_dimension_numbers<[1], [0], [0], [1], [0, 0, 1, 1], [], []>} : vector<64x128xbf16>, vector<128x62xbf16>, vector<64x62xf32> -> vector<64x62xf32>
    %54 = arith.addf %49, %53 : vector<64x62xf32>
    %c2_40 = arith.constant 2 : index
    %c0_41 = arith.constant 0 : index
    %c0_42 = arith.constant 0 : index
    %55 = vector.load %arg8[%c2_40, %c0_41, %c0_42] : memref<3x64x128xbf16, #tpu.memory_space<vmem>>, vector<1x64x128xbf16>
    %56 = vector.shape_cast %55 : vector<1x64x128xbf16> to vector<64x128xbf16>
    %57 = vector.extract_strided_slice %45 {offsets = [0, 2], sizes = [128, 62], strides = [1, 1]} : vector<128x64xbf16> to vector<128x62xbf16>
    %cst_43 = arith.constant dense<0.000000e+00> : vector<64x62xf32>
    %58 = tpu.matmul %56, %57, %cst_43 {dimension_numbers = #tpu.dot_dimension_numbers<[1], [0], [0], [1], [0, 0, 1, 1], [], []>} : vector<64x128xbf16>, vector<128x62xbf16>, vector<64x62xf32> -> vector<64x62xf32>
    %59 = arith.addf %54, %58 : vector<64x62xf32>
    %c0_44 = arith.constant 0 : index
    %c0_45 = arith.constant 0 : index
    %60 = vector.load %arg9[%c0_44, %c0_45] : memref<64x1xf32, #tpu.memory_space<vmem>>, vector<64x1xf32>
    %61 = vector.broadcast %60 : vector<64x1xf32> to vector<64x62xf32>
    %62 = arith.addf %59, %61 : vector<64x62xf32>
    %cst_46 = arith.constant 0.000000e+00 : f32
    %63 = vector.broadcast %cst_46 : f32 to vector<64x62xf32>
    %64 = arith.maximumf %62, %63 : vector<64x62xf32>
    %65 = arith.truncf %64 : vector<64x62xf32> to vector<64x62xbf16>
    %c0_47 = arith.constant 0 : index
    %c0_48 = arith.constant 0 : index
    %66 = vector.load %arg10[%c0_47, %c0_48] : memref<62x32xbf16, #tpu.memory_space<vmem>>, vector<62x32xbf16>
    %cst_49 = arith.constant dense<0.000000e+00> : vector<64x32xf32>
    %67 = tpu.matmul %65, %66, %cst_49 {dimension_numbers = #tpu.dot_dimension_numbers<[1], [0], [0], [1], [0, 0, 1, 1], [], []>} : vector<64x62xbf16>, vector<62x32xbf16>, vector<64x32xf32> -> vector<64x32xf32>
    %68 = vector.extract_strided_slice %67 {offsets = [0, 0], sizes = [8, 32], strides = [1, 1]} : vector<64x32xf32> to vector<8x32xf32>
    %69 = vector.extract_strided_slice %67 {offsets = [8, 0], sizes = [8, 32], strides = [1, 1]} : vector<64x32xf32> to vector<8x32xf32>
    %70 = vector.extract_strided_slice %67 {offsets = [16, 0], sizes = [8, 32], strides = [1, 1]} : vector<64x32xf32> to vector<8x32xf32>
    %71 = vector.extract_strided_slice %67 {offsets = [24, 0], sizes = [8, 32], strides = [1, 1]} : vector<64x32xf32> to vector<8x32xf32>
    %72 = vector.extract_strided_slice %67 {offsets = [32, 0], sizes = [8, 32], strides = [1, 1]} : vector<64x32xf32> to vector<8x32xf32>
    %73 = vector.extract_strided_slice %67 {offsets = [40, 0], sizes = [8, 32], strides = [1, 1]} : vector<64x32xf32> to vector<8x32xf32>
    %74 = vector.extract_strided_slice %67 {offsets = [48, 0], sizes = [8, 32], strides = [1, 1]} : vector<64x32xf32> to vector<8x32xf32>
    %75 = vector.extract_strided_slice %67 {offsets = [56, 0], sizes = [8, 32], strides = [1, 1]} : vector<64x32xf32> to vector<8x32xf32>
    %76 = tpu.concatenate %68, %69, %70, %71, %72, %73, %74, %75 in 1 : vector<8x32xf32>, vector<8x32xf32>, vector<8x32xf32>, vector<8x32xf32>, vector<8x32xf32>, vector<8x32xf32>, vector<8x32xf32>, vector<8x32xf32> -> vector<8x256xf32>
    %77 = arith.truncf %76 : vector<8x256xf32> to vector<8x256xbf16>
    %c0_50 = arith.constant 0 : index
    %c0_51 = arith.constant 0 : index
    %78 = vector.load %arg12[%c0_50, %c0_51] : memref<1x64xf32, #tpu.memory_space<vmem>>, vector<1x64xf32>
    %79 = vector.extract_strided_slice %77 {offsets = [0, 0], sizes = [1, 256], strides = [1, 1]} : vector<8x256xbf16> to vector<1x256xbf16>
    %c0_52 = arith.constant 0 : index
    %c0_53 = arith.constant 0 : index
    %c0_54 = arith.constant 0 : index
    %80 = vector.load %arg11[%c0_52, %c0_53, %c0_54] : memref<8x256x64xbf16, #tpu.memory_space<vmem>>, vector<1x256x64xbf16>
    %81 = vector.shape_cast %80 : vector<1x256x64xbf16> to vector<256x64xbf16>
    %cst_55 = arith.constant dense<0.000000e+00> : vector<1x64xf32>
    %82 = tpu.matmul %79, %81, %cst_55 {dimension_numbers = #tpu.dot_dimension_numbers<[1], [0], [0], [1], [0, 0, 1, 1], [], []>} : vector<1x256xbf16>, vector<256x64xbf16>, vector<1x64xf32> -> vector<1x64xf32>
    %83 = arith.addf %78, %82 : vector<1x64xf32>
    %84 = vector.extract_strided_slice %77 {offsets = [1, 0], sizes = [1, 256], strides = [1, 1]} : vector<8x256xbf16> to vector<1x256xbf16>
    %c1_56 = arith.constant 1 : index
    %c0_57 = arith.constant 0 : index
    %c0_58 = arith.constant 0 : index
    %85 = vector.load %arg11[%c1_56, %c0_57, %c0_58] : memref<8x256x64xbf16, #tpu.memory_space<vmem>>, vector<1x256x64xbf16>
    %86 = vector.shape_cast %85 : vector<1x256x64xbf16> to vector<256x64xbf16>
    %cst_59 = arith.constant dense<0.000000e+00> : vector<1x64xf32>
    %87 = tpu.matmul %84, %86, %cst_59 {dimension_numbers = #tpu.dot_dimension_numbers<[1], [0], [0], [1], [0, 0, 1, 1], [], []>} : vector<1x256xbf16>, vector<256x64xbf16>, vector<1x64xf32> -> vector<1x64xf32>
    %88 = arith.addf %83, %87 : vector<1x64xf32>
    %89 = vector.extract_strided_slice %77 {offsets = [2, 0], sizes = [1, 256], strides = [1, 1]} : vector<8x256xbf16> to vector<1x256xbf16>
    %c2_60 = arith.constant 2 : index
    %c0_61 = arith.constant 0 : index
    %c0_62 = arith.constant 0 : index
    %90 = vector.load %arg11[%c2_60, %c0_61, %c0_62] : memref<8x256x64xbf16, #tpu.memory_space<vmem>>, vector<1x256x64xbf16>
    %91 = vector.shape_cast %90 : vector<1x256x64xbf16> to vector<256x64xbf16>
    %cst_63 = arith.constant dense<0.000000e+00> : vector<1x64xf32>
    %92 = tpu.matmul %89, %91, %cst_63 {dimension_numbers = #tpu.dot_dimension_numbers<[1], [0], [0], [1], [0, 0, 1, 1], [], []>} : vector<1x256xbf16>, vector<256x64xbf16>, vector<1x64xf32> -> vector<1x64xf32>
    %93 = arith.addf %88, %92 : vector<1x64xf32>
    %94 = vector.extract_strided_slice %77 {offsets = [3, 0], sizes = [1, 256], strides = [1, 1]} : vector<8x256xbf16> to vector<1x256xbf16>
    %c3_64 = arith.constant 3 : index
    %c0_65 = arith.constant 0 : index
    %c0_66 = arith.constant 0 : index
    %95 = vector.load %arg11[%c3_64, %c0_65, %c0_66] : memref<8x256x64xbf16, #tpu.memory_space<vmem>>, vector<1x256x64xbf16>
    %96 = vector.shape_cast %95 : vector<1x256x64xbf16> to vector<256x64xbf16>
    %cst_67 = arith.constant dense<0.000000e+00> : vector<1x64xf32>
    %97 = tpu.matmul %94, %96, %cst_67 {dimension_numbers = #tpu.dot_dimension_numbers<[1], [0], [0], [1], [0, 0, 1, 1], [], []>} : vector<1x256xbf16>, vector<256x64xbf16>, vector<1x64xf32> -> vector<1x64xf32>
    %98 = arith.addf %93, %97 : vector<1x64xf32>
    %99 = vector.extract_strided_slice %77 {offsets = [4, 0], sizes = [1, 256], strides = [1, 1]} : vector<8x256xbf16> to vector<1x256xbf16>
    %c4_68 = arith.constant 4 : index
    %c0_69 = arith.constant 0 : index
    %c0_70 = arith.constant 0 : index
    %100 = vector.load %arg11[%c4_68, %c0_69, %c0_70] : memref<8x256x64xbf16, #tpu.memory_space<vmem>>, vector<1x256x64xbf16>
    %101 = vector.shape_cast %100 : vector<1x256x64xbf16> to vector<256x64xbf16>
    %cst_71 = arith.constant dense<0.000000e+00> : vector<1x64xf32>
    %102 = tpu.matmul %99, %101, %cst_71 {dimension_numbers = #tpu.dot_dimension_numbers<[1], [0], [0], [1], [0, 0, 1, 1], [], []>} : vector<1x256xbf16>, vector<256x64xbf16>, vector<1x64xf32> -> vector<1x64xf32>
    %103 = arith.addf %98, %102 : vector<1x64xf32>
    %104 = vector.extract_strided_slice %77 {offsets = [5, 0], sizes = [1, 256], strides = [1, 1]} : vector<8x256xbf16> to vector<1x256xbf16>
    %c5 = arith.constant 5 : index
    %c0_72 = arith.constant 0 : index
    %c0_73 = arith.constant 0 : index
    %105 = vector.load %arg11[%c5, %c0_72, %c0_73] : memref<8x256x64xbf16, #tpu.memory_space<vmem>>, vector<1x256x64xbf16>
    %106 = vector.shape_cast %105 : vector<1x256x64xbf16> to vector<256x64xbf16>
    %cst_74 = arith.constant dense<0.000000e+00> : vector<1x64xf32>
    %107 = tpu.matmul %104, %106, %cst_74 {dimension_numbers = #tpu.dot_dimension_numbers<[1], [0], [0], [1], [0, 0, 1, 1], [], []>} : vector<1x256xbf16>, vector<256x64xbf16>, vector<1x64xf32> -> vector<1x64xf32>
    %108 = arith.addf %103, %107 : vector<1x64xf32>
    %109 = vector.extract_strided_slice %77 {offsets = [6, 0], sizes = [1, 256], strides = [1, 1]} : vector<8x256xbf16> to vector<1x256xbf16>
    %c6 = arith.constant 6 : index
    %c0_75 = arith.constant 0 : index
    %c0_76 = arith.constant 0 : index
    %110 = vector.load %arg11[%c6, %c0_75, %c0_76] : memref<8x256x64xbf16, #tpu.memory_space<vmem>>, vector<1x256x64xbf16>
    %111 = vector.shape_cast %110 : vector<1x256x64xbf16> to vector<256x64xbf16>
    %cst_77 = arith.constant dense<0.000000e+00> : vector<1x64xf32>
    %112 = tpu.matmul %109, %111, %cst_77 {dimension_numbers = #tpu.dot_dimension_numbers<[1], [0], [0], [1], [0, 0, 1, 1], [], []>} : vector<1x256xbf16>, vector<256x64xbf16>, vector<1x64xf32> -> vector<1x64xf32>
    %113 = arith.addf %108, %112 : vector<1x64xf32>
    %114 = vector.extract_strided_slice %77 {offsets = [7, 0], sizes = [1, 256], strides = [1, 1]} : vector<8x256xbf16> to vector<1x256xbf16>
    %c7 = arith.constant 7 : index
    %c0_78 = arith.constant 0 : index
    %c0_79 = arith.constant 0 : index
    %115 = vector.load %arg11[%c7, %c0_78, %c0_79] : memref<8x256x64xbf16, #tpu.memory_space<vmem>>, vector<1x256x64xbf16>
    %116 = vector.shape_cast %115 : vector<1x256x64xbf16> to vector<256x64xbf16>
    %cst_80 = arith.constant dense<0.000000e+00> : vector<1x64xf32>
    %117 = tpu.matmul %114, %116, %cst_80 {dimension_numbers = #tpu.dot_dimension_numbers<[1], [0], [0], [1], [0, 0, 1, 1], [], []>} : vector<1x256xbf16>, vector<256x64xbf16>, vector<1x64xf32> -> vector<1x64xf32>
    %118 = arith.addf %113, %117 : vector<1x64xf32>
    %cst_81 = arith.constant 0.000000e+00 : f32
    %119 = vector.broadcast %cst_81 : f32 to vector<1x64xf32>
    %120 = arith.maximumf %118, %119 : vector<1x64xf32>
    %121 = arith.truncf %120 : vector<1x64xf32> to vector<1x64xbf16>
    %c0_82 = arith.constant 0 : index
    %c0_83 = arith.constant 0 : index
    %122 = vector.load %arg13[%c0_82, %c0_83] : memref<64x10xbf16, #tpu.memory_space<vmem>>, vector<64x10xbf16>
    %cst_84 = arith.constant dense<0.000000e+00> : vector<1x10xf32>
    %123 = tpu.matmul %121, %122, %cst_84 {dimension_numbers = #tpu.dot_dimension_numbers<[1], [0], [0], [1], [0, 0, 1, 1], [], []>} : vector<1x64xbf16>, vector<64x10xbf16>, vector<1x10xf32> -> vector<1x10xf32>
    %c0_85 = arith.constant 0 : index
    %c0_86 = arith.constant 0 : index
    %124 = vector.load %arg14[%c0_85, %c0_86] : memref<1x10xf32, #tpu.memory_space<vmem>>, vector<1x10xf32>
    %125 = arith.addf %123, %124 : vector<1x10xf32>
    %c0_87 = arith.constant 0 : index
    %c0_88 = arith.constant 0 : index
    %c0_89 = arith.constant 0 : index
    %126 = vector.load %arg15[%c0_87, %c0_88, %c0_89] : memref<2x1x10xf32, #tpu.memory_space<vmem>>, vector<1x1x10xf32>
    %127 = vector.shape_cast %126 : vector<1x1x10xf32> to vector<1x10xf32>
    %128 = vector.shape_cast %125 : vector<1x10xf32> to vector<1x1x10xf32>
    tpu.vector_store %arg15[%c0_87, %c0_88, %c0_89], %128 {strides = array<i32>} : memref<2x1x10xf32, #tpu.memory_space<vmem>>, vector<1x1x10xf32>,
    %c1_90 = arith.constant 1 : index
    %c0_91 = arith.constant 0 : index
    %c0_92 = arith.constant 0 : index
    %129 = vector.load %arg1[%c1_90, %c0_91, %c0_92] : memref<2x700x194xbf16, #tpu.memory_space<vmem>>, vector<1x700x194xbf16>
    %130 = vector.shape_cast %129 : vector<1x700x194xbf16> to vector<700x194xbf16>
    %c0_93 = arith.constant 0 : index
    %c0_94 = arith.constant 0 : index
    %131 = vector.load %arg2[%c0_93, %c0_94] : memref<256x700xbf16, #tpu.memory_space<vmem>>, vector<256x700xbf16>
    %cst_95 = arith.constant dense<0.000000e+00> : vector<256x194xf32>
    %132 = tpu.matmul %131, %130, %cst_95 {dimension_numbers = #tpu.dot_dimension_numbers<[1], [0], [0], [1], [0, 0, 1, 1], [], []>} : vector<256x700xbf16>, vector<700x194xbf16>, vector<256x194xf32> -> vector<256x194xf32>
    %c0_96 = arith.constant 0 : index
    %c0_97 = arith.constant 0 : index
    %133 = vector.load %arg3[%c0_96, %c0_97] : memref<256x1xf32, #tpu.memory_space<vmem>>, vector<256x1xf32>
    %134 = vector.broadcast %133 : vector<256x1xf32> to vector<256x194xf32>
    %135 = arith.addf %132, %134 : vector<256x194xf32>
    %cst_98 = arith.constant 0.000000e+00 : f32
    %136 = vector.broadcast %cst_98 : f32 to vector<256x194xf32>
    %137 = arith.maximumf %135, %136 : vector<256x194xf32>
    %138 = arith.truncf %137 : vector<256x194xf32> to vector<256x194xbf16>
    %c0_99 = arith.constant 0 : index
    %c0_100 = arith.constant 0 : index
    %139 = vector.load %arg4[%c0_99, %c0_100] : memref<194x128xbf16, #tpu.memory_space<vmem>>, vector<194x128xbf16>
    %cst_101 = arith.constant dense<0.000000e+00> : vector<256x128xf32>
    %140 = tpu.matmul %138, %139, %cst_101 {dimension_numbers = #tpu.dot_dimension_numbers<[1], [0], [0], [1], [0, 0, 1, 1], [], []>} : vector<256x194xbf16>, vector<194x128xbf16>, vector<256x128xf32> -> vector<256x128xf32>
    %141 = arith.truncf %140 : vector<256x128xf32> to vector<256x128xbf16>
    %c0_102 = arith.constant 0 : index
    %c0_103 = arith.constant 0 : index
    %c0_104 = arith.constant 0 : index
    %142 = vector.load %arg5[%c0_102, %c0_103, %c0_104] : memref<5x128x256xbf16, #tpu.memory_space<vmem>>, vector<1x128x256xbf16>
    %143 = vector.shape_cast %142 : vector<1x128x256xbf16> to vector<128x256xbf16>
    %144 = vector.extract_strided_slice %141 {offsets = [0, 0], sizes = [256, 124], strides = [1, 1]} : vector<256x128xbf16> to vector<256x124xbf16>
    %cst_105 = arith.constant dense<0.000000e+00> : vector<128x124xf32>
    %145 = tpu.matmul %143, %144, %cst_105 {dimension_numbers = #tpu.dot_dimension_numbers<[1], [0], [0], [1], [0, 0, 1, 1], [], []>} : vector<128x256xbf16>, vector<256x124xbf16>, vector<128x124xf32> -> vector<128x124xf32>
    %c1_106 = arith.constant 1 : index
    %c0_107 = arith.constant 0 : index
    %c0_108 = arith.constant 0 : index
    %146 = vector.load %arg5[%c1_106, %c0_107, %c0_108] : memref<5x128x256xbf16, #tpu.memory_space<vmem>>, vector<1x128x256xbf16>
    %147 = vector.shape_cast %146 : vector<1x128x256xbf16> to vector<128x256xbf16>
    %148 = vector.extract_strided_slice %141 {offsets = [0, 1], sizes = [256, 124], strides = [1, 1]} : vector<256x128xbf16> to vector<256x124xbf16>
    %cst_109 = arith.constant dense<0.000000e+00> : vector<128x124xf32>
    %149 = tpu.matmul %147, %148, %cst_109 {dimension_numbers = #tpu.dot_dimension_numbers<[1], [0], [0], [1], [0, 0, 1, 1], [], []>} : vector<128x256xbf16>, vector<256x124xbf16>, vector<128x124xf32> -> vector<128x124xf32>
    %150 = arith.addf %145, %149 : vector<128x124xf32>
    %c2_110 = arith.constant 2 : index
    %c0_111 = arith.constant 0 : index
    %c0_112 = arith.constant 0 : index
    %151 = vector.load %arg5[%c2_110, %c0_111, %c0_112] : memref<5x128x256xbf16, #tpu.memory_space<vmem>>, vector<1x128x256xbf16>
    %152 = vector.shape_cast %151 : vector<1x128x256xbf16> to vector<128x256xbf16>
    %153 = vector.extract_strided_slice %141 {offsets = [0, 2], sizes = [256, 124], strides = [1, 1]} : vector<256x128xbf16> to vector<256x124xbf16>
    %cst_113 = arith.constant dense<0.000000e+00> : vector<128x124xf32>
    %154 = tpu.matmul %152, %153, %cst_113 {dimension_numbers = #tpu.dot_dimension_numbers<[1], [0], [0], [1], [0, 0, 1, 1], [], []>} : vector<128x256xbf16>, vector<256x124xbf16>, vector<128x124xf32> -> vector<128x124xf32>
    %155 = arith.addf %150, %154 : vector<128x124xf32>
    %c3_114 = arith.constant 3 : index
    %c0_115 = arith.constant 0 : index
    %c0_116 = arith.constant 0 : index
    %156 = vector.load %arg5[%c3_114, %c0_115, %c0_116] : memref<5x128x256xbf16, #tpu.memory_space<vmem>>, vector<1x128x256xbf16>
    %157 = vector.shape_cast %156 : vector<1x128x256xbf16> to vector<128x256xbf16>
    %158 = vector.extract_strided_slice %141 {offsets = [0, 3], sizes = [256, 124], strides = [1, 1]} : vector<256x128xbf16> to vector<256x124xbf16>
    %cst_117 = arith.constant dense<0.000000e+00> : vector<128x124xf32>
    %159 = tpu.matmul %157, %158, %cst_117 {dimension_numbers = #tpu.dot_dimension_numbers<[1], [0], [0], [1], [0, 0, 1, 1], [], []>} : vector<128x256xbf16>, vector<256x124xbf16>, vector<128x124xf32> -> vector<128x124xf32>
    %160 = arith.addf %155, %159 : vector<128x124xf32>
    %c4_118 = arith.constant 4 : index
    %c0_119 = arith.constant 0 : index
    %c0_120 = arith.constant 0 : index
    %161 = vector.load %arg5[%c4_118, %c0_119, %c0_120] : memref<5x128x256xbf16, #tpu.memory_space<vmem>>, vector<1x128x256xbf16>
    %162 = vector.shape_cast %161 : vector<1x128x256xbf16> to vector<128x256xbf16>
    %163 = vector.extract_strided_slice %141 {offsets = [0, 4], sizes = [256, 124], strides = [1, 1]} : vector<256x128xbf16> to vector<256x124xbf16>
    %cst_121 = arith.constant dense<0.000000e+00> : vector<128x124xf32>
    %164 = tpu.matmul %162, %163, %cst_121 {dimension_numbers = #tpu.dot_dimension_numbers<[1], [0], [0], [1], [0, 0, 1, 1], [], []>} : vector<128x256xbf16>, vector<256x124xbf16>, vector<128x124xf32> -> vector<128x124xf32>
    %165 = arith.addf %160, %164 : vector<128x124xf32>
    %c0_122 = arith.constant 0 : index
    %c0_123 = arith.constant 0 : index
    %166 = vector.load %arg6[%c0_122, %c0_123] : memref<128x1xf32, #tpu.memory_space<vmem>>, vector<128x1xf32>
    %167 = vector.broadcast %166 : vector<128x1xf32> to vector<128x124xf32>
    %168 = arith.addf %165, %167 : vector<128x124xf32>
    %cst_124 = arith.constant 0.000000e+00 : f32
    %169 = vector.broadcast %cst_124 : f32 to vector<128x124xf32>
    %170 = arith.maximumf %168, %169 : vector<128x124xf32>
    %171 = arith.truncf %170 : vector<128x124xf32> to vector<128x124xbf16>
    %c0_125 = arith.constant 0 : index
    %c0_126 = arith.constant 0 : index
    %172 = vector.load %arg7[%c0_125, %c0_126] : memref<124x64xbf16, #tpu.memory_space<vmem>>, vector<124x64xbf16>
    %cst_127 = arith.constant dense<0.000000e+00> : vector<128x64xf32>
    %173 = tpu.matmul %171, %172, %cst_127 {dimension_numbers = #tpu.dot_dimension_numbers<[1], [0], [0], [1], [0, 0, 1, 1], [], []>} : vector<128x124xbf16>, vector<124x64xbf16>, vector<128x64xf32> -> vector<128x64xf32>
    %174 = arith.truncf %173 : vector<128x64xf32> to vector<128x64xbf16>
    %c0_128 = arith.constant 0 : index
    %c0_129 = arith.constant 0 : index
    %c0_130 = arith.constant 0 : index
    %175 = vector.load %arg8[%c0_128, %c0_129, %c0_130] : memref<3x64x128xbf16, #tpu.memory_space<vmem>>, vector<1x64x128xbf16>
    %176 = vector.shape_cast %175 : vector<1x64x128xbf16> to vector<64x128xbf16>
    %177 = vector.extract_strided_slice %174 {offsets = [0, 0], sizes = [128, 62], strides = [1, 1]} : vector<128x64xbf16> to vector<128x62xbf16>
    %cst_131 = arith.constant dense<0.000000e+00> : vector<64x62xf32>
    %178 = tpu.matmul %176, %177, %cst_131 {dimension_numbers = #tpu.dot_dimension_numbers<[1], [0], [0], [1], [0, 0, 1, 1], [], []>} : vector<64x128xbf16>, vector<128x62xbf16>, vector<64x62xf32> -> vector<64x62xf32>
    %c1_132 = arith.constant 1 : index
    %c0_133 = arith.constant 0 : index
    %c0_134 = arith.constant 0 : index
    %179 = vector.load %arg8[%c1_132, %c0_133, %c0_134] : memref<3x64x128xbf16, #tpu.memory_space<vmem>>, vector<1x64x128xbf16>
    %180 = vector.shape_cast %179 : vector<1x64x128xbf16> to vector<64x128xbf16>
    %181 = vector.extract_strided_slice %174 {offsets = [0, 1], sizes = [128, 62], strides = [1, 1]} : vector<128x64xbf16> to vector<128x62xbf16>
    %cst_135 = arith.constant dense<0.000000e+00> : vector<64x62xf32>
    %182 = tpu.matmul %180, %181, %cst_135 {dimension_numbers = #tpu.dot_dimension_numbers<[1], [0], [0], [1], [0, 0, 1, 1], [], []>} : vector<64x128xbf16>, vector<128x62xbf16>, vector<64x62xf32> -> vector<64x62xf32>
    %183 = arith.addf %178, %182 : vector<64x62xf32>
    %c2_136 = arith.constant 2 : index
    %c0_137 = arith.constant 0 : index
    %c0_138 = arith.constant 0 : index
    %184 = vector.load %arg8[%c2_136, %c0_137, %c0_138] : memref<3x64x128xbf16, #tpu.memory_space<vmem>>, vector<1x64x128xbf16>
    %185 = vector.shape_cast %184 : vector<1x64x128xbf16> to vector<64x128xbf16>
    %186 = vector.extract_strided_slice %174 {offsets = [0, 2], sizes = [128, 62], strides = [1, 1]} : vector<128x64xbf16> to vector<128x62xbf16>
    %cst_139 = arith.constant dense<0.000000e+00> : vector<64x62xf32>
    %187 = tpu.matmul %185, %186, %cst_139 {dimension_numbers = #tpu.dot_dimension_numbers<[1], [0], [0], [1], [0, 0, 1, 1], [], []>} : vector<64x128xbf16>, vector<128x62xbf16>, vector<64x62xf32> -> vector<64x62xf32>
    %188 = arith.addf %183, %187 : vector<64x62xf32>
    %c0_140 = arith.constant 0 : index
    %c0_141 = arith.constant 0 : index
    %189 = vector.load %arg9[%c0_140, %c0_141] : memref<64x1xf32, #tpu.memory_space<vmem>>, vector<64x1xf32>
    %190 = vector.broadcast %189 : vector<64x1xf32> to vector<64x62xf32>
    %191 = arith.addf %188, %190 : vector<64x62xf32>
    %cst_142 = arith.constant 0.000000e+00 : f32
    %192 = vector.broadcast %cst_142 : f32 to vector<64x62xf32>
    %193 = arith.maximumf %191, %192 : vector<64x62xf32>
    %194 = arith.truncf %193 : vector<64x62xf32> to vector<64x62xbf16>
    %c0_143 = arith.constant 0 : index
    %c0_144 = arith.constant 0 : index
    %195 = vector.load %arg10[%c0_143, %c0_144] : memref<62x32xbf16, #tpu.memory_space<vmem>>, vector<62x32xbf16>
    %cst_145 = arith.constant dense<0.000000e+00> : vector<64x32xf32>
    %196 = tpu.matmul %194, %195, %cst_145 {dimension_numbers = #tpu.dot_dimension_numbers<[1], [0], [0], [1], [0, 0, 1, 1], [], []>} : vector<64x62xbf16>, vector<62x32xbf16>, vector<64x32xf32> -> vector<64x32xf32>
    %197 = vector.extract_strided_slice %196 {offsets = [0, 0], sizes = [8, 32], strides = [1, 1]} : vector<64x32xf32> to vector<8x32xf32>
    %198 = vector.extract_strided_slice %196 {offsets = [8, 0], sizes = [8, 32], strides = [1, 1]} : vector<64x32xf32> to vector<8x32xf32>
    %199 = vector.extract_strided_slice %196 {offsets = [16, 0], sizes = [8, 32], strides = [1, 1]} : vector<64x32xf32> to vector<8x32xf32>
    %200 = vector.extract_strided_slice %196 {offsets = [24, 0], sizes = [8, 32], strides = [1, 1]} : vector<64x32xf32> to vector<8x32xf32>
    %201 = vector.extract_strided_slice %196 {offsets = [32, 0], sizes = [8, 32], strides = [1, 1]} : vector<64x32xf32> to vector<8x32xf32>
    %202 = vector.extract_strided_slice %196 {offsets = [40, 0], sizes = [8, 32], strides = [1, 1]} : vector<64x32xf32> to vector<8x32xf32>
    %203 = vector.extract_strided_slice %196 {offsets = [48, 0], sizes = [8, 32], strides = [1, 1]} : vector<64x32xf32> to vector<8x32xf32>
    %204 = vector.extract_strided_slice %196 {offsets = [56, 0], sizes = [8, 32], strides = [1, 1]} : vector<64x32xf32> to vector<8x32xf32>
    %205 = tpu.concatenate %197, %198, %199, %200, %201, %202, %203, %204 in 1 : vector<8x32xf32>, vector<8x32xf32>, vector<8x32xf32>, vector<8x32xf32>, vector<8x32xf32>, vector<8x32xf32>, vector<8x32xf32>, vector<8x32xf32> -> vector<8x256xf32>
    %206 = arith.truncf %205 : vector<8x256xf32> to vector<8x256xbf16>
    %c0_146 = arith.constant 0 : index
    %c0_147 = arith.constant 0 : index
    %207 = vector.load %arg12[%c0_146, %c0_147] : memref<1x64xf32, #tpu.memory_space<vmem>>, vector<1x64xf32>
    %208 = vector.extract_strided_slice %206 {offsets = [0, 0], sizes = [1, 256], strides = [1, 1]} : vector<8x256xbf16> to vector<1x256xbf16>
    %c0_148 = arith.constant 0 : index
    %c0_149 = arith.constant 0 : index
    %c0_150 = arith.constant 0 : index
    %209 = vector.load %arg11[%c0_148, %c0_149, %c0_150] : memref<8x256x64xbf16, #tpu.memory_space<vmem>>, vector<1x256x64xbf16>
    %210 = vector.shape_cast %209 : vector<1x256x64xbf16> to vector<256x64xbf16>
    %cst_151 = arith.constant dense<0.000000e+00> : vector<1x64xf32>
    %211 = tpu.matmul %208, %210, %cst_151 {dimension_numbers = #tpu.dot_dimension_numbers<[1], [0], [0], [1], [0, 0, 1, 1], [], []>} : vector<1x256xbf16>, vector<256x64xbf16>, vector<1x64xf32> -> vector<1x64xf32>
    %212 = arith.addf %207, %211 : vector<1x64xf32>
    %213 = vector.extract_strided_slice %206 {offsets = [1, 0], sizes = [1, 256], strides = [1, 1]} : vector<8x256xbf16> to vector<1x256xbf16>
    %c1_152 = arith.constant 1 : index
    %c0_153 = arith.constant 0 : index
    %c0_154 = arith.constant 0 : index
    %214 = vector.load %arg11[%c1_152, %c0_153, %c0_154] : memref<8x256x64xbf16, #tpu.memory_space<vmem>>, vector<1x256x64xbf16>
    %215 = vector.shape_cast %214 : vector<1x256x64xbf16> to vector<256x64xbf16>
    %cst_155 = arith.constant dense<0.000000e+00> : vector<1x64xf32>
    %216 = tpu.matmul %213, %215, %cst_155 {dimension_numbers = #tpu.dot_dimension_numbers<[1], [0], [0], [1], [0, 0, 1, 1], [], []>} : vector<1x256xbf16>, vector<256x64xbf16>, vector<1x64xf32> -> vector<1x64xf32>
    %217 = arith.addf %212, %216 : vector<1x64xf32>
    %218 = vector.extract_strided_slice %206 {offsets = [2, 0], sizes = [1, 256], strides = [1, 1]} : vector<8x256xbf16> to vector<1x256xbf16>
    %c2_156 = arith.constant 2 : index
    %c0_157 = arith.constant 0 : index
    %c0_158 = arith.constant 0 : index
    %219 = vector.load %arg11[%c2_156, %c0_157, %c0_158] : memref<8x256x64xbf16, #tpu.memory_space<vmem>>, vector<1x256x64xbf16>
    %220 = vector.shape_cast %219 : vector<1x256x64xbf16> to vector<256x64xbf16>
    %cst_159 = arith.constant dense<0.000000e+00> : vector<1x64xf32>
    %221 = tpu.matmul %218, %220, %cst_159 {dimension_numbers = #tpu.dot_dimension_numbers<[1], [0], [0], [1], [0, 0, 1, 1], [], []>} : vector<1x256xbf16>, vector<256x64xbf16>, vector<1x64xf32> -> vector<1x64xf32>
    %222 = arith.addf %217, %221 : vector<1x64xf32>
    %223 = vector.extract_strided_slice %206 {offsets = [3, 0], sizes = [1, 256], strides = [1, 1]} : vector<8x256xbf16> to vector<1x256xbf16>
    %c3_160 = arith.constant 3 : index
    %c0_161 = arith.constant 0 : index
    %c0_162 = arith.constant 0 : index
    %224 = vector.load %arg11[%c3_160, %c0_161, %c0_162] : memref<8x256x64xbf16, #tpu.memory_space<vmem>>, vector<1x256x64xbf16>
    %225 = vector.shape_cast %224 : vector<1x256x64xbf16> to vector<256x64xbf16>
    %cst_163 = arith.constant dense<0.000000e+00> : vector<1x64xf32>
    %226 = tpu.matmul %223, %225, %cst_163 {dimension_numbers = #tpu.dot_dimension_numbers<[1], [0], [0], [1], [0, 0, 1, 1], [], []>} : vector<1x256xbf16>, vector<256x64xbf16>, vector<1x64xf32> -> vector<1x64xf32>
    %227 = arith.addf %222, %226 : vector<1x64xf32>
    %228 = vector.extract_strided_slice %206 {offsets = [4, 0], sizes = [1, 256], strides = [1, 1]} : vector<8x256xbf16> to vector<1x256xbf16>
    %c4_164 = arith.constant 4 : index
    %c0_165 = arith.constant 0 : index
    %c0_166 = arith.constant 0 : index
    %229 = vector.load %arg11[%c4_164, %c0_165, %c0_166] : memref<8x256x64xbf16, #tpu.memory_space<vmem>>, vector<1x256x64xbf16>
    %230 = vector.shape_cast %229 : vector<1x256x64xbf16> to vector<256x64xbf16>
    %cst_167 = arith.constant dense<0.000000e+00> : vector<1x64xf32>
    %231 = tpu.matmul %228, %230, %cst_167 {dimension_numbers = #tpu.dot_dimension_numbers<[1], [0], [0], [1], [0, 0, 1, 1], [], []>} : vector<1x256xbf16>, vector<256x64xbf16>, vector<1x64xf32> -> vector<1x64xf32>
    %232 = arith.addf %227, %231 : vector<1x64xf32>
    %233 = vector.extract_strided_slice %206 {offsets = [5, 0], sizes = [1, 256], strides = [1, 1]} : vector<8x256xbf16> to vector<1x256xbf16>
    %c5_168 = arith.constant 5 : index
    %c0_169 = arith.constant 0 : index
    %c0_170 = arith.constant 0 : index
    %234 = vector.load %arg11[%c5_168, %c0_169, %c0_170] : memref<8x256x64xbf16, #tpu.memory_space<vmem>>, vector<1x256x64xbf16>
    %235 = vector.shape_cast %234 : vector<1x256x64xbf16> to vector<256x64xbf16>
    %cst_171 = arith.constant dense<0.000000e+00> : vector<1x64xf32>
    %236 = tpu.matmul %233, %235, %cst_171 {dimension_numbers = #tpu.dot_dimension_numbers<[1], [0], [0], [1], [0, 0, 1, 1], [], []>} : vector<1x256xbf16>, vector<256x64xbf16>, vector<1x64xf32> -> vector<1x64xf32>
    %237 = arith.addf %232, %236 : vector<1x64xf32>
    %238 = vector.extract_strided_slice %206 {offsets = [6, 0], sizes = [1, 256], strides = [1, 1]} : vector<8x256xbf16> to vector<1x256xbf16>
    %c6_172 = arith.constant 6 : index
    %c0_173 = arith.constant 0 : index
    %c0_174 = arith.constant 0 : index
    %239 = vector.load %arg11[%c6_172, %c0_173, %c0_174] : memref<8x256x64xbf16, #tpu.memory_space<vmem>>, vector<1x256x64xbf16>
    %240 = vector.shape_cast %239 : vector<1x256x64xbf16> to vector<256x64xbf16>
    %cst_175 = arith.constant dense<0.000000e+00> : vector<1x64xf32>
    %241 = tpu.matmul %238, %240, %cst_175 {dimension_numbers = #tpu.dot_dimension_numbers<[1], [0], [0], [1], [0, 0, 1, 1], [], []>} : vector<1x256xbf16>, vector<256x64xbf16>, vector<1x64xf32> -> vector<1x64xf32>
    %242 = arith.addf %237, %241 : vector<1x64xf32>
    %243 = vector.extract_strided_slice %206 {offsets = [7, 0], sizes = [1, 256], strides = [1, 1]} : vector<8x256xbf16> to vector<1x256xbf16>
    %c7_176 = arith.constant 7 : index
    %c0_177 = arith.constant 0 : index
    %c0_178 = arith.constant 0 : index
    %244 = vector.load %arg11[%c7_176, %c0_177, %c0_178] : memref<8x256x64xbf16, #tpu.memory_space<vmem>>, vector<1x256x64xbf16>
    %245 = vector.shape_cast %244 : vector<1x256x64xbf16> to vector<256x64xbf16>
    %cst_179 = arith.constant dense<0.000000e+00> : vector<1x64xf32>
    %246 = tpu.matmul %243, %245, %cst_179 {dimension_numbers = #tpu.dot_dimension_numbers<[1], [0], [0], [1], [0, 0, 1, 1], [], []>} : vector<1x256xbf16>, vector<256x64xbf16>, vector<1x64xf32> -> vector<1x64xf32>
    %247 = arith.addf %242, %246 : vector<1x64xf32>
    %cst_180 = arith.constant 0.000000e+00 : f32
    %248 = vector.broadcast %cst_180 : f32 to vector<1x64xf32>
    %249 = arith.maximumf %247, %248 : vector<1x64xf32>
    %250 = arith.truncf %249 : vector<1x64xf32> to vector<1x64xbf16>
    %c0_181 = arith.constant 0 : index
    %c0_182 = arith.constant 0 : index
    %251 = vector.load %arg13[%c0_181, %c0_182] : memref<64x10xbf16, #tpu.memory_space<vmem>>, vector<64x10xbf16>
    %cst_183 = arith.constant dense<0.000000e+00> : vector<1x10xf32>
    %252 = tpu.matmul %250, %251, %cst_183 {dimension_numbers = #tpu.dot_dimension_numbers<[1], [0], [0], [1], [0, 0, 1, 1], [], []>} : vector<1x64xbf16>, vector<64x10xbf16>, vector<1x10xf32> -> vector<1x10xf32>
    %c0_184 = arith.constant 0 : index
    %c0_185 = arith.constant 0 : index
    %253 = vector.load %arg14[%c0_184, %c0_185] : memref<1x10xf32, #tpu.memory_space<vmem>>, vector<1x10xf32>
    %254 = arith.addf %252, %253 : vector<1x10xf32>
    %c1_186 = arith.constant 1 : index
    %c0_187 = arith.constant 0 : index
    %c0_188 = arith.constant 0 : index
    %255 = vector.load %arg15[%c1_186, %c0_187, %c0_188] : memref<2x1x10xf32, #tpu.memory_space<vmem>>, vector<1x1x10xf32>
    %256 = vector.shape_cast %255 : vector<1x1x10xf32> to vector<1x10xf32>
    %257 = vector.shape_cast %254 : vector<1x10xf32> to vector<1x1x10xf32>
    tpu.vector_store %arg15[%c1_186, %c0_187, %c0_188], %257 {strides = array<i32>} : memref<2x1x10xf32, #tpu.memory_space<vmem>>, vector<1x1x10xf32>,
    return
  }
  func.func @transform_0(%arg0: i32) -> (i32, i32, i32) {
    %c0_i32 = arith.constant 0 : i32
    %c0_i32_0 = arith.constant 0 : i32
    %c0_i32_1 = arith.constant 0 : i32
    return %arg0, %c0_i32, %c0_i32_0 : i32, i32, i32
  }
  func.func @transform_1(%arg0: i32) -> (i32, i32) {
    %c0_i32 = arith.constant 0 : i32
    %c0_i32_0 = arith.constant 0 : i32
    %c0_i32_1 = arith.constant 0 : i32
    return %c0_i32, %c0_i32_0 : i32, i32
  }
  func.func @transform_2(%arg0: i32) -> (i32, i32) {
    %c0_i32 = arith.constant 0 : i32
    %c0_i32_0 = arith.constant 0 : i32
    %c0_i32_1 = arith.constant 0 : i32
    return %c0_i32, %c0_i32_0 : i32, i32
  }
  func.func @transform_3(%arg0: i32) -> (i32, i32) {
    %c0_i32 = arith.constant 0 : i32
    %c0_i32_0 = arith.constant 0 : i32
    %c0_i32_1 = arith.constant 0 : i32
    return %c0_i32, %c0_i32_0 : i32, i32
  }
  func.func @transform_4(%arg0: i32) -> (i32, i32, i32) {
    %c0_i32 = arith.constant 0 : i32
    %c0_i32_0 = arith.constant 0 : i32
    %c0_i32_1 = arith.constant 0 : i32
    %c0_i32_2 = arith.constant 0 : i32
    return %c0_i32, %c0_i32_0, %c0_i32_1 : i32, i32, i32
  }
  func.func @transform_5(%arg0: i32) -> (i32, i32) {
    %c0_i32 = arith.constant 0 : i32
    %c0_i32_0 = arith.constant 0 : i32
    %c0_i32_1 = arith.constant 0 : i32
    return %c0_i32, %c0_i32_0 : i32, i32
  }
  func.func @transform_6(%arg0: i32) -> (i32, i32) {
    %c0_i32 = arith.constant 0 : i32
    %c0_i32_0 = arith.constant 0 : i32
    %c0_i32_1 = arith.constant 0 : i32
    return %c0_i32, %c0_i32_0 : i32, i32
  }
  func.func @transform_7(%arg0: i32) -> (i32, i32, i32) {
    %c0_i32 = arith.constant 0 : i32
    %c0_i32_0 = arith.constant 0 : i32
    %c0_i32_1 = arith.constant 0 : i32
    %c0_i32_2 = arith.constant 0 : i32
    return %c0_i32, %c0_i32_0, %c0_i32_1 : i32, i32, i32
  }
  func.func @transform_8(%arg0: i32) -> (i32, i32) {
    %c0_i32 = arith.constant 0 : i32
    %c0_i32_0 = arith.constant 0 : i32
    %c0_i32_1 = arith.constant 0 : i32
    return %c0_i32, %c0_i32_0 : i32, i32
  }
  func.func @transform_9(%arg0: i32) -> (i32, i32) {
    %c0_i32 = arith.constant 0 : i32
    %c0_i32_0 = arith.constant 0 : i32
    %c0_i32_1 = arith.constant 0 : i32
    return %c0_i32, %c0_i32_0 : i32, i32
  }
  func.func @transform_10(%arg0: i32) -> (i32, i32, i32) {
    %c0_i32 = arith.constant 0 : i32
    %c0_i32_0 = arith.constant 0 : i32
    %c0_i32_1 = arith.constant 0 : i32
    %c0_i32_2 = arith.constant 0 : i32
    return %c0_i32, %c0_i32_0, %c0_i32_1 : i32, i32, i32
  }
  func.func @transform_11(%arg0: i32) -> (i32, i32) {
    %c0_i32 = arith.constant 0 : i32
    %c0_i32_0 = arith.constant 0 : i32
    %c0_i32_1 = arith.constant 0 : i32
    return %c0_i32, %c0_i32_0 : i32, i32
  }
  func.func @transform_12(%arg0: i32) -> (i32, i32) {
    %c0_i32 = arith.constant 0 : i32
    %c0_i32_0 = arith.constant 0 : i32
    %c0_i32_1 = arith.constant 0 : i32
    return %c0_i32, %c0_i32_0 : i32, i32
  }
  func.func @transform_13(%arg0: i32) -> (i32, i32) {
    %c0_i32 = arith.constant 0 : i32
    %c0_i32_0 = arith.constant 0 : i32
    %c0_i32_1 = arith.constant 0 : i32
    return %c0_i32, %c0_i32_0 : i32, i32
  }
  func.func @transform_14(%arg0: i32) -> (i32, i32, i32) {
    %c0_i32 = arith.constant 0 : i32
    %c0_i32_0 = arith.constant 0 : i32
    %c0_i32_1 = arith.constant 0 : i32
    return %arg0, %c0_i32, %c0_i32_0 : i32, i32, i32
  }
}

</mosaic_0001>

<bundles_post_ra>
// kernel: tpu_custom_call.1
= control target key start
LH: loop header
LB: loop body
LE: loop exit
PB: predicated region body
PF: predicated region fallthrough
CT: control target
= control target key end

     0   :  { %s21046_s0 = inlined_call_operand.vmem [shape: bf16[4,700,194], index: 0, kind: input, shape index: {}]   ;;  %s21047_s1 = inlined_call_operand.vmem [shape: bf16[256,700], index: 1, kind: input, shape index: {}]   ;;  %s21048_s2 = inlined_call_operand.vmem [shape: f32[256,1], index: 2, kind: input, shape index: {}]   ;;  %s21049_s3 = inlined_call_operand.vmem [shape: bf16[194,128], index: 3, kind: input, shape index: {}]   ;;  %s21050_s4 = inlined_call_operand.vmem [shape: bf16[5,128,256], index: 4, kind: input, shape index: {}]   ;;  %s21051_s5 = inlined_call_operand.vmem [shape: f32[128,1], index: 5, kind: input, shape index: {}]   ;;  %s21052_s6 = inlined_call_operand.vmem [shape: bf16[124,64], index: 6, kind: input, shape index: {}]   ;;  %s21053_s7 = inlined_call_operand.vmem [shape: bf16[3,64,128], index: 7, kind: input, shape index: {}]   ;;  %s21054_s8 = inlined_call_operand.vmem [shape: f32[64,1], index: 8, kind: input, shape index: {}]   ;;  %s21055_s9 = inlined_call_operand.vmem [shape: bf16[62,32], index: 9, kind: input, shape index: {}]   ;;  %s21056_s10 = inlined_call_operand.vmem [shape: bf16[8,256,64], index: 10, kind: input, shape index: {}]   ;;  %s21057_s11 = inlined_call_operand.vmem [shape: f32[1,64], index: 11, kind: input, shape index: {}]   ;;  %s21058_s12 = inlined_call_operand.vmem [shape: bf16[64,10], index: 12, kind: input, shape index: {}]   ;;  %s21059_s13 = inlined_call_operand.vmem [shape: f32[1,10], index: 13, kind: input, shape index: {}]   ;;  %s21060_s14 = inlined_call_operand.hbm [shape: f32[4,1,10], index: 14, kind: output, shape index: {}]  }
   0x1   :  { %21077 = sst [smem:[#allocation9_spill]] %s21046_s0 }
   0x2   :  { %19 = vsyncpa [#allocation3], 0 }
   0x3   :  { %21 = vsyncpa [#allocation3 + $0x1], 0  ;;  %s17253_s29 = smov 0   ;;  %s17255_s30 = smov 0  }
   0x4   :  { %s17257_s15 = smov 0   ;;  %s17259_s16 = smov 0  }
   0x5 LB: > { %21078 = sst [smem:[#allocation5_spill]] %s17159_s15  ;;  %s17274_s17 = sadd.s32 4294967295, %s17163_s16   ;;  %s17163_s16 = sphi %s17259_s16, %s21094_s16   ;;  %s17159_s15 = sphi %s17257_s15, %s21096_s15   ;;  %s17155_s30 = sphi %s17255_s30, %s21098_s30   ;;  %s17151_s29 = sphi %s17253_s29, %s21097_s29  }
   0x6   : > { %s12413_s18 = sadd.s32 4294967294, %s17163_s16   ;;  %s17278_s19 = sadd.s32 1, %s17163_s16  }
   0x7   : > { %21079 = sst [smem:[#allocation6_spill]] %s17278_s19  ;;  %s333_s20 = sadd.s32 1, %s17159_s15 }
   0x8   : > { %s330_s21 = ssub.s32 %s17163_s16, %s17278_s19  ;;  %p343_p0 = scmp.ne.s32.totalorder %s17159_s15, %s17155_s30 }
   0x9   : > { %p331_p1 = scmp.eq.s32.totalorder %s330_s21, 0  ;;  %p344_p2 = scmp.eq.s32.totalorder %s17274_s17, 1 }
   0xa   : > { %p349_p3 = scmp.ne.s32.totalorder %s17155_s30, %s17151_s29  ;;  %p350_p4 = scmp.eq.s32.totalorder %s12413_s18, 1 }
   0xb   : > { %s17289_s22 = scalar_select %p331_p1, %s17159_s15, %s333_s20  }
   0xc   : > { %p17291_p5 = por %p344_p2, %p343_p0  ;;  %p17295_p6 = por %p350_p4, %p349_p3 }
   0xd   : > { %21080 = sst [smem:[#allocation7_spill]] %s17289_s22  ;;  %p12416_p7 = scmp.ge.s32.totalorder %s17163_s16, 1 }
   0xe   : > { %s21082_s24 = scalar_select %p17295_p6, 1, 0 }
   0xf   : > { %p417_p8 = scmp.lt.s32.totalorder %s17163_s16, 3 }
  0x10   : > { %21083 = sst [smem:[#allocation8_spill]] %s21082_s24 }
  0x11   : > { %p418_p9 = pnand %p12416_p7, %p417_p8 }
  0x12   : > { %s12418_s25 = sshll.u32 (!%p418_p9), %s17274_s17, 1  ;;  %v16021_v0 = vld [vmem:[%s21047_s1 + $0x4] ss:$24 sps:$4 sm:$0xff] (!%p418_p9)   ;;  %s21084_s0 = sld [smem:[#allocation9_spill]] (!%p418_p9)  ;;  %v16019_v34 = vld [vmem:[%s21047_s1] ss:$24 sps:$4 sm:$0xff] (!%p418_p9)  }
  0x13   : > { %421 = sbr.rel (%p418_p9) target bundleno = 5978 (0x175a), region = 76  ;;  %p465_p10 = scmp.lt.s32.totalorder (!%p418_p9), %s12418_s25, 3  ;;  %1839 = vmatprep.mubr.bf16.mxu0 (!%p418_p9), %v16021_v0  ;;  %v16022_v35 = vld [vmem:[%s21047_s1 + $0x34] ss:$24 sps:$4 sm:$0xff] (!%p418_p9)   ;;  %v16024_v40 = vld [vmem:[%s21047_s1 + $0x30] ss:$24 sps:$4 sm:$0xff] (!%p418_p9)  }
  0x14   : > { %v16025_v41 = vld [vmem:[%s21047_s1 + $0x64] ss:$24 sps:$4 sm:$0xff] (!%p418_p9)   ;;  %v16027_v46 = vld [vmem:[%s21047_s1 + $0x60] ss:$24 sps:$4 sm:$0xff] (!%p418_p9)   ;;  %v16028_v47 = vld [vmem:[%s21047_s1 + $0x94] ss:$24 sps:$4 sm:$0xff] (!%p418_p9)  }
  0x15   : > { %v16030_v52 = vld [vmem:[%s21047_s1 + $0x90] ss:$24 sps:$4 sm:$0xff] (!%p418_p9)   ;;  %v16031_v53 = vld [vmem:[%s21047_s1 + $0xc4] ss:$24 sps:$4 sm:$0xff] (!%p418_p9)   ;;  %v16033_v58 = vld [vmem:[%s21047_s1 + $0xc0] ss:$24 sps:$4 sm:$0xff] (!%p418_p9)  }
  0x16   : > { %v16034_v59 = vld [vmem:[%s21047_s1 + $0xf4] ss:$24 sps:$4 sm:$0xff] (!%p418_p9)   ;;  %v16036_v0 = vld [vmem:[%s21047_s1 + $0xf0] ss:$24 sps:$4 sm:$0xff] (!%p418_p9)   ;;  %vm1800_vm0 = vcmask (!%p418_p9), 1045504   ;;  %vm1751_vm1 = vcmask (!%p418_p9), 490496  }
  0x17   : > { %vm2631_vm2 = vcmask (!%p418_p9), 1040384   ;;  %vm2582_vm3 = vcmask (!%p418_p9), 539648   ;;  %s21070_s27 = smov (!%p418_p9), 127   ;;  %s21066_s18 = smov (!%p418_p9), 125   ;;  %vm4236_vm4 = vcmask (!%p418_p9), 1014784   ;;  %vm4838_vm5 = vcmask (!%p418_p9), 1046528  }
  0x18   : > { %s21064_s20 = smov (!%p418_p9), 124   ;;  %s21085_s19 = smov (!%p418_p9), 126   ;;  %vm4825_vm6 = vcmask (!%p418_p9), 506880   ;;  %vm4931_vm7 = vcmask (!%p418_p9), 261120   ;;  %vm4933_vm8 = vcmask (!%p418_p9), 523264   ;;  %vm4935_vm9 = vcmask (!%p418_p9), 785408  }
  0x19   : > { %vm17174_vm10 = vmmov (!%p418_p9), 0   ;;  %vm6414_vm11 = vcmask (!%p418_p9), 73728   ;;  %s21087_s22 = smov (!%p418_p9), 125  }
  0x1a   : > { %s21100_s25 = smov (!%p465_p10, %s12418_s25), 3 }
  0x1b   : > { %s15887_s28 = smul.u32 704, %s21100_s25  ;;  %s14080_s25 = sshll.u32 %s17274_s17, 5 }
  0x1d   : > { %s17308_s21 = scalar_lea.vmem %s21084_s0, %s15887_s28  ;;  %s21068_s28 = smov 126  }
  0x1e   : > { %v15971_v1 = vld [vmem:[%s17308_s21 + $0x4] ss:$8 sps:$4 sm:$0xff]   ;;  %v15973_v2 = vld [vmem:[%s17308_s21] ss:$8 sps:$4 sm:$0xff]   ;;  %v15974_v3 = vld [vmem:[%s17308_s21 + $0x14] ss:$8 sps:$4 sm:$0xff]  }
  0x1f   : > { %1807 = vmatprep.subr.bf16.mxu0 %v15971_v1  ;;  %v15976_v4 = vld [vmem:[%s17308_s21 + $0x10] ss:$8 sps:$4 sm:$0xff]   ;;  %v15977_v5 = vld [vmem:[%s17308_s21 + $0x24] ss:$8 sps:$4 sm:$0xff]   ;;  %v15979_v6 = vld [vmem:[%s17308_s21 + $0x20] ss:$8 sps:$4 sm:$0xff]  }
  0x20   : > { %1808 = vmatpush1.bf16.msra.mxu0 %v15973_v2  ;;  %v15980_v7 = vld [vmem:[%s17308_s21 + $0x34] ss:$8 sps:$4 sm:$0xff]   ;;  %v15982_v8 = vld [vmem:[%s17308_s21 + $0x30] ss:$8 sps:$4 sm:$0xff]   ;;  %v15983_v9 = vld [vmem:[%s17308_s21 + $0x44] ss:$8 sps:$4 sm:$0xff]  }
  0x21   : > { %1809 = vmatprep.subr.bf16.mxu0 %v15974_v3  ;;  %v15985_v10 = vld [vmem:[%s17308_s21 + $0x40] ss:$8 sps:$4 sm:$0xff]   ;;  %v15986_v11 = vld [vmem:[%s17308_s21 + $0x54] ss:$8 sps:$4 sm:$0xff]   ;;  %v15988_v12 = vld [vmem:[%s17308_s21 + $0x50] ss:$8 sps:$4 sm:$0xff]  }
  0x22   : > { %v15989_v13 = vld [vmem:[%s17308_s21 + $0x64] ss:$8 sps:$4 sm:$0xff]   ;;  %v15991_v14 = vld [vmem:[%s17308_s21 + $0x60] ss:$8 sps:$4 sm:$0xff]   ;;  %v15992_v15 = vld [vmem:[%s17308_s21 + $0x74] ss:$8 sps:$4 sm:$0xff]  }
  0x23   : > { %v15994_v16 = vld [vmem:[%s17308_s21 + $0x70] ss:$8 sps:$4 sm:$0xff]   ;;  %v15995_v17 = vld [vmem:[%s17308_s21 + $0x84] ss:$8 sps:$4 sm:$0xff]   ;;  %v15997_v18 = vld [vmem:[%s17308_s21 + $0x80] ss:$8 sps:$4 sm:$0xff]  }
  0x24   : > { %1810 = vmatpush1.bf16.msra.mxu0 %v15976_v4  ;;  %v15998_v19 = vld [vmem:[%s17308_s21 + $0x94] ss:$8 sps:$4 sm:$0xff]   ;;  %v16000_v20 = vld [vmem:[%s17308_s21 + $0x90] ss:$8 sps:$4 sm:$0xff]   ;;  %v16001_v21 = vld [vmem:[%s17308_s21 + $0xa4] ss:$8 sps:$4 sm:$0xff]  }
  0x25   : > { %1811 = vmatprep.subr.bf16.mxu0 %v15977_v5  ;;  %v16003_v22 = vld [vmem:[%s17308_s21 + $0xa0] ss:$8 sps:$4 sm:$0xff]   ;;  %v16004_v23 = vld [vmem:[%s17308_s21 + $0xb4] ss:$8 sps:$4 sm:$0xff]   ;;  %v16006_v24 = vld [vmem:[%s17308_s21 + $0xb0] ss:$8 sps:$4 sm:$0xff]  }
  0x26   : > { %v16007_v25 = vld [vmem:[%s17308_s21 + $0xc4] ss:$8 sps:$4 sm:$0xff]   ;;  %v16009_v26 = vld [vmem:[%s17308_s21 + $0xc0] ss:$8 sps:$4 sm:$0xff]   ;;  %v16010_v27 = vld [vmem:[%s17308_s21 + $0xd4] ss:$8 sps:$4 sm:$0xff]  }
  0x27   : > { %v16012_v28 = vld [vmem:[%s17308_s21 + $0xd0] ss:$8 sps:$4 sm:$0xff]   ;;  %v16013_v29 = vld [vmem:[%s17308_s21 + $0xe4] ss:$8 sps:$4 sm:$0xff]   ;;  %v16015_v30 = vld [vmem:[%s17308_s21 + $0xe0] ss:$8 sps:$4 sm:$0xff]  }
  0x28   : > { %1812 = vmatpush1.bf16.msra.mxu0 %v15979_v6  ;;  %v16016_v31 = vld [vmem:[%s17308_s21 + $0xf4] ss:$8 sps:$4 sm:$0xff]   ;;  %v16018_v32 = vld [vmem:[%s17308_s21 + $0xf0] ss:$8 sps:$4 sm:$0xff]   ;;  %v16048_v33 = vld [vmem:[%s17308_s21 + $0x104] ss:$8 sps:$4 sm:$0xff]  }
  0x29   : > { %1813 = vmatprep.subr.bf16.mxu0 %v15980_v7  ;;  %v16046_v36 = vld [vmem:[%s17308_s21 + $0x100] ss:$8 sps:$4 sm:$0xff]   ;;  %v16051_v37 = vld [vmem:[%s17308_s21 + $0x114] ss:$8 sps:$4 sm:$0xff]   ;;  %v16049_v38 = vld [vmem:[%s17308_s21 + $0x110] ss:$8 sps:$4 sm:$0xff]  }
  0x2a   : > { %v16057_v39 = vld [vmem:[%s17308_s21 + $0x124] ss:$8 sps:$4 sm:$0xff]   ;;  %v16055_v42 = vld [vmem:[%s17308_s21 + $0x120] ss:$8 sps:$4 sm:$0xff]   ;;  %v16060_v43 = vld [vmem:[%s17308_s21 + $0x134] ss:$8 sps:$4 sm:$0xff]  }
  0x2b   : > { %v16058_v44 = vld [vmem:[%s17308_s21 + $0x130] ss:$8 sps:$4 sm:$0xff]   ;;  %v16066_v45 = vld [vmem:[%s17308_s21 + $0x144] ss:$8 sps:$4 sm:$0xff]   ;;  %v16064_v48 = vld [vmem:[%s17308_s21 + $0x140] ss:$8 sps:$4 sm:$0xff]  }
  0x2c   : > { %1814 = vmatpush1.bf16.msra.mxu0 %v15982_v8  ;;  %v16069_v49 = vld [vmem:[%s17308_s21 + $0x154] ss:$8 sps:$4 sm:$0xff]   ;;  %v16067_v50 = vld [vmem:[%s17308_s21 + $0x150] ss:$8 sps:$4 sm:$0xff]   ;;  %v16075_v51 = vld [vmem:[%s17308_s21 + $0x164] ss:$8 sps:$4 sm:$0xff]  }
  0x2d   : > { %1815 = vmatprep.subr.bf16.mxu0 %v15983_v9  ;;  %v16073_v54 = vld [vmem:[%s17308_s21 + $0x160] ss:$8 sps:$4 sm:$0xff]   ;;  %v16078_v55 = vld [vmem:[%s17308_s21 + $0x174] ss:$8 sps:$4 sm:$0xff]   ;;  %v16076_v56 = vld [vmem:[%s17308_s21 + $0x170] ss:$8 sps:$4 sm:$0xff]  }
  0x2e   : > { %v16084_v57 = vld [vmem:[%s17308_s21 + $0x184] ss:$8 sps:$4 sm:$0xff]   ;;  %v16082_v60 = vld [vmem:[%s17308_s21 + $0x180] ss:$8 sps:$4 sm:$0xff]   ;;  %v16087_v61 = vld [vmem:[%s17308_s21 + $0x194] ss:$8 sps:$4 sm:$0xff]  }
  0x2f   : > { %v16085_v62 = vld [vmem:[%s17308_s21 + $0x190] ss:$8 sps:$4 sm:$0xff]   ;;  %v16093_v63 = vld [vmem:[%s17308_s21 + $0x1a4] ss:$8 sps:$4 sm:$0xff]   ;;  %v16091_v2 = vld [vmem:[%s17308_s21 + $0x1a0] ss:$8 sps:$4 sm:$0xff]  }
  0x30   : > { %1816 = vmatpush1.bf16.msra.mxu0 %v15985_v10  ;;  %v16037_v1 = vld [vmem:[%s21047_s1 + $0x124] ss:$24 sps:$4 sm:$0xff]   ;;  %v16094_v4 = vld [vmem:[%s17308_s21 + $0x1b0] ss:$8 sps:$4 sm:$0xff]   ;;  %v16040_v7 = vld [vmem:[%s21047_s1 + $0x154] ss:$24 sps:$4 sm:$0xff]  }
  0x31   : > { %1817 = vmatprep.subr.bf16.mxu0 %v15986_v11  ;;  %v16096_v3 = vld [vmem:[%s17308_s21 + $0x1b4] ss:$8 sps:$4 sm:$0xff]   ;;  %v16102_v5 = vld [vmem:[%s17308_s21 + $0x1c4] ss:$8 sps:$4 sm:$0xff]   ;;  %v16039_v6 = vld [vmem:[%s21047_s1 + $0x120] ss:$24 sps:$4 sm:$0xff]  }
  0x32   : > { %v16100_v8 = vld [vmem:[%s17308_s21 + $0x1c0] ss:$8 sps:$4 sm:$0xff]   ;;  %v16105_v9 = vld [vmem:[%s17308_s21 + $0x1d4] ss:$8 sps:$4 sm:$0xff]   ;;  %v16103_v10 = vld [vmem:[%s17308_s21 + $0x1d0] ss:$8 sps:$4 sm:$0xff]  }
  0x33   : > { %v16111_v11 = vld [vmem:[%s17308_s21 + $0x1e4] ss:$8 sps:$4 sm:$0xff]   ;;  %s21086_s0 = smov 127  }
  0x34   : > { %1818 = vmatpush1.bf16.msra.mxu0 %v15988_v12  ;;  %v16042_v12 = vld [vmem:[%s21047_s1 + $0x150] ss:$24 sps:$4 sm:$0xff]  }
  0x35   : > { %1819 = vmatprep.subr.bf16.mxu0 %v15989_v13  ;;  %v16043_v13 = vld [vmem:[%s21047_s1 + $0x184] ss:$24 sps:$4 sm:$0xff]  }
  0x38   : > { %1820 = vmatpush1.bf16.msra.mxu0 %v15991_v14  ;;  %v16109_v14 = vld [vmem:[%s17308_s21 + $0x1e0] ss:$8 sps:$4 sm:$0xff]  }
  0x39   : > { %1821 = vmatprep.subr.bf16.mxu0 %v15992_v15  ;;  %v16114_v15 = vld [vmem:[%s17308_s21 + $0x1f4] ss:$8 sps:$4 sm:$0xff]  }
  0x3c   : > { %1822 = vmatpush1.bf16.msra.mxu0 %v15994_v16  ;;  %v16112_v16 = vld [vmem:[%s17308_s21 + $0x1f0] ss:$8 sps:$4 sm:$0xff]  }
  0x3d   : > { %1823 = vmatprep.subr.bf16.mxu0 %v15995_v17  ;;  %v16045_v17 = vld [vmem:[%s21047_s1 + $0x180] ss:$24 sps:$4 sm:$0xff]  }
  0x40   : > { %1824 = vmatpush1.bf16.msra.mxu0 %v15997_v18  ;;  %v16052_v18 = vld [vmem:[%s21047_s1 + $0x1b4] ss:$24 sps:$4 sm:$0xff]  }
  0x41   : > { %1825 = vmatprep.subr.bf16.mxu0 %v15998_v19  ;;  %v16144_v19 = vld [vmem:[%s17308_s21 + $0x204] ss:$8 sps:$4 sm:$0xff]  }
  0x44   : > { %1826 = vmatpush1.bf16.msra.mxu0 %v16000_v20  ;;  %v16054_v20 = vld [vmem:[%s21047_s1 + $0x1b0] ss:$24 sps:$4 sm:$0xff]  }
  0x45   : > { %1827 = vmatprep.subr.bf16.mxu0 %v16001_v21  ;;  %v16061_v21 = vld [vmem:[%s21047_s1 + $0x1e4] ss:$24 sps:$4 sm:$0xff]  }
  0x48   : > { %1828 = vmatpush1.bf16.msra.mxu0 %v16003_v22  ;;  %v16063_v22 = vld [vmem:[%s21047_s1 + $0x1e0] ss:$24 sps:$4 sm:$0xff]  }
  0x49   : > { %1829 = vmatprep.subr.bf16.mxu0 %v16004_v23  ;;  %v16070_v23 = vld [vmem:[%s21047_s1 + $0x214] ss:$24 sps:$4 sm:$0xff]  }
  0x4c   : > { %1830 = vmatpush1.bf16.msra.mxu0 %v16006_v24  ;;  %v16072_v24 = vld [vmem:[%s21047_s1 + $0x210] ss:$24 sps:$4 sm:$0xff]  }
  0x4d   : > { %1831 = vmatprep.subr.bf16.mxu0 %v16007_v25  ;;  %v16079_v25 = vld [vmem:[%s21047_s1 + $0x244] ss:$24 sps:$4 sm:$0xff]  }
  0x50   : > { %1832 = vmatpush1.bf16.msra.mxu0 %v16009_v26  ;;  %v16081_v26 = vld [vmem:[%s21047_s1 + $0x240] ss:$24 sps:$4 sm:$0xff]  }
  0x51   : > { %1833 = vmatprep.subr.bf16.mxu0 %v16010_v27  ;;  %v16088_v27 = vld [vmem:[%s21047_s1 + $0x274] ss:$24 sps:$4 sm:$0xff]  }
  0x54   : > { %1834 = vmatpush1.bf16.msra.mxu0 %v16012_v28  ;;  %v16090_v28 = vld [vmem:[%s21047_s1 + $0x270] ss:$24 sps:$4 sm:$0xff]  }
  0x55   : > { %1835 = vmatprep.subr.bf16.mxu0 %v16013_v29  ;;  %v16097_v29 = vld [vmem:[%s21047_s1 + $0x2a4] ss:$24 sps:$4 sm:$0xff]  }
  0x58   : > { %1836 = vmatpush1.bf16.msra.mxu0 %v16015_v30  ;;  %v16099_v30 = vld [vmem:[%s21047_s1 + $0x2a0] ss:$24 sps:$4 sm:$0xff]  }
  0x59   : > { %1837 = vmatprep.subr.bf16.mxu0 %v16016_v31  ;;  %v16106_v31 = vld [vmem:[%s21047_s1 + $0x2d4] ss:$24 sps:$4 sm:$0xff]  }
  0x5c   : > { %1838 = vmatpush1.bf16.msra.mxu0 %v16018_v32  ;;  %v16108_v32 = vld [vmem:[%s21047_s1 + $0x2d0] ss:$24 sps:$4 sm:$0xff]  }
  0x5d   : > { %2000 = vmatprep.subr.bf16.mxu0 %v16048_v33  ;;  %v16117_v33 = vld [vmem:[%s21047_s1 + $0xc] ss:$24 sps:$4 sm:$0xff]  }
  0x5f   : > { %1840 = vmatmul.mubr.bf16.vlgmr.msra.gmra.mrb[0].mxu0 %v16019_v34  ;;  %v16115_v34 = vld [vmem:[%s21047_s1 + $0x8] ss:$24 sps:$4 sm:$0xff]  }
  0x60   : > { %1849 = vmatprep.mubr.bf16.mxu0 %v16022_v35  ;;  %2001 = vmatpush1.bf16.msra.mxu0 %v16046_v36  ;;  %v16118_v35 = vld [vmem:[%s21047_s1 + $0x3c] ss:$24 sps:$4 sm:$0xff]   ;;  %v16142_v36 = vld [vmem:[%s17308_s21 + $0x200] ss:$8 sps:$4 sm:$0xff]  }
  0x61   : > { %2002 = vmatprep.subr.bf16.mxu0 %v16051_v37  ;;  %v16152_v37 = vld [vmem:[%s17308_s21 + $0x214] ss:$8 sps:$4 sm:$0xff]  }
  0x64   : > { %2003 = vmatpush1.bf16.msra.mxu0 %v16049_v38  ;;  %v16150_v38 = vld [vmem:[%s17308_s21 + $0x210] ss:$8 sps:$4 sm:$0xff]  }
  0x65   : > { %2004 = vmatprep.subr.bf16.mxu0 %v16057_v39  ;;  %v16159_v39 = vld [vmem:[%s17308_s21 + $0x224] ss:$8 sps:$4 sm:$0xff]  }
  0x67   : > { %1850 = vmatmul.mubr.bf16.gmra.mrb[4].mxu0 %v16024_v40  ;;  %v16120_v40 = vld [vmem:[%s21047_s1 + $0x38] ss:$24 sps:$4 sm:$0xff]  }
  0x68   : > { %1859 = vmatprep.mubr.bf16.mxu0 %v16025_v41  ;;  %2005 = vmatpush1.bf16.msra.mxu0 %v16055_v42  ;;  %v16121_v41 = vld [vmem:[%s21047_s1 + $0x6c] ss:$24 sps:$4 sm:$0xff]   ;;  %v16157_v42 = vld [vmem:[%s17308_s21 + $0x220] ss:$8 sps:$4 sm:$0xff]  }
  0x69   : > { %2006 = vmatprep.subr.bf16.mxu0 %v16060_v43  ;;  %v16162_v43 = vld [vmem:[%s17308_s21 + $0x234] ss:$8 sps:$4 sm:$0xff]  }
  0x6c   : > { %2007 = vmatpush1.bf16.msra.mxu0 %v16058_v44  ;;  %v16160_v44 = vld [vmem:[%s17308_s21 + $0x230] ss:$8 sps:$4 sm:$0xff]  }
  0x6d   : > { %2008 = vmatprep.subr.bf16.mxu0 %v16066_v45  ;;  %v16168_v45 = vld [vmem:[%s17308_s21 + $0x244] ss:$8 sps:$4 sm:$0xff]  }
  0x6f   : > { %1860 = vmatmul.mubr.bf16.gmra.mrb[8].mxu0 %v16027_v46  ;;  %v16123_v46 = vld [vmem:[%s21047_s1 + $0x68] ss:$24 sps:$4 sm:$0xff]  }
  0x70   : > { %1869 = vmatprep.mubr.bf16.mxu0 %v16028_v47  ;;  %2009 = vmatpush1.bf16.msra.mxu0 %v16064_v48  ;;  %v16124_v47 = vld [vmem:[%s21047_s1 + $0x9c] ss:$24 sps:$4 sm:$0xff]   ;;  %v16166_v48 = vld [vmem:[%s17308_s21 + $0x240] ss:$8 sps:$4 sm:$0xff]  }
  0x71   : > { %2010 = vmatprep.subr.bf16.mxu0 %v16069_v49  ;;  %v16171_v49 = vld [vmem:[%s17308_s21 + $0x254] ss:$8 sps:$4 sm:$0xff]  }
  0x74   : > { %2011 = vmatpush1.bf16.msra.mxu0 %v16067_v50  ;;  %v16169_v50 = vld [vmem:[%s17308_s21 + $0x250] ss:$8 sps:$4 sm:$0xff]  }
  0x75   : > { %2012 = vmatprep.subr.bf16.mxu0 %v16075_v51  ;;  %v657_v51 = vld [vmem:[%s21048_s2] sm:$0xff] }
  0x77   : > { %1870 = vmatmul.mubr.bf16.gmra.mrb[12].mxu0 %v16030_v52  ;;  %v16177_v52 = vld [vmem:[%s17308_s21 + $0x264] ss:$8 sps:$4 sm:$0xff]  }
  0x78   : > { %1879 = vmatprep.mubr.bf16.mxu0 %v16031_v53  ;;  %2013 = vmatpush1.bf16.msra.mxu0 %v16073_v54  ;;  %v16126_v53 = vld [vmem:[%s21047_s1 + $0x98] ss:$24 sps:$4 sm:$0xff]   ;;  %v17165_v54 = vmov 0  }
  0x79   : > { %2014 = vmatprep.subr.bf16.mxu0 %v16078_v55  ;;  %15939 = vset.pattern.permute.xlu0 %v17165_v54  ;;  %v16127_v55 = vld [vmem:[%s21047_s1 + $0xcc] ss:$24 sps:$4 sm:$0xff]  }
  0x7a   : > { %691 = vperm.xlu0 %15939, %v657_v51   ;;  %15940 = vset.pattern.permute.xlu1 %v17165_v54  ;;  %v16165_v51 = vld [vmem:[%s21047_s1 + $0x248] ss:$24 sps:$4 sm:$0xff]  }
  0x7b   : > { %2635 = vmatprep.subr.bf16.mxu1 %v17165_v54 }
  0x7c   : > { %2015 = vmatpush1.bf16.msra.mxu0 %v16076_v56  ;;  %v16175_v56 = vld [vmem:[%s17308_s21 + $0x260] ss:$8 sps:$4 sm:$0xff]  }
  0x7d   : > { %2016 = vmatprep.subr.bf16.mxu0 %v16084_v57  ;;  %v16180_v57 = vld [vmem:[%s17308_s21 + $0x274] ss:$8 sps:$4 sm:$0xff]  }
  0x7f   : > { %1880 = vmatmul.mubr.bf16.gmra.mrb[16].mxu0 %v16033_v58  ;;  %v16178_v58 = vld [vmem:[%s17308_s21 + $0x270] ss:$8 sps:$4 sm:$0xff]  }
  0x80   : > { %1889 = vmatprep.mubr.bf16.mxu0 %v16034_v59  ;;  %2017 = vmatpush1.bf16.msra.mxu0 %v16082_v60  ;;  %v658_v59 = vld [vmem:[%s21048_s2 + $0x8] sm:$0xff]  ;;  %v659_v60 = vld [vmem:[%s21048_s2 + $0x10] sm:$0xff] }
  0x81   : > { %2018 = vmatprep.subr.bf16.mxu0 %v16087_v61  ;;  %v16186_v61 = vld [vmem:[%s17308_s21 + $0x284] ss:$8 sps:$4 sm:$0xff]   ;;  %696 = vperm.xlu0 %15939, %v658_v59  }
  0x82   : > { %701 = vperm.xlu1 %15940, %v659_v60   ;;  %v16201_v59 = vld [vmem:[%s21047_s1 + $0x14] ss:$24 sps:$4 sm:$0xff]   ;;  %v16247_v60 = vld [vmem:[%s21049_s3] sm:$0xff]  }
  0x83   : > { %2636 = vmatpush1.bf16.msra.mxu1 %v16247_v60 }
  0x84   : > { %2019 = vmatpush1.bf16.msra.mxu0 %v16085_v62  ;;  %v661_v62 = vld [vmem:[%s21048_s2 + $0x20] sm:$0xff]  ;;  %2637 = vmatprep.subr.bf16.mxu1 %v17165_v54 }
  0x85   : > { %2020 = vmatprep.subr.bf16.mxu0 %v16093_v63  ;;  %v16129_v63 = vld [vmem:[%s21047_s1 + $0xc8] ss:$24 sps:$4 sm:$0xff]   ;;  %711 = vperm.xlu0 %15939, %v661_v62  }
  0x86   : > { %v16248_v62 = vld [vmem:[%s21049_s3 + $0x8] sm:$0xff]  }
  0x87   : > { %1890 = vmatmul.mubr.bf16.gmra.mrb[20].mxu0 %v16036_v0  ;;  %v16130_v0 = vld [vmem:[%s21047_s1 + $0xfc] ss:$24 sps:$4 sm:$0xff]   ;;  %2638 = vmatpush1.bf16.msra.mxu1 %v16248_v62 }
  0x88   : > { %1899 = vmatprep.mubr.bf16.mxu0 %v16037_v1  ;;  %2021 = vmatpush1.bf16.msra.mxu0 %v16091_v2  ;;  %v16184_v1 = vld [vmem:[%s17308_s21 + $0x280] ss:$8 sps:$4 sm:$0xff]   ;;  %v16189_v2 = vld [vmem:[%s17308_s21 + $0x294] ss:$8 sps:$4 sm:$0xff]  }
  0x89   : > { %2022 = vmatprep.subr.bf16.mxu0 %v16096_v3  ;;  %v660_v3 = vld [vmem:[%s21048_s2 + $0x18] sm:$0xff]  ;;  %2639 = vmatprep.subr.bf16.mxu1 %v17165_v54 }
  0x8a   : > { %706 = vperm.xlu1 %15940, %v660_v3   ;;  %v16205_v3 = vld [vmem:[%s21047_s1 + $0x74] ss:$24 sps:$4 sm:$0xff]  }
  0x8c   : > { %2023 = vmatpush1.bf16.msra.mxu0 %v16094_v4  ;;  %v663_v4 = vld [vmem:[%s21048_s2 + $0x30] sm:$0xff] }
  0x8d   : > { %2024 = vmatprep.subr.bf16.mxu0 %v16102_v5  ;;  %v16187_v5 = vld [vmem:[%s17308_s21 + $0x290] ss:$8 sps:$4 sm:$0xff]   ;;  %721 = vperm.xlu0 %15939, %v663_v4   ;;  %v16251_v4 = vld [vmem:[%s21049_s3 + $0x20] sm:$0xff]  }
  0x8f   : > { %1900 = vmatmul.mubr.bf16.gmra.mrb[24].mxu0 %v16039_v6  ;;  %v16195_v6 = vld [vmem:[%s17308_s21 + $0x2a4] ss:$8 sps:$4 sm:$0xff]  }
  0x90   : > { %1909 = vmatprep.mubr.bf16.mxu0 %v16040_v7  ;;  %2025 = vmatpush1.bf16.msra.mxu0 %v16100_v8  ;;  %v662_v7 = vld [vmem:[%s21048_s2 + $0x28] sm:$0xff]  ;;  %v16132_v8 = vld [vmem:[%s21047_s1 + $0xf8] ss:$24 sps:$4 sm:$0xff]  }
  0x91   : > { %2026 = vmatprep.subr.bf16.mxu0 %v16105_v9  ;;  %v665_v9 = vld [vmem:[%s21048_s2 + $0x40] sm:$0xff]  ;;  %716 = vperm.xlu1 %15940, %v662_v7  }
  0x92   : > { %731 = vperm.xlu0 %15939, %v665_v9   ;;  %v16208_v7 = vld [vmem:[%s21047_s1 + $0xa4] ss:$24 sps:$4 sm:$0xff]  }
  0x93   : > { %v16254_v9 = vld [vmem:[%s21049_s3 + $0x38] sm:$0xff]  }
  0x94   : > { %2027 = vmatpush1.bf16.msra.mxu0 %v16103_v10  ;;  %v16133_v10 = vld [vmem:[%s21047_s1 + $0x12c] ss:$24 sps:$4 sm:$0xff]  }
  0x95   : > { %2028 = vmatprep.subr.bf16.mxu0 %v16111_v11  ;;  %v16193_v11 = vld [vmem:[%s17308_s21 + $0x2a0] ss:$8 sps:$4 sm:$0xff]  }
  0x97   : > { %1910 = vmatmul.mubr.bf16.gmra.mrb[28].mxu0 %v16042_v12  ;;  %v16198_v12 = vld [vmem:[%s17308_s21 + $0x2b0] ss:$8 sps:$4 sm:$0x3f]  }
  0x98   : > { %1919 = vmatprep.mubr.bf16.mxu0 %v16043_v13  ;;  %2029 = vmatpush1.bf16.msra.mxu0 %v16109_v14  ;;  %v16196_v13 = vld [vmem:[%s17308_s21 + $0x2b4] ss:$8 sps:$4 sm:$0x3f]  }
  0x99   : > { %2030 = vmatprep.subr.bf16.mxu0 %v16114_v15  ;;  %v664_v14 = vld [vmem:[%s21048_s2 + $0x38] sm:$0xff]  ;;  %v667_v15 = vld [vmem:[%s21048_s2 + $0x50] sm:$0xff] }
  0x9a   : > { %726 = vperm.xlu1 %15940, %v664_v14   ;;  %741 = vperm.xlu0 %15939, %v667_v15   ;;  %v16213_v14 = vld [vmem:[%s21047_s1 + $0xd0] ss:$24 sps:$4 sm:$0xff]   ;;  %v16214_v15 = vld [vmem:[%s21047_s1 + $0x104] ss:$24 sps:$4 sm:$0xff]  }
  0x9c   : > { %2031 = vmatpush1.bf16.msra.mxu0 %v16112_v16  ;;  %v1802_v16 = vsel %vm1800_vm0, %v16198_v12, 0  ;;  %v16255_v12 = vld [vmem:[%s21049_s3 + $0x40] sm:$0xff]  }
  0x9d   : > { %2193 = vmatprep.subr.bf16.mxu0 %v16144_v19  ;;  %v669_v19 = vld [vmem:[%s21048_s2 + $0x60] sm:$0xff] }
  0x9e   : > { %751 = vperm.xlu0 %15939, %v669_v19   ;;  %v16220_v19 = vld [vmem:[%s21047_s1 + $0x164] ss:$24 sps:$4 sm:$0xff]  }
  0x9f   : > { %1920 = vmatmul.mubr.bf16.gmra.mrb[32].mxu0 %v16045_v17  ;;  %v666_v17 = vld [vmem:[%s21048_s2 + $0x48] sm:$0xff] }
  0xa0   : > { %1929 = vmatprep.mubr.bf16.mxu0 %v16052_v18  ;;  %v16135_v18 = vld [vmem:[%s21047_s1 + $0x128] ss:$24 sps:$4 sm:$0xff]   ;;  %736 = vperm.xlu1 %15940, %v666_v17   ;;  %v16217_v17 = vld [vmem:[%s21047_s1 + $0x134] ss:$24 sps:$4 sm:$0xff]  }
  0xa7   : > { %1930 = vmatmul.mubr.bf16.gmra.mrb[36].mxu0 %v16054_v20  ;;  %v16136_v20 = vld [vmem:[%s21047_s1 + $0x15c] ss:$24 sps:$4 sm:$0xff]  }
  0xa8   : > { %1939 = vmatprep.mubr.bf16.mxu0 %v16061_v21  ;;  %v668_v21 = vld [vmem:[%s21048_s2 + $0x58] sm:$0xff] }
  0xa9   : > { %746 = vperm.xlu1 %15940, %v668_v21   ;;  %v16223_v21 = vld [vmem:[%s21047_s1 + $0x194] ss:$24 sps:$4 sm:$0xff]  }
  0xaf   : > { %1940 = vmatmul.mubr.bf16.gmra.mrb[40].mxu0 %v16063_v22  ;;  %v671_v22 = vld [vmem:[%s21048_s2 + $0x70] sm:$0xff] }
  0xb0   : > { %1949 = vmatprep.mubr.bf16.mxu0 %v16070_v23  ;;  %v670_v23 = vld [vmem:[%s21048_s2 + $0x68] sm:$0xff]  ;;  %761 = vperm.xlu0 %15939, %v671_v22  }
  0xb1   : > { %756 = vperm.xlu1 %15940, %v670_v23   ;;  %v16225_v22 = vld [vmem:[%s21047_s1 + $0x190] ss:$24 sps:$4 sm:$0xff]   ;;  %v16226_v23 = vld [vmem:[%s21047_s1 + $0x1c4] ss:$24 sps:$4 sm:$0xff]  }
  0xb7   : > { %1950 = vmatmul.mubr.bf16.gmra.mrb[44].mxu0 %v16072_v24  ;;  %v16138_v24 = vld [vmem:[%s21047_s1 + $0x158] ss:$24 sps:$4 sm:$0xff]  }
  0xb8   : > { %1959 = vmatprep.mubr.bf16.mxu0 %v16079_v25  ;;  %v673_v25 = vld [vmem:[%s21048_s2 + $0x80] sm:$0xff] }
  0xb9   : > { %771 = vperm.xlu0 %15939, %v673_v25   ;;  %v16229_v25 = vld [vmem:[%s21047_s1 + $0x1f4] ss:$24 sps:$4 sm:$0xff]  }
  0xbf   : > { %1960 = vmatmul.mubr.bf16.gmra.mrb[48].mxu0 %v16081_v26  ;;  %v16139_v26 = vld [vmem:[%s21047_s1 + $0x18c] ss:$24 sps:$4 sm:$0xff]  }
  0xc0   : > { %1969 = vmatprep.mubr.bf16.mxu0 %v16088_v27  ;;  %v672_v27 = vld [vmem:[%s21048_s2 + $0x78] sm:$0xff] }
  0xc1   : > { %766 = vperm.xlu1 %15940, %v672_v27   ;;  %v16232_v27 = vld [vmem:[%s21047_s1 + $0x224] ss:$24 sps:$4 sm:$0xff]  }
  0xc7   : > { %1970 = vmatmul.mubr.bf16.gmra.mrb[52].mxu0 %v16090_v28  ;;  %v675_v28 = vld [vmem:[%s21048_s2 + $0x90] sm:$0xff] }
  0xc8   : > { %1979 = vmatprep.mubr.bf16.mxu0 %v16097_v29  ;;  %v674_v29 = vld [vmem:[%s21048_s2 + $0x88] sm:$0xff]  ;;  %781 = vperm.xlu0 %15939, %v675_v28   ;;  %v16257_v28 = vld [vmem:[%s21049_s3 + $0x50] sm:$0xff]  }
  0xc9   : > { %776 = vperm.xlu1 %15940, %v674_v29   ;;  %v16234_v29 = vld [vmem:[%s21047_s1 + $0x220] ss:$24 sps:$4 sm:$0xff]  }
  0xcf   : > { %1980 = vmatmul.mubr.bf16.gmra.mrb[56].mxu0 %v16099_v30  ;;  %v16141_v30 = vld [vmem:[%s21047_s1 + $0x188] ss:$24 sps:$4 sm:$0xff]  }
  0xd0   : > { %1989 = vmatprep.mubr.bf16.mxu0 %v16106_v31  ;;  %v677_v31 = vld [vmem:[%s21048_s2 + $0xa0] sm:$0xff] }
  0xd1   : > { %791 = vperm.xlu0 %15939, %v677_v31   ;;  %v16258_v31 = vld [vmem:[%s21049_s3 + $0x58] sm:$0xff]  }
  0xd7   : > { %1990 = vmatmul.mubr.bf16.gmra.mrb[60].mxu0 %v16108_v32  ;;  %v16145_v32 = vld [vmem:[%s21047_s1 + $0x1bc] ss:$24 sps:$4 sm:$0xff]  }
  0xd8   : > { %2032 = vmatprep.mubr.bf16.mxu0 %v16117_v33  ;;  %v676_v33 = vld [vmem:[%s21048_s2 + $0x98] sm:$0xff] }
  0xd9   : > { %786 = vperm.xlu1 %15940, %v676_v33   ;;  %v16237_v33 = vld [vmem:[%s21047_s1 + $0x250] ss:$24 sps:$4 sm:$0xff]  }
  0xdf   : > { %2033 = vmatmul.mubr.bf16.vlgmr.msra.gmra.mrb[0].mxu0 %v16115_v34  ;;  %v679_v34 = vld [vmem:[%s21048_s2 + $0xb0] sm:$0xff] }
  0xe0   : > { %2042 = vmatprep.mubr.bf16.mxu0 %v16118_v35  ;;  %2194 = vmatpush1.bf16.msra.mxu0 %v16142_v36  ;;  %v678_v35 = vld [vmem:[%s21048_s2 + $0xa8] sm:$0xff]  ;;  %v16147_v36 = vld [vmem:[%s21047_s1 + $0x1b8] ss:$24 sps:$4 sm:$0xff]  }
  0xe1   : > { %2195 = vmatprep.subr.bf16.mxu0 %v16152_v37  ;;  %v681_v37 = vld [vmem:[%s21048_s2 + $0xc0] sm:$0xff]  ;;  %801 = vperm.xlu0 %15939, %v679_v34  }
  0xe2   : > { %796 = vperm.xlu1 %15940, %v678_v35   ;;  %v16238_v35 = vld [vmem:[%s21047_s1 + $0x284] ss:$24 sps:$4 sm:$0xff]  }
  0xe4   : > { %2196 = vmatpush1.bf16.msra.mxu0 %v16150_v38  ;;  %v16148_v38 = vld [vmem:[%s21047_s1 + $0x1ec] ss:$24 sps:$4 sm:$0xff]  }
  0xe5   : > { %2197 = vmatprep.subr.bf16.mxu0 %v16159_v39  ;;  %811 = vperm.xlu0 %15939, %v681_v37   ;;  %v680_v39 = vld [vmem:[%s21048_s2 + $0xb8] sm:$0xff]  ;;  %v16241_v37 = vld [vmem:[%s21047_s1 + $0x2b4] ss:$24 sps:$4 sm:$0xff]  }
  0xe6   : > { %806 = vperm.xlu1 %15940, %v680_v39   ;;  %v16244_v39 = vld [vmem:[%s21047_s1 + $0x2e4] ss:$24 sps:$4 sm:$0xff]  }
  0xe7   : > { %2043 = vmatmul.mubr.bf16.gmra.mrb[4].mxu0 %v16120_v40  ;;  %v683_v40 = vld [vmem:[%s21048_s2 + $0xd0] sm:$0xff] }
  0xe8   : > { %2052 = vmatprep.mubr.bf16.mxu0 %v16121_v41  ;;  %2198 = vmatpush1.bf16.msra.mxu0 %v16157_v42  ;;  %v682_v41 = vld [vmem:[%s21048_s2 + $0xc8] sm:$0xff] }
  0xe9   : > { %2199 = vmatprep.subr.bf16.mxu0 %v16162_v43  ;;  %v16153_v42 = vld [vmem:[%s21047_s1 + $0x1e8] ss:$24 sps:$4 sm:$0xff]   ;;  %821 = vperm.xlu0 %15939, %v683_v40  }
  0xea   : > { %v685_v43 = vld [vmem:[%s21048_s2 + $0xe0] sm:$0xff]  ;;  %816 = vperm.xlu1 %15940, %v682_v41  }
  0xeb   : > { %v16246_v40 = vld [vmem:[%s21047_s1 + $0x2e0] ss:$24 sps:$4 sm:$0xff]  }
  0xec   : > { %2200 = vmatpush1.bf16.msra.mxu0 %v16160_v44  ;;  %v16154_v44 = vld [vmem:[%s21047_s1 + $0x21c] ss:$24 sps:$4 sm:$0xff]  }
  0xed   : > { %2201 = vmatprep.subr.bf16.mxu0 %v16168_v45  ;;  %831 = vperm.xlu0 %15939, %v685_v43   ;;  %v684_v45 = vld [vmem:[%s21048_s2 + $0xd8] sm:$0xff] }
  0xee   : > { %826 = vperm.xlu1 %15940, %v684_v45  }
  0xef   : > { %2053 = vmatmul.mubr.bf16.gmra.mrb[8].mxu0 %v16123_v46  ;;  %v687_v46 = vld [vmem:[%s21048_s2 + $0xf0] sm:$0xff] }
  0xf0   : > { %2062 = vmatprep.mubr.bf16.mxu0 %v16124_v47  ;;  %2202 = vmatpush1.bf16.msra.mxu0 %v16166_v48  ;;  %v686_v47 = vld [vmem:[%s21048_s2 + $0xe8] sm:$0xff]  ;;  %v16156_v48 = vld [vmem:[%s21047_s1 + $0x218] ss:$24 sps:$4 sm:$0xff]  }
  0xf1   : > { %2203 = vmatprep.subr.bf16.mxu0 %v16171_v49  ;;  %v16163_v49 = vld [vmem:[%s21047_s1 + $0x24c] ss:$24 sps:$4 sm:$0xff]   ;;  %841 = vperm.xlu0 %15939, %v687_v46  }
  0xf2   : > { %836 = vperm.xlu1 %15940, %v686_v47  }
  0xf4   : > { %2204 = vmatpush1.bf16.msra.mxu0 %v16169_v50  ;;  %v688_v50 = vld [vmem:[%s21048_s2 + $0xf8] sm:$0xff] }
  0xf5   : > { %2205 = vmatprep.subr.bf16.mxu0 %v16177_v52  ;;  %v16172_v52 = vld [vmem:[%s21047_s1 + $0x27c] ss:$24 sps:$4 sm:$0xff]  }
  0xf6   : > { %846 = vperm.xlu1 %15940, %v688_v50  }
  0xf7   : > { %2063 = vmatmul.mubr.bf16.gmra.mrb[12].mxu0 %v16126_v53  ;;  %v16174_v53 = vld [vmem:[%s21047_s1 + $0x278] ss:$24 sps:$4 sm:$0xff]  }
  0xf8   : > { %2072 = vmatprep.mubr.bf16.mxu0 %v16127_v55  ;;  %2206 = vmatpush1.bf16.msra.mxu0 %v16175_v56  ;;  %v16181_v55 = vld [vmem:[%s21047_s1 + $0x2ac] ss:$24 sps:$4 sm:$0xff]   ;;  %v16183_v56 = vld [vmem:[%s21047_s1 + $0x2a8] ss:$24 sps:$4 sm:$0xff]  }
  0xf9   : > { %2207 = vmatprep.subr.bf16.mxu0 %v16180_v57  ;;  %v16190_v57 = vld [vmem:[%s21047_s1 + $0x2dc] ss:$24 sps:$4 sm:$0xff]   ;;  %v692_v41 = vpop.permute.xlu0 %691 }
  0xfc   : > { %2208 = vmatpush1.bf16.msra.mxu0 %v16178_v58  ;;  %v16192_v58 = vld [vmem:[%s21047_s1 + $0x2d8] ss:$24 sps:$4 sm:$0xff]  }
  0xfd   : > { %2209 = vmatprep.subr.bf16.mxu0 %v16186_v61  ;;  %v16199_v61 = vld [vmem:[%s21047_s1 + $0x10] ss:$24 sps:$4 sm:$0xff]  }
  0xff   : > { %2073 = vmatmul.mubr.bf16.gmra.mrb[16].mxu0 %v16129_v63  ;;  %v16202_v63 = vld [vmem:[%s21047_s1 + $0x44] ss:$24 sps:$4 sm:$0xff]  }
 0x100   : > { %2082 = vmatprep.mubr.bf16.mxu0 %v16130_v0  ;;  %2210 = vmatpush1.bf16.msra.mxu0 %v16184_v1  ;;  %v16249_v0 = vld [vmem:[%s21049_s3 + $0x10] sm:$0xff]   ;;  %v16250_v1 = vld [vmem:[%s21049_s3 + $0x18] sm:$0xff]   ;;  %v697_v45 = vpop.permute.xlu0 %696 }
 0x101   : > { %2211 = vmatprep.subr.bf16.mxu0 %v16189_v2  ;;  %v16204_v2 = vld [vmem:[%s21047_s1 + $0x40] ss:$24 sps:$4 sm:$0xff]   ;;  %2640 = vmatpush1.bf16.msra.mxu1 %v16249_v0  ;;  %v702_v50 = vpop.permute.xlu1 %701 }
 0x102   : > { %2641 = vmatprep.subr.bf16.mxu1 %v17165_v54 }
 0x104   : > { %2212 = vmatpush1.bf16.msra.mxu0 %v16187_v5  ;;  %v16252_v5 = vld [vmem:[%s21049_s3 + $0x28] sm:$0xff]  }
 0x105   : > { %2213 = vmatprep.subr.bf16.mxu0 %v16195_v6  ;;  %2642 = vmatpush1.bf16.msra.mxu1 %v16250_v1  ;;  %v16207_v6 = vld [vmem:[%s21047_s1 + $0x70] ss:$24 sps:$4 sm:$0xff]  }
 0x106   : > { %2643 = vmatprep.subr.bf16.mxu1 %v17165_v54 }
 0x107   : > { %2083 = vmatmul.mubr.bf16.gmra.mrb[20].mxu0 %v16132_v8  ;;  %v16253_v8 = vld [vmem:[%s21049_s3 + $0x30] sm:$0xff]  }
 0x108   : > { %2092 = vmatprep.mubr.bf16.mxu0 %v16133_v10  ;;  %2214 = vmatpush1.bf16.msra.mxu0 %v16193_v11  ;;  %v16210_v10 = vld [vmem:[%s21047_s1 + $0xa0] ss:$24 sps:$4 sm:$0xff]   ;;  %v16211_v11 = vld [vmem:[%s21047_s1 + $0xd4] ss:$24 sps:$4 sm:$0xff]  }
 0x109   : > { %12604 = vmatprep.subr.msk.bf16.mxu0 %vm1800_vm0, %v16196_v13  ;;  %2644 = vmatpush1.bf16.msra.mxu1 %v16251_v4  ;;  %v16256_v13 = vld [vmem:[%s21049_s3 + $0x48] sm:$0xff]   ;;  %v707_v62 = vpop.permute.xlu1 %706 }
 0x10a   : > { %2645 = vmatprep.subr.bf16.mxu1 %v17165_v54 }
 0x10c   : > { %2216 = vmatpush1.bf16.msra.mxu0 %v1802_v16  ;;  %v16216_v16 = vld [vmem:[%s21047_s1 + $0x100] ss:$24 sps:$4 sm:$0xff]  }
 0x10d   : > { %2646 = vmatpush1.bf16.msra.mxu1 %v16252_v5 }
 0x10e   : > { %2647 = vmatprep.subr.bf16.mxu1 %v17165_v54 }
 0x10f   : > { %2093 = vmatmul.mubr.bf16.gmra.mrb[24].mxu0 %v16135_v18  ;;  %v16219_v18 = vld [vmem:[%s21047_s1 + $0x130] ss:$24 sps:$4 sm:$0xff]  }
 0x110   : > { %2102 = vmatprep.mubr.bf16.mxu0 %v16136_v20  ;;  %v16222_v20 = vld [vmem:[%s21047_s1 + $0x160] ss:$24 sps:$4 sm:$0xff]  }
 0x111   : > { %2648 = vmatpush1.bf16.msra.mxu1 %v16253_v8 }
 0x112   : > { %2649 = vmatprep.subr.bf16.mxu1 %v17165_v54 }
 0x115   : > { %2650 = vmatpush1.bf16.msra.mxu1 %v16254_v9  ;;  %v712_v9 = vpop.permute.xlu0 %711 }
 0x116   : > { %2651 = vmatprep.subr.bf16.mxu1 %v17165_v54 }
 0x117   : > { %2103 = vmatmul.mubr.bf16.gmra.mrb[28].mxu0 %v16138_v24  ;;  %v16228_v24 = vld [vmem:[%s21047_s1 + $0x1c0] ss:$24 sps:$4 sm:$0xff]  }
 0x118   : > { %2112 = vmatprep.mubr.bf16.mxu0 %v16139_v26  ;;  %v16231_v26 = vld [vmem:[%s21047_s1 + $0x1f0] ss:$24 sps:$4 sm:$0xff]  }
 0x119   : > { %2652 = vmatpush1.bf16.msra.mxu1 %v16255_v12 }
 0x11a   : > { %2653 = vmatprep.subr.bf16.mxu1 %v17165_v54 }
 0x11d   : > { %2654 = vmatpush1.bf16.msra.mxu1 %v16256_v13 }
 0x11e   : > { %2655 = vmatprep.subr.bf16.mxu1 %v17165_v54 }
 0x11f   : > { %2113 = vmatmul.mubr.bf16.gmra.mrb[32].mxu0 %v16141_v30  ;;  %v16235_v30 = vld [vmem:[%s21047_s1 + $0x254] ss:$24 sps:$4 sm:$0xff]  }
 0x120   : > { %2122 = vmatprep.mubr.bf16.mxu0 %v16145_v32  ;;  %v16259_v32 = vld [vmem:[%s21049_s3 + $0x60] ss:$0 sps:$4 sm:$0x11]  }
 0x121   : > { %2656 = vmatpush1.bf16.msra.mxu1 %v16257_v28  ;;  %v2633_v34 = vsel %vm2631_vm2, %v16259_v32, 0 }
 0x122   : > { %2657 = vmatprep.subr.bf16.mxu1 %v17165_v54 }
 0x125   : > { %2658 = vmatpush1.bf16.msra.mxu1 %v16258_v31 }
 0x126   : > { %2659 = vmatprep.subr.bf16.mxu1 %v17165_v54 }
 0x127   : > { %2123 = vmatmul.mubr.bf16.gmra.mrb[36].mxu0 %v16147_v36  ;;  %v16240_v36 = vld [vmem:[%s21047_s1 + $0x280] ss:$24 sps:$4 sm:$0xff]  }
 0x128   : > { %2132 = vmatprep.mubr.bf16.mxu0 %v16148_v38  ;;  %v16243_v38 = vld [vmem:[%s21047_s1 + $0x2b0] ss:$24 sps:$4 sm:$0xff]  }
 0x129   : > { %2660 = vmatpush1.bf16.msra.mxu1 %v2633_v34 }
 0x12f   : > { %2133 = vmatmul.mubr.bf16.gmra.mrb[40].mxu0 %v16153_v42 }
 0x130   : > { %2142 = vmatprep.mubr.bf16.mxu0 %v16154_v44 }
 0x137   : > { %2143 = vmatmul.mubr.bf16.gmra.mrb[44].mxu0 %v16156_v48 }
 0x138   : > { %2152 = vmatprep.mubr.bf16.mxu0 %v16163_v49 }
 0x13f   : > { %2153 = vmatmul.mubr.bf16.gmra.mrb[48].mxu0 %v16165_v51 }
 0x140   : > { %2162 = vmatprep.mubr.bf16.mxu0 %v16172_v52 }
 0x147   : > { %2163 = vmatmul.mubr.bf16.gmra.mrb[52].mxu0 %v16174_v53 }
 0x148   : > { %2172 = vmatprep.mubr.bf16.mxu0 %v16181_v55 }
 0x14f   : > { %2173 = vmatmul.mubr.bf16.gmra.mrb[56].mxu0 %v16183_v56 }
 0x150   : > { %2182 = vmatprep.mubr.bf16.mxu0 %v16190_v57 }
 0x157   : > { %2183 = vmatmul.mubr.bf16.gmra.mrb[60].mxu0 %v16192_v58 }
 0x158   : > { %12605 = vmatprep.mubr.msk.bf16.mxu0 %vm1751_vm1, %v16201_v59 }
 0x15f   : > { %2226 = vmatmul.mubr.bf16.vlgmr.msra.gmra.mrb[0].mxu0 %v16199_v61 }
 0x160   : > { %12606 = vmatprep.mubr.msk.bf16.mxu0 %vm1751_vm1, %v16202_v63 }
 0x167   : > { %2236 = vmatmul.mubr.bf16.gmra.mrb[4].mxu0 %v16204_v2 }
 0x168   : > { %12607 = vmatprep.mubr.msk.bf16.mxu0 %vm1751_vm1, %v16205_v3 }
 0x16f   : > { %2246 = vmatmul.mubr.bf16.gmra.mrb[8].mxu0 %v16207_v6 }
 0x170   : > { %12608 = vmatprep.mubr.msk.bf16.mxu0 %vm1751_vm1, %v16208_v7 }
 0x177   : > { %2256 = vmatmul.mubr.bf16.gmra.mrb[12].mxu0 %v16210_v10 }
 0x178   : > { %12609 = vmatprep.mubr.msk.bf16.mxu0 %vm1751_vm1, %v16211_v11 }
 0x17f   : > { %2266 = vmatmul.mubr.bf16.gmra.mrb[16].mxu0 %v16213_v14  ;;  %v717_v14 = vpop.permute.xlu1 %716 }
 0x180   : > { %12610 = vmatprep.mubr.msk.bf16.mxu0 %vm1751_vm1, %v16214_v15 }
 0x187   : > { %2276 = vmatmul.mubr.bf16.gmra.mrb[20].mxu0 %v16216_v16 }
 0x188   : > { %12611 = vmatprep.mubr.msk.bf16.mxu0 %vm1751_vm1, %v16217_v17 }
 0x18f   : > { %2286 = vmatmul.mubr.bf16.gmra.mrb[24].mxu0 %v16219_v18 }
 0x190   : > { %12612 = vmatprep.mubr.msk.bf16.mxu0 %vm1751_vm1, %v16220_v19 }
 0x197   : > { %2296 = vmatmul.mubr.bf16.gmra.mrb[28].mxu0 %v16222_v20 }
 0x198   : > { %12613 = vmatprep.mubr.msk.bf16.mxu0 %vm1751_vm1, %v16223_v21 }
 0x19f   : > { %2306 = vmatmul.mubr.bf16.gmra.mrb[32].mxu0 %v16225_v22 }
 0x1a0   : > { %12614 = vmatprep.mubr.msk.bf16.mxu0 %vm1751_vm1, %v16226_v23 }
 0x1a7   : > { %2316 = vmatmul.mubr.bf16.gmra.mrb[36].mxu0 %v16228_v24 }
 0x1a8   : > { %12615 = vmatprep.mubr.msk.bf16.mxu0 %vm1751_vm1, %v16229_v25  ;;  %v722_v25 = vpop.permute.xlu0 %721 }
 0x1af   : > { %2326 = vmatmul.mubr.bf16.gmra.mrb[40].mxu0 %v16231_v26 }
 0x1b0   : > { %12616 = vmatprep.mubr.msk.bf16.mxu0 %vm1751_vm1, %v16232_v27 }
 0x1b7   : > { %2336 = vmatmul.mubr.bf16.gmra.mrb[44].mxu0 %v16234_v29 }
 0x1b8   : > { %12617 = vmatprep.mubr.msk.bf16.mxu0 %vm1751_vm1, %v16235_v30  ;;  %v727_v30 = vpop.permute.xlu1 %726 }
 0x1bf   : > { %2346 = vmatmul.mubr.bf16.gmra.mrb[48].mxu0 %v16237_v33 }
 0x1c0   : > { %12618 = vmatprep.mubr.msk.bf16.mxu0 %vm1751_vm1, %v16238_v35 }
 0x1c7   : > { %2356 = vmatmul.mubr.bf16.gmra.mrb[52].mxu0 %v16240_v36 }
 0x1c8   : > { %12619 = vmatprep.mubr.msk.bf16.mxu0 %vm1751_vm1, %v16241_v37 }
 0x1cf   : > { %2366 = vmatmul.mubr.bf16.gmra.mrb[56].mxu0 %v16243_v38 }
 0x1d0   : > { %12620 = vmatprep.mubr.msk.bf16.mxu0 %vm1751_vm1, %v16244_v39 }
 0x1d7   : > { %2376 = vmatmul.mubr.bf16.gmra.mrb[60].mxu0 %v16246_v40 }
 0x232   : > { %v2227_v42 = vpop.f32.mrb[0].mxu0 }
 0x233   : > { %v15467_v43 = vadd.f32 %v2227_v42, %v692_v41  ;;  %v2229_v44 = vpop.f32.mrb[1].mxu0 }
 0x234   : > { %v15468_v46 = vadd.f32 %v2229_v44, %v692_v41  ;;  %v2231_v47 = vpop.f32.mrb[2].mxu0  ;;  %v732_v41 = vpop.permute.xlu0 %731 }
 0x235   : > { %v15469_v48 = vadd.f32 %v2231_v47, %v697_v45  ;;  %v2233_v49 = vpop.f32.mrb[3].mxu0  ;;  %v2386_v52 = vmax.f32 %v15467_v43, 0.0 }
 0x236   : > { %v15470_v51 = vadd.f32 %v2233_v49, %v697_v45  ;;  %v2387_v55 = vmax.f32 %v15468_v46, 0.0  ;;  %v737_v46 = vpop.permute.xlu1 %736 }
 0x237   : > { %v2388_v53 = vmax.f32 %v15469_v48, 0.0 }
 0x238   : > { %v2389_v56 = vmax.f32 %v15470_v51, 0.0 }
 0x239   : > { %v2450_v57 = vpack.c.bf16 %v2388_v53, %v2386_v52 }
 0x23a   : > { %v2237_v58 = vpop.f32.mrb[4].mxu0  ;;  %v2451_v59 = vpack.c.bf16 %v2389_v56, %v2387_v55 }
 0x23b   : > { %v15471_v60 = vadd.f32 %v2237_v58, %v702_v50  ;;  %v2239_v61 = vpop.f32.mrb[5].mxu0  ;;  %v742_v58 = vpop.permute.xlu0 %741 }
 0x23c   : > { %v15472_v63 = vadd.f32 %v2239_v61, %v702_v50  ;;  %v2241_v0 = vpop.f32.mrb[6].mxu0  ;;  %12634 = vmatprep.mubr.msk.bf16.mxu1 %vm2582_vm3, %v2451_v59 }
 0x23d   : > { %v15473_v1 = vadd.f32 %v2241_v0, %v707_v62  ;;  %v2243_v2 = vpop.f32.mrb[7].mxu0  ;;  %2668 = vmatmul.mubr.bf16.vlgmr.msra.gmra.mrb[0].mxu1 %v2450_v57  ;;  %v2390_v4 = vmax.f32 %v15471_v60, 0.0 }
 0x23e   : > { %v15474_v3 = vadd.f32 %v2243_v2, %v707_v62  ;;  %v2391_v6 = vmax.f32 %v15472_v63, 0.0  ;;  %v747_v63 = vpop.permute.xlu1 %746 }
 0x23f   : > { %v2392_v5 = vmax.f32 %v15473_v1, 0.0 }
 0x240   : > { %v2393_v7 = vmax.f32 %v15474_v3, 0.0 }
 0x241   : > { %v2452_v8 = vpack.c.bf16 %v2392_v5, %v2390_v4 }
 0x242   : > { %v2453_v10 = vpack.c.bf16 %v2393_v7, %v2391_v6  ;;  %v2247_v11 = vpop.f32.mrb[8].mxu0 }
 0x243   : > { %v15475_v12 = vadd.f32 %v2247_v11, %v712_v9  ;;  %v2249_v13 = vpop.f32.mrb[9].mxu0 }
 0x244   : > { %v15476_v15 = vadd.f32 %v2249_v13, %v712_v9  ;;  %v2251_v16 = vpop.f32.mrb[10].mxu0  ;;  %12635 = vmatprep.mubr.msk.bf16.mxu1 %vm2582_vm3, %v2453_v10  ;;  %v752_v10 = vpop.permute.xlu0 %751 }
 0x245   : > { %v15477_v17 = vadd.f32 %v2251_v16, %v717_v14  ;;  %v2253_v18 = vpop.f32.mrb[11].mxu0  ;;  %2676 = vmatmul.mubr.bf16.gmra.mrb[4].mxu1 %v2452_v8  ;;  %v2394_v20 = vmax.f32 %v15475_v12, 0.0 }
 0x246   : > { %v15478_v19 = vadd.f32 %v2253_v18, %v717_v14  ;;  %v2395_v22 = vmax.f32 %v15476_v15, 0.0  ;;  %v757_v15 = vpop.permute.xlu1 %756 }
 0x247   : > { %v2396_v21 = vmax.f32 %v15477_v17, 0.0 }
 0x248   : > { %v2397_v23 = vmax.f32 %v15478_v19, 0.0 }
 0x249   : > { %v2454_v24 = vpack.c.bf16 %v2396_v21, %v2394_v20 }
 0x24a   : > { %v2455_v26 = vpack.c.bf16 %v2397_v23, %v2395_v22  ;;  %v2257_v27 = vpop.f32.mrb[12].mxu0 }
 0x24b   : > { %v15479_v28 = vadd.f32 %v2257_v27, %v722_v25  ;;  %v2259_v29 = vpop.f32.mrb[13].mxu0 }
 0x24c   : > { %v15480_v31 = vadd.f32 %v2259_v29, %v722_v25  ;;  %v2261_v32 = vpop.f32.mrb[14].mxu0  ;;  %12636 = vmatprep.mubr.msk.bf16.mxu1 %vm2582_vm3, %v2455_v26  ;;  %v762_v26 = vpop.permute.xlu0 %761 }
 0x24d   : > { %v15481_v33 = vadd.f32 %v2261_v32, %v727_v30  ;;  %v2263_v34 = vpop.f32.mrb[15].mxu0  ;;  %2684 = vmatmul.mubr.bf16.gmra.mrb[8].mxu1 %v2454_v24  ;;  %v2398_v36 = vmax.f32 %v15479_v28, 0.0 }
 0x24e   : > { %v15482_v35 = vadd.f32 %v2263_v34, %v727_v30  ;;  %v2399_v38 = vmax.f32 %v15480_v31, 0.0  ;;  %v767_v31 = vpop.permute.xlu1 %766 }
 0x24f   : > { %v2400_v37 = vmax.f32 %v15481_v33, 0.0 }
 0x250   : > { %v2401_v39 = vmax.f32 %v15482_v35, 0.0 }
 0x251   : > { %v2456_v40 = vpack.c.bf16 %v2400_v37, %v2398_v36 }
 0x252   : > { %v2457_v42 = vpack.c.bf16 %v2401_v39, %v2399_v38  ;;  %v2267_v43 = vpop.f32.mrb[16].mxu0 }
 0x253   : > { %v15483_v44 = vadd.f32 %v2267_v43, %v732_v41  ;;  %v2269_v45 = vpop.f32.mrb[17].mxu0 }
 0x254   : > { %v15484_v47 = vadd.f32 %v2269_v45, %v732_v41  ;;  %v2271_v48 = vpop.f32.mrb[18].mxu0  ;;  %12637 = vmatprep.mubr.msk.bf16.mxu1 %vm2582_vm3, %v2457_v42  ;;  %v772_v42 = vpop.permute.xlu0 %771 }
 0x255   : > { %v15485_v49 = vadd.f32 %v2271_v48, %v737_v46  ;;  %v2273_v50 = vpop.f32.mrb[19].mxu0  ;;  %2692 = vmatmul.mubr.bf16.gmra.mrb[12].mxu1 %v2456_v40  ;;  %v2402_v52 = vmax.f32 %v15483_v44, 0.0 }
 0x256   : > { %v15486_v51 = vadd.f32 %v2273_v50, %v737_v46  ;;  %v2403_v55 = vmax.f32 %v15484_v47, 0.0  ;;  %v777_v47 = vpop.permute.xlu1 %776 }
 0x257   : > { %v2404_v53 = vmax.f32 %v15485_v49, 0.0 }
 0x258   : > { %v2405_v56 = vmax.f32 %v15486_v51, 0.0 }
 0x259   : > { %v2458_v57 = vpack.c.bf16 %v2404_v53, %v2402_v52 }
 0x25a   : > { %v2459_v59 = vpack.c.bf16 %v2405_v56, %v2403_v55  ;;  %v2277_v60 = vpop.f32.mrb[20].mxu0 }
 0x25b   : > { %v15487_v61 = vadd.f32 %v2277_v60, %v742_v58  ;;  %v2279_v62 = vpop.f32.mrb[21].mxu0 }
 0x25c   : > { %v15488_v0 = vadd.f32 %v2279_v62, %v742_v58  ;;  %v2281_v1 = vpop.f32.mrb[22].mxu0  ;;  %12638 = vmatprep.mubr.msk.bf16.mxu1 %vm2582_vm3, %v2459_v59  ;;  %v782_v59 = vpop.permute.xlu0 %781 }
 0x25d   : > { %v15489_v2 = vadd.f32 %v2281_v1, %v747_v63  ;;  %v2283_v3 = vpop.f32.mrb[23].mxu0  ;;  %2700 = vmatmul.mubr.bf16.gmra.mrb[16].mxu1 %v2458_v57  ;;  %v2406_v5 = vmax.f32 %v15487_v61, 0.0 }
 0x25e   : > { %v15490_v4 = vadd.f32 %v2283_v3, %v747_v63  ;;  %v2407_v7 = vmax.f32 %v15488_v0, 0.0  ;;  %v787_v0 = vpop.permute.xlu1 %786 }
 0x25f   : > { %v2408_v6 = vmax.f32 %v15489_v2, 0.0 }
 0x260   : > { %v2409_v8 = vmax.f32 %v15490_v4, 0.0 }
 0x261   : > { %v2460_v9 = vpack.c.bf16 %v2408_v6, %v2406_v5 }
 0x262   : > { %v2461_v11 = vpack.c.bf16 %v2409_v8, %v2407_v7  ;;  %v2287_v12 = vpop.f32.mrb[24].mxu0 }
 0x263   : > { %v15491_v13 = vadd.f32 %v2287_v12, %v752_v10  ;;  %v2289_v14 = vpop.f32.mrb[25].mxu0 }
 0x264   : > { %v15492_v16 = vadd.f32 %v2289_v14, %v752_v10  ;;  %v2291_v17 = vpop.f32.mrb[26].mxu0  ;;  %12639 = vmatprep.mubr.msk.bf16.mxu1 %vm2582_vm3, %v2461_v11  ;;  %v792_v11 = vpop.permute.xlu0 %791 }
 0x265   : > { %v15493_v18 = vadd.f32 %v2291_v17, %v757_v15  ;;  %v2293_v19 = vpop.f32.mrb[27].mxu0  ;;  %2708 = vmatmul.mubr.bf16.gmra.mrb[20].mxu1 %v2460_v9  ;;  %v2410_v21 = vmax.f32 %v15491_v13, 0.0 }
 0x266   : > { %v15494_v20 = vadd.f32 %v2293_v19, %v757_v15  ;;  %v2411_v23 = vmax.f32 %v15492_v16, 0.0  ;;  %v797_v16 = vpop.permute.xlu1 %796 }
 0x267   : > { %v2412_v22 = vmax.f32 %v15493_v18, 0.0 }
 0x268   : > { %v2413_v24 = vmax.f32 %v15494_v20, 0.0 }
 0x269   : > { %v2462_v25 = vpack.c.bf16 %v2412_v22, %v2410_v21 }
 0x26a   : > { %v2463_v27 = vpack.c.bf16 %v2413_v24, %v2411_v23  ;;  %v2297_v28 = vpop.f32.mrb[28].mxu0 }
 0x26b   : > { %v15495_v29 = vadd.f32 %v2297_v28, %v762_v26  ;;  %v2299_v30 = vpop.f32.mrb[29].mxu0 }
 0x26c   : > { %v15496_v32 = vadd.f32 %v2299_v30, %v762_v26  ;;  %v2301_v33 = vpop.f32.mrb[30].mxu0  ;;  %12640 = vmatprep.mubr.msk.bf16.mxu1 %vm2582_vm3, %v2463_v27  ;;  %v802_v27 = vpop.permute.xlu0 %801 }
 0x26d   : > { %v15497_v34 = vadd.f32 %v2301_v33, %v767_v31  ;;  %v2303_v35 = vpop.f32.mrb[31].mxu0  ;;  %2716 = vmatmul.mubr.bf16.gmra.mrb[24].mxu1 %v2462_v25  ;;  %v2414_v37 = vmax.f32 %v15495_v29, 0.0 }
 0x26e   : > { %v15498_v36 = vadd.f32 %v2303_v35, %v767_v31  ;;  %v2415_v39 = vmax.f32 %v15496_v32, 0.0  ;;  %v807_v32 = vpop.permute.xlu1 %806 }
 0x26f   : > { %v2416_v38 = vmax.f32 %v15497_v34, 0.0 }
 0x270   : > { %v2417_v40 = vmax.f32 %v15498_v36, 0.0 }
 0x271   : > { %v2464_v41 = vpack.c.bf16 %v2416_v38, %v2414_v37 }
 0x272   : > { %v2465_v43 = vpack.c.bf16 %v2417_v40, %v2415_v39  ;;  %v2307_v44 = vpop.f32.mrb[32].mxu0 }
 0x273   : > { %v15499_v45 = vadd.f32 %v2307_v44, %v772_v42  ;;  %v2309_v46 = vpop.f32.mrb[33].mxu0 }
 0x274   : > { %v15500_v48 = vadd.f32 %v2309_v46, %v772_v42  ;;  %v2311_v49 = vpop.f32.mrb[34].mxu0  ;;  %12641 = vmatprep.mubr.msk.bf16.mxu1 %vm2582_vm3, %v2465_v43  ;;  %v812_v43 = vpop.permute.xlu0 %811 }
 0x275   : > { %v15501_v50 = vadd.f32 %v2311_v49, %v777_v47  ;;  %v2313_v51 = vpop.f32.mrb[35].mxu0  ;;  %2724 = vmatmul.mubr.bf16.gmra.mrb[28].mxu1 %v2464_v41  ;;  %v2418_v53 = vmax.f32 %v15499_v45, 0.0 }
 0x276   : > { %v15502_v52 = vadd.f32 %v2313_v51, %v777_v47  ;;  %v2419_v56 = vmax.f32 %v15500_v48, 0.0  ;;  %v817_v48 = vpop.permute.xlu1 %816 }
 0x277   : > { %v2420_v55 = vmax.f32 %v15501_v50, 0.0 }
 0x278   : > { %v2421_v57 = vmax.f32 %v15502_v52, 0.0 }
 0x279   : > { %v2466_v58 = vpack.c.bf16 %v2420_v55, %v2418_v53 }
 0x27a   : > { %v2467_v60 = vpack.c.bf16 %v2421_v57, %v2419_v56  ;;  %v2317_v61 = vpop.f32.mrb[36].mxu0 }
 0x27b   : > { %v15503_v62 = vadd.f32 %v2317_v61, %v782_v59  ;;  %v2319_v63 = vpop.f32.mrb[37].mxu0 }
 0x27c   : > { %v15504_v1 = vadd.f32 %v2319_v63, %v782_v59  ;;  %v2321_v2 = vpop.f32.mrb[38].mxu0  ;;  %12642 = vmatprep.mubr.msk.bf16.mxu1 %vm2582_vm3, %v2467_v60  ;;  %v822_v60 = vpop.permute.xlu0 %821 }
 0x27d   : > { %v15505_v3 = vadd.f32 %v2321_v2, %v787_v0  ;;  %v2323_v4 = vpop.f32.mrb[39].mxu0  ;;  %2732 = vmatmul.mubr.bf16.gmra.mrb[32].mxu1 %v2466_v58  ;;  %v2422_v6 = vmax.f32 %v15503_v62, 0.0 }
 0x27e   : > { %v15506_v5 = vadd.f32 %v2323_v4, %v787_v0  ;;  %v2423_v8 = vmax.f32 %v15504_v1, 0.0  ;;  %v827_v1 = vpop.permute.xlu1 %826 }
 0x27f   : > { %v2424_v7 = vmax.f32 %v15505_v3, 0.0 }
 0x280   : > { %v2425_v9 = vmax.f32 %v15506_v5, 0.0 }
 0x281   : > { %v2468_v10 = vpack.c.bf16 %v2424_v7, %v2422_v6 }
 0x282   : > { %v2469_v12 = vpack.c.bf16 %v2425_v9, %v2423_v8  ;;  %v2327_v13 = vpop.f32.mrb[40].mxu0 }
 0x283   : > { %v15507_v14 = vadd.f32 %v2327_v13, %v792_v11  ;;  %v2329_v15 = vpop.f32.mrb[41].mxu0 }
 0x284   : > { %v15508_v17 = vadd.f32 %v2329_v15, %v792_v11  ;;  %v2331_v18 = vpop.f32.mrb[42].mxu0  ;;  %12643 = vmatprep.mubr.msk.bf16.mxu1 %vm2582_vm3, %v2469_v12  ;;  %v832_v12 = vpop.permute.xlu0 %831 }
 0x285   : > { %v15509_v19 = vadd.f32 %v2331_v18, %v797_v16  ;;  %v2333_v20 = vpop.f32.mrb[43].mxu0  ;;  %2740 = vmatmul.mubr.bf16.gmra.mrb[36].mxu1 %v2468_v10  ;;  %v2426_v22 = vmax.f32 %v15507_v14, 0.0 }
 0x286   : > { %v15510_v21 = vadd.f32 %v2333_v20, %v797_v16  ;;  %v2427_v24 = vmax.f32 %v15508_v17, 0.0  ;;  %v837_v17 = vpop.permute.xlu1 %836 }
 0x287   : > { %v2428_v23 = vmax.f32 %v15509_v19, 0.0 }
 0x288   : > { %v2429_v25 = vmax.f32 %v15510_v21, 0.0 }
 0x289   : > { %v2470_v26 = vpack.c.bf16 %v2428_v23, %v2426_v22 }
 0x28a   : > { %v2471_v28 = vpack.c.bf16 %v2429_v25, %v2427_v24  ;;  %v2337_v29 = vpop.f32.mrb[44].mxu0 }
 0x28b   : > { %v15511_v30 = vadd.f32 %v2337_v29, %v802_v27  ;;  %v2339_v31 = vpop.f32.mrb[45].mxu0 }
 0x28c   : > { %v15512_v33 = vadd.f32 %v2339_v31, %v802_v27  ;;  %v2341_v34 = vpop.f32.mrb[46].mxu0  ;;  %12644 = vmatprep.mubr.msk.bf16.mxu1 %vm2582_vm3, %v2471_v28  ;;  %v842_v28 = vpop.permute.xlu0 %841 }
 0x28d   : > { %v15513_v35 = vadd.f32 %v2341_v34, %v807_v32  ;;  %v2343_v36 = vpop.f32.mrb[47].mxu0  ;;  %2748 = vmatmul.mubr.bf16.gmra.mrb[40].mxu1 %v2470_v26  ;;  %v2430_v38 = vmax.f32 %v15511_v30, 0.0 }
 0x28e   : > { %v15514_v37 = vadd.f32 %v2343_v36, %v807_v32  ;;  %v2431_v40 = vmax.f32 %v15512_v33, 0.0  ;;  %v847_v33 = vpop.permute.xlu1 %846 }
 0x28f   : > { %v2432_v39 = vmax.f32 %v15513_v35, 0.0 }
 0x290   : > { %v2433_v41 = vmax.f32 %v15514_v37, 0.0 }
 0x291   : > { %v2472_v42 = vpack.c.bf16 %v2432_v39, %v2430_v38 }
 0x292   : > { %v2473_v44 = vpack.c.bf16 %v2433_v41, %v2431_v40  ;;  %v2347_v45 = vpop.f32.mrb[48].mxu0 }
 0x293   : > { %v15515_v46 = vadd.f32 %v2347_v45, %v812_v43  ;;  %v2349_v47 = vpop.f32.mrb[49].mxu0 }
 0x294   : > { %v15516_v49 = vadd.f32 %v2349_v47, %v812_v43  ;;  %v2351_v50 = vpop.f32.mrb[50].mxu0  ;;  %12645 = vmatprep.mubr.msk.bf16.mxu1 %vm2582_vm3, %v2473_v44 }
 0x295   : > { %v15517_v51 = vadd.f32 %v2351_v50, %v817_v48  ;;  %v2353_v52 = vpop.f32.mrb[51].mxu0  ;;  %2756 = vmatmul.mubr.bf16.gmra.mrb[44].mxu1 %v2472_v42  ;;  %v2434_v55 = vmax.f32 %v15515_v46, 0.0 }
 0x296   : > { %v15518_v53 = vadd.f32 %v2353_v52, %v817_v48  ;;  %v2435_v57 = vmax.f32 %v15516_v49, 0.0 }
 0x297   : > { %v2436_v56 = vmax.f32 %v15517_v51, 0.0 }
 0x298   : > { %v2437_v58 = vmax.f32 %v15518_v53, 0.0 }
 0x299   : > { %v2474_v59 = vpack.c.bf16 %v2436_v56, %v2434_v55 }
 0x29a   : > { %v2475_v61 = vpack.c.bf16 %v2437_v58, %v2435_v57  ;;  %v2357_v62 = vpop.f32.mrb[52].mxu0 }
 0x29b   : > { %v15519_v63 = vadd.f32 %v2357_v62, %v822_v60  ;;  %v2359_v0 = vpop.f32.mrb[53].mxu0 }
 0x29c   : > { %v15520_v2 = vadd.f32 %v2359_v0, %v822_v60  ;;  %v2361_v3 = vpop.f32.mrb[54].mxu0  ;;  %12646 = vmatprep.mubr.msk.bf16.mxu1 %vm2582_vm3, %v2475_v61 }
 0x29d   : > { %v15521_v4 = vadd.f32 %v2361_v3, %v827_v1  ;;  %v2363_v5 = vpop.f32.mrb[55].mxu0  ;;  %2764 = vmatmul.mubr.bf16.gmra.mrb[48].mxu1 %v2474_v59  ;;  %v2438_v7 = vmax.f32 %v15519_v63, 0.0 }
 0x29e   : > { %v15522_v6 = vadd.f32 %v2363_v5, %v827_v1  ;;  %v2439_v9 = vmax.f32 %v15520_v2, 0.0 }
 0x29f   : > { %v2440_v8 = vmax.f32 %v15521_v4, 0.0 }
 0x2a0   : > { %v2441_v10 = vmax.f32 %v15522_v6, 0.0 }
 0x2a1   : > { %v2476_v11 = vpack.c.bf16 %v2440_v8, %v2438_v7 }
 0x2a2   : > { %v2477_v13 = vpack.c.bf16 %v2441_v10, %v2439_v9  ;;  %v2367_v14 = vpop.f32.mrb[56].mxu0 }
 0x2a3   : > { %v15523_v15 = vadd.f32 %v2367_v14, %v832_v12  ;;  %v2369_v16 = vpop.f32.mrb[57].mxu0 }
 0x2a4   : > { %v15524_v18 = vadd.f32 %v2369_v16, %v832_v12  ;;  %v2371_v19 = vpop.f32.mrb[58].mxu0  ;;  %12647 = vmatprep.mubr.msk.bf16.mxu1 %vm2582_vm3, %v2477_v13 }
 0x2a5   : > { %v15525_v20 = vadd.f32 %v2371_v19, %v837_v17  ;;  %v2373_v21 = vpop.f32.mrb[59].mxu0  ;;  %2772 = vmatmul.mubr.bf16.gmra.mrb[52].mxu1 %v2476_v11  ;;  %v2442_v23 = vmax.f32 %v15523_v15, 0.0 }
 0x2a6   : > { %v15526_v22 = vadd.f32 %v2373_v21, %v837_v17  ;;  %v2443_v25 = vmax.f32 %v15524_v18, 0.0 }
 0x2a7   : > { %v2444_v24 = vmax.f32 %v15525_v20, 0.0 }
 0x2a8   : > { %v2445_v26 = vmax.f32 %v15526_v22, 0.0 }
 0x2a9   : > { %v2478_v27 = vpack.c.bf16 %v2444_v24, %v2442_v23 }
 0x2aa   : > { %v2479_v29 = vpack.c.bf16 %v2445_v26, %v2443_v25  ;;  %v2377_v30 = vpop.f32.mrb[60].mxu0 }
 0x2ab   : > { %v15527_v31 = vadd.f32 %v2377_v30, %v842_v28  ;;  %v2379_v32 = vpop.f32.mrb[61].mxu0 }
 0x2ac   : > { %v15528_v34 = vadd.f32 %v2379_v32, %v842_v28  ;;  %v2381_v35 = vpop.f32.mrb[62].mxu0  ;;  %12648 = vmatprep.mubr.msk.bf16.mxu1 %vm2582_vm3, %v2479_v29 }
 0x2ad   : > { %v15529_v36 = vadd.f32 %v2381_v35, %v847_v33  ;;  %v2383_v37 = vpop.f32.mrb[63].mxu0  ;;  %2780 = vmatmul.mubr.bf16.gmra.mrb[56].mxu1 %v2478_v27  ;;  %v2446_v39 = vmax.f32 %v15527_v31, 0.0 }
 0x2ae   : > { %v15530_v38 = vadd.f32 %v2383_v37, %v847_v33  ;;  %v2447_v41 = vmax.f32 %v15528_v34, 0.0 }
 0x2af   : > { %v2448_v40 = vmax.f32 %v15529_v36, 0.0 }
 0x2b0   : > { %v2449_v42 = vmax.f32 %v15530_v38, 0.0 }
 0x2b1   : > { %v2480_v43 = vpack.c.bf16 %v2448_v40, %v2446_v39 }
 0x2b2   : > { %v2481_v44 = vpack.c.bf16 %v2449_v42, %v2447_v41 }
 0x2b4   : > { %12649 = vmatprep.mubr.msk.bf16.mxu1 %vm2582_vm3, %v2481_v44 }
 0x2b5   : > { %2788 = vmatmul.mubr.bf16.gmra.mrb[60].mxu1 %v2480_v43 }
 0x310   : > { %v2669_v45 = vpop.f32.mrb[0].mxu1 }
 0x311   : > { %v2671_v46 = vpop.f32.mrb[1].mxu1 }
 0x312   : > { %v2672_v47 = vpop.f32.mrb[2].mxu1 }
 0x313   : > { %v17868_v48 = vpack.c.bf16 %v2672_v47, %v2669_v45  ;;  %v2674_v49 = vpop.f32.mrb[3].mxu1 }
 0x315   : > { %2941 = vrot.lane.b32.xlu1 %v17868_v48, %s21070_s27 }
 0x318   : > { %v2677_v50 = vpop.f32.mrb[4].mxu1 }
 0x319   : > { %v2679_v51 = vpop.f32.mrb[5].mxu1 }
 0x31a   : > { %v2680_v52 = vpop.f32.mrb[6].mxu1 }
 0x31b   : > { %v17872_v53 = vpack.c.bf16 %v2680_v52, %v2677_v50  ;;  %v2682_v55 = vpop.f32.mrb[7].mxu1 }
 0x31d   : > { %2943 = vrot.lane.b32.xlu1 %v17872_v53, %s21070_s27 }
 0x320   : > { %v2685_v56 = vpop.f32.mrb[8].mxu1 }
 0x321   : > { %v2687_v57 = vpop.f32.mrb[9].mxu1 }
 0x322   : > { %v2688_v58 = vpop.f32.mrb[10].mxu1 }
 0x323   : > { %v17876_v59 = vpack.c.bf16 %v2688_v58, %v2685_v56  ;;  %v2690_v60 = vpop.f32.mrb[11].mxu1  ;;  %v16262_v58 = vld [vmem:[%s21050_s4 + $0x84] ss:$8 sps:$4 sm:$0xff]  }
 0x324   : > { %3021 = vmatprep.mubr.bf16.mxu1 %v16262_v58 }
 0x325   : > { %2945 = vrot.lane.b32.xlu1 %v17876_v59, %s21070_s27 }
 0x328   : > { %v2693_v61 = vpop.f32.mrb[12].mxu1 }
 0x329   : > { %v2695_v62 = vpop.f32.mrb[13].mxu1 }
 0x32a   : > { %v2696_v63 = vpop.f32.mrb[14].mxu1 }
 0x32b   : > { %v17880_v0 = vpack.c.bf16 %v2696_v63, %v2693_v61  ;;  %v2698_v1 = vpop.f32.mrb[15].mxu1 }
 0x32d   : > { %2947 = vrot.lane.b32.xlu1 %v17880_v0, %s21070_s27 }
 0x330   : > { %v2701_v2 = vpop.f32.mrb[16].mxu1 }
 0x331   : > { %v2703_v3 = vpop.f32.mrb[17].mxu1 }
 0x332   : > { %v2704_v4 = vpop.f32.mrb[18].mxu1 }
 0x333   : > { %v17884_v5 = vpack.c.bf16 %v2704_v4, %v2701_v2  ;;  %v2706_v6 = vpop.f32.mrb[19].mxu1  ;;  %v4038_v4 = vld [vmem:[%s21051_s5 + $0x8] sm:$0xff] }
 0x334   : > { %v4040_v6 = vld [vmem:[%s21051_s5 + $0x18] sm:$0xff] }
 0x335   : > { %2949 = vrot.lane.b32.xlu1 %v17884_v5, %s21070_s27 }
 0x338   : > { %v2709_v7 = vpop.f32.mrb[20].mxu1 }
 0x339   : > { %v2711_v8 = vpop.f32.mrb[21].mxu1 }
 0x33a   : > { %v2712_v9 = vpop.f32.mrb[22].mxu1  ;;  %v4044_v8 = vld [vmem:[%s21051_s5 + $0x38] sm:$0xff] }
 0x33b   : > { %v17888_v10 = vpack.c.bf16 %v2712_v9, %v2709_v7  ;;  %v2714_v11 = vpop.f32.mrb[23].mxu1  ;;  %v4042_v7 = vld [vmem:[%s21051_s5 + $0x28] sm:$0xff] }
 0x33c   : > { %v4046_v9 = vld [vmem:[%s21051_s5 + $0x48] sm:$0xff]  ;;  %v4048_v11 = vld [vmem:[%s21051_s5 + $0x58] sm:$0xff] }
 0x33d   : > { %2951 = vrot.lane.b32.xlu1 %v17888_v10, %s21070_s27 }
 0x340   : > { %v2717_v12 = vpop.f32.mrb[24].mxu1 }
 0x341   : > { %v2719_v13 = vpop.f32.mrb[25].mxu1 }
 0x342   : > { %v2720_v14 = vpop.f32.mrb[26].mxu1 }
 0x343   : > { %v17892_v15 = vpack.c.bf16 %v2720_v14, %v2717_v12  ;;  %v2722_v16 = vpop.f32.mrb[27].mxu1  ;;  %v4050_v12 = vld [vmem:[%s21051_s5 + $0x68] sm:$0xff] }
 0x344   : > { %v4052_v16 = vld [vmem:[%s21051_s5 + $0x78] sm:$0xff] }
 0x345   : > { %2953 = vrot.lane.b32.xlu1 %v17892_v15, %s21070_s27 }
 0x348   : > { %v2725_v17 = vpop.f32.mrb[28].mxu1 }
 0x349   : > { %v2727_v18 = vpop.f32.mrb[29].mxu1 }
 0x34a   : > { %v2728_v19 = vpop.f32.mrb[30].mxu1 }
 0x34b   : > { %v17896_v20 = vpack.c.bf16 %v2728_v19, %v2725_v17  ;;  %v2730_v21 = vpop.f32.mrb[31].mxu1 }
 0x34d   : > { %2955 = vrot.lane.b32.xlu1 %v17896_v20, %s21070_s27 }
 0x350   : > { %v2733_v22 = vpop.f32.mrb[32].mxu1 }
 0x351   : > { %3360 = vrot.lane.b32.xlu1 %v17868_v48, %s21068_s28  ;;  %v2735_v23 = vpop.f32.mrb[33].mxu1 }
 0x352   : > { %v2736_v24 = vpop.f32.mrb[34].mxu1 }
 0x353   : > { %v17902_v25 = vpack.c.bf16 %v2736_v24, %v2733_v22  ;;  %v2738_v26 = vpop.f32.mrb[35].mxu1 }
 0x355   : > { %3362 = vrot.lane.b32.xlu1 %v17872_v53, %s21068_s28  ;;  %2957 = vrot.lane.b32.xlu0 %v17902_v25, %s21070_s27 }
 0x358   : > { %v2741_v27 = vpop.f32.mrb[36].mxu1 }
 0x359   : > { %3364 = vrot.lane.b32.xlu1 %v17876_v59, %s21068_s28  ;;  %v2743_v28 = vpop.f32.mrb[37].mxu1 }
 0x35a   : > { %v2744_v29 = vpop.f32.mrb[38].mxu1  ;;  %v4037_v28 = vld [vmem:[%s21051_s5] sm:$0xff] }
 0x35b   : > { %v17910_v30 = vpack.c.bf16 %v2744_v29, %v2741_v27  ;;  %v2746_v31 = vpop.f32.mrb[39].mxu1 }
 0x35c   : > { %v4039_v31 = vld [vmem:[%s21051_s5 + $0x10] sm:$0xff] }
 0x35d   : > { %3366 = vrot.lane.b32.xlu1 %v17880_v0, %s21068_s28  ;;  %2959 = vrot.lane.b32.xlu0 %v17910_v30, %s21070_s27 }
 0x360   : > { %v2749_v32 = vpop.f32.mrb[40].mxu1 }
 0x361   : > { %3368 = vrot.lane.b32.xlu1 %v17884_v5, %s21068_s28  ;;  %v2751_v33 = vpop.f32.mrb[41].mxu1 }
 0x362   : > { %v2752_v34 = vpop.f32.mrb[42].mxu1  ;;  %v4041_v33 = vld [vmem:[%s21051_s5 + $0x20] sm:$0xff] }
 0x363   : > { %v17918_v35 = vpack.c.bf16 %v2752_v34, %v2749_v32  ;;  %v2754_v36 = vpop.f32.mrb[43].mxu1 }
 0x364   : > { %v4043_v36 = vld [vmem:[%s21051_s5 + $0x30] sm:$0xff] }
 0x365   : > { %3370 = vrot.lane.b32.xlu1 %v17888_v10, %s21068_s28  ;;  %2961 = vrot.lane.b32.xlu0 %v17918_v35, %s21070_s27 }
 0x368   : > { %v2757_v37 = vpop.f32.mrb[44].mxu1 }
 0x369   : > { %3372 = vrot.lane.b32.xlu1 %v17892_v15, %s21068_s28  ;;  %v2759_v38 = vpop.f32.mrb[45].mxu1 }
 0x36a   : > { %v2760_v39 = vpop.f32.mrb[46].mxu1  ;;  %v4045_v38 = vld [vmem:[%s21051_s5 + $0x40] sm:$0xff] }
 0x36b   : > { %v17926_v40 = vpack.c.bf16 %v2760_v39, %v2757_v37  ;;  %v2762_v41 = vpop.f32.mrb[47].mxu1 }
 0x36c   : > { %v16260_v41 = vld [vmem:[%s21050_s4 + $0x80] ss:$8 sps:$4 sm:$0xff]  }
 0x36d   : > { %3374 = vrot.lane.b32.xlu1 %v17896_v20, %s21068_s28  ;;  %2963 = vrot.lane.b32.xlu0 %v17926_v40, %s21070_s27 }
 0x370   : > { %v2765_v42 = vpop.f32.mrb[48].mxu1 }
 0x371   : > { %3618 = vrot.lane.b32.xlu1 %v17868_v48, %s21066_s18  ;;  %v2767_v43 = vpop.f32.mrb[49].mxu1 }
 0x372   : > { %v2768_v44 = vpop.f32.mrb[50].mxu1  ;;  %v4047_v43 = vld [vmem:[%s21051_s5 + $0x50] sm:$0xff] }
 0x373   : > { %v17934_v45 = vpack.c.bf16 %v2768_v44, %v2765_v42  ;;  %v2770_v46 = vpop.f32.mrb[51].mxu1  ;;  %v16263_v42 = vld [vmem:[%s21050_s4 + $0x94] ss:$8 sps:$4 sm:$0xff]   ;;  %v4049_v44 = vld [vmem:[%s21051_s5 + $0x60] sm:$0xff] }
 0x374   : > { %v16265_v46 = vld [vmem:[%s21050_s4 + $0x90] ss:$8 sps:$4 sm:$0xff]  }
 0x375   : > { %3620 = vrot.lane.b32.xlu1 %v17872_v53, %s21066_s18  ;;  %2965 = vrot.lane.b32.xlu0 %v17934_v45, %s21070_s27 }
 0x378   : > { %v2773_v47 = vpop.f32.mrb[52].mxu1 }
 0x379   : > { %3622 = vrot.lane.b32.xlu1 %v17876_v59, %s21066_s18  ;;  %v2775_v49 = vpop.f32.mrb[53].mxu1 }
 0x37a   : > { %v2776_v50 = vpop.f32.mrb[54].mxu1 }
 0x37b   : > { %v17942_v51 = vpack.c.bf16 %v2776_v50, %v2773_v47  ;;  %v2778_v52 = vpop.f32.mrb[55].mxu1  ;;  %v16283_v50 = vld [vmem:[%s21050_s4 + $0xf0] ss:$8 sps:$4 sm:$0xff]  }
 0x37d   : > { %3624 = vrot.lane.b32.xlu1 %v17880_v0, %s21066_s18  ;;  %2967 = vrot.lane.b32.xlu0 %v17942_v51, %s21070_s27 }
 0x380   : > { %v2781_v55 = vpop.f32.mrb[56].mxu1 }
 0x381   : > { %3626 = vrot.lane.b32.xlu1 %v17884_v5, %s21066_s18  ;;  %v2783_v56 = vpop.f32.mrb[57].mxu1 }
 0x382   : > { %v2784_v57 = vpop.f32.mrb[58].mxu1  ;;  %v16284_v56 = vld [vmem:[%s21050_s4] ss:$8 sps:$4 sm:$0xff]  }
 0x383   : > { %v17953_v60 = vpack.c.bf16 %v2784_v57, %v2781_v55  ;;  %v2786_v61 = vpop.f32.mrb[59].mxu1  ;;  %v16287_v57 = vld [vmem:[%s21050_s4 + $0x14] ss:$8 sps:$4 sm:$0xff]  }
 0x385   : > { %3628 = vrot.lane.b32.xlu1 %v17888_v10, %s21066_s18  ;;  %2969 = vrot.lane.b32.xlu0 %v17953_v60, %s21070_s27 }
 0x387   : > { %v2942_v14 = vpop.permute.xlu1 %2941 }
 0x388   : > { %v2789_v62 = vpop.f32.mrb[60].mxu1 }
 0x389   : > { %3630 = vrot.lane.b32.xlu1 %v17892_v15, %s21066_s18  ;;  %v2791_v63 = vpop.f32.mrb[61].mxu1 }
 0x38a   : > { %v2792_v1 = vpop.f32.mrb[62].mxu1 }
 0x38b   : > { %v17961_v2 = vpack.c.bf16 %v2792_v1, %v2789_v62  ;;  %v2794_v3 = vpop.f32.mrb[63].mxu1  ;;  %v16289_v62 = vld [vmem:[%s21050_s4 + $0x10] ss:$8 sps:$4 sm:$0xff]   ;;  %v16290_v1 = vld [vmem:[%s21050_s4 + $0x24] ss:$8 sps:$4 sm:$0xff]  }
 0x38d   : > { %3632 = vrot.lane.b32.xlu1 %v17896_v20, %s21066_s18  ;;  %2971 = vrot.lane.b32.xlu0 %v17961_v2, %s21070_s27 }
 0x38f   : > { %v2944_v18 = vpop.permute.xlu1 %2943 }
 0x391   : > { %3876 = vrot.lane.b32.xlu1 %v17868_v48, %s21064_s20  ;;  %3376 = vrot.lane.b32.xlu0 %v17902_v25, %s21068_s28 }
 0x395   : > { %3878 = vrot.lane.b32.xlu1 %v17872_v53, %s21064_s20  ;;  %3378 = vrot.lane.b32.xlu0 %v17910_v30, %s21068_s28 }
 0x397   : > { %v2946_v21 = vpop.permute.xlu1 %2945 }
 0x399   : > { %3880 = vrot.lane.b32.xlu1 %v17876_v59, %s21064_s20  ;;  %3380 = vrot.lane.b32.xlu0 %v17918_v35, %s21068_s28 }
 0x39d   : > { %3882 = vrot.lane.b32.xlu1 %v17880_v0, %s21064_s20  ;;  %3382 = vrot.lane.b32.xlu0 %v17926_v40, %s21068_s28 }
 0x39f   : > { %v2948_v23 = vpop.permute.xlu1 %2947 }
 0x3a1   : > { %3884 = vrot.lane.b32.xlu1 %v17884_v5, %s21064_s20  ;;  %3384 = vrot.lane.b32.xlu0 %v17934_v45, %s21068_s28 }
 0x3a5   : > { %3886 = vrot.lane.b32.xlu1 %v17888_v10, %s21064_s20  ;;  %3386 = vrot.lane.b32.xlu0 %v17942_v51, %s21068_s28 }
 0x3a7   : > { %v2950_v26 = vpop.permute.xlu1 %2949 }
 0x3a9   : > { %3888 = vrot.lane.b32.xlu1 %v17892_v15, %s21064_s20  ;;  %3388 = vrot.lane.b32.xlu0 %v17953_v60, %s21068_s28 }
 0x3ad   : > { %3890 = vrot.lane.b32.xlu1 %v17896_v20, %s21064_s20  ;;  %3390 = vrot.lane.b32.xlu0 %v17961_v2, %s21068_s28  ;;  %s21091_s28 = smov 96  }
 0x3af   : > { %v2952_v29 = vpop.permute.xlu1 %2951 }
 0x3b1   : > { %4060 = vperm.xlu1 %15940, %v4038_v4   ;;  %3634 = vrot.lane.b32.xlu0 %v17902_v25, %s21066_s18  ;;  %v16292_v4 = vld [vmem:[%s21050_s4 + $0x20] ss:$8 sps:$4 sm:$0xff]  }
 0x3b5   : > { %4070 = vperm.xlu1 %15940, %v4040_v6   ;;  %3636 = vrot.lane.b32.xlu0 %v17910_v30, %s21066_s18  ;;  %v16293_v6 = vld [vmem:[%s21050_s4 + $0x34] ss:$8 sps:$4 sm:$0xff]  }
 0x3b7   : > { %v2954_v34 = vpop.permute.xlu1 %2953 }
 0x3b9   : > { %4080 = vperm.xlu1 %15940, %v4042_v7   ;;  %3638 = vrot.lane.b32.xlu0 %v17918_v35, %s21066_s18 }
 0x3bd   : > { %4090 = vperm.xlu1 %15940, %v4044_v8   ;;  %3640 = vrot.lane.b32.xlu0 %v17926_v40, %s21066_s18 }
 0x3bf   : > { %v2956_v39 = vpop.permute.xlu1 %2955 }
 0x3c1   : > { %4100 = vperm.xlu1 %15940, %v4046_v9   ;;  %3642 = vrot.lane.b32.xlu0 %v17934_v45, %s21066_s18  ;;  %v16295_v9 = vld [vmem:[%s21050_s4 + $0x30] ss:$8 sps:$4 sm:$0xff]  }
 0x3c3   : > { %v3361_v47 = vpop.permute.xlu1 %3360 }
 0x3c5   : > { %4110 = vperm.xlu1 %15940, %v4048_v11   ;;  %3644 = vrot.lane.b32.xlu0 %v17942_v51, %s21066_s18  ;;  %v16296_v11 = vld [vmem:[%s21050_s4 + $0x44] ss:$8 sps:$4 sm:$0xff]  }
 0x3c7   : > { %v2958_v13 = vpop.permute.xlu0 %2957  ;;  %v3363_v52 = vpop.permute.xlu1 %3362 }
 0x3c8   : > { %14081 = vmatprep.subr.bf16.mxu1 %v2958_v13 }
 0x3c9   : > { %4120 = vperm.xlu1 %15940, %v4050_v12   ;;  %14082 = vmatpush3.bf16.msra.mxu1 %v2942_v14 }
 0x3ca   : > { %3646 = vrot.lane.b32.xlu0 %v17953_v60, %s21066_s18 }
 0x3cb   : > { %v3365_v58 = vpop.permute.xlu1 %3364 }
 0x3cd   : > { %4130 = vperm.xlu1 %15940, %v4052_v16   ;;  %v16298_v16 = vld [vmem:[%s21050_s4 + $0x40] ss:$8 sps:$4 sm:$0xff]  }
 0x3ce   : > { %3648 = vrot.lane.b32.xlu0 %v17961_v2, %s21066_s18  ;;  %s21074_s18 = smov 96  }
 0x3cf   : > { %v2960_v17 = vpop.permute.xlu0 %2959  ;;  %v3367_v61 = vpop.permute.xlu1 %3366 }
 0x3d0   : > { %14083 = vmatprep.subr.bf16.mxu1 %v2960_v17 }
 0x3d1   : > { %14084 = vmatpush3.bf16.msra.mxu1 %v2944_v18  ;;  %v16299_v18 = vld [vmem:[%s21050_s4 + $0x54] ss:$8 sps:$4 sm:$0xff]  }
 0x3d2   : > { %3892 = vrot.lane.b32.xlu0 %v17902_v25, %s21064_s20 }
 0x3d6   : > { %3894 = vrot.lane.b32.xlu0 %v17910_v30, %s21064_s20 }
 0x3d7   : > { %v2962_v19 = vpop.permute.xlu0 %2961 }
 0x3d8   : > { %14085 = vmatprep.subr.bf16.mxu1 %v2962_v19  ;;  %v16301_v19 = vld [vmem:[%s21050_s4 + $0x50] ss:$8 sps:$4 sm:$0xff]  }
 0x3d9   : > { %14086 = vmatpush3.bf16.msra.mxu1 %v2946_v21  ;;  %v16302_v21 = vld [vmem:[%s21050_s4 + $0x64] ss:$8 sps:$4 sm:$0xff]  }
 0x3da   : > { %3896 = vrot.lane.b32.xlu0 %v17918_v35, %s21064_s20 }
 0x3de   : > { %3898 = vrot.lane.b32.xlu0 %v17926_v40, %s21064_s20 }
 0x3df   : > { %v2964_v22 = vpop.permute.xlu0 %2963 }
 0x3e0   : > { %14087 = vmatprep.subr.bf16.mxu1 %v2964_v22  ;;  %v16304_v22 = vld [vmem:[%s21050_s4 + $0x60] ss:$8 sps:$4 sm:$0xff]  }
 0x3e1   : > { %14088 = vmatpush3.bf16.msra.mxu1 %v2948_v23  ;;  %v16305_v23 = vld [vmem:[%s21050_s4 + $0x74] ss:$8 sps:$4 sm:$0xff]  }
 0x3e2   : > { %3900 = vrot.lane.b32.xlu0 %v17934_v45, %s21064_s20 }
 0x3e6   : > { %3902 = vrot.lane.b32.xlu0 %v17942_v51, %s21064_s20 }
 0x3e7   : > { %v2966_v24 = vpop.permute.xlu0 %2965 }
 0x3e8   : > { %14089 = vmatprep.subr.bf16.mxu1 %v2966_v24 }
 0x3e9   : > { %14090 = vmatpush3.bf16.msra.mxu1 %v2950_v26 }
 0x3ea   : > { %3904 = vrot.lane.b32.xlu0 %v17953_v60, %s21064_s20 }
 0x3ee   : > { %3906 = vrot.lane.b32.xlu0 %v17961_v2, %s21064_s20  ;;  %s21075_s20 = smov 64  }
 0x3ef   : > { %v2968_v27 = vpop.permute.xlu0 %2967 }
 0x3f0   : > { %14091 = vmatprep.subr.bf16.mxu1 %v2968_v27  ;;  %v16307_v27 = vld [vmem:[%s21050_s4 + $0x70] ss:$8 sps:$4 sm:$0xff]  }
 0x3f1   : > { %14092 = vmatpush3.bf16.msra.mxu1 %v2952_v29 }
 0x3f2   : > { %4055 = vperm.xlu0 %15939, %v4037_v28   ;;  %v16310_v28 = vld [vmem:[%s21050_s4 + $0x104] ss:$8 sps:$4 sm:$0xff]  }
 0x3f6   : > { %4065 = vperm.xlu0 %15939, %v4039_v31  }
 0x3f7   : > { %v2970_v32 = vpop.permute.xlu0 %2969 }
 0x3f8   : > { %14093 = vmatprep.subr.bf16.mxu1 %v2970_v32  ;;  %v16308_v32 = vld [vmem:[%s21050_s4 + $0x100] ss:$8 sps:$4 sm:$0xff]  }
 0x3f9   : > { %14094 = vmatpush3.bf16.msra.mxu1 %v2954_v34 }
 0x3fa   : > { %4075 = vperm.xlu0 %15939, %v4041_v33   ;;  %v16311_v33 = vld [vmem:[%s21050_s4 + $0x114] ss:$8 sps:$4 sm:$0xff]  }
 0x3fe   : > { %4085 = vperm.xlu0 %15939, %v4043_v36  }
 0x3ff   : > { %v2972_v37 = vpop.permute.xlu0 %2971 }
 0x400   : > { %14095 = vmatprep.subr.bf16.mxu1 %v2972_v37 }
 0x401   : > { %14096 = vmatpush3.bf16.msra.mxu1 %v2956_v39 }
 0x402   : > { %4095 = vperm.xlu0 %15939, %v4045_v38   ;;  %14145 = vmatprep.subr.bf16.mxu1 %v17902_v25  ;;  %v16266_v25 = vld [vmem:[%s21050_s4 + $0xa4] ss:$8 sps:$4 sm:$0xff]   ;;  %v16313_v38 = vld [vmem:[%s21050_s4 + $0x110] ss:$8 sps:$4 sm:$0xff]  }
 0x404   : > { %3022 = vmatmul.mubr.bf16.vlgmr.msra.gmra.mrb[64].mxu1 %v16260_v41  ;;  %v16314_v41 = vld [vmem:[%s21050_s4 + $0x124] ss:$8 sps:$4 sm:$0xff]  }
 0x405   : > { %14146 = vmatpush3.bf16.msra.mxu1 %v17868_v48  ;;  %3029 = vmatprep.mubr.bf16.mxu1 %v16263_v42  ;;  %v4051_v48 = vld [vmem:[%s21051_s5 + $0x70] sm:$0xff] }
 0x406   : > { %4105 = vperm.xlu0 %15939, %v4047_v43   ;;  %14147 = vmatprep.subr.bf16.mxu1 %v17910_v30  ;;  %v16269_v30 = vld [vmem:[%s21050_s4 + $0xb4] ss:$8 sps:$4 sm:$0xff]  }
 0x409   : > { %14148 = vmatpush3.bf16.msra.mxu1 %v17872_v53  ;;  %v16268_v53 = vld [vmem:[%s21050_s4 + $0xa0] ss:$8 sps:$4 sm:$0xff]  }
 0x40a   : > { %4115 = vperm.xlu0 %15939, %v4049_v44   ;;  %14149 = vmatprep.subr.bf16.mxu1 %v17918_v35  ;;  %v3377_v35 = vpop.permute.xlu0 %3376  ;;  %v16316_v44 = vld [vmem:[%s21050_s4 + $0x120] ss:$8 sps:$4 sm:$0xff]  }
 0x40c   : > { %3030 = vmatmul.mubr.bf16.gmra.mrb[68].mxu1 %v16265_v46  ;;  %v16317_v46 = vld [vmem:[%s21050_s4 + $0x134] ss:$8 sps:$4 sm:$0xff]  }
 0x40d   : > { %14150 = vmatpush3.bf16.msra.mxu1 %v17876_v59  ;;  %3037 = vmatprep.mubr.bf16.mxu1 %v16266_v25  ;;  %v16271_v59 = vld [vmem:[%s21050_s4 + $0xb0] ss:$8 sps:$4 sm:$0xff]  }
 0x40e   : > { %4125 = vperm.xlu0 %15939, %v4051_v48   ;;  %14151 = vmatprep.subr.bf16.mxu1 %v17926_v40  ;;  %v16278_v40 = vld [vmem:[%s21050_s4 + $0xe4] ss:$8 sps:$4 sm:$0xff]   ;;  %v3379_v49 = vpop.permute.xlu0 %3378 }
 0x411   : > { %14152 = vmatpush3.bf16.msra.mxu1 %v17880_v0  ;;  %v16272_v0 = vld [vmem:[%s21050_s4 + $0xc4] ss:$8 sps:$4 sm:$0xff]  }
 0x412   : > { %14153 = vmatprep.subr.bf16.mxu1 %v17934_v45  ;;  %v16281_v45 = vld [vmem:[%s21050_s4 + $0xf4] ss:$8 sps:$4 sm:$0xff]   ;;  %v3381_v55 = vpop.permute.xlu0 %3380 }
 0x414   : > { %3038 = vmatmul.mubr.bf16.gmra.mrb[72].mxu1 %v16268_v53  ;;  %v16319_v53 = vld [vmem:[%s21050_s4 + $0x130] ss:$8 sps:$4 sm:$0xff]  }
 0x415   : > { %14154 = vmatpush3.bf16.msra.mxu1 %v17884_v5  ;;  %3045 = vmatprep.mubr.bf16.mxu1 %v16269_v30  ;;  %v16274_v5 = vld [vmem:[%s21050_s4 + $0xc0] ss:$8 sps:$4 sm:$0xff]   ;;  %v16320_v30 = vld [vmem:[%s21050_s4 + $0x144] ss:$8 sps:$4 sm:$0xff]  }
 0x416   : > { %14155 = vmatprep.subr.bf16.mxu1 %v17942_v51  ;;  %v16286_v51 = vld [vmem:[%s21050_s4 + $0x4] ss:$8 sps:$4 sm:$0xff]  }
 0x419   : > { %14156 = vmatpush3.bf16.msra.mxu1 %v17888_v10  ;;  %v16275_v10 = vld [vmem:[%s21050_s4 + $0xd4] ss:$8 sps:$4 sm:$0xff]  }
 0x41a   : > { %14157 = vmatprep.subr.bf16.mxu1 %v17953_v60  ;;  %v3383_v60 = vpop.permute.xlu0 %3382 }
 0x41c   : > { %3046 = vmatmul.mubr.bf16.gmra.mrb[76].mxu1 %v16271_v59 }
 0x41d   : > { %14158 = vmatpush3.bf16.msra.mxu1 %v17892_v15  ;;  %3053 = vmatprep.mubr.bf16.mxu1 %v16272_v0  ;;  %v16277_v15 = vld [vmem:[%s21050_s4 + $0xd0] ss:$8 sps:$4 sm:$0xff]  }
 0x41e   : > { %14159 = vmatprep.subr.bf16.mxu1 %v17961_v2  ;;  %v3385_v63 = vpop.permute.xlu0 %3384  ;;  %v3369_v2 = vpop.permute.xlu1 %3368 }
 0x421   : > { %14160 = vmatpush3.bf16.msra.mxu1 %v17896_v20  ;;  %v16280_v20 = vld [vmem:[%s21050_s4 + $0xe0] ss:$8 sps:$4 sm:$0xff]  }
 0x422   : > { %14209 = vmatprep.subr.bf16.mxu1 %v3377_v35  ;;  %v3387_v3 = vpop.permute.xlu0 %3386  ;;  %v3371_v7 = vpop.permute.xlu1 %3370  ;;  %v16322_v35 = vld [vmem:[%s21050_s4 + $0x140] ss:$8 sps:$4 sm:$0xff]  }
 0x424   : > { %3054 = vmatmul.mubr.bf16.gmra.mrb[80].mxu1 %v16274_v5 }
 0x425   : > { %3061 = vmatprep.mubr.bf16.mxu1 %v16275_v10 }
 0x426   : > { %v3389_v8 = vpop.permute.xlu0 %3388  ;;  %v3373_v12 = vpop.permute.xlu1 %3372 }
 0x42a   : > { %v3391_v13 = vpop.permute.xlu0 %3390  ;;  %v3375_v14 = vpop.permute.xlu1 %3374 }
 0x42c   : > { %3062 = vmatmul.mubr.bf16.gmra.mrb[84].mxu1 %v16277_v15  ;;  %v16323_v15 = vld [vmem:[%s21050_s4 + $0x154] ss:$8 sps:$4 sm:$0xff]  }
 0x42d   : > { %3069 = vmatprep.mubr.bf16.mxu1 %v16278_v40  ;;  %v16325_v40 = vld [vmem:[%s21050_s4 + $0x150] ss:$8 sps:$4 sm:$0xff]  }
 0x42e   : > { %v3635_v17 = vpop.permute.xlu0 %3634  ;;  %v3619_v24 = vpop.permute.xlu1 %3618 }
 0x432   : > { %v3637_v26 = vpop.permute.xlu0 %3636  ;;  %v3621_v29 = vpop.permute.xlu1 %3620 }
 0x434   : > { %3070 = vmatmul.mubr.bf16.gmra.mrb[88].mxu1 %v16280_v20  ;;  %v16326_v20 = vld [vmem:[%s21050_s4 + $0x164] ss:$8 sps:$4 sm:$0xff]  }
 0x435   : > { %3077 = vmatprep.mubr.bf16.mxu1 %v16281_v45  ;;  %v16328_v45 = vld [vmem:[%s21050_s4 + $0x160] ss:$8 sps:$4 sm:$0xff]  }
 0x436   : > { %v3639_v31 = vpop.permute.xlu0 %3638  ;;  %v3623_v34 = vpop.permute.xlu1 %3622 }
 0x43a   : > { %v3641_v36 = vpop.permute.xlu0 %3640  ;;  %v3625_v37 = vpop.permute.xlu1 %3624 }
 0x43c   : > { %3078 = vmatmul.mubr.bf16.gmra.mrb[92].mxu1 %v16283_v50  ;;  %v16331_v50 = vld [vmem:[%s21050_s4 + $0x170] ss:$8 sps:$4 sm:$0xff]  }
 0x43d   : > { %3198 = vmatprep.mubr.bf16.mxu1 %v16286_v51 }
 0x43e   : > { %v3643_v39 = vpop.permute.xlu0 %3642  ;;  %v3627_v42 = vpop.permute.xlu1 %3626 }
 0x442   : > { %v3645_v43 = vpop.permute.xlu0 %3644  ;;  %v3629_v25 = vpop.permute.xlu1 %3628 }
 0x444   : > { %3199 = vmatmul.mubr.bf16.vlgmr.msra.gmra.mrb[96].mxu1 %v16284_v56 }
 0x445   : > { %14210 = vmatpush3.bf16.msra.mxu1 %v3361_v47  ;;  %3206 = vmatprep.mubr.bf16.mxu1 %v16287_v57  ;;  %v16329_v47 = vld [vmem:[%s21050_s4 + $0x174] ss:$8 sps:$4 sm:$0xff]   ;;  %v16332_v57 = vld [vmem:[%s21050_s4 + $0x180] ss:$8 sps:$4 sm:$0xff]  }
 0x446   : > { %14211 = vmatprep.subr.bf16.mxu1 %v3379_v49  ;;  %v3647_v48 = vpop.permute.xlu0 %3646  ;;  %v3631_v59 = vpop.permute.xlu1 %3630 }
 0x449   : > { %14212 = vmatpush3.bf16.msra.mxu1 %v3363_v52  ;;  %v16334_v52 = vld [vmem:[%s21050_s4 + $0x184] ss:$8 sps:$4 sm:$0xff]  }
 0x44a   : > { %14213 = vmatprep.subr.bf16.mxu1 %v3381_v55  ;;  %v3649_v0 = vpop.permute.xlu0 %3648  ;;  %v3633_v5 = vpop.permute.xlu1 %3632 }
 0x44c   : > { %3207 = vmatmul.mubr.bf16.gmra.mrb[100].mxu1 %v16289_v62 }
 0x44d   : > { %14214 = vmatpush3.bf16.msra.mxu1 %v3365_v58  ;;  %3214 = vmatprep.mubr.bf16.mxu1 %v16290_v1  ;;  %v16335_v58 = vld [vmem:[%s21050_s4 + $0x194] ss:$8 sps:$4 sm:$0xff]   ;;  %v16338_v1 = vld [vmem:[%s21050_s4 + $0x1a4] ss:$8 sps:$4 sm:$0xff]  }
 0x44e   : > { %14215 = vmatprep.subr.bf16.mxu1 %v3383_v60  ;;  %v3893_v10 = vpop.permute.xlu0 %3892  ;;  %v3877_v49 = vpop.permute.xlu1 %3876 }
 0x451   : > { %14216 = vmatpush3.bf16.msra.mxu1 %v3367_v61 }
 0x452   : > { %14217 = vmatprep.subr.bf16.mxu1 %v3385_v63  ;;  %v3895_v51 = vpop.permute.xlu0 %3894  ;;  %v3879_v55 = vpop.permute.xlu1 %3878  ;;  %v16337_v63 = vld [vmem:[%s21050_s4 + $0x190] ss:$8 sps:$4 sm:$0xff]  }
 0x454   : > { %3215 = vmatmul.mubr.bf16.gmra.mrb[104].mxu1 %v16292_v4  ;;  %v16340_v4 = vld [vmem:[%s21050_s4 + $0x1a0] ss:$8 sps:$4 sm:$0xff]  }
 0x455   : > { %14218 = vmatpush3.bf16.msra.mxu1 %v3369_v2  ;;  %3222 = vmatprep.mubr.bf16.mxu1 %v16293_v6 }
 0x456   : > { %14219 = vmatprep.subr.bf16.mxu1 %v3387_v3  ;;  %v3897_v56 = vpop.permute.xlu0 %3896  ;;  %v3881_v60 = vpop.permute.xlu1 %3880 }
 0x459   : > { %14220 = vmatpush3.bf16.msra.mxu1 %v3371_v7  ;;  %v16341_v7 = vld [vmem:[%s21050_s4 + $0x1b4] ss:$8 sps:$4 sm:$0xff]  }
 0x45a   : > { %14221 = vmatprep.subr.bf16.mxu1 %v3389_v8  ;;  %v3899_v61 = vpop.permute.xlu0 %3898  ;;  %v3883_v62 = vpop.permute.xlu1 %3882 }
 0x45c   : > { %3223 = vmatmul.mubr.bf16.gmra.mrb[108].mxu1 %v16295_v9 }
 0x45d   : > { %14222 = vmatpush3.bf16.msra.mxu1 %v3373_v12  ;;  %3230 = vmatprep.mubr.bf16.mxu1 %v16296_v11 }
 0x45e   : > { %14223 = vmatprep.subr.bf16.mxu1 %v3391_v13  ;;  %v3901_v2 = vpop.permute.xlu0 %3900  ;;  %v3885_v3 = vpop.permute.xlu1 %3884  ;;  %v16343_v13 = vld [vmem:[%s21050_s4 + $0x1b0] ss:$8 sps:$4 sm:$0xff]  }
 0x461   : > { %14224 = vmatpush3.bf16.msra.mxu1 %v3375_v14 }
 0x462   : > { %14273 = vmatprep.subr.bf16.mxu1 %v3635_v17  ;;  %v3903_v6 = vpop.permute.xlu0 %3902  ;;  %v3887_v8 = vpop.permute.xlu1 %3886  ;;  %v16344_v17 = vld [vmem:[%s21050_s4 + $0x1c4] ss:$8 sps:$4 sm:$0xff]  }
 0x464   : > { %3231 = vmatmul.mubr.bf16.gmra.mrb[112].mxu1 %v16298_v16 }
 0x465   : > { %3238 = vmatprep.mubr.bf16.mxu1 %v16299_v18 }
 0x466   : > { %v3905_v9 = vpop.permute.xlu0 %3904  ;;  %v3889_v18 = vpop.permute.xlu1 %3888 }
 0x46c   : > { %3239 = vmatmul.mubr.bf16.gmra.mrb[116].mxu1 %v16301_v19 }
 0x46d   : > { %3246 = vmatprep.mubr.bf16.mxu1 %v16302_v21 }
 0x474   : > { %3247 = vmatmul.mubr.bf16.gmra.mrb[120].mxu1 %v16304_v22  ;;  %v3907_v22 = vpop.permute.xlu0 %3906 }
 0x475   : > { %3254 = vmatprep.mubr.bf16.mxu1 %v16305_v23 }
 0x47c   : > { %3255 = vmatmul.mubr.bf16.gmra.mrb[124].mxu1 %v16307_v27  ;;  %v16346_v27 = vld [vmem:[%s21050_s4 + $0x1c0] ss:$8 sps:$4 sm:$0xff]  }
 0x47d   : > { %3440 = vmatprep.mubr.bf16.mxu1 %v16310_v28 }
 0x484   : > { %3441 = vmatmul.mubr.bf16.vlgmr.msra.gmra.mrb[128].mxu1 %v16308_v32 }
 0x485   : > { %14274 = vmatpush3.bf16.msra.mxu1 %v3619_v24  ;;  %3448 = vmatprep.mubr.bf16.mxu1 %v16311_v33  ;;  %v3891_v24 = vpop.permute.xlu1 %3890 }
 0x486   : > { %14275 = vmatprep.subr.bf16.mxu1 %v3637_v26 }
 0x489   : > { %14276 = vmatpush3.bf16.msra.mxu1 %v3621_v29 }
 0x48a   : > { %14277 = vmatprep.subr.bf16.mxu1 %v3639_v31  ;;  %v16347_v31 = vld [vmem:[%s21050_s4 + $0x1d4] ss:$8 sps:$4 sm:$0xff]  }
 0x48c   : > { %3449 = vmatmul.mubr.bf16.gmra.mrb[132].mxu1 %v16313_v38 }
 0x48d   : > { %14278 = vmatpush3.bf16.msra.mxu1 %v3623_v34  ;;  %3456 = vmatprep.mubr.bf16.mxu1 %v16314_v41  ;;  %v16350_v41 = vld [vmem:[%s21050_s4 + $0x1e4] ss:$8 sps:$4 sm:$0xff]  }
 0x48e   : > { %14279 = vmatprep.subr.bf16.mxu1 %v3641_v36 }
 0x491   : > { %14280 = vmatpush3.bf16.msra.mxu1 %v3625_v37  ;;  %v16349_v37 = vld [vmem:[%s21050_s4 + $0x1d0] ss:$8 sps:$4 sm:$0xff]  }
 0x492   : > { %14281 = vmatprep.subr.bf16.mxu1 %v3643_v39 }
 0x494   : > { %3457 = vmatmul.mubr.bf16.gmra.mrb[136].mxu1 %v16316_v44 }
 0x495   : > { %14282 = vmatpush3.bf16.msra.mxu1 %v3627_v42  ;;  %3464 = vmatprep.mubr.bf16.mxu1 %v16317_v46 }
 0x496   : > { %14283 = vmatprep.subr.bf16.mxu1 %v3645_v43 }
 0x499   : > { %14284 = vmatpush3.bf16.msra.mxu1 %v3629_v25  ;;  %v16352_v25 = vld [vmem:[%s21050_s4 + $0x1e0] ss:$8 sps:$4 sm:$0xff]  }
 0x49a   : > { %14285 = vmatprep.subr.bf16.mxu1 %v3647_v48 }
 0x49c   : > { %3465 = vmatmul.mubr.bf16.gmra.mrb[140].mxu1 %v16319_v53 }
 0x49d   : > { %14286 = vmatpush3.bf16.msra.mxu1 %v3631_v59  ;;  %3472 = vmatprep.mubr.bf16.mxu1 %v16320_v30  ;;  %v16353_v30 = vld [vmem:[%s21050_s4 + $0x1f4] ss:$8 sps:$4 sm:$0xff]  }
 0x49e   : > { %14287 = vmatprep.subr.bf16.mxu1 %v3649_v0 }
 0x4a1   : > { %14288 = vmatpush3.bf16.msra.mxu1 %v3633_v5 }
 0x4a2   : > { %14337 = vmatprep.subr.bf16.mxu1 %v3893_v10  ;;  %v16355_v10 = vld [vmem:[%s21050_s4 + $0x1f0] ss:$8 sps:$4 sm:$0xff]  }
 0x4a4   : > { %3473 = vmatmul.mubr.bf16.gmra.mrb[144].mxu1 %v16322_v35 }
 0x4a5   : > { %3480 = vmatprep.mubr.bf16.mxu1 %v16323_v15 }
 0x4ac   : > { %3481 = vmatmul.mubr.bf16.gmra.mrb[148].mxu1 %v16325_v40 }
 0x4ad   : > { %3488 = vmatprep.mubr.bf16.mxu1 %v16326_v20  ;;  %v16358_v20 = vld [vmem:[%s21050_s4 + $0x204] ss:$8 sps:$4 sm:$0xff]  }
 0x4b4   : > { %3489 = vmatmul.mubr.bf16.gmra.mrb[152].mxu1 %v16328_v45 }
 0x4b5   : > { %3496 = vmatprep.mubr.bf16.mxu1 %v16329_v47 }
 0x4bc   : > { %3497 = vmatmul.mubr.bf16.gmra.mrb[156].mxu1 %v16331_v50 }
 0x4bd   : > { %3698 = vmatprep.mubr.bf16.mxu1 %v16334_v52 }
 0x4c4   : > { %3699 = vmatmul.mubr.bf16.vlgmr.msra.gmra.mrb[160].mxu1 %v16332_v57 }
 0x4c5   : > { %14338 = vmatpush3.bf16.msra.mxu1 %v3877_v49  ;;  %3706 = vmatprep.mubr.bf16.mxu1 %v16335_v58 }
 0x4c6   : > { %14339 = vmatprep.subr.bf16.mxu1 %v3895_v51  ;;  %v16356_v51 = vld [vmem:[%s21050_s4 + $0x200] ss:$8 sps:$4 sm:$0xff]  }
 0x4c9   : > { %14340 = vmatpush3.bf16.msra.mxu1 %v3879_v55 }
 0x4ca   : > { %14341 = vmatprep.subr.bf16.mxu1 %v3897_v56  ;;  %v16359_v56 = vld [vmem:[%s21050_s4 + $0x214] ss:$8 sps:$4 sm:$0xff]  }
 0x4cc   : > { %3707 = vmatmul.mubr.bf16.gmra.mrb[164].mxu1 %v16337_v63 }
 0x4cd   : > { %14342 = vmatpush3.bf16.msra.mxu1 %v3881_v60  ;;  %3714 = vmatprep.mubr.bf16.mxu1 %v16338_v1 }
 0x4ce   : > { %14343 = vmatprep.subr.bf16.mxu1 %v3899_v61 }
 0x4d1   : > { %14344 = vmatpush3.bf16.msra.mxu1 %v3883_v62  ;;  %v16361_v62 = vld [vmem:[%s21050_s4 + $0x210] ss:$8 sps:$4 sm:$0xff]  }
 0x4d2   : > { %14345 = vmatprep.subr.bf16.mxu1 %v3901_v2  ;;  %v16362_v2 = vld [vmem:[%s21050_s4 + $0x224] ss:$8 sps:$4 sm:$0xff]  }
 0x4d4   : > { %3715 = vmatmul.mubr.bf16.gmra.mrb[168].mxu1 %v16340_v4 }
 0x4d5   : > { %14346 = vmatpush3.bf16.msra.mxu1 %v3885_v3  ;;  %3722 = vmatprep.mubr.bf16.mxu1 %v16341_v7 }
 0x4d6   : > { %14347 = vmatprep.subr.bf16.mxu1 %v3903_v6 }
 0x4d7   : > { %v14097_v11 = vpop.f32.mrb[64].mxu1 }
 0x4d8   : > { %v14098_v12 = vpop.f32.mrb[65].mxu1 }
 0x4d9   : > { %v18260_v14 = vadd.f32 %v14098_v12, %v14097_v11  ;;  %14348 = vmatpush3.bf16.msra.mxu1 %v3887_v8  ;;  %v14100_v16 = vpop.f32.mrb[66].mxu1  ;;  %v16364_v8 = vld [vmem:[%s21050_s4 + $0x220] ss:$8 sps:$4 sm:$0xff]   ;;  %v16365_v12 = vld [vmem:[%s21050_s4 + $0x234] ss:$8 sps:$4 sm:$0xff]  }
 0x4da   : > { %14349 = vmatprep.subr.bf16.mxu1 %v3905_v9  ;;  %v14101_v19 = vpop.f32.mrb[67].mxu1 }
 0x4db   : > { %v18265_v21 = vadd.f32 %v14101_v19, %v14100_v16  ;;  %v16367_v19 = vld [vmem:[%s21050_s4 + $0x230] ss:$8 sps:$4 sm:$0xff]  }
 0x4dc   : > { %3723 = vmatmul.mubr.bf16.gmra.mrb[172].mxu1 %v16343_v13 }
 0x4dd   : > { %14350 = vmatpush3.bf16.msra.mxu1 %v3889_v18  ;;  %3730 = vmatprep.mubr.bf16.mxu1 %v16344_v17 }
 0x4de   : > { %14351 = vmatprep.subr.bf16.mxu1 %v3907_v22 }
 0x4df   : > { %v14103_v23 = vpop.f32.mrb[68].mxu1 }
 0x4e0   : > { %v14104_v26 = vpop.f32.mrb[69].mxu1 }
 0x4e1   : > { %v18270_v28 = vadd.f32 %v14104_v26, %v14103_v23  ;;  %14352 = vmatpush3.bf16.msra.mxu1 %v3891_v24  ;;  %v14106_v29 = vpop.f32.mrb[70].mxu1  ;;  %v16368_v24 = vld [vmem:[%s21050_s4 + $0x244] ss:$8 sps:$4 sm:$0xff]  }
 0x4e2   : > { %v14107_v32 = vpop.f32.mrb[71].mxu1 }
 0x4e3   : > { %v18275_v33 = vadd.f32 %v14107_v32, %v14106_v29 }
 0x4e4   : > { %3731 = vmatmul.mubr.bf16.gmra.mrb[176].mxu1 %v16346_v27 }
 0x4e5   : > { %3738 = vmatprep.mubr.bf16.mxu1 %v16347_v31 }
 0x4e7   : > { %v14109_v34 = vpop.f32.mrb[72].mxu1 }
 0x4e8   : > { %v14110_v36 = vpop.f32.mrb[73].mxu1 }
 0x4e9   : > { %v18280_v38 = vadd.f32 %v14110_v36, %v14109_v34  ;;  %v14112_v39 = vpop.f32.mrb[74].mxu1  ;;  %v16370_v36 = vld [vmem:[%s21050_s4 + $0x240] ss:$8 sps:$4 sm:$0xff]  }
 0x4ea   : > { %v14113_v42 = vpop.f32.mrb[75].mxu1 }
 0x4eb   : > { %v18285_v43 = vadd.f32 %v14113_v42, %v14112_v39 }
 0x4ec   : > { %3739 = vmatmul.mubr.bf16.gmra.mrb[180].mxu1 %v16349_v37 }
 0x4ed   : > { %3746 = vmatprep.mubr.bf16.mxu1 %v16350_v41  ;;  %v16371_v41 = vld [vmem:[%s21050_s4 + $0x254] ss:$8 sps:$4 sm:$0xff]  }
 0x4ef   : > { %v14115_v44 = vpop.f32.mrb[76].mxu1 }
 0x4f0   : > { %v14116_v46 = vpop.f32.mrb[77].mxu1 }
 0x4f1   : > { %v18290_v48 = vadd.f32 %v14116_v46, %v14115_v44  ;;  %v14118_v53 = vpop.f32.mrb[78].mxu1 }
 0x4f2   : > { %v14119_v59 = vpop.f32.mrb[79].mxu1 }
 0x4f3   : > { %v18295_v0 = vadd.f32 %v14119_v59, %v14118_v53  ;;  %v16373_v53 = vld [vmem:[%s21050_s4 + $0x250] ss:$8 sps:$4 sm:$0xff]  }
 0x4f4   : > { %3747 = vmatmul.mubr.bf16.gmra.mrb[184].mxu1 %v16352_v25 }
 0x4f5   : > { %3754 = vmatprep.mubr.bf16.mxu1 %v16353_v30 }
 0x4f7   : > { %v14121_v5 = vpop.f32.mrb[80].mxu1 }
 0x4f8   : > { %v14122_v35 = vpop.f32.mrb[81].mxu1 }
 0x4f9   : > { %v18300_v15 = vadd.f32 %v14122_v35, %v14121_v5  ;;  %v14124_v40 = vpop.f32.mrb[82].mxu1  ;;  %v16374_v5 = vld [vmem:[%s21050_s4 + $0x264] ss:$8 sps:$4 sm:$0xff]  }
 0x4fa   : > { %v14125_v45 = vpop.f32.mrb[83].mxu1 }
 0x4fb   : > { %v18305_v47 = vadd.f32 %v14125_v45, %v14124_v40  ;;  %v16376_v45 = vld [vmem:[%s21050_s4 + $0x260] ss:$8 sps:$4 sm:$0xff]  }
 0x4fc   : > { %3755 = vmatmul.mubr.bf16.gmra.mrb[188].mxu1 %v16355_v10 }
 0x4fd   : > { %3956 = vmatprep.mubr.bf16.mxu1 %v16358_v20 }
 0x4ff   : > { %v14127_v49 = vpop.f32.mrb[84].mxu1 }
 0x500   : > { %v14128_v50 = vpop.f32.mrb[85].mxu1 }
 0x501   : > { %v18310_v52 = vadd.f32 %v14128_v50, %v14127_v49  ;;  %v14130_v55 = vpop.f32.mrb[86].mxu1 }
 0x502   : > { %v14131_v57 = vpop.f32.mrb[87].mxu1 }
 0x503   : > { %v18315_v58 = vadd.f32 %v14131_v57, %v14130_v55 }
 0x504   : > { %3957 = vmatmul.mubr.bf16.vlgmr.msra.gmra.mrb[192].mxu1 %v16356_v51  ;;  %v16377_v51 = vld [vmem:[%s21050_s4 + $0x274] ss:$8 sps:$4 sm:$0xff]  }
 0x505   : > { %3964 = vmatprep.mubr.bf16.mxu1 %v16359_v56 }
 0x507   : > { %v14133_v60 = vpop.f32.mrb[88].mxu1 }
 0x508   : > { %v14134_v61 = vpop.f32.mrb[89].mxu1 }
 0x509   : > { %v18320_v63 = vadd.f32 %v14134_v61, %v14133_v60  ;;  %v14136_v1 = vpop.f32.mrb[90].mxu1  ;;  %v16379_v61 = vld [vmem:[%s21050_s4 + $0x270] ss:$8 sps:$4 sm:$0xff]  }
 0x50a   : > { %v14137_v3 = vpop.f32.mrb[91].mxu1 }
 0x50b   : > { %v18325_v4 = vadd.f32 %v14137_v3, %v14136_v1 }
 0x50c   : > { %3965 = vmatmul.mubr.bf16.gmra.mrb[196].mxu1 %v16361_v62 }
 0x50d   : > { %3972 = vmatprep.mubr.bf16.mxu1 %v16362_v2 }
 0x50f   : > { %v14139_v6 = vpop.f32.mrb[92].mxu1 }
 0x510   : > { %v14140_v7 = vpop.f32.mrb[93].mxu1 }
 0x511   : > { %v18330_v9 = vadd.f32 %v14140_v7, %v14139_v6  ;;  %v14142_v11 = vpop.f32.mrb[94].mxu1 }
 0x512   : > { %v14143_v13 = vpop.f32.mrb[95].mxu1 }
 0x513   : > { %v18335_v16 = vadd.f32 %v14143_v13, %v14142_v11 }
 0x514   : > { %3973 = vmatmul.mubr.bf16.gmra.mrb[200].mxu1 %v16364_v8 }
 0x515   : > { %3980 = vmatprep.mubr.bf16.mxu1 %v16365_v12 }
 0x517   : > { %v14161_v17 = vpop.f32.mrb[96].mxu1 }
 0x518   : > { %v14162_v18 = vpop.f32.mrb[97].mxu1 }
 0x519   : > { %v14163_v22 = vadd.f32 %v14162_v18, %v14161_v17  ;;  %v14164_v23 = vpop.f32.mrb[98].mxu1 }
 0x51a   : > { %v14165_v26 = vpop.f32.mrb[99].mxu1 }
 0x51b   : > { %v18344_v27 = vadd.f32 %v14163_v22, %v18260_v14  ;;  %v14166_v29 = vadd.f32 %v14165_v26, %v14164_v23 }
 0x51c   : > { %3981 = vmatmul.mubr.bf16.gmra.mrb[204].mxu1 %v16367_v19 }
 0x51d   : > { %v18347_v31 = vadd.f32 %v14166_v29, %v18265_v21  ;;  %3988 = vmatprep.mubr.bf16.mxu1 %v16368_v24  ;;  %v16380_v29 = vld [vmem:[%s21052_s6] sm:$0xff]  }
 0x51e   : > { %15203 = vmatprep.subr.bf16.mxu0 %v16380_v29 }
 0x51f   : > { %v14167_v32 = vpop.f32.mrb[100].mxu1  ;;  %15204 = vmatpush3.bf16.msra.mxu0 %v16380_v29 }
 0x520   : > { %v14168_v34 = vpop.f32.mrb[101].mxu1 }
 0x521   : > { %v14169_v37 = vadd.f32 %v14168_v34, %v14167_v32  ;;  %v14170_v39 = vpop.f32.mrb[102].mxu1  ;;  %v16381_v34 = vld [vmem:[%s21052_s6 + $0x8] sm:$0xff]  }
 0x522   : > { %v14171_v14 = vpop.f32.mrb[103].mxu1  ;;  %15205 = vmatprep.subr.bf16.mxu0 %v16381_v34 }
 0x523   : > { %v18356_v42 = vadd.f32 %v14169_v37, %v18270_v28  ;;  %v14172_v44 = vadd.f32 %v14171_v14, %v14170_v39  ;;  %15206 = vmatpush3.bf16.msra.mxu0 %v16381_v34 }
 0x524   : > { %3989 = vmatmul.mubr.bf16.gmra.mrb[208].mxu1 %v16370_v36 }
 0x525   : > { %v18359_v21 = vadd.f32 %v14172_v44, %v18275_v33  ;;  %3996 = vmatprep.mubr.bf16.mxu1 %v16371_v41 }
 0x527   : > { %v14173_v46 = vpop.f32.mrb[104].mxu1 }
 0x528   : > { %v14174_v25 = vpop.f32.mrb[105].mxu1 }
 0x529   : > { %v14175_v30 = vadd.f32 %v14174_v25, %v14173_v46  ;;  %v14176_v59 = vpop.f32.mrb[106].mxu1  ;;  %v16383_v25 = vld [vmem:[%s21052_s6 + $0x18] sm:$0xff]  }
 0x52a   : > { %v14177_v28 = vpop.f32.mrb[107].mxu1 }
 0x52b   : > { %v18368_v35 = vadd.f32 %v14175_v30, %v18280_v38  ;;  %v14178_v10 = vadd.f32 %v14177_v28, %v14176_v59 }
 0x52c   : > { %3997 = vmatmul.mubr.bf16.gmra.mrb[212].mxu1 %v16373_v53 }
 0x52d   : > { %v18371_v33 = vadd.f32 %v14178_v10, %v18285_v43  ;;  %4004 = vmatprep.mubr.bf16.mxu1 %v16374_v5 }
 0x52f   : > { %v14179_v40 = vpop.f32.mrb[108].mxu1 }
 0x530   : > { %v14180_v20 = vpop.f32.mrb[109].mxu1 }
 0x531   : > { %v14181_v49 = vadd.f32 %v14180_v20, %v14179_v40  ;;  %v14182_v50 = vpop.f32.mrb[110].mxu1  ;;  %v16385_v20 = vld [vmem:[%s21052_s6 + $0x28] sm:$0xff]  }
 0x532   : > { %v14183_v38 = vpop.f32.mrb[111].mxu1 }
 0x533   : > { %v18380_v55 = vadd.f32 %v14181_v49, %v18290_v48  ;;  %v14184_v56 = vadd.f32 %v14183_v38, %v14182_v50 }
 0x534   : > { %4005 = vmatmul.mubr.bf16.gmra.mrb[216].mxu1 %v16376_v45 }
 0x535   : > { %v18383_v43 = vadd.f32 %v14184_v56, %v18295_v0  ;;  %4012 = vmatprep.mubr.bf16.mxu1 %v16377_v51 }
 0x537   : > { %v14185_v57 = vpop.f32.mrb[112].mxu1 }
 0x538   : > { %v14186_v60 = vpop.f32.mrb[113].mxu1 }
 0x539   : > { %v14187_v62 = vadd.f32 %v14186_v60, %v14185_v57  ;;  %v14188_v1 = vpop.f32.mrb[114].mxu1  ;;  %v16387_v60 = vld [vmem:[%s21052_s6 + $0x38] sm:$0x3f]  }
 0x53a   : > { %v14189_v2 = vpop.f32.mrb[115].mxu1 }
 0x53b   : > { %v18389_v3 = vadd.f32 %v14187_v62, %v18300_v15  ;;  %v14190_v48 = vadd.f32 %v14189_v2, %v14188_v1  ;;  %v4262_v1 = vsel %vm1800_vm0, %v16387_v60, 0 }
 0x53c   : > { %4013 = vmatmul.mubr.bf16.gmra.mrb[220].mxu1 %v16379_v61 }
 0x53d   : > { %v18392_v6 = vadd.f32 %v14190_v48, %v18305_v47 }
 0x53f   : > { %v14191_v0 = vpop.f32.mrb[116].mxu1 }
 0x540   : > { %v14192_v7 = vpop.f32.mrb[117].mxu1 }
 0x541   : > { %v14193_v8 = vadd.f32 %v14192_v7, %v14191_v0  ;;  %v14194_v11 = vpop.f32.mrb[118].mxu1 }
 0x542   : > { %v14195_v12 = vpop.f32.mrb[119].mxu1 }
 0x543   : > { %v18395_v13 = vadd.f32 %v14193_v8, %v18310_v52  ;;  %v14196_v17 = vadd.f32 %v14195_v12, %v14194_v11 }
 0x545   : > { %v18398_v18 = vadd.f32 %v14196_v17, %v18315_v58 }
 0x547   : > { %v14197_v19 = vpop.f32.mrb[120].mxu1 }
 0x548   : > { %v14198_v15 = vpop.f32.mrb[121].mxu1 }
 0x549   : > { %v14199_v22 = vadd.f32 %v14198_v15, %v14197_v19  ;;  %v14200_v23 = vpop.f32.mrb[122].mxu1 }
 0x54a   : > { %v14201_v24 = vpop.f32.mrb[123].mxu1 }
 0x54b   : > { %v18401_v47 = vadd.f32 %v14199_v22, %v18320_v63  ;;  %v14202_v26 = vadd.f32 %v14201_v24, %v14200_v23 }
 0x54d   : > { %v18407_v52 = vadd.f32 %v14202_v26, %v18325_v4  ;;  %v16382_v4 = vld [vmem:[%s21052_s6 + $0x10] sm:$0xff]  }
 0x54e   : > { %15207 = vmatprep.subr.bf16.mxu0 %v16382_v4 }
 0x54f   : > { %v14203_v58 = vpop.f32.mrb[124].mxu1  ;;  %15208 = vmatpush3.bf16.msra.mxu0 %v16382_v4 }
 0x550   : > { %v14204_v32 = vpop.f32.mrb[125].mxu1  ;;  %15209 = vmatprep.subr.bf16.mxu0 %v16383_v25 }
 0x551   : > { %v14205_v36 = vadd.f32 %v14204_v32, %v14203_v58  ;;  %v14206_v37 = vpop.f32.mrb[126].mxu1 }
 0x552   : > { %v14207_v63 = vpop.f32.mrb[127].mxu1 }
 0x553   : > { %v18413_v39 = vadd.f32 %v14205_v36, %v18330_v9  ;;  %v14208_v41 = vadd.f32 %v14207_v63, %v14206_v37  ;;  %15210 = vmatpush3.bf16.msra.mxu0 %v16383_v25 }
 0x555   : > { %v18419_v14 = vadd.f32 %v14208_v41, %v18335_v16  ;;  %v16384_v16 = vld [vmem:[%s21052_s6 + $0x20] sm:$0xff]  }
 0x556   : > { %15211 = vmatprep.subr.bf16.mxu0 %v16384_v16 }
 0x557   : > { %v14225_v44 = vpop.f32.mrb[128].mxu1  ;;  %15212 = vmatpush3.bf16.msra.mxu0 %v16384_v16 }
 0x558   : > { %v14226_v46 = vpop.f32.mrb[129].mxu1  ;;  %15213 = vmatprep.subr.bf16.mxu0 %v16385_v20 }
 0x559   : > { %v14227_v53 = vadd.f32 %v14226_v46, %v14225_v44  ;;  %v14228_v9 = vpop.f32.mrb[130].mxu1 }
 0x55a   : > { %v14229_v30 = vpop.f32.mrb[131].mxu1 }
 0x55b   : > { %v18425_v59 = vadd.f32 %v14227_v53, %v18344_v27  ;;  %v14230_v5 = vadd.f32 %v14229_v30, %v14228_v9  ;;  %15214 = vmatpush3.bf16.msra.mxu0 %v16385_v20 }
 0x55d   : > { %v18431_v28 = vadd.f32 %v14230_v5, %v18347_v31  ;;  %v16386_v31 = vld [vmem:[%s21052_s6 + $0x30] sm:$0xff]  }
 0x55e   : > { %15215 = vmatprep.subr.bf16.mxu0 %v16386_v31 }
 0x55f   : > { %v14231_v10 = vpop.f32.mrb[132].mxu1  ;;  %15216 = vmatpush3.bf16.msra.mxu0 %v16386_v31 }
 0x560   : > { %v14232_v40 = vpop.f32.mrb[133].mxu1  ;;  %15883 = vmatprep.subr.msk.bf16.mxu0 %vm1800_vm0, %v16387_v60 }
 0x561   : > { %v14233_v45 = vadd.f32 %v14232_v40, %v14231_v10  ;;  %v14234_v27 = vpop.f32.mrb[134].mxu1 }
 0x562   : > { %v14235_v49 = vpop.f32.mrb[135].mxu1 }
 0x563   : > { %v18437_v50 = vadd.f32 %v14233_v45, %v18356_v42  ;;  %v14236_v51 = vadd.f32 %v14235_v49, %v14234_v27  ;;  %15218 = vmatpush3.bf16.msra.mxu0 %v4262_v1 }
 0x565   : > { %v18443_v38 = vadd.f32 %v14236_v51, %v18359_v21 }
 0x567   : > { %v14237_v56 = vpop.f32.mrb[136].mxu1 }
 0x568   : > { %v14238_v57 = vpop.f32.mrb[137].mxu1 }
 0x569   : > { %v14239_v61 = vadd.f32 %v14238_v57, %v14237_v56  ;;  %v14240_v42 = vpop.f32.mrb[138].mxu1 }
 0x56a   : > { %v14241_v62 = vpop.f32.mrb[139].mxu1 }
 0x56b   : > { %v18451_v2 = vadd.f32 %v14239_v61, %v18368_v35  ;;  %v14242_v21 = vadd.f32 %v14241_v62, %v14240_v42 }
 0x56d   : > { %v18454_v48 = vadd.f32 %v14242_v21, %v18371_v33 }
 0x56f   : > { %v14243_v0 = vpop.f32.mrb[140].mxu1 }
 0x570   : > { %v14244_v7 = vpop.f32.mrb[141].mxu1 }
 0x571   : > { %v14245_v8 = vadd.f32 %v14244_v7, %v14243_v0  ;;  %v14246_v11 = vpop.f32.mrb[142].mxu1 }
 0x572   : > { %v14247_v12 = vpop.f32.mrb[143].mxu1 }
 0x573   : > { %v18457_v17 = vadd.f32 %v14245_v8, %v18380_v55  ;;  %v14248_v19 = vadd.f32 %v14247_v12, %v14246_v11 }
 0x575   : > { %v18460_v15 = vadd.f32 %v14248_v19, %v18383_v43 }
 0x577   : > { %v14249_v22 = vpop.f32.mrb[144].mxu1 }
 0x578   : > { %v14250_v35 = vpop.f32.mrb[145].mxu1 }
 0x579   : > { %v14251_v23 = vadd.f32 %v14250_v35, %v14249_v22  ;;  %v14252_v24 = vpop.f32.mrb[146].mxu1 }
 0x57a   : > { %v14253_v26 = vpop.f32.mrb[147].mxu1 }
 0x57b   : > { %v18463_v33 = vadd.f32 %v14251_v23, %v18389_v3  ;;  %v14254_v29 = vadd.f32 %v14253_v26, %v14252_v24 }
 0x57d   : > { %v18466_v58 = vadd.f32 %v14254_v29, %v18392_v6 }
 0x57f   : > { %v14255_v32 = vpop.f32.mrb[148].mxu1 }
 0x580   : > { %v14256_v34 = vpop.f32.mrb[149].mxu1 }
 0x581   : > { %v14257_v55 = vadd.f32 %v14256_v34, %v14255_v32  ;;  %v14258_v36 = vpop.f32.mrb[150].mxu1 }
 0x582   : > { %v14259_v37 = vpop.f32.mrb[151].mxu1 }
 0x583   : > { %v18469_v43 = vadd.f32 %v14257_v55, %v18395_v13  ;;  %v14260_v63 = vadd.f32 %v14259_v37, %v14258_v36 }
 0x585   : > { %v18472_v41 = vadd.f32 %v14260_v63, %v18398_v18 }
 0x587   : > { %v14261_v4 = vpop.f32.mrb[152].mxu1 }
 0x588   : > { %v14262_v44 = vpop.f32.mrb[153].mxu1 }
 0x589   : > { %v14263_v3 = vadd.f32 %v14262_v44, %v14261_v4  ;;  %v14264_v46 = vpop.f32.mrb[154].mxu1 }
 0x58a   : > { %v14265_v25 = vpop.f32.mrb[155].mxu1 }
 0x58b   : > { %v18475_v6 = vadd.f32 %v14263_v3, %v18401_v47  ;;  %v14266_v53 = vadd.f32 %v14265_v25, %v14264_v46 }
 0x58d   : > { %v18478_v9 = vadd.f32 %v14266_v53, %v18407_v52 }
 0x58f   : > { %v14267_v30 = vpop.f32.mrb[156].mxu1 }
 0x590   : > { %v14268_v5 = vpop.f32.mrb[157].mxu1 }
 0x591   : > { %v14269_v13 = vadd.f32 %v14268_v5, %v14267_v30  ;;  %v14270_v16 = vpop.f32.mrb[158].mxu1 }
 0x592   : > { %v14271_v10 = vpop.f32.mrb[159].mxu1 }
 0x593   : > { %v18481_v18 = vadd.f32 %v14269_v13, %v18413_v39  ;;  %v14272_v40 = vadd.f32 %v14271_v10, %v14270_v16 }
 0x595   : > { %v18484_v20 = vadd.f32 %v14272_v40, %v18419_v14 }
 0x597   : > { %v14289_v45 = vpop.f32.mrb[160].mxu1 }
 0x598   : > { %v14290_v27 = vpop.f32.mrb[161].mxu1 }
 0x599   : > { %v14291_v47 = vadd.f32 %v14290_v27, %v14289_v45  ;;  %v14292_v49 = vpop.f32.mrb[162].mxu1 }
 0x59a   : > { %v14293_v51 = vpop.f32.mrb[163].mxu1 }
 0x59b   : > { %v18487_v52 = vadd.f32 %v14291_v47, %v18425_v59  ;;  %v14294_v31 = vadd.f32 %v14293_v51, %v14292_v49 }
 0x59d   : > { %v18490_v56 = vadd.f32 %v14294_v31, %v18431_v28 }
 0x59f   : > { %v14295_v57 = vpop.f32.mrb[164].mxu1 }
 0x5a0   : > { %v14296_v60 = vpop.f32.mrb[165].mxu1 }
 0x5a1   : > { %v14297_v39 = vadd.f32 %v14296_v60, %v14295_v57  ;;  %v14298_v61 = vpop.f32.mrb[166].mxu1 }
 0x5a2   : > { %v14299_v42 = vpop.f32.mrb[167].mxu1 }
 0x5a3   : > { %v18493_v14 = vadd.f32 %v14297_v39, %v18437_v50  ;;  %v14300_v62 = vadd.f32 %v14299_v42, %v14298_v61  ;;  %v4056_v42 = vpop.permute.xlu0 %4055 }
 0x5a5   : > { %v18496_v1 = vadd.f32 %v14300_v62, %v18443_v38 }
 0x5a7   : > { %v14301_v21 = vpop.f32.mrb[168].mxu1 }
 0x5a8   : > { %v14302_v0 = vpop.f32.mrb[169].mxu1 }
 0x5a9   : > { %v14303_v59 = vadd.f32 %v14302_v0, %v14301_v21  ;;  %v14304_v7 = vpop.f32.mrb[170].mxu1  ;;  %v4061_v0 = vpop.permute.xlu1 %4060 }
 0x5aa   : > { %v14305_v8 = vpop.f32.mrb[171].mxu1 }
 0x5ab   : > { %v18499_v28 = vadd.f32 %v14303_v59, %v18451_v2  ;;  %v14306_v11 = vadd.f32 %v14305_v8, %v14304_v7 }
 0x5ad   : > { %v18502_v12 = vadd.f32 %v14306_v11, %v18454_v48 }
 0x5af   : > { %v14307_v19 = vpop.f32.mrb[172].mxu1 }
 0x5b0   : > { %v14308_v22 = vpop.f32.mrb[173].mxu1 }
 0x5b1   : > { %v14309_v50 = vadd.f32 %v14308_v22, %v14307_v19  ;;  %v14310_v35 = vpop.f32.mrb[174].mxu1 }
 0x5b2   : > { %v14311_v23 = vpop.f32.mrb[175].mxu1 }
 0x5b3   : > { %v18505_v38 = vadd.f32 %v14309_v50, %v18457_v17  ;;  %v14312_v24 = vadd.f32 %v14311_v23, %v14310_v35 }
 0x5b5   : > { %v18508_v26 = vadd.f32 %v14312_v24, %v18460_v15 }
 0x5b7   : > { %v14313_v29 = vpop.f32.mrb[176].mxu1 }
 0x5b8   : > { %v14314_v32 = vpop.f32.mrb[177].mxu1 }
 0x5b9   : > { %v14315_v2 = vadd.f32 %v14314_v32, %v14313_v29  ;;  %v14316_v34 = vpop.f32.mrb[178].mxu1 }
 0x5ba   : > { %v14317_v55 = vpop.f32.mrb[179].mxu1 }
 0x5bb   : > { %v18511_v48 = vadd.f32 %v14315_v2, %v18463_v33  ;;  %v14318_v36 = vadd.f32 %v14317_v55, %v14316_v34 }
 0x5bd   : > { %v18514_v37 = vadd.f32 %v14318_v36, %v18466_v58 }
 0x5bf   : > { %v14319_v63 = vpop.f32.mrb[180].mxu1 }
 0x5c0   : > { %v14320_v4 = vpop.f32.mrb[181].mxu1 }
 0x5c1   : > { %v14321_v17 = vadd.f32 %v14320_v4, %v14319_v63  ;;  %v14322_v44 = vpop.f32.mrb[182].mxu1 }
 0x5c2   : > { %v14323_v3 = vpop.f32.mrb[183].mxu1 }
 0x5c3   : > { %v18517_v15 = vadd.f32 %v14321_v17, %v18469_v43  ;;  %v14324_v46 = vadd.f32 %v14323_v3, %v14322_v44 }
 0x5c5   : > { %v18520_v25 = vadd.f32 %v14324_v46, %v18472_v41 }
 0x5c7   : > { %v14325_v53 = vpop.f32.mrb[184].mxu1 }
 0x5c8   : > { %v14326_v30 = vpop.f32.mrb[185].mxu1 }
 0x5c9   : > { %v14327_v33 = vadd.f32 %v14326_v30, %v14325_v53  ;;  %v14328_v5 = vpop.f32.mrb[186].mxu1 }
 0x5ca   : > { %v14329_v13 = vpop.f32.mrb[187].mxu1 }
 0x5cb   : > { %v18523_v58 = vadd.f32 %v14327_v33, %v18475_v6  ;;  %v14330_v16 = vadd.f32 %v14329_v13, %v14328_v5 }
 0x5cd   : > { %v18526_v10 = vadd.f32 %v14330_v16, %v18478_v9 }
 0x5cf   : > { %v14331_v40 = vpop.f32.mrb[188].mxu1 }
 0x5d0   : > { %v14332_v45 = vpop.f32.mrb[189].mxu1 }
 0x5d1   : > { %v14333_v43 = vadd.f32 %v14332_v45, %v14331_v40  ;;  %v14334_v27 = vpop.f32.mrb[190].mxu1 }
 0x5d2   : > { %v14335_v47 = vpop.f32.mrb[191].mxu1 }
 0x5d3   : > { %v18529_v41 = vadd.f32 %v14333_v43, %v18481_v18  ;;  %v14336_v49 = vadd.f32 %v14335_v47, %v14334_v27 }
 0x5d5   : > { %v18532_v51 = vadd.f32 %v14336_v49, %v18484_v20 }
 0x5d7   : > { %v14353_v31 = vpop.f32.mrb[192].mxu1 }
 0x5d8   : > { %v14354_v57 = vpop.f32.mrb[193].mxu1 }
 0x5d9   : > { %v14355_v6 = vadd.f32 %v14354_v57, %v14353_v31  ;;  %v14356_v60 = vpop.f32.mrb[194].mxu1 }
 0x5da   : > { %v14357_v39 = vpop.f32.mrb[195].mxu1 }
 0x5db   : > { %v4021_v9 = vadd.f32 %v14355_v6, %v18487_v52  ;;  %v14358_v61 = vadd.f32 %v14357_v39, %v14356_v60  ;;  %v4066_v52 = vpop.permute.xlu0 %4065 }
 0x5dd   : > { %v4133_v62 = vadd.f32 %v4056_v42, %v4021_v9  ;;  %v4022_v21 = vadd.f32 %v14358_v61, %v18490_v56  ;;  %v4071_v56 = vpop.permute.xlu1 %4070 }
 0x5df   : > { %v4134_v59 = vadd.f32 %v4061_v0, %v4022_v21  ;;  %v14359_v18 = vpop.f32.mrb[196].mxu1  ;;  %v4149_v8 = vmax.f32 %v4133_v62, 0.0  ;;  %v4076_v46 = vpop.permute.xlu0 %4075 }
 0x5e0   : > { %v14360_v7 = vpop.f32.mrb[197].mxu1 }
 0x5e1   : > { %v4150_v11 = vmax.f32 %v4134_v59, 0.0  ;;  %v14361_v20 = vadd.f32 %v14360_v7, %v14359_v18  ;;  %v14362_v19 = vpop.f32.mrb[198].mxu1 }
 0x5e2   : > { %v14363_v22 = vpop.f32.mrb[199].mxu1 }
 0x5e3   : > { %v4023_v50 = vadd.f32 %v14361_v20, %v18493_v14  ;;  %v14364_v35 = vadd.f32 %v14363_v22, %v14362_v19  ;;  %v4165_v23 = vpack.c.bf16 %v4150_v11, %v4149_v8  ;;  %v4086_v31 = vpop.permute.xlu0 %4085 }
 0x5e5   : > { %v4135_v24 = vadd.f32 %v4066_v52, %v4023_v50  ;;  %v4024_v29 = vadd.f32 %v14364_v35, %v18496_v1  ;;  %15219 = vmatprep.mubr.msk.bf16.mxu0 %vm4236_vm4, %v4165_v23  ;;  %v4081_v1 = vpop.permute.xlu1 %4080 }
 0x5e7   : > { %v4136_v32 = vadd.f32 %v4071_v56, %v4024_v29  ;;  %v14365_v2 = vpop.f32.mrb[200].mxu1  ;;  %v4151_v55 = vmax.f32 %v4135_v24, 0.0  ;;  %v4096_v7 = vpop.permute.xlu0 %4095 }
 0x5e8   : > { %v14366_v34 = vpop.f32.mrb[201].mxu1 }
 0x5e9   : > { %v4152_v36 = vmax.f32 %v4136_v32, 0.0  ;;  %v14367_v63 = vadd.f32 %v14366_v34, %v14365_v2  ;;  %v14368_v4 = vpop.f32.mrb[202].mxu1 }
 0x5ea   : > { %v14369_v17 = vpop.f32.mrb[203].mxu1 }
 0x5eb   : > { %v4166_v44 = vpack.c.bf16 %v4152_v36, %v4151_v55  ;;  %v4025_v14 = vadd.f32 %v14367_v63, %v18499_v28  ;;  %v14370_v3 = vadd.f32 %v14369_v17, %v14368_v4  ;;  %v4106_v32 = vpop.permute.xlu0 %4105 }
 0x5ed   : > { %v4137_v53 = vadd.f32 %v4076_v46, %v4025_v14  ;;  %v4026_v30 = vadd.f32 %v14370_v3, %v18502_v12  ;;  %15220 = vmatmul.mubr.msk.bf16.vlgmr.msra.gmra.mrb[64].mxu0 %vm4236_vm4, %v4166_v44  ;;  %v4091_v12 = vpop.permute.xlu1 %4090 }
 0x5ef   : > { %v4138_v33 = vadd.f32 %v4081_v1, %v4026_v30  ;;  %v14371_v5 = vpop.f32.mrb[204].mxu1  ;;  %v4153_v16 = vmax.f32 %v4137_v53, 0.0  ;;  %v4116_v30 = vpop.permute.xlu0 %4115 }
 0x5f0   : > { %v14372_v13 = vpop.f32.mrb[205].mxu1 }
 0x5f1   : > { %v4154_v40 = vmax.f32 %v4138_v33, 0.0  ;;  %v14373_v45 = vadd.f32 %v14372_v13, %v14371_v5  ;;  %v14374_v43 = vpop.f32.mrb[206].mxu1 }
 0x5f2   : > { %v14375_v27 = vpop.f32.mrb[207].mxu1 }
 0x5f3   : > { %v4027_v47 = vadd.f32 %v14373_v45, %v18505_v38  ;;  %v14376_v49 = vadd.f32 %v14375_v27, %v14374_v43  ;;  %v4167_v28 = vpack.c.bf16 %v4154_v40, %v4153_v16 }
 0x5f5   : > { %v4139_v57 = vadd.f32 %v4086_v31, %v4027_v47  ;;  %v4028_v6 = vadd.f32 %v14376_v49, %v18508_v26  ;;  %15223 = vmatprep.mubr.msk.bf16.mxu0 %vm4236_vm4, %v4167_v28  ;;  %v4101_v26 = vpop.permute.xlu1 %4100  ;;  %v4126_v31 = vpop.permute.xlu0 %4125 }
 0x5f7   : > { %v4140_v60 = vadd.f32 %v4091_v12, %v4028_v6  ;;  %v14377_v39 = vpop.f32.mrb[208].mxu1  ;;  %v4155_v61 = vmax.f32 %v4139_v57, 0.0 }
 0x5f8   : > { %v14378_v9 = vpop.f32.mrb[209].mxu1 }
 0x5f9   : > { %v4156_v42 = vmax.f32 %v4140_v60, 0.0  ;;  %v14379_v62 = vadd.f32 %v14378_v9, %v14377_v39  ;;  %v14380_v21 = vpop.f32.mrb[210].mxu1 }
 0x5fa   : > { %v14381_v0 = vpop.f32.mrb[211].mxu1 }
 0x5fb   : > { %v4029_v59 = vadd.f32 %v14379_v62, %v18511_v48  ;;  %v14382_v38 = vadd.f32 %v14381_v0, %v14380_v21  ;;  %v4168_v18 = vpack.c.bf16 %v4156_v42, %v4155_v61 }
 0x5fd   : > { %v4141_v8 = vadd.f32 %v4096_v7, %v4029_v59  ;;  %v4030_v11 = vadd.f32 %v14382_v38, %v18514_v37  ;;  %15224 = vmatmul.mubr.msk.bf16.gmra.mrb[68].mxu0 %vm4236_vm4, %v4168_v18  ;;  %v4111_v37 = vpop.permute.xlu1 %4110 }
 0x5ff   : > { %v4142_v20 = vadd.f32 %v4101_v26, %v4030_v11  ;;  %v14383_v19 = vpop.f32.mrb[212].mxu1  ;;  %v4157_v50 = vmax.f32 %v4141_v8, 0.0 }
 0x600   : > { %v14384_v22 = vpop.f32.mrb[213].mxu1 }
 0x601   : > { %v4158_v35 = vmax.f32 %v4142_v20, 0.0  ;;  %v14385_v23 = vadd.f32 %v14384_v22, %v14383_v19  ;;  %v14386_v52 = vpop.f32.mrb[214].mxu1 }
 0x602   : > { %v14387_v24 = vpop.f32.mrb[215].mxu1 }
 0x603   : > { %v4031_v29 = vadd.f32 %v14385_v23, %v18517_v15  ;;  %v14388_v48 = vadd.f32 %v14387_v24, %v14386_v52  ;;  %v4169_v56 = vpack.c.bf16 %v4158_v35, %v4157_v50  ;;  %v16388_v23 = vld [vmem:[%s21053_s7 + $0x20] sm:$0xff]  }
 0x605   : > { %v4143_v2 = vadd.f32 %v4106_v32, %v4031_v29  ;;  %v4032_v34 = vadd.f32 %v14388_v48, %v18520_v25  ;;  %15227 = vmatprep.mubr.msk.bf16.mxu0 %vm4236_vm4, %v4169_v56  ;;  %v4121_v25 = vpop.permute.xlu1 %4120  ;;  %v4727_v32 = vld [vmem:[%s21054_s8 + $0x8] sm:$0xff] }
 0x607   : > { %v4144_v55 = vadd.f32 %v4111_v37, %v4032_v34  ;;  %v14389_v36 = vpop.f32.mrb[216].mxu1  ;;  %v4159_v4 = vmax.f32 %v4143_v2, 0.0  ;;  %v4726_v2 = vld [vmem:[%s21054_s8] sm:$0xff]  ;;  %v4729_v34 = vld [vmem:[%s21054_s8 + $0x18] sm:$0xff]  ;;  %v4728_v37 = vld [vmem:[%s21054_s8 + $0x10] sm:$0xff] }
 0x608   : > { %v14390_v63 = vpop.f32.mrb[217].mxu1 }
 0x609   : > { %v4160_v17 = vmax.f32 %v4144_v55, 0.0  ;;  %v14391_v44 = vadd.f32 %v14390_v63, %v14389_v36  ;;  %v14392_v14 = vpop.f32.mrb[218].mxu1  ;;  %v4731_v55 = vld [vmem:[%s21054_s8 + $0x28] sm:$0xff]  ;;  %v4730_v36 = vld [vmem:[%s21054_s8 + $0x20] sm:$0xff]  ;;  %v4733_v63 = vld [vmem:[%s21054_s8 + $0x38] sm:$0xff] }
 0x60a   : > { %v14393_v3 = vpop.f32.mrb[219].mxu1 }
 0x60b   : > { %v4033_v46 = vadd.f32 %v14391_v44, %v18523_v58  ;;  %v14394_v15 = vadd.f32 %v14393_v3, %v14392_v14  ;;  %v4170_v53 = vpack.c.bf16 %v4160_v17, %v4159_v4  ;;  %v4732_v4 = vld [vmem:[%s21054_s8 + $0x30] sm:$0xff]  ;;  %v16400_v44 = vld [vmem:[%s21055_s9] sm:$0xff]   ;;  %v16401_v14 = vld [vmem:[%s21055_s9 + $0x8] sm:$0xff]  }
 0x60c   : > { %15307 = vmatprep.subr.bf16.mxu1 %v16400_v44 }
 0x60d   : > { %v4145_v1 = vadd.f32 %v4116_v30, %v4033_v46  ;;  %v4034_v33 = vadd.f32 %v14394_v15, %v18526_v10  ;;  %15228 = vmatmul.mubr.msk.bf16.gmra.mrb[72].mxu0 %vm4236_vm4, %v4170_v53  ;;  %v4131_v10 = vpop.permute.xlu1 %4130  ;;  %15308 = vmatpush3.bf16.msra.mxu1 %v16400_v44 }
 0x60e   : > { %15309 = vmatprep.subr.bf16.mxu1 %v16401_v14 }
 0x60f   : > { %v4146_v5 = vadd.f32 %v4121_v25, %v4034_v33  ;;  %v14395_v13 = vpop.f32.mrb[220].mxu1  ;;  %v4161_v40 = vmax.f32 %v4145_v1, 0.0  ;;  %v16389_v25 = vld [vmem:[%s21053_s7 + $0x28] sm:$0xff]  }
 0x610   : > { %v14396_v16 = vpop.f32.mrb[221].mxu1 }
 0x611   : > { %v4162_v45 = vmax.f32 %v4146_v5, 0.0  ;;  %v14397_v43 = vadd.f32 %v14396_v16, %v14395_v13  ;;  %v14398_v27 = vpop.f32.mrb[222].mxu1  ;;  %15310 = vmatpush3.bf16.msra.mxu1 %v16401_v14  ;;  %v16390_v5 = vld [vmem:[%s21053_s7 + $0x30] sm:$0xff]   ;;  %v16391_v13 = vld [vmem:[%s21053_s7 + $0x38] sm:$0xff]   ;;  %v16392_v16 = vld [vmem:[%s21053_s7] sm:$0xff]  }
 0x612   : > { %v14399_v47 = vpop.f32.mrb[223].mxu1 }
 0x613   : > { %v4035_v49 = vadd.f32 %v14397_v43, %v18529_v41  ;;  %v14400_v58 = vadd.f32 %v14399_v47, %v14398_v27  ;;  %v4171_v28 = vpack.c.bf16 %v4162_v45, %v4161_v40  ;;  %v16393_v40 = vld [vmem:[%s21053_s7 + $0x8] sm:$0xff]   ;;  %v16394_v43 = vld [vmem:[%s21053_s7 + $0x10] sm:$0xff]   ;;  %v16395_v47 = vld [vmem:[%s21053_s7 + $0x18] sm:$0xff]  }
 0x615   : > { %v4147_v57 = vadd.f32 %v4126_v31, %v4035_v49  ;;  %v4036_v6 = vadd.f32 %v14400_v58, %v18532_v51  ;;  %15231 = vmatprep.mubr.msk.bf16.mxu0 %vm4236_vm4, %v4171_v28  ;;  %v16396_v58 = vld [vmem:[%s21053_s7 + $0x40] sm:$0xff]  }
 0x617   : > { %v4148_v12 = vadd.f32 %v4131_v10, %v4036_v6  ;;  %v4163_v60 = vmax.f32 %v4147_v57, 0.0 }
 0x619   : > { %v4164_v39 = vmax.f32 %v4148_v12, 0.0  ;;  %v16397_v12 = vld [vmem:[%s21053_s7 + $0x48] sm:$0xff]  }
 0x61b   : > { %v4172_v9 = vpack.c.bf16 %v4164_v39, %v4163_v60  ;;  %v16398_v60 = vld [vmem:[%s21053_s7 + $0x50] sm:$0xff]   ;;  %v16399_v39 = vld [vmem:[%s21053_s7 + $0x58] sm:$0xff]  }
 0x61d   : > { %15232 = vmatmul.mubr.msk.bf16.gmra.mrb[76].mxu0 %vm4236_vm4, %v4172_v9  ;;  %v16402_v9 = vld [vmem:[%s21055_s9 + $0x10] sm:$0xff]  }
 0x61e   : > { %15251 = vmatprep.mubr.bf16.mxu0 %v16388_v23  ;;  %15311 = vmatprep.subr.bf16.mxu1 %v16402_v9 }
 0x61f   : > { %15312 = vmatpush3.bf16.msra.mxu1 %v16402_v9  ;;  %v16427_v9 = vld [vmem:[%s21056_s10 + $0x128] sm:$0xff]  }
 0x6c0   : > { %v15221_v61 = vpop.f32.mrb[64].mxu0 }
 0x6c1   : > { %v4298_v42 = vpop.f32.mrb[65].mxu0 }
 0x6c2   : > { %v15222_v62 = vpop.f32.mrb[66].mxu0 }
 0x6c3   : > { %v18558_v21 = vpack.c.bf16 %v15222_v62, %v15221_v61  ;;  %v4301_v41 = vpop.f32.mrb[67].mxu0  ;;  %v16403_v61 = vld [vmem:[%s21055_s9 + $0x18] sm:$0x7f]  }
 0x6c4   : > { %v18560_v0 = vpack.c.bf16 %v4301_v41, %v4298_v42  ;;  %15884 = vmatprep.subr.msk.bf16.mxu1 %vm4838_vm5, %v16403_v61  ;;  %v4840_v42 = vsel %vm4838_vm5, %v16403_v61, 0 }
 0x6c5   : > { %4420 = vrot.lane.b32.xlu1 %v18558_v21, %s21070_s27  ;;  %15314 = vmatpush3.bf16.msra.mxu1 %v4840_v42  ;;  %v16428_v42 = vld [vmem:[%s21056_s10 + $0x70] sm:$0xff]  }
 0x6c6   : > { %4418 = vrot.lane.b32.xlu0 %v18560_v0, %s21070_s27 }
 0x6d0   : > { %v15225_v51 = vpop.f32.mrb[68].mxu0 }
 0x6d1   : > { %v4314_v59 = vpop.f32.mrb[69].mxu0 }
 0x6d2   : > { %v15226_v38 = vpop.f32.mrb[70].mxu0 }
 0x6d3   : > { %v18566_v18 = vpack.c.bf16 %v15226_v38, %v15225_v51  ;;  %v4317_v7 = vpop.f32.mrb[71].mxu0 }
 0x6d4   : > { %v18568_v8 = vpack.c.bf16 %v4317_v7, %v4314_v59 }
 0x6d5   : > { %4424 = vrot.lane.b32.xlu1 %v18566_v18, %s21070_s27 }
 0x6d6   : > { %4422 = vrot.lane.b32.xlu0 %v18568_v8, %s21070_s27 }
 0x6e0   : > { %v15229_v11 = vpop.f32.mrb[72].mxu0 }
 0x6e1   : > { %v4330_v26 = vpop.f32.mrb[73].mxu0 }
 0x6e2   : > { %v15230_v20 = vpop.f32.mrb[74].mxu0 }
 0x6e3   : > { %v18574_v19 = vpack.c.bf16 %v15230_v20, %v15229_v11  ;;  %v4333_v22 = vpop.f32.mrb[75].mxu0 }
 0x6e4   : > { %v18576_v50 = vpack.c.bf16 %v4333_v22, %v4330_v26 }
 0x6e5   : > { %4428 = vrot.lane.b32.xlu1 %v18574_v19, %s21070_s27 }
 0x6e6   : > { %4426 = vrot.lane.b32.xlu0 %v18576_v50, %s21070_s27 }
 0x6f0   : > { %v15233_v35 = vpop.f32.mrb[76].mxu0 }
 0x6f1   : > { %v4346_v52 = vpop.f32.mrb[77].mxu0 }
 0x6f2   : > { %v15234_v24 = vpop.f32.mrb[78].mxu0 }
 0x6f3   : > { %v18585_v29 = vpack.c.bf16 %v15234_v24, %v15233_v35  ;;  %v4349_v48 = vpop.f32.mrb[79].mxu0 }
 0x6f4   : > { %v18587_v56 = vpack.c.bf16 %v4349_v48, %v4346_v52 }
 0x6f5   : > { %4432 = vrot.lane.b32.xlu1 %v18585_v29, %s21070_s27 }
 0x6f6   : > { %4430 = vrot.lane.b32.xlu0 %v18587_v56, %s21070_s27  ;;  %s21073_s27 = smov 32  }
 0x6f9   : > { %4631 = vrot.lane.b32.xlu1 %v18558_v21, %s21085_s19 }
 0x6fa   : > { %4629 = vrot.lane.b32.xlu0 %v18560_v0, %s21085_s19 }
 0x6fd   : > { %4635 = vrot.lane.b32.xlu1 %v18566_v18, %s21085_s19 }
 0x6fe   : > { %4633 = vrot.lane.b32.xlu0 %v18568_v8, %s21085_s19 }
 0x701   : > { %4639 = vrot.lane.b32.xlu1 %v18574_v19, %s21085_s19 }
 0x702   : > { %4637 = vrot.lane.b32.xlu0 %v18576_v50, %s21085_s19 }
 0x705   : > { %4643 = vrot.lane.b32.xlu1 %v18585_v29, %s21085_s19 }
 0x706   : > { %4641 = vrot.lane.b32.xlu0 %v18587_v56, %s21085_s19 }
 0x709   : > { %4741 = vperm.xlu1 %15940, %v4727_v32  }
 0x70a   : > { %4736 = vperm.xlu0 %15939, %v4726_v2  }
 0x70d   : > { %4751 = vperm.xlu1 %15940, %v4729_v34  }
 0x70e   : > { %4746 = vperm.xlu0 %15939, %v4728_v37  }
 0x711   : > { %4761 = vperm.xlu1 %15940, %v4731_v55  }
 0x712   : > { %4756 = vperm.xlu0 %15939, %v4730_v36  }
 0x715   : > { %4771 = vperm.xlu1 %15940, %v4733_v63  }
 0x716   : > { %4766 = vperm.xlu0 %15939, %v4732_v4  }
 0x737   : > { %v4421_v3 = vpop.permute.xlu1 %4420 }
 0x738   : > { %v4419_v17 = vpop.permute.xlu0 %4418 }
 0x739   : > { %15235 = vmatprep.subr.bf16.mxu0 %v4419_v17 }
 0x73a   : > { %15236 = vmatpush3.bf16.msra.mxu0 %v4419_v17 }
 0x73b   : > { %15237 = vmatprep.subr.bf16.mxu0 %v4421_v3 }
 0x73e   : > { %15238 = vmatpush3.bf16.msra.mxu0 %v4421_v3 }
 0x747   : > { %v4425_v15 = vpop.permute.xlu1 %4424 }
 0x748   : > { %v4423_v46 = vpop.permute.xlu0 %4422 }
 0x749   : > { %15239 = vmatprep.subr.bf16.mxu0 %v4423_v46 }
 0x74a   : > { %15240 = vmatpush3.bf16.msra.mxu0 %v4423_v46 }
 0x74b   : > { %15241 = vmatprep.subr.bf16.mxu0 %v4425_v15 }
 0x74e   : > { %15242 = vmatpush3.bf16.msra.mxu0 %v4425_v15  ;;  %v16404_v15 = vld [vmem:[%s21056_s10 + $0x40] sm:$0xff]  }
 0x74f   : > { %14461 = vmatprep.subr.bf16.mxu1 %v16404_v15  ;;  %v6618_v15 = vld [vmem:[%s21048_s2 + $0x88] sm:$0xff] }
 0x757   : > { %v4429_v30 = vpop.permute.xlu1 %4428 }
 0x758   : > { %v4427_v53 = vpop.permute.xlu0 %4426 }
 0x759   : > { %15243 = vmatprep.subr.bf16.mxu0 %v4427_v53 }
 0x75a   : > { %15244 = vmatpush3.bf16.msra.mxu0 %v4427_v53  ;;  %v16405_v53 = vld [vmem:[%s21056_s10] sm:$0xff]  }
 0x75b   : > { %15245 = vmatprep.subr.bf16.mxu0 %v4429_v30 }
 0x75e   : > { %15246 = vmatpush3.bf16.msra.mxu0 %v4429_v30  ;;  %v16406_v30 = vld [vmem:[%s21056_s10 + $0x140] sm:$0xff]  }
 0x767   : > { %v4433_v33 = vpop.permute.xlu1 %4432 }
 0x768   : > { %v4431_v1 = vpop.permute.xlu0 %4430 }
 0x769   : > { %15247 = vmatprep.subr.bf16.mxu0 %v4431_v1 }
 0x76a   : > { %15248 = vmatpush3.bf16.msra.mxu0 %v4431_v1  ;;  %v16407_v1 = vld [vmem:[%s21056_s10 + $0x100] sm:$0xff]  }
 0x76b   : > { %15249 = vmatprep.subr.bf16.mxu0 %v4433_v33  ;;  %v4632_v27 = vpop.permute.xlu1 %4631 }
 0x76c   : > { %v4630_v45 = vpop.permute.xlu0 %4629 }
 0x76e   : > { %15250 = vmatpush3.bf16.msra.mxu0 %v4433_v33  ;;  %v16408_v33 = vld [vmem:[%s21056_s10 + $0x48] sm:$0xff]  }
 0x76f   : > { %15259 = vmatprep.subr.bf16.mxu0 %v18560_v0  ;;  %v4636_v28 = vpop.permute.xlu1 %4635 }
 0x770   : > { %v4634_v49 = vpop.permute.xlu0 %4633 }
 0x771   : > { %15252 = vmatmul.mubr.bf16.vlgmr.msra.gmra.mrb[80].mxu0 %v16389_v25  ;;  %v16410_v25 = vld [vmem:[%s21056_s10 + $0x148] sm:$0xff]  }
 0x772   : > { %15260 = vmatpush3.bf16.msra.mxu0 %v18560_v0  ;;  %15255 = vmatprep.mubr.bf16.mxu0 %v16390_v5  ;;  %v16409_v5 = vld [vmem:[%s21056_s10 + $0x8] sm:$0xff]  }
 0x773   : > { %15261 = vmatprep.subr.bf16.mxu0 %v18558_v21  ;;  %v4640_v57 = vpop.permute.xlu1 %4639 }
 0x774   : > { %v4638_v31 = vpop.permute.xlu0 %4637 }
 0x776   : > { %15262 = vmatpush3.bf16.msra.mxu0 %v18558_v21 }
 0x777   : > { %15263 = vmatprep.subr.bf16.mxu0 %v18568_v8  ;;  %v4644_v10 = vpop.permute.xlu1 %4643 }
 0x778   : > { %v4642_v6 = vpop.permute.xlu0 %4641 }
 0x779   : > { %15256 = vmatmul.mubr.bf16.gmra.mrb[84].mxu0 %v16391_v13  ;;  %v16411_v13 = vld [vmem:[%s21056_s10 + $0x108] sm:$0xff]  }
 0x77a   : > { %15264 = vmatpush3.bf16.msra.mxu0 %v18568_v8  ;;  %15275 = vmatprep.mubr.bf16.mxu0 %v16392_v16  ;;  %v16412_v16 = vld [vmem:[%s21056_s10 + $0x50] sm:$0xff]  }
 0x77b   : > { %15265 = vmatprep.subr.bf16.mxu0 %v18566_v18 }
 0x77e   : > { %15266 = vmatpush3.bf16.msra.mxu0 %v18566_v18 }
 0x77f   : > { %15267 = vmatprep.subr.bf16.mxu0 %v18576_v50 }
 0x782   : > { %15268 = vmatpush3.bf16.msra.mxu0 %v18576_v50 }
 0x783   : > { %15269 = vmatprep.subr.bf16.mxu0 %v18574_v19 }
 0x786   : > { %15270 = vmatpush3.bf16.msra.mxu0 %v18574_v19 }
 0x787   : > { %15271 = vmatprep.subr.bf16.mxu0 %v18587_v56 }
 0x788   : > { %v4742_v21 = vpop.permute.xlu1 %4741 }
 0x789   : > { %v4737_v62 = vpop.permute.xlu0 %4736 }
 0x78a   : > { %15272 = vmatpush3.bf16.msra.mxu0 %v18587_v56 }
 0x78b   : > { %15273 = vmatprep.subr.bf16.mxu0 %v18585_v29 }
 0x78c   : > { %v4752_v0 = vpop.permute.xlu1 %4751 }
 0x78d   : > { %v4747_v41 = vpop.permute.xlu0 %4746 }
 0x78e   : > { %15274 = vmatpush3.bf16.msra.mxu0 %v18585_v29 }
 0x78f   : > { %15283 = vmatprep.subr.bf16.mxu0 %v4630_v45 }
 0x790   : > { %v4762_v20 = vpop.permute.xlu1 %4761 }
 0x791   : > { %15276 = vmatmul.mubr.bf16.vlgmr.msra.gmra.mrb[80].mxu0 %v16393_v40  ;;  %v4757_v18 = vpop.permute.xlu0 %4756  ;;  %v16414_v40 = vld [vmem:[%s21056_s10 + $0x150] sm:$0xff]  }
 0x792   : > { %15284 = vmatpush3.bf16.msra.mxu0 %v4630_v45  ;;  %15279 = vmatprep.mubr.bf16.mxu0 %v16394_v43  ;;  %v16413_v45 = vld [vmem:[%s21056_s10 + $0x10] sm:$0xff]  }
 0x793   : > { %15285 = vmatprep.subr.bf16.mxu0 %v4632_v27  ;;  %v16415_v43 = vld [vmem:[%s21056_s10 + $0x110] sm:$0xff]  }
 0x794   : > { %v4772_v2 = vpop.permute.xlu1 %4771 }
 0x795   : > { %v4767_v24 = vpop.permute.xlu0 %4766 }
 0x796   : > { %15286 = vmatpush3.bf16.msra.mxu0 %v4632_v27  ;;  %v16416_v27 = vld [vmem:[%s21056_s10 + $0x58] sm:$0xff]  }
 0x797   : > { %15287 = vmatprep.subr.bf16.mxu0 %v4634_v49 }
 0x799   : > { %15280 = vmatmul.mubr.bf16.gmra.mrb[84].mxu0 %v16395_v47  ;;  %v16418_v47 = vld [vmem:[%s21056_s10 + $0x158] sm:$0xff]  }
 0x79a   : > { %15288 = vmatpush3.bf16.msra.mxu0 %v4634_v49  ;;  %15299 = vmatprep.mubr.bf16.mxu0 %v16396_v58  ;;  %v16417_v49 = vld [vmem:[%s21056_s10 + $0x18] sm:$0xff]  }
 0x79b   : > { %15289 = vmatprep.subr.bf16.mxu0 %v4636_v28  ;;  %v16419_v58 = vld [vmem:[%s21056_s10 + $0x118] sm:$0xff]  }
 0x79e   : > { %15290 = vmatpush3.bf16.msra.mxu0 %v4636_v28  ;;  %v16420_v28 = vld [vmem:[%s21056_s10 + $0x60] sm:$0xff]  }
 0x79f   : > { %15291 = vmatprep.subr.bf16.mxu0 %v4638_v31 }
 0x7a2   : > { %15292 = vmatpush3.bf16.msra.mxu0 %v4638_v31  ;;  %v16422_v31 = vld [vmem:[%s21056_s10 + $0x160] sm:$0xff]  }
 0x7a3   : > { %15293 = vmatprep.subr.bf16.mxu0 %v4640_v57 }
 0x7a6   : > { %15294 = vmatpush3.bf16.msra.mxu0 %v4640_v57  ;;  %v16421_v57 = vld [vmem:[%s21056_s10 + $0x20] sm:$0xff]  }
 0x7a7   : > { %15295 = vmatprep.subr.bf16.mxu0 %v4642_v6 }
 0x7aa   : > { %15296 = vmatpush3.bf16.msra.mxu0 %v4642_v6  ;;  %v16423_v6 = vld [vmem:[%s21056_s10 + $0x120] sm:$0xff]  }
 0x7ab   : > { %15297 = vmatprep.subr.bf16.mxu0 %v4644_v10 }
 0x7ae   : > { %15298 = vmatpush3.bf16.msra.mxu0 %v4644_v10  ;;  %v16424_v10 = vld [vmem:[%s21056_s10 + $0x68] sm:$0xff]  }
 0x7af   : > { %14505 = vmatprep.subr.bf16.mxu0 %v16406_v30  ;;  %v6620_v30 = vld [vmem:[%s21048_s2 + $0x98] sm:$0xff] }
 0x7b1   : > { %15300 = vmatmul.mubr.bf16.vlgmr.msra.gmra.mrb[80].mxu0 %v16397_v12  ;;  %v16425_v12 = vld [vmem:[%s21056_s10 + $0x28] sm:$0xff]  }
 0x7b2   : > { %15303 = vmatprep.mubr.bf16.mxu0 %v16398_v60  ;;  %14506 = vmatpush3.bf16.msra.mxu0 %v16407_v1  ;;  %v16426_v60 = vld [vmem:[%s21056_s10 + $0x168] sm:$0xff]   ;;  %v6623_v1 = vld [vmem:[%s21048_s2 + $0xb0] sm:$0xff] }
 0x7b3   : > { %14507 = vmatprep.subr.bf16.mxu0 %v16410_v25  ;;  %v6625_v25 = vld [vmem:[%s21048_s2 + $0xc0] sm:$0xff] }
 0x7b6   : > { %14508 = vmatpush3.bf16.msra.mxu0 %v16411_v13  ;;  %v6627_v13 = vld [vmem:[%s21048_s2 + $0xd0] sm:$0xff] }
 0x7b7   : > { %14509 = vmatprep.subr.bf16.mxu0 %v16414_v40  ;;  %v6629_v40 = vld [vmem:[%s21048_s2 + $0xe0] sm:$0xff] }
 0x7b9   : > { %15304 = vmatmul.mubr.bf16.gmra.mrb[84].mxu0 %v16399_v39 }
 0x7ba   : > { %14510 = vmatpush3.bf16.msra.mxu0 %v16415_v43  ;;  %v6631_v43 = vld [vmem:[%s21048_s2 + $0xf0] sm:$0xff] }
 0x7bb   : > { %14511 = vmatprep.subr.bf16.mxu0 %v16418_v47  ;;  %v6632_v47 = vld [vmem:[%s21048_s2 + $0xf8] sm:$0xff] }
 0x7be   : > { %14512 = vmatpush3.bf16.msra.mxu0 %v16419_v58 }
 0x7bf   : > { %14513 = vmatprep.subr.bf16.mxu0 %v16422_v31 }
 0x7c2   : > { %14514 = vmatpush3.bf16.msra.mxu0 %v16423_v6 }
 0x7c3   : > { %14515 = vmatprep.subr.bf16.mxu0 %v16426_v60 }
 0x7c6   : > { %14516 = vmatpush3.bf16.msra.mxu0 %v16427_v9 }
 0x884   : > { %v15301_v51 = vpop.f32.mrb[80].mxu0 }
 0x885   : > { %v4776_v59 = vadd.f32 %v15301_v51, %v4747_v41  ;;  %v4687_v38 = vpop.f32.mrb[81].mxu0  ;;  %v16431_v51 = vld [vmem:[%s21056_s10 + $0x130] sm:$0xff]  }
 0x886   : > { %v4774_v7 = vadd.f32 %v4737_v62, %v4687_v38  ;;  %v15302_v8 = vpop.f32.mrb[82].mxu0  ;;  %v16433_v38 = vld [vmem:[%s21056_s10 + $0x38] sm:$0xff]  }
 0x887   : > { %v4777_v11 = vadd.f32 %v15302_v8, %v4752_v0  ;;  %v4690_v26 = vpop.f32.mrb[83].mxu0  ;;  %v4784_v22 = vmax.f32 %v4776_v59, 0.0  ;;  %v16430_v0 = vld [vmem:[%s21056_s10 + $0x170] sm:$0xff]   ;;  %v16432_v59 = vld [vmem:[%s21056_s10 + $0x78] sm:$0xff]  }
 0x888   : > { %v4775_v19 = vadd.f32 %v4742_v21, %v4690_v26  ;;  %v4782_v35 = vmax.f32 %v4774_v7, 0.0  ;;  %v16429_v21 = vld [vmem:[%s21056_s10 + $0x30] sm:$0xff]   ;;  %14517 = vmatprep.subr.bf16.mxu0 %v16430_v0  ;;  %v16435_v8 = vld [vmem:[%s21056_s10 + $0x138] sm:$0xff]  }
 0x889   : > { %v4785_v50 = vmax.f32 %v4777_v11, 0.0  ;;  %14518 = vmatpush3.bf16.msra.mxu0 %v16431_v51  ;;  %v16437_v51 = vld [vmem:[%s21056_s10 + $0x80] sm:$0xff]  }
 0x88a   : > { %v4783_v23 = vmax.f32 %v4775_v19, 0.0 }
 0x88b   : > { %v4791_v52 = vpack.c.bf16 %v4785_v50, %v4784_v22 }
 0x88c   : > { %v4790_v29 = vpack.c.bf16 %v4783_v23, %v4782_v35  ;;  %v15305_v48 = vpop.f32.mrb[84].mxu0  ;;  %v16438_v35 = vld [vmem:[%s21056_s10 + $0x240] sm:$0xff]  }
 0x88d   : > { %v4780_v56 = vadd.f32 %v15305_v48, %v4767_v24  ;;  %v4703_v32 = vpop.f32.mrb[85].mxu0  ;;  %v6603_v24 = vld [vmem:[%s21048_s2 + $0x10] sm:$0xff]  ;;  %v6605_v48 = vld [vmem:[%s21048_s2 + $0x20] sm:$0xff] }
 0x88e   : > { %v4778_v34 = vadd.f32 %v4757_v18, %v4703_v32  ;;  %v15306_v37 = vpop.f32.mrb[86].mxu0  ;;  %15315 = vmatprep.mubr.msk.bf16.mxu1 %vm4825_vm6, %v4790_v29  ;;  %v16434_v18 = vld [vmem:[%s21056_s10 + $0x178] sm:$0xff]   ;;  %v6602_v29 = vld [vmem:[%s21048_s2 + $0x8] sm:$0xff]  ;;  %v6607_v32 = vld [vmem:[%s21048_s2 + $0x30] sm:$0xff] }
 0x88f   : > { %v4781_v55 = vadd.f32 %v15306_v37, %v4772_v2  ;;  %v4706_v36 = vpop.f32.mrb[87].mxu0  ;;  %15316 = vmatmul.mubr.msk.bf16.vlgmr.msra.gmra.mrb[224].mxu1 %vm4825_vm6, %v4791_v52  ;;  %v4788_v4 = vmax.f32 %v4780_v56, 0.0  ;;  %14519 = vmatprep.subr.bf16.mxu0 %v16434_v18  ;;  %v6601_v52 = vld [vmem:[%s21048_s2] sm:$0xff]  ;;  %v6604_v56 = vld [vmem:[%s21048_s2 + $0x18] sm:$0xff]  ;;  %v6606_v2 = vld [vmem:[%s21048_s2 + $0x28] sm:$0xff] }
 0x890   : > { %v4779_v63 = vadd.f32 %v4762_v20, %v4706_v36  ;;  %v4786_v44 = vmax.f32 %v4778_v34, 0.0  ;;  %14462 = vmatpush3.bf16.msra.mxu1 %v16405_v53  ;;  %v16436_v20 = vld [vmem:[%s21056_s10 + $0xc0] sm:$0xff]   ;;  %14520 = vmatpush3.bf16.msra.mxu0 %v16435_v8  ;;  %v6608_v37 = vld [vmem:[%s21048_s2 + $0x38] sm:$0xff]  ;;  %v6610_v36 = vld [vmem:[%s21048_s2 + $0x48] sm:$0xff] }
 0x891   : > { %v4789_v17 = vmax.f32 %v4781_v55, 0.0  ;;  %14463 = vmatprep.subr.bf16.mxu1 %v16408_v33  ;;  %14549 = vmatprep.subr.bf16.mxu0 %v16438_v35  ;;  %v6609_v34 = vld [vmem:[%s21048_s2 + $0x40] sm:$0xff]  ;;  %v6611_v55 = vld [vmem:[%s21048_s2 + $0x50] sm:$0xff]  ;;  %v6622_v33 = vld [vmem:[%s21048_s2 + $0xa8] sm:$0xff] }
 0x892   : > { %v4787_v14 = vmax.f32 %v4779_v63, 0.0  ;;  %v6613_v63 = vld [vmem:[%s21048_s2 + $0x60] sm:$0xff]  ;;  %v16446_v35 = vld [vmem:[%s21056_s10 + $0x250] sm:$0xff]  }
 0x893   : > { %v4793_v3 = vpack.c.bf16 %v4789_v17, %v4788_v4  ;;  %v6612_v4 = vld [vmem:[%s21048_s2 + $0x58] sm:$0xff]  ;;  %v6615_v17 = vld [vmem:[%s21048_s2 + $0x70] sm:$0xff]  ;;  %v6621_v53 = vld [vmem:[%s21048_s2 + $0xa0] sm:$0xff] }
 0x894   : > { %v4792_v46 = vpack.c.bf16 %v4787_v14, %v4786_v44  ;;  %14464 = vmatpush3.bf16.msra.mxu1 %v16409_v5  ;;  %v6614_v44 = vld [vmem:[%s21048_s2 + $0x68] sm:$0xff]  ;;  %v6617_v14 = vld [vmem:[%s21048_s2 + $0x80] sm:$0xff]  ;;  %v6624_v5 = vld [vmem:[%s21048_s2 + $0xb8] sm:$0xff] }
 0x895   : > { %14465 = vmatprep.subr.bf16.mxu1 %v16412_v16  ;;  %v6626_v16 = vld [vmem:[%s21048_s2 + $0xc8] sm:$0xff]  ;;  %v16439_v8 = vld [vmem:[%s21056_s10 + $0x200] sm:$0xff]  }
 0x896   : > { %15319 = vmatprep.mubr.msk.bf16.mxu1 %vm4825_vm6, %v4792_v46  ;;  %v6619_v46 = vld [vmem:[%s21048_s2 + $0x90] sm:$0xff] }
 0x897   : > { %15320 = vmatmul.mubr.msk.bf16.gmra.mrb[228].mxu1 %vm4825_vm6, %v4793_v3  ;;  %v6616_v3 = vld [vmem:[%s21048_s2 + $0x78] sm:$0xff] }
 0x898   : > { %14466 = vmatpush3.bf16.msra.mxu1 %v16413_v45  ;;  %v6628_v45 = vld [vmem:[%s21048_s2 + $0xd8] sm:$0xff] }
 0x899   : > { %14467 = vmatprep.subr.bf16.mxu1 %v16416_v27  ;;  %v6630_v27 = vld [vmem:[%s21048_s2 + $0xe8] sm:$0xff] }
 0x89c   : > { %14468 = vmatpush3.bf16.msra.mxu1 %v16417_v49 }
 0x89d   : > { %14469 = vmatprep.subr.bf16.mxu1 %v16420_v28 }
 0x8a0   : > { %14470 = vmatpush3.bf16.msra.mxu1 %v16421_v57 }
 0x8a1   : > { %14471 = vmatprep.subr.bf16.mxu1 %v16424_v10 }
 0x8a4   : > { %14472 = vmatpush3.bf16.msra.mxu1 %v16425_v12 }
 0x8a5   : > { %14473 = vmatprep.subr.bf16.mxu1 %v16428_v42 }
 0x8a8   : > { %14474 = vmatpush3.bf16.msra.mxu1 %v16429_v21 }
 0x8a9   : > { %14475 = vmatprep.subr.bf16.mxu1 %v16432_v59  ;;  %v16440_v59 = vld [vmem:[%s21056_s10 + $0xc8] sm:$0xff]  }
 0x8ac   : > { %14476 = vmatpush3.bf16.msra.mxu1 %v16433_v38 }
 0x8ad   : > { %14483 = vmatprep.subr.bf16.mxu1 %v16436_v20 }
 0x962   : > { %v15317_v39 = vpop.f32.mrb[224].mxu1 }
 0x963   : > { %v18772_v61 = vpop.f32.mrb[225].mxu1 }
 0x964   : > { %v15318_v62 = vpop.f32.mrb[226].mxu1 }
 0x965   : > { %v4879_v41 = vpop.f32.mrb[227].mxu1 }
 0x96a   : > { %v15321_v7 = vpop.f32.mrb[228].mxu1 }
 0x96b   : > { %v15941_v11 = vpack.i.bf16 %v15317_v39, %v15321_v7  ;;  %v18798_v26 = vpop.f32.mrb[229].mxu1 }
 0x96c   : > { %v15322_v19 = vpop.f32.mrb[230].mxu1 }
 0x96d   : > { %v15951_v22 = vpack.i.bf16 %v15318_v62, %v15322_v19  ;;  %15942 = vrot.lane.b32.xlu1 %v15941_v11, %s21075_s20  ;;  %v4895_v50 = vpop.f32.mrb[231].mxu1  ;;  %v16441_v11 = vld [vmem:[%s21056_s10 + $0x88] sm:$0xff]   ;;  %v16444_v19 = vld [vmem:[%s21056_s10 + $0xd0] sm:$0xff]   ;;  %s21089_s20 = smov 64  }
 0x96e   : > { %v15946_v23 = vpack.i.bf16 %v4879_v41, %v4895_v50  ;;  %v16445_v50 = vld [vmem:[%s21056_s10 + $0x90] sm:$0xff]  }
 0x970   : > { %15947 = vrot.lane.b32.xlu0 %v15946_v23, %s21073_s27  ;;  %v16448_v23 = vld [vmem:[%s21056_s10 + $0xd8] sm:$0xff]   ;;  %s21076_s27 = sand.u32 1, %s17155_s30  }
 0x971   : > { %6635 = vperm.xlu1 %15940, %v6601_v52   ;;  %v16447_v52 = vld [vmem:[%s21056_s10 + $0x210] sm:$0xff]   ;;  %s12417_s15 = sshll.u32 %s21076_s27, 1  ;;  %s21088_s27 = smov 124  }
 0x972   : > { %s19451_s24 = scalar_lea.vmem [#allocation2], %s12417_s15  ;;  %s21092_s15 = sand.u32 1, %s17155_s30  }
 0x974   : > { %15952 = vrot.lane.b32.xlu0 %v15951_v22, %s21074_s18  ;;  %v16443_v22 = vld [vmem:[%s21056_s10 + $0x208] sm:$0xff]   ;;  %s21090_s18 = smov 32  }
 0x975   : > { %6645 = vperm.xlu1 %15940, %v6603_v24   ;;  %v16449_v24 = vld [vmem:[%s21056_s10 + $0x98] sm:$0xff]  }
 0x978   : > { %6640 = vperm.xlu0 %15939, %v6602_v29   ;;  %v16450_v29 = vld [vmem:[%s21056_s10 + $0x258] sm:$0xff]  }
 0x979   : > { %6655 = vperm.xlu1 %15940, %v6605_v48   ;;  %v16452_v48 = vld [vmem:[%s21056_s10 + $0xe0] sm:$0xff]  }
 0x97c   : > { %6650 = vperm.xlu0 %15939, %v6604_v56   ;;  %v16451_v56 = vld [vmem:[%s21056_s10 + $0x218] sm:$0xff]  }
 0x97d   : > { %6665 = vperm.xlu1 %15940, %v6607_v32   ;;  %v16453_v32 = vld [vmem:[%s21056_s10 + $0xa0] sm:$0xff]  }
 0x980   : > { %6660 = vperm.xlu0 %15939, %v6606_v2   ;;  %v16454_v2 = vld [vmem:[%s21056_s10 + $0x260] sm:$0xff]  }
 0x981   : > { %6675 = vperm.xlu1 %15940, %v6609_v34   ;;  %v16456_v34 = vld [vmem:[%s21056_s10 + $0xe8] sm:$0xff]  }
 0x984   : > { %6670 = vperm.xlu0 %15939, %v6608_v37   ;;  %v16455_v37 = vld [vmem:[%s21056_s10 + $0x220] sm:$0xff]  }
 0x985   : > { %6685 = vperm.xlu1 %15940, %v6611_v55   ;;  %v16457_v55 = vld [vmem:[%s21056_s10 + $0xa8] sm:$0xff]  }
 0x988   : > { %6680 = vperm.xlu0 %15939, %v6610_v36   ;;  %v16458_v36 = vld [vmem:[%s21056_s10 + $0x268] sm:$0xff]  }
 0x989   : > { %6695 = vperm.xlu1 %15940, %v6613_v63   ;;  %v16460_v63 = vld [vmem:[%s21056_s10 + $0xf0] sm:$0xff]  }
 0x98c   : > { %6690 = vperm.xlu0 %15939, %v6612_v4   ;;  %v16459_v4 = vld [vmem:[%s21056_s10 + $0x228] sm:$0xff]  }
 0x98d   : > { %6705 = vperm.xlu1 %15940, %v6615_v17   ;;  %v16461_v17 = vld [vmem:[%s21056_s10 + $0xb0] sm:$0xff]  }
 0x990   : > { %6700 = vperm.xlu0 %15939, %v6614_v44   ;;  %v16462_v44 = vld [vmem:[%s21056_s10 + $0x270] sm:$0xff]  }
 0x991   : > { %6715 = vperm.xlu1 %15940, %v6617_v14   ;;  %v16464_v14 = vld [vmem:[%s21056_s10 + $0xf8] sm:$0xff]  }
 0x994   : > { %6710 = vperm.xlu0 %15939, %v6616_v3   ;;  %v16463_v3 = vld [vmem:[%s21056_s10 + $0x230] sm:$0xff]  }
 0x995   : > { %6725 = vperm.xlu1 %15940, %v6619_v46   ;;  %v16465_v46 = vld [vmem:[%s21056_s10 + $0xb8] sm:$0xff]  }
 0x998   : > { %6720 = vperm.xlu0 %15939, %v6618_v15   ;;  %v16466_v15 = vld [vmem:[%s21056_s10 + $0x278] sm:$0xff]  }
 0x999   : > { %6735 = vperm.xlu1 %15940, %v6621_v53   ;;  %v16468_v53 = vld [vmem:[%s21056_s10 + $0x1c0] sm:$0xff]  }
 0x99c   : > { %6730 = vperm.xlu0 %15939, %v6620_v30   ;;  %v16467_v30 = vld [vmem:[%s21056_s10 + $0x238] sm:$0xff]  }
 0x99d   : > { %6745 = vperm.xlu1 %15940, %v6623_v1   ;;  %v16469_v1 = vld [vmem:[%s21056_s10 + $0x180] sm:$0xff]  }
 0x9a0   : > { %6740 = vperm.xlu0 %15939, %v6622_v33  }
 0x9a1   : > { %6755 = vperm.xlu1 %15940, %v6625_v25   ;;  %v16470_v25 = vld [vmem:[%s21056_s10 + $0x340] sm:$0xff]  }
 0x9a4   : > { %6750 = vperm.xlu0 %15939, %v6624_v5   ;;  %v16472_v5 = vld [vmem:[%s21056_s10 + $0x1c8] sm:$0xff]  }
 0x9a5   : > { %6765 = vperm.xlu1 %15940, %v6627_v13  }
 0x9a8   : > { %6760 = vperm.xlu0 %15939, %v6626_v16   ;;  %v16471_v16 = vld [vmem:[%s21056_s10 + $0x300] sm:$0xff]  }
 0x9a9   : > { %6775 = vperm.xlu1 %15940, %v6629_v40  }
 0x9ac   : > { %6770 = vperm.xlu0 %15939, %v6628_v45   ;;  %v16473_v45 = vld [vmem:[%s21056_s10 + $0x188] sm:$0xff]  }
 0x9ad   : > { %6785 = vperm.xlu1 %15940, %v6631_v43   ;;  %v16474_v43 = vld [vmem:[%s21056_s10 + $0x348] sm:$0xff]  }
 0x9b0   : > { %6780 = vperm.xlu0 %15939, %v6630_v27  }
 0x9b4   : > { %6790 = vperm.xlu0 %15939, %v6632_v47   ;;  %v16476_v47 = vld [vmem:[%s21056_s10 + $0x1d0] sm:$0xff]  }
 0x9df   : > { %v15943_v58 = vpop.permute.xlu1 %15942 }
 0x9e0   : > { %v15945_v10 = vunpack.i.h.bf16 %v15943_v58  ;;  %v15944_v12 = vunpack.i.l.bf16 %v15943_v58  ;;  %v16477_v58 = vld [vmem:[%s21056_s10 + $0x190] sm:$0xff]  }
 0x9e2   : > { %v15948_v49 = vpop.permute.xlu0 %15947 }
 0x9e3   : > { %v15950_v28 = vunpack.i.h.bf16 %v15948_v49  ;;  %v15949_v31 = vunpack.i.l.bf16 %v15948_v49  ;;  %v16475_v49 = vld [vmem:[%s21056_s10 + $0x308] sm:$0xff]  }
 0x9e5   : > { %v4932_v57 = vsel %vm4931_vm7, %v18772_v61, %v15950_v28  ;;  %v4937_v6 = vsel %vm4931_vm7, %v18798_v26, %v15949_v31  ;;  %v16442_v26 = vld [vmem:[%s21056_s10 + $0x248] sm:$0xff]   ;;  %v16478_v28 = vld [vmem:[%s21056_s10 + $0x350] sm:$0xff]   ;;  %v16480_v31 = vld [vmem:[%s21056_s10 + $0x1d8] sm:$0xff]  }
 0x9e6   : > { %v15953_v60 = vpop.permute.xlu0 %15952  ;;  %v4934_v42 = vsel %vm4933_vm8, %v4932_v57, %v15945_v10  ;;  %v4938_v62 = vsel %vm4933_vm8, %v4937_v6, %v15944_v12  ;;  %v16479_v57 = vld [vmem:[%s21056_s10 + $0x310] sm:$0xff]   ;;  %v16481_v6 = vld [vmem:[%s21056_s10 + $0x198] sm:$0xff]   ;;  %v16484_v12 = vld [vmem:[%s21056_s10 + $0x1e0] sm:$0xff]  }
 0x9e7   : > { %v15955_v39 = vunpack.i.h.bf16 %v15953_v60  ;;  %v15954_v9 = vunpack.i.l.bf16 %v15953_v60  ;;  %v16482_v10 = vld [vmem:[%s21056_s10 + $0x358] sm:$0xff]  }
 0x9e8   : > { %v16483_v60 = vld [vmem:[%s21056_s10 + $0x318] sm:$0xff]  }
 0x9e9   : > { %v4936_v21 = vsel %vm4935_vm9, %v4934_v42, %v15955_v39  ;;  %v4939_v41 = vsel %vm4935_vm9, %v4938_v62, %v15954_v9  ;;  %v16485_v39 = vld [vmem:[%s21056_s10 + $0x1a0] sm:$0xff]   ;;  %v16488_v42 = vld [vmem:[%s21056_s10 + $0x1e8] sm:$0xff]  }
 0x9ea   : > { %v18913_v0 = vpack.c.bf16 %v4936_v21, %v4936_v21  ;;  %v18915_v61 = vpack.c.bf16 %v4939_v41, %v4939_v41  ;;  %v16486_v9 = vld [vmem:[%s21056_s10 + $0x360] sm:$0xff]   ;;  %v16489_v21 = vld [vmem:[%s21056_s10 + $0x1a8] sm:$0xff]  }
 0x9eb   : > { %v16487_v62 = vld [vmem:[%s21056_s10 + $0x320] sm:$0xff]   ;;  %v16490_v41 = vld [vmem:[%s21056_s10 + $0x368] sm:$0xff]  }
 0x9ec   : > { %5103 = vmatprep.mubr.bf16.mxu1 %v18915_v61  ;;  %v18925_v38 = vshrl.u32 %v18915_v61, 16  ;;  %v5326_v18 = vrot.slane %v18915_v61, 1  ;;  %v5325_v7 = vrot.slane %v18913_v0, 1  ;;  %v5674_v20 = vrot.slane %v18915_v61, 2 }
 0x9ed   : > { %5104 = vmatmul.mubr.bf16.vlgmr.msra.gmra.mrb[232].mxu1 %v18913_v0  ;;  %v19023_v33 = vshrl.u32 %v18913_v0, 16  ;;  %v5673_v40 = vrot.slane %v18913_v0, 2  ;;  %v6022_v27 = vrot.slane %v18915_v61, 3  ;;  %v16492_v61 = vld [vmem:[%s21056_s10 + $0x1f0] sm:$0xff]  }
 0x9ee   : > { %14484 = vmatpush3.bf16.msra.mxu1 %v16437_v51  ;;  %5281 = vmatprep.mubr.bf16.mxu1 %v18925_v38  ;;  %v5500_v13 = vrot.slane %v18925_v38, 1  ;;  %v16491_v51 = vld [vmem:[%s21056_s10 + $0x328] sm:$0xff]  }
 0x9ef   : > { %5457 = vmatprep.mubr.bf16.mxu0 %v5326_v18  ;;  %14485 = vmatprep.subr.bf16.mxu1 %v16440_v59  ;;  %v16493_v59 = vld [vmem:[%s21056_s10 + $0x1b0] sm:$0xff]  }
 0x9f0   : > { %5458 = vmatmul.mubr.bf16.vlgmr.msra.gmra.mrb[88].mxu0 %v5325_v7  ;;  %v16494_v18 = vld [vmem:[%s21056_s10 + $0x370] sm:$0xff]   ;;  %v16496_v7 = vld [vmem:[%s21056_s10 + $0x1f8] sm:$0xff]  }
 0x9f1   : > { %14550 = vmatpush3.bf16.msra.mxu0 %v16439_v8  ;;  %5805 = vmatprep.mubr.bf16.mxu0 %v5674_v20  ;;  %v16495_v8 = vld [vmem:[%s21056_s10 + $0x330] sm:$0xff]   ;;  %v16500_v20 = vld [vmem:[%s21056_s10 + $0x2c0] sm:$0xff]  }
 0x9f2   : > { %14486 = vmatpush3.bf16.msra.mxu1 %v16441_v11  ;;  %14551 = vmatprep.subr.bf16.mxu0 %v16442_v26  ;;  %v16497_v11 = vld [vmem:[%s21056_s10 + $0x1b8] sm:$0xff]  }
 0x9f3   : > { %14487 = vmatprep.subr.bf16.mxu1 %v16444_v19  ;;  %v16498_v26 = vld [vmem:[%s21056_s10 + $0x378] sm:$0xff]  }
 0x9f4   : > { %v16499_v19 = vld [vmem:[%s21056_s10 + $0x338] sm:$0xff]  }
 0x9f5   : > { %14552 = vmatpush3.bf16.msra.mxu0 %v16443_v22  ;;  %v16501_v22 = vld [vmem:[%s21056_s10 + $0x280] sm:$0xff]  }
 0x9f6   : > { %14488 = vmatpush3.bf16.msra.mxu1 %v16445_v50  ;;  %14553 = vmatprep.subr.bf16.mxu0 %v16446_v35  ;;  %v5499_v50 = vrot.slane %v19023_v33, 1  ;;  %v16502_v35 = vld [vmem:[%s21056_s10 + $0x2c8] sm:$0xff]  }
 0x9f7   : > { %14489 = vmatprep.subr.bf16.mxu1 %v16448_v23  ;;  %v5848_v23 = vrot.slane %v18925_v38, 2 }
 0x9f9   : > { %14554 = vmatpush3.bf16.msra.mxu0 %v16447_v52  ;;  %v6021_v52 = vrot.slane %v18913_v0, 3  ;;  %v16506_v0 = vld [vmem:[%s21056_s10 + $0x2d8] sm:$0xff]  }
 0x9fa   : > { %14490 = vmatpush3.bf16.msra.mxu1 %v16449_v24  ;;  %14555 = vmatprep.subr.bf16.mxu0 %v16450_v29  ;;  %v16503_v24 = vld [vmem:[%s21056_s10 + $0x288] sm:$0xff]   ;;  %v16504_v29 = vld [vmem:[%s21056_s10 + $0x2d0] sm:$0xff]  }
 0x9fb   : > { %14491 = vmatprep.subr.bf16.mxu1 %v16452_v48  ;;  %v16505_v48 = vld [vmem:[%s21056_s10 + $0x290] sm:$0xff]  }
 0x9fd   : > { %14556 = vmatpush3.bf16.msra.mxu0 %v16451_v56  ;;  %v16507_v56 = vld [vmem:[%s21056_s10 + $0x298] sm:$0xff]  }
 0x9fe   : > { %14492 = vmatpush3.bf16.msra.mxu1 %v16453_v32  ;;  %14557 = vmatprep.subr.bf16.mxu0 %v16454_v2  ;;  %v16508_v32 = vld [vmem:[%s21056_s10 + $0x2e0] sm:$0xff]  }
 0x9ff   : > { %14493 = vmatprep.subr.bf16.mxu1 %v16456_v34  ;;  %v16509_v2 = vld [vmem:[%s21056_s10 + $0x2a0] sm:$0xff]   ;;  %v16510_v34 = vld [vmem:[%s21056_s10 + $0x2e8] sm:$0xff]  }
 0xa01   : > { %14558 = vmatpush3.bf16.msra.mxu0 %v16455_v37  ;;  %v16511_v37 = vld [vmem:[%s21056_s10 + $0x2a8] sm:$0xff]  }
 0xa02   : > { %14494 = vmatpush3.bf16.msra.mxu1 %v16457_v55  ;;  %14559 = vmatprep.subr.bf16.mxu0 %v16458_v36  ;;  %v16512_v55 = vld [vmem:[%s21056_s10 + $0x2f0] sm:$0xff]  }
 0xa03   : > { %14495 = vmatprep.subr.bf16.mxu1 %v16460_v63  ;;  %v16513_v36 = vld [vmem:[%s21056_s10 + $0x2b0] sm:$0xff]   ;;  %v16514_v63 = vld [vmem:[%s21056_s10 + $0x2f8] sm:$0xff]  }
 0xa05   : > { %14560 = vmatpush3.bf16.msra.mxu0 %v16459_v4  ;;  %v16515_v4 = vld [vmem:[%s21056_s10 + $0x2b8] sm:$0xff]  }
 0xa06   : > { %14496 = vmatpush3.bf16.msra.mxu1 %v16461_v17  ;;  %14561 = vmatprep.subr.bf16.mxu0 %v16462_v44  ;;  %v16516_v17 = vld [vmem:[%s21056_s10 + $0x3c0] sm:$0xff]  }
 0xa07   : > { %14497 = vmatprep.subr.bf16.mxu1 %v16464_v14  ;;  %v16517_v44 = vld [vmem:[%s21056_s10 + $0x380] sm:$0xff]   ;;  %v5847_v14 = vrot.slane %v19023_v33, 2 }
 0xa09   : > { %14562 = vmatpush3.bf16.msra.mxu0 %v16463_v3  ;;  %v16518_v3 = vld [vmem:[%s21056_s10 + $0x3c8] sm:$0xff]  }
 0xa0a   : > { %14498 = vmatpush3.bf16.msra.mxu1 %v16465_v46  ;;  %14563 = vmatprep.subr.bf16.mxu0 %v16466_v15  ;;  %v6196_v46 = vrot.slane %v18925_v38, 3  ;;  %v16519_v15 = vld [vmem:[%s21056_s10 + $0x388] sm:$0xff]   ;;  %v16522_v38 = vld [vmem:[%s21056_s10 + $0x3d8] sm:$0xff]  }
 0xa0b   : > { %14527 = vmatprep.subr.bf16.mxu1 %v16468_v53  ;;  %v16520_v53 = vld [vmem:[%s21056_s10 + $0x3d0] sm:$0xff]  }
 0xa0d   : > { %14564 = vmatpush3.bf16.msra.mxu0 %v16467_v30  ;;  %5282 = vmatmul.mubr.bf16.vlgmr.msra.gmra.mrb[236].mxu1 %v19023_v33  ;;  %v16521_v30 = vld [vmem:[%s21056_s10 + $0x390] sm:$0xff]  }
 0xa0e   : > { %14528 = vmatpush3.bf16.msra.mxu1 %v16469_v1  ;;  %5631 = vmatprep.mubr.bf16.mxu1 %v5500_v13  ;;  %v16523_v1 = vld [vmem:[%s21056_s10 + $0x398] sm:$0xff]   ;;  %v16526_v13 = vld [vmem:[%s21056_s10 + $0x3e8] sm:$0xff]  }
 0xa0f   : > { %14593 = vmatprep.subr.bf16.mxu0 %v16470_v25  ;;  %14529 = vmatprep.subr.bf16.mxu1 %v16472_v5  ;;  %v16524_v25 = vld [vmem:[%s21056_s10 + $0x3e0] sm:$0xff]  }
 0xa10   : > { %5806 = vmatmul.mubr.bf16.vlgmr.msra.gmra.mrb[92].mxu0 %v5673_v40  ;;  %v16525_v5 = vld [vmem:[%s21056_s10 + $0x3a0] sm:$0xff]   ;;  %v16528_v40 = vld [vmem:[%s21056_s10 + $0x3f0] sm:$0xff]  }
 0xa11   : > { %14594 = vmatpush3.bf16.msra.mxu0 %v16471_v16  ;;  %6153 = vmatprep.mubr.bf16.mxu0 %v6022_v27  ;;  %v16527_v16 = vld [vmem:[%s21056_s10 + $0x3a8] sm:$0xff]   ;;  %v16531_v27 = vld [vmem:[%s21056_s10 + $0x3b8] sm:$0xff]  }
 0xa12   : > { %14530 = vmatpush3.bf16.msra.mxu1 %v16473_v45  ;;  %14595 = vmatprep.subr.bf16.mxu0 %v16474_v43  ;;  %v16529_v45 = vld [vmem:[%s21056_s10 + $0x3b0] sm:$0xff]   ;;  %v16530_v43 = vld [vmem:[%s21056_s10 + $0x3f8] sm:$0xff]  }
 0xa13   : > { %14531 = vmatprep.subr.bf16.mxu1 %v16476_v47  ;;  %v6195_v47 = vrot.slane %v19023_v33, 3 }
 0xa15   : > { %14596 = vmatpush3.bf16.msra.mxu0 %v16475_v49  ;;  %v16532_v49 = vld [vmem:[%s21058_s12] sm:$0xff]  }
 0xa16   : > { %14532 = vmatpush3.bf16.msra.mxu1 %v16477_v58  ;;  %14597 = vmatprep.subr.bf16.mxu0 %v16478_v28  ;;  %v17173_v58 = vmov 0.0   ;;  %v16533_v28 = vld [vmem:[%s21058_s12 + $0x8] sm:$0xff]  }
 0xa17   : > { %14533 = vmatprep.subr.bf16.mxu1 %v16480_v31 }
 0xa19   : > { %14598 = vmatpush3.bf16.msra.mxu0 %v16479_v57  ;;  %v16534_v57 = vld [vmem:[%s21058_s12 + $0x10] sm:$0xff]  }
 0xa1a   : > { %14534 = vmatpush3.bf16.msra.mxu1 %v16481_v6  ;;  %14599 = vmatprep.subr.bf16.mxu0 %v16482_v10 }
 0xa1b   : > { %14535 = vmatprep.subr.bf16.mxu1 %v16484_v12 }
 0xa1d   : > { %14600 = vmatpush3.bf16.msra.mxu0 %v16483_v60 }
 0xa1e   : > { %14536 = vmatpush3.bf16.msra.mxu1 %v16485_v39  ;;  %14601 = vmatprep.subr.bf16.mxu0 %v16486_v9 }
 0xa1f   : > { %14537 = vmatprep.subr.bf16.mxu1 %v16488_v42 }
 0xa21   : > { %14602 = vmatpush3.bf16.msra.mxu0 %v16487_v62  ;;  %v16535_v62 = vld [vmem:[%s21058_s12 + $0x18] sm:$0xff]  }
 0xa22   : > { %14538 = vmatpush3.bf16.msra.mxu1 %v16489_v21  ;;  %14603 = vmatprep.subr.bf16.mxu0 %v16490_v41  ;;  %v16538_v41 = vld [vmem:[%s17308_s21 + $0x2c4] ss:$8 sps:$4 sm:$0xff]  }
 0xa23   : > { %14539 = vmatprep.subr.bf16.mxu1 %v16492_v61  ;;  %v4942_v61 = vld [vmem:[%s21057_s11] sm:$0x1] }
 0xa25   : > { %14604 = vmatpush3.bf16.msra.mxu0 %v16491_v51 }
 0xa26   : > { %14540 = vmatpush3.bf16.msra.mxu1 %v16493_v59  ;;  %14605 = vmatprep.subr.bf16.mxu0 %v16494_v18 }
 0xa27   : > { %14541 = vmatprep.subr.bf16.mxu1 %v16496_v7 }
 0xa29   : > { %14606 = vmatpush3.bf16.msra.mxu0 %v16495_v8 }
 0xa2a   : > { %14542 = vmatpush3.bf16.msra.mxu1 %v16497_v11  ;;  %14607 = vmatprep.subr.bf16.mxu0 %v16498_v26 }
 0xa2b   : > { %14571 = vmatprep.subr.bf16.mxu1 %v16500_v20 }
 0xa2d   : > { %14608 = vmatpush3.bf16.msra.mxu0 %v16499_v19  ;;  %5632 = vmatmul.mubr.bf16.vlgmr.msra.gmra.mrb[240].mxu1 %v5499_v50 }
 0xa2e   : > { %14572 = vmatpush3.bf16.msra.mxu1 %v16501_v22  ;;  %5979 = vmatprep.mubr.bf16.mxu1 %v5848_v23 }
 0xa2f   : > { %14573 = vmatprep.subr.bf16.mxu1 %v16502_v35  ;;  %15323 = vmatprep.subr.bf16.mxu0 %v17173_v58 }
 0xa30   : > { %6154 = vmatmul.mubr.bf16.vlgmr.msra.gmra.mrb[96].mxu0 %v6021_v52 }
 0xa31   : > { %15324 = vmatpush3.bf16.msra.mxu0 %v16532_v49  ;;  %15331 = vmatprep.mubr.msk.bf16.mxu0 %vm17174_vm10, %v17173_v58  ;;  %v16547_v49 = vld [vmem:[%s17308_s21 + $0x2f4] ss:$8 sps:$4 sm:$0xff]  }
 0xa32   : > { %14574 = vmatpush3.bf16.msra.mxu1 %v16503_v24  ;;  %15325 = vmatprep.subr.bf16.mxu0 %v17173_v58 }
 0xa33   : > { %14575 = vmatprep.subr.bf16.mxu1 %v16504_v29 }
 0xa35   : > { %15326 = vmatpush3.bf16.msra.mxu0 %v16533_v28  ;;  %v16545_v28 = vld [vmem:[%s17308_s21 + $0x2f0] ss:$8 sps:$4 sm:$0xff]  }
 0xa36   : > { %14576 = vmatpush3.bf16.msra.mxu1 %v16505_v48  ;;  %15327 = vmatprep.subr.bf16.mxu0 %v17173_v58 }
 0xa37   : > { %14577 = vmatprep.subr.bf16.mxu1 %v16506_v0 }
 0xa39   : > { %15328 = vmatpush3.bf16.msra.mxu0 %v16534_v57  ;;  %v16553_v57 = vld [vmem:[%s17308_s21 + $0x314] ss:$8 sps:$4 sm:$0xff]  }
 0xa3a   : > { %14578 = vmatpush3.bf16.msra.mxu1 %v16507_v56  ;;  %15329 = vmatprep.subr.bf16.mxu0 %v17173_v58 }
 0xa3b   : > { %14579 = vmatprep.subr.bf16.mxu1 %v16508_v32 }
 0xa3d   : > { %15330 = vmatpush3.bf16.msra.mxu0 %v16535_v62  ;;  %v16565_v62 = vld [vmem:[%s17308_s21 + $0x354] ss:$8 sps:$4 sm:$0xff]  }
 0xa3e   : > { %14580 = vmatpush3.bf16.msra.mxu1 %v16509_v2  ;;  %7749 = vmatprep.subr.bf16.mxu0 %v16538_v41  ;;  %v16568_v41 = vld [vmem:[%s17308_s21 + $0x364] ss:$8 sps:$4 sm:$0xff]  }
 0xa3f   : > { %14581 = vmatprep.subr.bf16.mxu1 %v16510_v34 }
 0xa42   : > { %14582 = vmatpush3.bf16.msra.mxu1 %v16511_v37 }
 0xa43   : > { %14583 = vmatprep.subr.bf16.mxu1 %v16512_v55 }
 0xa46   : > { %14584 = vmatpush3.bf16.msra.mxu1 %v16513_v36 }
 0xa47   : > { %14585 = vmatprep.subr.bf16.mxu1 %v16514_v63 }
 0xa4a   : > { %14586 = vmatpush3.bf16.msra.mxu1 %v16515_v4 }
 0xa4b   : > { %14615 = vmatprep.subr.bf16.mxu1 %v16516_v17 }
 0xa4d   : > { %5980 = vmatmul.mubr.bf16.vlgmr.msra.gmra.mrb[244].mxu1 %v5847_v14 }
 0xa4e   : > { %14616 = vmatpush3.bf16.msra.mxu1 %v16517_v44  ;;  %6327 = vmatprep.mubr.bf16.mxu1 %v6196_v46 }
 0xa4f   : > { %14617 = vmatprep.subr.bf16.mxu1 %v16518_v3 }
 0xa52   : > { %14618 = vmatpush3.bf16.msra.mxu1 %v16519_v15 }
 0xa53   : > { %14619 = vmatprep.subr.bf16.mxu1 %v16520_v53 }
 0xa56   : > { %14620 = vmatpush3.bf16.msra.mxu1 %v16521_v30 }
 0xa57   : > { %14621 = vmatprep.subr.bf16.mxu1 %v16522_v38 }
 0xa5a   : > { %14622 = vmatpush3.bf16.msra.mxu1 %v16523_v1 }
 0xa5b   : > { %14623 = vmatprep.subr.bf16.mxu1 %v16524_v25 }
 0xa5e   : > { %14624 = vmatpush3.bf16.msra.mxu1 %v16525_v5 }
 0xa5f   : > { %14625 = vmatprep.subr.bf16.mxu1 %v16526_v13  ;;  %v16536_v13 = vld [vmem:[%s17308_s21 + $0x2c0] ss:$8 sps:$4 sm:$0xff]  }
 0xa62   : > { %14626 = vmatpush3.bf16.msra.mxu1 %v16527_v16  ;;  %v16586_v16 = vld [vmem:[%s21047_s1 + $0x4] ss:$24 sps:$4 sm:$0xff]  }
 0xa63   : > { %14627 = vmatprep.subr.bf16.mxu1 %v16528_v40 }
 0xa66   : > { %14628 = vmatpush3.bf16.msra.mxu1 %v16529_v45  ;;  %v16541_v45 = vld [vmem:[%s17308_s21 + $0x2d4] ss:$8 sps:$4 sm:$0xff]  }
 0xa67   : > { %14629 = vmatprep.subr.bf16.mxu1 %v16530_v43  ;;  %v16539_v43 = vld [vmem:[%s17308_s21 + $0x2d0] ss:$8 sps:$4 sm:$0xff]  }
 0xa6a   : > { %14630 = vmatpush3.bf16.msra.mxu1 %v16531_v27  ;;  %v16544_v27 = vld [vmem:[%s17308_s21 + $0x2e4] ss:$8 sps:$4 sm:$0xff]  }
 0xa6b   : > { %8575 = vmatprep.subr.bf16.mxu1 %v17165_v54 }
 0xa6d   : > { %6328 = vmatmul.mubr.bf16.vlgmr.msra.gmra.mrb[248].mxu1 %v6195_v47  ;;  %v16542_v47 = vld [vmem:[%s17308_s21 + $0x2e0] ss:$8 sps:$4 sm:$0xff]  }
 0xac0   : > { %v14477_v33 = vpop.f32.mrb[232].mxu1 }
 0xac1   : > { %v14478_v31 = vpop.f32.mrb[233].mxu1 }
 0xac2   : > { %v14479_v6 = vadd.f32 %v14478_v31, %v14477_v33  ;;  %v14480_v10 = vpop.f32.mrb[234].mxu1  ;;  %v16550_v33 = vld [vmem:[%s17308_s21 + $0x304] ss:$8 sps:$4 sm:$0xff]   ;;  %v16548_v31 = vld [vmem:[%s17308_s21 + $0x300] ss:$8 sps:$4 sm:$0xff]  }
 0xac3   : > { %v14521_v12 = vpop.f32.mrb[88].mxu0  ;;  %v14481_v60 = vpop.f32.mrb[235].mxu1  ;;  %v16556_v10 = vld [vmem:[%s17308_s21 + $0x324] ss:$8 sps:$4 sm:$0xff]  }
 0xac4   : > { %v14522_v39 = vpop.f32.mrb[89].mxu0  ;;  %v5111_v18 = vadd.f32 %v14479_v6, %v4942_v61  ;;  %v16551_v6 = vld [vmem:[%s17308_s21 + $0x310] ss:$8 sps:$4 sm:$0xff]   ;;  %v16559_v60 = vld [vmem:[%s17308_s21 + $0x334] ss:$8 sps:$4 sm:$0xff]  }
 0xac5   : > { %v14523_v9 = vadd.f32 %v14522_v39, %v14521_v12  ;;  %v14524_v42 = vpop.f32.mrb[90].mxu0  ;;  %v16554_v12 = vld [vmem:[%s17308_s21 + $0x320] ss:$8 sps:$4 sm:$0xff]   ;;  %v16557_v39 = vld [vmem:[%s17308_s21 + $0x330] ss:$8 sps:$4 sm:$0xff]  }
 0xac6   : > { %v14525_v21 = vpop.f32.mrb[91].mxu0  ;;  %v16560_v42 = vld [vmem:[%s17308_s21 + $0x340] ss:$8 sps:$4 sm:$0xff]  }
 0xac7   : > { %v16563_v21 = vld [vmem:[%s17308_s21 + $0x350] ss:$8 sps:$4 sm:$0xff]   ;;  %v16566_v61 = vld [vmem:[%s17308_s21 + $0x360] ss:$8 sps:$4 sm:$0xff]  }
 0xae0   : > { %v14499_v51 = vpop.f32.mrb[236].mxu1 }
 0xae1   : > { %v14500_v59 = vpop.f32.mrb[237].mxu1 }
 0xae2   : > { %v14501_v7 = vadd.f32 %v14500_v59, %v14499_v51  ;;  %v14502_v8 = vpop.f32.mrb[238].mxu1  ;;  %v16571_v51 = vld [vmem:[%s17308_s21 + $0x374] ss:$8 sps:$4 sm:$0xff]   ;;  %v16569_v59 = vld [vmem:[%s17308_s21 + $0x370] ss:$8 sps:$4 sm:$0xff]  }
 0xae3   : > { %v14565_v11 = vpop.f32.mrb[92].mxu0  ;;  %v14503_v26 = vpop.f32.mrb[239].mxu1  ;;  %v16577_v8 = vld [vmem:[%s17308_s21 + $0x394] ss:$8 sps:$4 sm:$0xff]  }
 0xae4   : > { %v5289_v20 = vadd.f32 %v14501_v7, %v5111_v18  ;;  %v14566_v19 = vpop.f32.mrb[93].mxu0  ;;  %v16574_v18 = vld [vmem:[%s17308_s21 + $0x384] ss:$8 sps:$4 sm:$0xff]   ;;  %v16572_v7 = vld [vmem:[%s17308_s21 + $0x380] ss:$8 sps:$4 sm:$0xff]  }
 0xae5   : > { %v14567_v22 = vadd.f32 %v14566_v19, %v14565_v11  ;;  %v14568_v50 = vpop.f32.mrb[94].mxu0  ;;  %v16575_v11 = vld [vmem:[%s17308_s21 + $0x390] ss:$8 sps:$4 sm:$0xff]   ;;  %v16580_v26 = vld [vmem:[%s17308_s21 + $0x3a4] ss:$8 sps:$4 sm:$0xff]  }
 0xae6   : > { %v14569_v35 = vpop.f32.mrb[95].mxu0  ;;  %v5465_v23 = vadd.f32 %v14523_v9, %v5289_v20  ;;  %v16562_v9 = vld [vmem:[%s17308_s21 + $0x344] ss:$8 sps:$4 sm:$0xff]   ;;  %v16578_v20 = vld [vmem:[%s17308_s21 + $0x3a0] ss:$8 sps:$4 sm:$0xff]  }
 0xae7   : > { %v16583_v19 = vld [vmem:[%s17308_s21 + $0x3b4] ss:$8 sps:$4 sm:$0xff]   ;;  %v16613_v50 = vld [vmem:[%s17308_s21 + $0x3c4] ss:$8 sps:$4 sm:$0xff]   ;;  %v16584_v35 = vld [vmem:[%s21047_s1] ss:$24 sps:$4 sm:$0xff]  }
 0xb00   : > { %v14543_v52 = vpop.f32.mrb[240].mxu1 }
 0xb01   : > { %v14544_v24 = vpop.f32.mrb[241].mxu1 }
 0xb02   : > { %v14545_v29 = vadd.f32 %v14544_v24, %v14543_v52  ;;  %v14546_v48 = vpop.f32.mrb[242].mxu1  ;;  %v16611_v52 = vld [vmem:[%s17308_s21 + $0x3c0] ss:$8 sps:$4 sm:$0xff]   ;;  %v16616_v24 = vld [vmem:[%s17308_s21 + $0x3d4] ss:$8 sps:$4 sm:$0xff]  }
 0xb03   : > { %v14609_v0 = vpop.f32.mrb[96].mxu0  ;;  %v14547_v56 = vpop.f32.mrb[243].mxu1  ;;  %v16622_v48 = vld [vmem:[%s17308_s21 + $0x3e4] ss:$8 sps:$4 sm:$0xff]  }
 0xb04   : > { %v5639_v32 = vadd.f32 %v14545_v29, %v5465_v23  ;;  %v14610_v2 = vpop.f32.mrb[97].mxu0  ;;  %v16587_v23 = vld [vmem:[%s21047_s1 + $0x34] ss:$24 sps:$4 sm:$0xff]   ;;  %v16614_v29 = vld [vmem:[%s17308_s21 + $0x3d0] ss:$8 sps:$4 sm:$0xff]  }
 0xb05   : > { %v14611_v34 = vadd.f32 %v14610_v2, %v14609_v0  ;;  %v14612_v37 = vpop.f32.mrb[98].mxu0  ;;  %v16589_v0 = vld [vmem:[%s21047_s1 + $0x30] ss:$24 sps:$4 sm:$0xff]   ;;  %v16590_v56 = vld [vmem:[%s21047_s1 + $0x64] ss:$24 sps:$4 sm:$0xff]  }
 0xb06   : > { %v14613_v55 = vpop.f32.mrb[99].mxu0  ;;  %v5813_v36 = vadd.f32 %v14567_v22, %v5639_v32  ;;  %v16581_v22 = vld [vmem:[%s17308_s21 + $0x3b0] ss:$8 sps:$4 sm:$0xff]   ;;  %v16620_v32 = vld [vmem:[%s17308_s21 + $0x3e0] ss:$8 sps:$4 sm:$0xff]  }
 0xb07   : > { %v16625_v2 = vld [vmem:[%s17308_s21 + $0x3f4] ss:$8 sps:$4 sm:$0xff]   ;;  %v16631_v37 = vld [vmem:[%s17308_s21 + $0x404] ss:$8 sps:$4 sm:$0xff]   ;;  %v16592_v55 = vld [vmem:[%s21047_s1 + $0x60] ss:$24 sps:$4 sm:$0xff]  }
 0xb20   : > { %v14587_v63 = vpop.f32.mrb[244].mxu1 }
 0xb21   : > { %v14588_v4 = vpop.f32.mrb[245].mxu1 }
 0xb22   : > { %v14589_v17 = vadd.f32 %v14588_v4, %v14587_v63  ;;  %v14590_v44 = vpop.f32.mrb[246].mxu1  ;;  %v16629_v63 = vld [vmem:[%s17308_s21 + $0x400] ss:$8 sps:$4 sm:$0xff]   ;;  %v16634_v4 = vld [vmem:[%s17308_s21 + $0x414] ss:$8 sps:$4 sm:$0xff]  }
 0xb23   : > { %v14591_v14 = vpop.f32.mrb[247].mxu1  ;;  %v16640_v44 = vld [vmem:[%s17308_s21 + $0x424] ss:$8 sps:$4 sm:$0xff]  }
 0xb24   : > { %v5987_v3 = vadd.f32 %v14589_v17, %v5813_v36  ;;  %v16593_v36 = vld [vmem:[%s21047_s1 + $0x94] ss:$24 sps:$4 sm:$0xff]   ;;  %v16632_v17 = vld [vmem:[%s17308_s21 + $0x410] ss:$8 sps:$4 sm:$0xff]  }
 0xb25   : > { %v16595_v14 = vld [vmem:[%s21047_s1 + $0x90] ss:$24 sps:$4 sm:$0xff]  }
 0xb26   : > { %v6161_v46 = vadd.f32 %v14611_v34, %v5987_v3  ;;  %v16623_v34 = vld [vmem:[%s17308_s21 + $0x3f0] ss:$8 sps:$4 sm:$0xff]   ;;  %v16596_v3 = vld [vmem:[%s21047_s1 + $0xc4] ss:$24 sps:$4 sm:$0xff]  }
 0xb40   : > { %v14631_v15 = vpop.f32.mrb[248].mxu1 }
 0xb41   : > { %v14632_v53 = vpop.f32.mrb[249].mxu1 }
 0xb42   : > { %v14633_v30 = vadd.f32 %v14632_v53, %v14631_v15  ;;  %v14634_v38 = vpop.f32.mrb[250].mxu1  ;;  %v16643_v15 = vld [vmem:[%s17308_s21 + $0x434] ss:$8 sps:$4 sm:$0xff]   ;;  %v16641_v53 = vld [vmem:[%s17308_s21 + $0x430] ss:$8 sps:$4 sm:$0xff]  }
 0xb43   : > { %v14635_v1 = vpop.f32.mrb[251].mxu1  ;;  %v16598_v38 = vld [vmem:[%s21047_s1 + $0xc0] ss:$24 sps:$4 sm:$0xff]  }
 0xb44   : > { %v6335_v25 = vadd.f32 %v14633_v30, %v6161_v46  ;;  %v16638_v46 = vld [vmem:[%s17308_s21 + $0x420] ss:$8 sps:$4 sm:$0xff]   ;;  %v16649_v30 = vld [vmem:[%s17308_s21 + $0x444] ss:$8 sps:$4 sm:$0xff]  }
 0xb45   : > { %v16599_v1 = vld [vmem:[%s21047_s1 + $0xf4] ss:$24 sps:$4 sm:$0xff]  }
 0xb46   : > { %v6336_v5 = vmax.f32 %v6335_v25, 0.0  ;;  %v16647_v25 = vld [vmem:[%s17308_s21 + $0x440] ss:$8 sps:$4 sm:$0xff]  }
 0xb48   : > { %v6337_v40 = vpack.c.bf16 %v6336_v5, %v6336_v5  ;;  %v16652_v5 = vld [vmem:[%s17308_s21 + $0x454] ss:$8 sps:$4 sm:$0xff]  }
 0xb4a   : > { %15332 = vmatmul.mubr.msk.bf16.vlgmr.msra.gmra.mrb[100].mxu0 %vm4933_vm8, %v6337_v40  ;;  %v16601_v40 = vld [vmem:[%s21047_s1 + $0xf0] ss:$24 sps:$4 sm:$0xff]  }
 0xb4b   : > { %7750 = vmatpush1.bf16.msra.mxu0 %v16536_v13  ;;  %7781 = vmatprep.mubr.bf16.mxu0 %v16586_v16  ;;  %v16650_v13 = vld [vmem:[%s17308_s21 + $0x450] ss:$8 sps:$4 sm:$0xff]   ;;  %v16658_v16 = vld [vmem:[%s17308_s21 + $0x464] ss:$8 sps:$4 sm:$0xff]  }
 0xb4c   : > { %7751 = vmatprep.subr.bf16.mxu0 %v16541_v45  ;;  %v16602_v45 = vld [vmem:[%s21047_s1 + $0x124] ss:$24 sps:$4 sm:$0xff]  }
 0xb4f   : > { %7752 = vmatpush1.bf16.msra.mxu0 %v16539_v43  ;;  %v16656_v43 = vld [vmem:[%s17308_s21 + $0x460] ss:$8 sps:$4 sm:$0xff]  }
 0xb50   : > { %7753 = vmatprep.subr.bf16.mxu0 %v16544_v27  ;;  %v16661_v27 = vld [vmem:[%s17308_s21 + $0x474] ss:$8 sps:$4 sm:$0xff]  }
 0xb53   : > { %7754 = vmatpush1.bf16.msra.mxu0 %v16542_v47  ;;  %v16659_v47 = vld [vmem:[%s17308_s21 + $0x470] ss:$8 sps:$4 sm:$0xff]  }
 0xb54   : > { %7755 = vmatprep.subr.bf16.mxu0 %v16547_v49  ;;  %v16667_v49 = vld [vmem:[%s17308_s21 + $0x484] ss:$8 sps:$4 sm:$0xff]  }
 0xb57   : > { %7756 = vmatpush1.bf16.msra.mxu0 %v16545_v28  ;;  %v16604_v28 = vld [vmem:[%s21047_s1 + $0x120] ss:$24 sps:$4 sm:$0xff]  }
 0xb58   : > { %7757 = vmatprep.subr.bf16.mxu0 %v16550_v33  ;;  %v16605_v33 = vld [vmem:[%s21047_s1 + $0x154] ss:$24 sps:$4 sm:$0xff]  }
 0xb5b   : > { %7758 = vmatpush1.bf16.msra.mxu0 %v16548_v31  ;;  %v16665_v31 = vld [vmem:[%s17308_s21 + $0x480] ss:$8 sps:$4 sm:$0xff]  }
 0xb5c   : > { %7759 = vmatprep.subr.bf16.mxu0 %v16553_v57  ;;  %v16670_v57 = vld [vmem:[%s17308_s21 + $0x494] ss:$8 sps:$4 sm:$0xff]  }
 0xb5f   : > { %7760 = vmatpush1.bf16.msra.mxu0 %v16551_v6  ;;  %v16668_v6 = vld [vmem:[%s17308_s21 + $0x490] ss:$8 sps:$4 sm:$0xff]  }
 0xb60   : > { %7761 = vmatprep.subr.bf16.mxu0 %v16556_v10  ;;  %v16676_v10 = vld [vmem:[%s17308_s21 + $0x4a4] ss:$8 sps:$4 sm:$0xff]  }
 0xb63   : > { %7762 = vmatpush1.bf16.msra.mxu0 %v16554_v12  ;;  %v16607_v12 = vld [vmem:[%s21047_s1 + $0x150] ss:$24 sps:$4 sm:$0xff]  }
 0xb64   : > { %7763 = vmatprep.subr.bf16.mxu0 %v16559_v60  ;;  %v16608_v60 = vld [vmem:[%s21047_s1 + $0x184] ss:$24 sps:$4 sm:$0xff]  }
 0xb67   : > { %7764 = vmatpush1.bf16.msra.mxu0 %v16557_v39  ;;  %v16674_v39 = vld [vmem:[%s17308_s21 + $0x4a0] ss:$8 sps:$4 sm:$0xff]  }
 0xb68   : > { %7765 = vmatprep.subr.bf16.mxu0 %v16562_v9  ;;  %v16679_v9 = vld [vmem:[%s17308_s21 + $0x4b4] ss:$8 sps:$4 sm:$0xff]  }
 0xb6b   : > { %7766 = vmatpush1.bf16.msra.mxu0 %v16560_v42  ;;  %v16677_v42 = vld [vmem:[%s17308_s21 + $0x4b0] ss:$8 sps:$4 sm:$0xff]  }
 0xb6c   : > { %7767 = vmatprep.subr.bf16.mxu0 %v16565_v62  ;;  %v16610_v62 = vld [vmem:[%s21047_s1 + $0x180] ss:$24 sps:$4 sm:$0xff]  }
 0xb6f   : > { %7768 = vmatpush1.bf16.msra.mxu0 %v16563_v21  ;;  %v16617_v21 = vld [vmem:[%s21047_s1 + $0x1b4] ss:$24 sps:$4 sm:$0xff]  }
 0xb70   : > { %7769 = vmatprep.subr.bf16.mxu0 %v16568_v41  ;;  %v16709_v41 = vld [vmem:[%s17308_s21 + $0x4c4] ss:$8 sps:$4 sm:$0xff]  }
 0xb73   : > { %7770 = vmatpush1.bf16.msra.mxu0 %v16566_v61  ;;  %v16619_v61 = vld [vmem:[%s21047_s1 + $0x1b0] ss:$24 sps:$4 sm:$0xff]  }
 0xb74   : > { %7771 = vmatprep.subr.bf16.mxu0 %v16571_v51  ;;  %v16626_v51 = vld [vmem:[%s21047_s1 + $0x1e4] ss:$24 sps:$4 sm:$0xff]  }
 0xb77   : > { %7772 = vmatpush1.bf16.msra.mxu0 %v16569_v59  ;;  %v16628_v59 = vld [vmem:[%s21047_s1 + $0x1e0] ss:$24 sps:$4 sm:$0xff]  }
 0xb78   : > { %7773 = vmatprep.subr.bf16.mxu0 %v16574_v18  ;;  %v16635_v18 = vld [vmem:[%s21047_s1 + $0x214] ss:$24 sps:$4 sm:$0xff]  }
 0xb7b   : > { %7774 = vmatpush1.bf16.msra.mxu0 %v16572_v7  ;;  %v16637_v7 = vld [vmem:[%s21047_s1 + $0x210] ss:$24 sps:$4 sm:$0xff]  }
 0xb7c   : > { %7775 = vmatprep.subr.bf16.mxu0 %v16577_v8  ;;  %v16644_v8 = vld [vmem:[%s21047_s1 + $0x244] ss:$24 sps:$4 sm:$0xff]  }
 0xb7f   : > { %7776 = vmatpush1.bf16.msra.mxu0 %v16575_v11  ;;  %v16646_v11 = vld [vmem:[%s21047_s1 + $0x240] ss:$24 sps:$4 sm:$0xff]  }
 0xb80   : > { %7777 = vmatprep.subr.bf16.mxu0 %v16580_v26  ;;  %v16653_v26 = vld [vmem:[%s21047_s1 + $0x274] ss:$24 sps:$4 sm:$0xff]  }
 0xb83   : > { %7778 = vmatpush1.bf16.msra.mxu0 %v16578_v20  ;;  %v16655_v20 = vld [vmem:[%s21047_s1 + $0x270] ss:$24 sps:$4 sm:$0xff]  }
 0xb84   : > { %7779 = vmatprep.subr.bf16.mxu0 %v16583_v19  ;;  %v16662_v19 = vld [vmem:[%s21047_s1 + $0x2a4] ss:$24 sps:$4 sm:$0xff]  }
 0xb87   : > { %7780 = vmatpush1.bf16.msra.mxu0 %v16581_v22  ;;  %v16664_v22 = vld [vmem:[%s21047_s1 + $0x2a0] ss:$24 sps:$4 sm:$0xff]  }
 0xb88   : > { %7942 = vmatprep.subr.bf16.mxu0 %v16613_v50  ;;  %v16671_v50 = vld [vmem:[%s21047_s1 + $0x2d4] ss:$24 sps:$4 sm:$0xff]  }
 0xb8a   : > { %7782 = vmatmul.mubr.bf16.vlgmr.msra.gmra.mrb[104].mxu0 %v16584_v35  ;;  %v16673_v35 = vld [vmem:[%s21047_s1 + $0x2d0] ss:$24 sps:$4 sm:$0xff]  }
 0xb8b   : > { %7791 = vmatprep.mubr.bf16.mxu0 %v16587_v23  ;;  %7943 = vmatpush1.bf16.msra.mxu0 %v16611_v52  ;;  %v16682_v23 = vld [vmem:[%s21047_s1 + $0xc] ss:$24 sps:$4 sm:$0xff]   ;;  %v16680_v52 = vld [vmem:[%s21047_s1 + $0x8] ss:$24 sps:$4 sm:$0xff]  }
 0xb8c   : > { %7944 = vmatprep.subr.bf16.mxu0 %v16616_v24  ;;  %v16683_v24 = vld [vmem:[%s21047_s1 + $0x3c] ss:$24 sps:$4 sm:$0xff]  }
 0xb8f   : > { %7945 = vmatpush1.bf16.msra.mxu0 %v16614_v29  ;;  %v16707_v29 = vld [vmem:[%s17308_s21 + $0x4c0] ss:$8 sps:$4 sm:$0xff]  }
 0xb90   : > { %7946 = vmatprep.subr.bf16.mxu0 %v16622_v48  ;;  %v16717_v48 = vld [vmem:[%s17308_s21 + $0x4d4] ss:$8 sps:$4 sm:$0xff]  }
 0xb92   : > { %7792 = vmatmul.mubr.bf16.gmra.mrb[108].mxu0 %v16589_v0  ;;  %v16715_v0 = vld [vmem:[%s17308_s21 + $0x4d0] ss:$8 sps:$4 sm:$0xff]  }
 0xb93   : > { %7801 = vmatprep.mubr.bf16.mxu0 %v16590_v56  ;;  %7947 = vmatpush1.bf16.msra.mxu0 %v16620_v32  ;;  %v16724_v56 = vld [vmem:[%s17308_s21 + $0x4e4] ss:$8 sps:$4 sm:$0xff]   ;;  %v16685_v32 = vld [vmem:[%s21047_s1 + $0x38] ss:$24 sps:$4 sm:$0xff]  }
 0xb94   : > { %7948 = vmatprep.subr.bf16.mxu0 %v16625_v2  ;;  %v16686_v2 = vld [vmem:[%s21047_s1 + $0x6c] ss:$24 sps:$4 sm:$0xff]  }
 0xb97   : > { %7949 = vmatpush1.bf16.msra.mxu0 %v16623_v34  ;;  %v16722_v34 = vld [vmem:[%s17308_s21 + $0x4e0] ss:$8 sps:$4 sm:$0xff]  }
 0xb98   : > { %7950 = vmatprep.subr.bf16.mxu0 %v16631_v37  ;;  %v16727_v37 = vld [vmem:[%s17308_s21 + $0x4f4] ss:$8 sps:$4 sm:$0xff]  }
 0xb9a   : > { %7802 = vmatmul.mubr.bf16.gmra.mrb[112].mxu0 %v16592_v55  ;;  %v16725_v55 = vld [vmem:[%s17308_s21 + $0x4f0] ss:$8 sps:$4 sm:$0xff]  }
 0xb9b   : > { %7811 = vmatprep.mubr.bf16.mxu0 %v16593_v36  ;;  %7951 = vmatpush1.bf16.msra.mxu0 %v16629_v63  ;;  %v16733_v36 = vld [vmem:[%s17308_s21 + $0x504] ss:$8 sps:$4 sm:$0xff]   ;;  %v16688_v63 = vld [vmem:[%s21047_s1 + $0x68] ss:$24 sps:$4 sm:$0xff]  }
 0xb9c   : > { %7952 = vmatprep.subr.bf16.mxu0 %v16634_v4  ;;  %v16689_v4 = vld [vmem:[%s21047_s1 + $0x9c] ss:$24 sps:$4 sm:$0xff]  }
 0xb9f   : > { %7953 = vmatpush1.bf16.msra.mxu0 %v16632_v17  ;;  %v16731_v17 = vld [vmem:[%s17308_s21 + $0x500] ss:$8 sps:$4 sm:$0xff]  }
 0xba0   : > { %7954 = vmatprep.subr.bf16.mxu0 %v16640_v44  ;;  %v16736_v44 = vld [vmem:[%s17308_s21 + $0x514] ss:$8 sps:$4 sm:$0xff]  }
 0xba2   : > { %7812 = vmatmul.mubr.bf16.gmra.mrb[116].mxu0 %v16595_v14  ;;  %v6346_v14 = vld [vmem:[%s21059_s13] sm:$0x1] }
 0xba3   : > { %7821 = vmatprep.mubr.bf16.mxu0 %v16596_v3  ;;  %7955 = vmatpush1.bf16.msra.mxu0 %v16638_v46  ;;  %v16734_v3 = vld [vmem:[%s17308_s21 + $0x510] ss:$8 sps:$4 sm:$0xff]   ;;  %v16742_v46 = vld [vmem:[%s17308_s21 + $0x524] ss:$8 sps:$4 sm:$0xff]  }
 0xba4   : > { %7956 = vmatprep.subr.bf16.mxu0 %v16643_v15 }
 0xba7   : > { %7957 = vmatpush1.bf16.msra.mxu0 %v16641_v53 }
 0xba8   : > { %7958 = vmatprep.subr.bf16.mxu0 %v16649_v30 }
 0xbaa   : > { %7822 = vmatmul.mubr.bf16.gmra.mrb[120].mxu0 %v16598_v38  ;;  %v16691_v38 = vld [vmem:[%s21047_s1 + $0x98] ss:$24 sps:$4 sm:$0xff]  }
 0xbab   : > { %7831 = vmatprep.mubr.bf16.mxu0 %v16599_v1  ;;  %7959 = vmatpush1.bf16.msra.mxu0 %v16647_v25  ;;  %v16692_v25 = vld [vmem:[%s21047_s1 + $0xcc] ss:$24 sps:$4 sm:$0xff]  }
 0xbac   : > { %7960 = vmatprep.subr.bf16.mxu0 %v16652_v5  ;;  %v16740_v5 = vld [vmem:[%s17308_s21 + $0x520] ss:$8 sps:$4 sm:$0xff]  }
 0xbaf   : > { %7961 = vmatpush1.bf16.msra.mxu0 %v16650_v13 }
 0xbb0   : > { %7962 = vmatprep.subr.bf16.mxu0 %v16658_v16  ;;  %v16745_v16 = vld [vmem:[%s17308_s21 + $0x534] ss:$8 sps:$4 sm:$0xff]  }
 0xbb2   : > { %7832 = vmatmul.mubr.bf16.gmra.mrb[124].mxu0 %v16601_v40  ;;  %v16743_v40 = vld [vmem:[%s17308_s21 + $0x530] ss:$8 sps:$4 sm:$0xff]  }
 0xbb3   : > { %7841 = vmatprep.mubr.bf16.mxu0 %v16602_v45  ;;  %7963 = vmatpush1.bf16.msra.mxu0 %v16656_v43  ;;  %v16751_v45 = vld [vmem:[%s17308_s21 + $0x544] ss:$8 sps:$4 sm:$0xff]   ;;  %v16694_v43 = vld [vmem:[%s21047_s1 + $0xc8] ss:$24 sps:$4 sm:$0xff]  }
 0xbb4   : > { %7964 = vmatprep.subr.bf16.mxu0 %v16661_v27  ;;  %v16695_v27 = vld [vmem:[%s21047_s1 + $0xfc] ss:$24 sps:$4 sm:$0xff]  }
 0xbb7   : > { %7965 = vmatpush1.bf16.msra.mxu0 %v16659_v47  ;;  %v16749_v47 = vld [vmem:[%s17308_s21 + $0x540] ss:$8 sps:$4 sm:$0xff]  }
 0xbb8   : > { %7966 = vmatprep.subr.bf16.mxu0 %v16667_v49  ;;  %v16754_v49 = vld [vmem:[%s17308_s21 + $0x554] ss:$8 sps:$4 sm:$0xff]  }
 0xbba   : > { %7842 = vmatmul.mubr.bf16.gmra.mrb[128].mxu0 %v16604_v28  ;;  %v16752_v28 = vld [vmem:[%s17308_s21 + $0x550] ss:$8 sps:$4 sm:$0xff]  }
 0xbbb   : > { %7851 = vmatprep.mubr.bf16.mxu0 %v16605_v33  ;;  %7967 = vmatpush1.bf16.msra.mxu0 %v16665_v31  ;;  %v16760_v33 = vld [vmem:[%s17308_s21 + $0x564] ss:$8 sps:$4 sm:$0xff]   ;;  %v16697_v31 = vld [vmem:[%s21047_s1 + $0xf8] ss:$24 sps:$4 sm:$0xff]  }
 0xbbc   : > { %7968 = vmatprep.subr.bf16.mxu0 %v16670_v57  ;;  %v16698_v57 = vld [vmem:[%s21047_s1 + $0x12c] ss:$24 sps:$4 sm:$0xff]  }
 0xbbf   : > { %7969 = vmatpush1.bf16.msra.mxu0 %v16668_v6  ;;  %v16758_v6 = vld [vmem:[%s17308_s21 + $0x560] ss:$8 sps:$4 sm:$0xff]  }
 0xbc0   : > { %7970 = vmatprep.subr.bf16.mxu0 %v16676_v10  ;;  %v16761_v10 = vld [vmem:[%s17308_s21 + $0x574] ss:$8 sps:$4 sm:$0x3f]  }
 0xbc2   : > { %7852 = vmatmul.mubr.bf16.gmra.mrb[132].mxu0 %v16607_v12  ;;  %v16763_v12 = vld [vmem:[%s17308_s21 + $0x570] ss:$8 sps:$4 sm:$0x3f]  }
 0xbc3   : > { %7861 = vmatprep.mubr.bf16.mxu0 %v16608_v60  ;;  %7971 = vmatpush1.bf16.msra.mxu0 %v16674_v39  ;;  %v7744_v60 = vsel %vm1800_vm0, %v16763_v12, 0  ;;  %v16700_v39 = vld [vmem:[%s21047_s1 + $0x128] ss:$24 sps:$4 sm:$0xff]   ;;  %v16806_v12 = vld [vmem:[%s21047_s1 + $0x2b4] ss:$24 sps:$4 sm:$0xff]  }
 0xbc4   : > { %7972 = vmatprep.subr.bf16.mxu0 %v16679_v9  ;;  %v16701_v9 = vld [vmem:[%s21047_s1 + $0x15c] ss:$24 sps:$4 sm:$0xff]  }
 0xbc7   : > { %7973 = vmatpush1.bf16.msra.mxu0 %v16677_v42  ;;  %v16703_v42 = vld [vmem:[%s21047_s1 + $0x158] ss:$24 sps:$4 sm:$0xff]  }
 0xbc8   : > { %8135 = vmatprep.subr.bf16.mxu0 %v16709_v41  ;;  %v16710_v41 = vld [vmem:[%s21047_s1 + $0x1bc] ss:$24 sps:$4 sm:$0xff]  }
 0xbca   : > { %7862 = vmatmul.mubr.bf16.gmra.mrb[136].mxu0 %v16610_v62  ;;  %v16704_v62 = vld [vmem:[%s21047_s1 + $0x18c] ss:$24 sps:$4 sm:$0xff]  }
 0xbcb   : > { %7871 = vmatprep.mubr.bf16.mxu0 %v16617_v21  ;;  %v16706_v21 = vld [vmem:[%s21047_s1 + $0x188] ss:$24 sps:$4 sm:$0xff]  }
 0xbd2   : > { %7872 = vmatmul.mubr.bf16.gmra.mrb[140].mxu0 %v16619_v61  ;;  %v16712_v61 = vld [vmem:[%s21047_s1 + $0x1b8] ss:$24 sps:$4 sm:$0xff]  }
 0xbd3   : > { %7881 = vmatprep.mubr.bf16.mxu0 %v16626_v51  ;;  %v16713_v51 = vld [vmem:[%s21047_s1 + $0x1ec] ss:$24 sps:$4 sm:$0xff]  }
 0xbda   : > { %7882 = vmatmul.mubr.bf16.gmra.mrb[144].mxu0 %v16628_v59  ;;  %v16718_v59 = vld [vmem:[%s21047_s1 + $0x1e8] ss:$24 sps:$4 sm:$0xff]  }
 0xbdb   : > { %7891 = vmatprep.mubr.bf16.mxu0 %v16635_v18  ;;  %v16719_v18 = vld [vmem:[%s21047_s1 + $0x21c] ss:$24 sps:$4 sm:$0xff]  }
 0xbe2   : > { %7892 = vmatmul.mubr.bf16.gmra.mrb[148].mxu0 %v16637_v7  ;;  %v16721_v7 = vld [vmem:[%s21047_s1 + $0x218] ss:$24 sps:$4 sm:$0xff]  }
 0xbe3   : > { %7901 = vmatprep.mubr.bf16.mxu0 %v16644_v8  ;;  %v16728_v8 = vld [vmem:[%s21047_s1 + $0x24c] ss:$24 sps:$4 sm:$0xff]  }
 0xbea   : > { %7902 = vmatmul.mubr.bf16.gmra.mrb[152].mxu0 %v16646_v11  ;;  %v16730_v11 = vld [vmem:[%s21047_s1 + $0x248] ss:$24 sps:$4 sm:$0xff]  }
 0xbeb   : > { %7911 = vmatprep.mubr.bf16.mxu0 %v16653_v26  ;;  %v16737_v26 = vld [vmem:[%s21047_s1 + $0x27c] ss:$24 sps:$4 sm:$0xff]  }
 0xbf2   : > { %7912 = vmatmul.mubr.bf16.gmra.mrb[156].mxu0 %v16655_v20  ;;  %v16739_v20 = vld [vmem:[%s21047_s1 + $0x278] ss:$24 sps:$4 sm:$0xff]  }
 0xbf3   : > { %7921 = vmatprep.mubr.bf16.mxu0 %v16662_v19  ;;  %v16746_v19 = vld [vmem:[%s21047_s1 + $0x2ac] ss:$24 sps:$4 sm:$0xff]  }
 0xbfa   : > { %7922 = vmatmul.mubr.bf16.gmra.mrb[160].mxu0 %v16664_v22  ;;  %v16748_v22 = vld [vmem:[%s21047_s1 + $0x2a8] ss:$24 sps:$4 sm:$0xff]  }
 0xbfb   : > { %7931 = vmatprep.mubr.bf16.mxu0 %v16671_v50  ;;  %v16755_v50 = vld [vmem:[%s21047_s1 + $0x2dc] ss:$24 sps:$4 sm:$0xff]  }
 0xc02   : > { %7932 = vmatmul.mubr.bf16.gmra.mrb[164].mxu0 %v16673_v35  ;;  %v16757_v35 = vld [vmem:[%s21047_s1 + $0x2d8] ss:$24 sps:$4 sm:$0xff]  }
 0xc03   : > { %7974 = vmatprep.mubr.bf16.mxu0 %v16682_v23  ;;  %v16766_v23 = vld [vmem:[%s21047_s1 + $0x14] ss:$24 sps:$4 sm:$0xff]  }
 0xc0a   : > { %7975 = vmatmul.mubr.bf16.vlgmr.msra.gmra.mrb[104].mxu0 %v16680_v52  ;;  %v16812_v52 = vld [vmem:[%s21049_s3] sm:$0xff]  }
 0xc0b   : > { %7984 = vmatprep.mubr.bf16.mxu0 %v16683_v24  ;;  %8136 = vmatpush1.bf16.msra.mxu0 %v16707_v29  ;;  %v16813_v24 = vld [vmem:[%s21049_s3 + $0x8] sm:$0xff]  }
 0xc0c   : > { %8137 = vmatprep.subr.bf16.mxu0 %v16717_v48  ;;  %8576 = vmatpush1.bf16.msra.mxu1 %v16812_v52  ;;  %v16764_v29 = vld [vmem:[%s21047_s1 + $0x10] ss:$24 sps:$4 sm:$0xff]   ;;  %v16767_v48 = vld [vmem:[%s21047_s1 + $0x44] ss:$24 sps:$4 sm:$0xff]  }
 0xc0d   : > { %8577 = vmatprep.subr.bf16.mxu1 %v17165_v54 }
 0xc0f   : > { %8138 = vmatpush1.bf16.msra.mxu0 %v16715_v0  ;;  %v16814_v0 = vld [vmem:[%s21049_s3 + $0x10] sm:$0xff]  }
 0xc10   : > { %8139 = vmatprep.subr.bf16.mxu0 %v16724_v56  ;;  %8578 = vmatpush1.bf16.msra.mxu1 %v16813_v24  ;;  %v16815_v56 = vld [vmem:[%s21049_s3 + $0x18] sm:$0xff]  }
 0xc11   : > { %8579 = vmatprep.subr.bf16.mxu1 %v17165_v54 }
 0xc12   : > { %7985 = vmatmul.mubr.bf16.gmra.mrb[108].mxu0 %v16685_v32  ;;  %v16769_v32 = vld [vmem:[%s21047_s1 + $0x40] ss:$24 sps:$4 sm:$0xff]  }
 0xc13   : > { %7994 = vmatprep.mubr.bf16.mxu0 %v16686_v2  ;;  %8140 = vmatpush1.bf16.msra.mxu0 %v16722_v34  ;;  %v16770_v2 = vld [vmem:[%s21047_s1 + $0x74] ss:$24 sps:$4 sm:$0xff]   ;;  %v16816_v34 = vld [vmem:[%s21049_s3 + $0x20] sm:$0xff]  }
 0xc14   : > { %8141 = vmatprep.subr.bf16.mxu0 %v16727_v37  ;;  %8580 = vmatpush1.bf16.msra.mxu1 %v16814_v0  ;;  %v16817_v37 = vld [vmem:[%s21049_s3 + $0x28] sm:$0xff]  }
 0xc15   : > { %8581 = vmatprep.subr.bf16.mxu1 %v17165_v54 }
 0xc17   : > { %8142 = vmatpush1.bf16.msra.mxu0 %v16725_v55  ;;  %v16772_v55 = vld [vmem:[%s21047_s1 + $0x70] ss:$24 sps:$4 sm:$0xff]  }
 0xc18   : > { %8143 = vmatprep.subr.bf16.mxu0 %v16733_v36  ;;  %8582 = vmatpush1.bf16.msra.mxu1 %v16815_v56  ;;  %v16773_v36 = vld [vmem:[%s21047_s1 + $0xa4] ss:$24 sps:$4 sm:$0xff]  }
 0xc19   : > { %8583 = vmatprep.subr.bf16.mxu1 %v17165_v54 }
 0xc1a   : > { %7995 = vmatmul.mubr.bf16.gmra.mrb[112].mxu0 %v16688_v63  ;;  %v16818_v63 = vld [vmem:[%s21049_s3 + $0x30] sm:$0xff]  }
 0xc1b   : > { %8004 = vmatprep.mubr.bf16.mxu0 %v16689_v4  ;;  %8144 = vmatpush1.bf16.msra.mxu0 %v16731_v17  ;;  %v16819_v4 = vld [vmem:[%s21049_s3 + $0x38] sm:$0xff]  }
 0xc1c   : > { %8145 = vmatprep.subr.bf16.mxu0 %v16736_v44  ;;  %8584 = vmatpush1.bf16.msra.mxu1 %v16816_v34  ;;  %v16775_v17 = vld [vmem:[%s21047_s1 + $0xa0] ss:$24 sps:$4 sm:$0xff]   ;;  %v16776_v44 = vld [vmem:[%s21047_s1 + $0xd4] ss:$24 sps:$4 sm:$0xff]  }
 0xc1d   : > { %v6408_v15 = vpop.f32.mrb[100].mxu0  ;;  %8585 = vmatprep.subr.bf16.mxu1 %v17165_v54 }
 0xc1e   : > { %v6409_v53 = vadd.f32 %v6408_v15, %v6346_v14  ;;  %v15333_v30 = vpop.f32.mrb[101].mxu0  ;;  %v16820_v14 = vld [vmem:[%s21049_s3 + $0x40] sm:$0xff]  }
 0xc1f   : > { %v6411_v1 = vpop.f32.mrb[102].mxu0  ;;  %8146 = vmatpush1.bf16.msra.mxu0 %v16734_v3  ;;  %v16821_v3 = vld [vmem:[%s21049_s3 + $0x48] sm:$0xff]   ;;  %v16779_v15 = vld [vmem:[%s21047_s1 + $0x104] ss:$24 sps:$4 sm:$0xff]  }
 0xc20   : > { %6415 = vst.msk [vmem:[%s19451_s24] sm:$0x1] %vm6414_vm11, %v6409_v53  ;;  %v15334_v13 = vpop.f32.mrb[103].mxu0  ;;  %8147 = vmatprep.subr.bf16.mxu0 %v16742_v46  ;;  %8586 = vmatpush1.bf16.msra.mxu1 %v16817_v37  ;;  %v16778_v46 = vld [vmem:[%s21047_s1 + $0xd0] ss:$24 sps:$4 sm:$0xff]  }
 0xc21   : > { %8587 = vmatprep.subr.bf16.mxu1 %v17165_v54  ;;  %v16781_v53 = vld [vmem:[%s21047_s1 + $0x100] ss:$24 sps:$4 sm:$0xff]   ;;  %v16782_v30 = vld [vmem:[%s21047_s1 + $0x134] ss:$24 sps:$4 sm:$0xff]   ;;  %v16785_v1 = vld [vmem:[%s21047_s1 + $0x164] ss:$24 sps:$4 sm:$0xff]  }
 0xc22   : > { %8005 = vmatmul.mubr.bf16.gmra.mrb[116].mxu0 %v16691_v38  ;;  %v16784_v38 = vld [vmem:[%s21047_s1 + $0x130] ss:$24 sps:$4 sm:$0xff]  }
 0xc23   : > { %8014 = vmatprep.mubr.bf16.mxu0 %v16692_v25  ;;  %8148 = vmatpush1.bf16.msra.mxu0 %v16740_v5  ;;  %v16787_v25 = vld [vmem:[%s21047_s1 + $0x160] ss:$24 sps:$4 sm:$0xff]   ;;  %v16788_v5 = vld [vmem:[%s21047_s1 + $0x194] ss:$24 sps:$4 sm:$0xff]   ;;  %v16790_v13 = vld [vmem:[%s21047_s1 + $0x190] ss:$24 sps:$4 sm:$0xff]  }
 0xc24   : > { %8149 = vmatprep.subr.bf16.mxu0 %v16745_v16  ;;  %8588 = vmatpush1.bf16.msra.mxu1 %v16818_v63  ;;  %v16791_v16 = vld [vmem:[%s21047_s1 + $0x1c4] ss:$24 sps:$4 sm:$0xff]  }
 0xc25   : > { %8589 = vmatprep.subr.bf16.mxu1 %v17165_v54 }
 0xc27   : > { %8150 = vmatpush1.bf16.msra.mxu0 %v16743_v40  ;;  %v16793_v40 = vld [vmem:[%s21047_s1 + $0x1c0] ss:$24 sps:$4 sm:$0xff]  }
 0xc28   : > { %8151 = vmatprep.subr.bf16.mxu0 %v16751_v45  ;;  %8590 = vmatpush1.bf16.msra.mxu1 %v16819_v4  ;;  %v16794_v45 = vld [vmem:[%s21047_s1 + $0x1f4] ss:$24 sps:$4 sm:$0xff]  }
 0xc29   : > { %8591 = vmatprep.subr.bf16.mxu1 %v17165_v54 }
 0xc2a   : > { %8015 = vmatmul.mubr.bf16.gmra.mrb[120].mxu0 %v16694_v43  ;;  %v16796_v43 = vld [vmem:[%s21047_s1 + $0x1f0] ss:$24 sps:$4 sm:$0xff]  }
 0xc2b   : > { %8024 = vmatprep.mubr.bf16.mxu0 %v16695_v27  ;;  %8152 = vmatpush1.bf16.msra.mxu0 %v16749_v47  ;;  %v16797_v27 = vld [vmem:[%s21047_s1 + $0x224] ss:$24 sps:$4 sm:$0xff]   ;;  %v16822_v47 = vld [vmem:[%s21049_s3 + $0x50] sm:$0xff]  }
 0xc2c   : > { %8153 = vmatprep.subr.bf16.mxu0 %v16754_v49  ;;  %8592 = vmatpush1.bf16.msra.mxu1 %v16820_v14  ;;  %v16799_v49 = vld [vmem:[%s21047_s1 + $0x220] ss:$24 sps:$4 sm:$0xff]  }
 0xc2d   : > { %8593 = vmatprep.subr.bf16.mxu1 %v17165_v54 }
 0xc2f   : > { %8154 = vmatpush1.bf16.msra.mxu0 %v16752_v28  ;;  %v16800_v28 = vld [vmem:[%s21047_s1 + $0x254] ss:$24 sps:$4 sm:$0xff]  }
 0xc30   : > { %8155 = vmatprep.subr.bf16.mxu0 %v16760_v33  ;;  %8594 = vmatpush1.bf16.msra.mxu1 %v16821_v3  ;;  %v16823_v33 = vld [vmem:[%s21049_s3 + $0x58] sm:$0xff]  }
 0xc31   : > { %8595 = vmatprep.subr.bf16.mxu1 %v17165_v54 }
 0xc32   : > { %8025 = vmatmul.mubr.bf16.gmra.mrb[124].mxu0 %v16697_v31  ;;  %v16824_v31 = vld [vmem:[%s21049_s3 + $0x60] ss:$0 sps:$4 sm:$0x11]  }
 0xc33   : > { %8034 = vmatprep.mubr.bf16.mxu0 %v16698_v57  ;;  %8156 = vmatpush1.bf16.msra.mxu0 %v16758_v6  ;;  %v8573_v57 = vsel %vm2631_vm2, %v16824_v31, 0  ;;  %v16802_v6 = vld [vmem:[%s21047_s1 + $0x250] ss:$24 sps:$4 sm:$0xff]  }
 0xc34   : > { %13475 = vmatprep.subr.msk.bf16.mxu0 %vm1800_vm0, %v16761_v10  ;;  %8596 = vmatpush1.bf16.msra.mxu1 %v16822_v47  ;;  %v16803_v10 = vld [vmem:[%s21047_s1 + $0x284] ss:$24 sps:$4 sm:$0xff]  }
 0xc35   : > { %8597 = vmatprep.subr.bf16.mxu1 %v17165_v54 }
 0xc37   : > { %8158 = vmatpush1.bf16.msra.mxu0 %v7744_v60  ;;  %v16808_v60 = vld [vmem:[%s21047_s1 + $0x2b0] ss:$24 sps:$4 sm:$0xff]  }
 0xc38   : > { %8598 = vmatpush1.bf16.msra.mxu1 %v16823_v33 }
 0xc39   : > { %8599 = vmatprep.subr.bf16.mxu1 %v17165_v54  ;;  %v16805_v54 = vld [vmem:[%s21047_s1 + $0x280] ss:$24 sps:$4 sm:$0xff]  }
 0xc3a   : > { %8035 = vmatmul.mubr.bf16.gmra.mrb[128].mxu0 %v16700_v39  ;;  %v16809_v39 = vld [vmem:[%s21047_s1 + $0x2e4] ss:$24 sps:$4 sm:$0xff]  }
 0xc3b   : > { %8044 = vmatprep.mubr.bf16.mxu0 %v16701_v9  ;;  %v16811_v9 = vld [vmem:[%s21047_s1 + $0x2e0] ss:$24 sps:$4 sm:$0xff]  }
 0xc3c   : > { %8600 = vmatpush1.bf16.msra.mxu1 %v8573_v57 }
 0xc42   : > { %8045 = vmatmul.mubr.bf16.gmra.mrb[132].mxu0 %v16703_v42  ;;  %v6636_v42 = vpop.permute.xlu1 %6635 }
 0xc43   : > { %8054 = vmatprep.mubr.bf16.mxu0 %v16704_v62 }
 0xc4a   : > { %8055 = vmatmul.mubr.bf16.gmra.mrb[136].mxu0 %v16706_v21 }
 0xc4b   : > { %8064 = vmatprep.mubr.bf16.mxu0 %v16710_v41 }
 0xc52   : > { %8065 = vmatmul.mubr.bf16.gmra.mrb[140].mxu0 %v16712_v61  ;;  %v6641_v61 = vpop.permute.xlu0 %6640 }
 0xc53   : > { %8074 = vmatprep.mubr.bf16.mxu0 %v16713_v51 }
 0xc5a   : > { %8075 = vmatmul.mubr.bf16.gmra.mrb[144].mxu0 %v16718_v59 }
 0xc5b   : > { %8084 = vmatprep.mubr.bf16.mxu0 %v16719_v18 }
 0xc62   : > { %8085 = vmatmul.mubr.bf16.gmra.mrb[148].mxu0 %v16721_v7 }
 0xc63   : > { %8094 = vmatprep.mubr.bf16.mxu0 %v16728_v8 }
 0xc6a   : > { %8095 = vmatmul.mubr.bf16.gmra.mrb[152].mxu0 %v16730_v11 }
 0xc6b   : > { %8104 = vmatprep.mubr.bf16.mxu0 %v16737_v26 }
 0xc72   : > { %8105 = vmatmul.mubr.bf16.gmra.mrb[156].mxu0 %v16739_v20 }
 0xc73   : > { %8114 = vmatprep.mubr.bf16.mxu0 %v16746_v19 }
 0xc7a   : > { %8115 = vmatmul.mubr.bf16.gmra.mrb[160].mxu0 %v16748_v22 }
 0xc7b   : > { %8124 = vmatprep.mubr.bf16.mxu0 %v16755_v50  ;;  %v6646_v50 = vpop.permute.xlu1 %6645 }
 0xc7f   : > { %v6656_v4 = vpop.permute.xlu1 %6655 }
 0xc82   : > { %8125 = vmatmul.mubr.bf16.gmra.mrb[164].mxu0 %v16757_v35 }
 0xc83   : > { %13476 = vmatprep.mubr.msk.bf16.mxu0 %vm1751_vm1, %v16766_v23 }
 0xc8a   : > { %8168 = vmatmul.mubr.bf16.vlgmr.msra.gmra.mrb[104].mxu0 %v16764_v29  ;;  %v6651_v29 = vpop.permute.xlu0 %6650 }
 0xc8b   : > { %13477 = vmatprep.mubr.msk.bf16.mxu0 %vm1751_vm1, %v16767_v48 }
 0xc92   : > { %8178 = vmatmul.mubr.bf16.gmra.mrb[108].mxu0 %v16769_v32 }
 0xc93   : > { %13478 = vmatprep.mubr.msk.bf16.mxu0 %vm1751_vm1, %v16770_v2 }
 0xc9a   : > { %8188 = vmatmul.mubr.bf16.gmra.mrb[112].mxu0 %v16772_v55 }
 0xc9b   : > { %13479 = vmatprep.mubr.msk.bf16.mxu0 %vm1751_vm1, %v16773_v36 }
 0xca2   : > { %8198 = vmatmul.mubr.bf16.gmra.mrb[116].mxu0 %v16775_v17 }
 0xca3   : > { %13480 = vmatprep.mubr.msk.bf16.mxu0 %vm1751_vm1, %v16776_v44 }
 0xcaa   : > { %8208 = vmatmul.mubr.bf16.gmra.mrb[120].mxu0 %v16778_v46  ;;  %v6661_v46 = vpop.permute.xlu0 %6660 }
 0xcab   : > { %13481 = vmatprep.mubr.msk.bf16.mxu0 %vm1751_vm1, %v16779_v15 }
 0xcb2   : > { %8218 = vmatmul.mubr.bf16.gmra.mrb[124].mxu0 %v16781_v53 }
 0xcb3   : > { %13482 = vmatprep.mubr.msk.bf16.mxu0 %vm1751_vm1, %v16782_v30 }
 0xcba   : > { %8228 = vmatmul.mubr.bf16.gmra.mrb[128].mxu0 %v16784_v38 }
 0xcbb   : > { %13483 = vmatprep.mubr.msk.bf16.mxu0 %vm1751_vm1, %v16785_v1 }
 0xcc2   : > { %8238 = vmatmul.mubr.bf16.gmra.mrb[132].mxu0 %v16787_v25 }
 0xcc3   : > { %13484 = vmatprep.mubr.msk.bf16.mxu0 %vm1751_vm1, %v16788_v5 }
 0xcca   : > { %8248 = vmatmul.mubr.bf16.gmra.mrb[136].mxu0 %v16790_v13 }
 0xccb   : > { %13485 = vmatprep.mubr.msk.bf16.mxu0 %vm1751_vm1, %v16791_v16 }
 0xcd2   : > { %8258 = vmatmul.mubr.bf16.gmra.mrb[140].mxu0 %v16793_v40 }
 0xcd3   : > { %13486 = vmatprep.mubr.msk.bf16.mxu0 %vm1751_vm1, %v16794_v45  ;;  %v6666_v45 = vpop.permute.xlu1 %6665 }
 0xcda   : > { %8268 = vmatmul.mubr.bf16.gmra.mrb[144].mxu0 %v16796_v43 }
 0xcdb   : > { %13487 = vmatprep.mubr.msk.bf16.mxu0 %vm1751_vm1, %v16797_v27 }
 0xce2   : > { %8278 = vmatmul.mubr.bf16.gmra.mrb[148].mxu0 %v16799_v49 }
 0xce3   : > { %13488 = vmatprep.mubr.msk.bf16.mxu0 %vm1751_vm1, %v16800_v28  ;;  %v6671_v28 = vpop.permute.xlu0 %6670 }
 0xcea   : > { %8288 = vmatmul.mubr.bf16.gmra.mrb[152].mxu0 %v16802_v6 }
 0xceb   : > { %13489 = vmatprep.mubr.msk.bf16.mxu0 %vm1751_vm1, %v16803_v10 }
 0xcf2   : > { %8298 = vmatmul.mubr.bf16.gmra.mrb[156].mxu0 %v16805_v54 }
 0xcf3   : > { %13490 = vmatprep.mubr.msk.bf16.mxu0 %vm1751_vm1, %v16806_v12 }
 0xcfa   : > { %8308 = vmatmul.mubr.bf16.gmra.mrb[160].mxu0 %v16808_v60 }
 0xcfb   : > { %13491 = vmatprep.mubr.msk.bf16.mxu0 %vm1751_vm1, %v16809_v39 }
 0xd02   : > { %8318 = vmatmul.mubr.bf16.gmra.mrb[164].mxu0 %v16811_v9 }
 0xd5d   : > { %v8169_v62 = vpop.f32.mrb[104].mxu0 }
 0xd5e   : > { %v15531_v21 = vadd.f32 %v8169_v62, %v6636_v42  ;;  %v8171_v41 = vpop.f32.mrb[105].mxu0 }
 0xd5f   : > { %v15532_v51 = vadd.f32 %v8171_v41, %v6636_v42  ;;  %v8173_v59 = vpop.f32.mrb[106].mxu0  ;;  %v6676_v42 = vpop.permute.xlu1 %6675 }
 0xd60   : > { %v15533_v18 = vadd.f32 %v8173_v59, %v6641_v61  ;;  %v8175_v7 = vpop.f32.mrb[107].mxu0  ;;  %v8328_v11 = vmax.f32 %v15531_v21, 0.0 }
 0xd61   : > { %v15534_v8 = vadd.f32 %v8175_v7, %v6641_v61  ;;  %v8329_v20 = vmax.f32 %v15532_v51, 0.0  ;;  %v6681_v51 = vpop.permute.xlu0 %6680 }
 0xd62   : > { %v8330_v26 = vmax.f32 %v15533_v18, 0.0 }
 0xd63   : > { %v8331_v19 = vmax.f32 %v15534_v8, 0.0 }
 0xd64   : > { %v8392_v22 = vpack.c.bf16 %v8330_v26, %v8328_v11 }
 0xd65   : > { %v8393_v35 = vpack.c.bf16 %v8331_v19, %v8329_v20  ;;  %v8179_v23 = vpop.f32.mrb[108].mxu0 }
 0xd66   : > { %v15535_v52 = vadd.f32 %v8179_v23, %v6646_v50  ;;  %v8181_v24 = vpop.f32.mrb[109].mxu0 }
 0xd67   : > { %v15536_v48 = vadd.f32 %v8181_v24, %v6646_v50  ;;  %v8183_v0 = vpop.f32.mrb[110].mxu0  ;;  %13505 = vmatprep.mubr.msk.bf16.mxu1 %vm2582_vm3, %v8393_v35  ;;  %v6686_v35 = vpop.permute.xlu1 %6685 }
 0xd68   : > { %v15537_v56 = vadd.f32 %v8183_v0, %v6651_v29  ;;  %v8185_v32 = vpop.f32.mrb[111].mxu0  ;;  %8608 = vmatmul.mubr.bf16.vlgmr.msra.gmra.mrb[252].mxu1 %v8392_v22  ;;  %v8332_v34 = vmax.f32 %v15535_v52, 0.0 }
 0xd69   : > { %v15538_v2 = vadd.f32 %v8185_v32, %v6651_v29  ;;  %v8333_v55 = vmax.f32 %v15536_v48, 0.0  ;;  %v6691_v48 = vpop.permute.xlu0 %6690 }
 0xd6a   : > { %v8334_v37 = vmax.f32 %v15537_v56, 0.0 }
 0xd6b   : > { %v8335_v36 = vmax.f32 %v15538_v2, 0.0 }
 0xd6c   : > { %v8394_v63 = vpack.c.bf16 %v8334_v37, %v8332_v34 }
 0xd6d   : > { %v8395_v17 = vpack.c.bf16 %v8335_v36, %v8333_v55  ;;  %v8189_v44 = vpop.f32.mrb[112].mxu0 }
 0xd6e   : > { %v15539_v14 = vadd.f32 %v8189_v44, %v6656_v4  ;;  %v8191_v3 = vpop.f32.mrb[113].mxu0 }
 0xd6f   : > { %v15540_v15 = vadd.f32 %v8191_v3, %v6656_v4  ;;  %v8193_v53 = vpop.f32.mrb[114].mxu0  ;;  %13506 = vmatprep.mubr.msk.bf16.mxu1 %vm2582_vm3, %v8395_v17  ;;  %v6696_v17 = vpop.permute.xlu1 %6695 }
 0xd70   : > { %v15541_v30 = vadd.f32 %v8193_v53, %v6661_v46  ;;  %v8195_v38 = vpop.f32.mrb[115].mxu0  ;;  %8616 = vmatmul.mubr.bf16.gmra.mrb[0].mxu1 %v8394_v63  ;;  %v8336_v25 = vmax.f32 %v15539_v14, 0.0 }
 0xd71   : > { %v15542_v1 = vadd.f32 %v8195_v38, %v6661_v46  ;;  %v8337_v13 = vmax.f32 %v15540_v15, 0.0  ;;  %v6701_v15 = vpop.permute.xlu0 %6700 }
 0xd72   : > { %v8338_v5 = vmax.f32 %v15541_v30, 0.0 }
 0xd73   : > { %v8339_v16 = vmax.f32 %v15542_v1, 0.0 }
 0xd74   : > { %v8396_v40 = vpack.c.bf16 %v8338_v5, %v8336_v25 }
 0xd75   : > { %v8397_v43 = vpack.c.bf16 %v8339_v16, %v8337_v13  ;;  %v8199_v27 = vpop.f32.mrb[116].mxu0 }
 0xd76   : > { %v15543_v47 = vadd.f32 %v8199_v27, %v6666_v45  ;;  %v8201_v49 = vpop.f32.mrb[117].mxu0 }
 0xd77   : > { %v15544_v33 = vadd.f32 %v8201_v49, %v6666_v45  ;;  %v8203_v31 = vpop.f32.mrb[118].mxu0  ;;  %13507 = vmatprep.mubr.msk.bf16.mxu1 %vm2582_vm3, %v8397_v43  ;;  %v6706_v43 = vpop.permute.xlu1 %6705 }
 0xd78   : > { %v15545_v57 = vadd.f32 %v8203_v31, %v6671_v28  ;;  %v8205_v6 = vpop.f32.mrb[119].mxu0  ;;  %8624 = vmatmul.mubr.bf16.gmra.mrb[4].mxu1 %v8396_v40  ;;  %v8340_v54 = vmax.f32 %v15543_v47, 0.0 }
 0xd79   : > { %v15546_v10 = vadd.f32 %v8205_v6, %v6671_v28  ;;  %v8341_v60 = vmax.f32 %v15544_v33, 0.0  ;;  %v6711_v33 = vpop.permute.xlu0 %6710 }
 0xd7a   : > { %v8342_v12 = vmax.f32 %v15545_v57, 0.0 }
 0xd7b   : > { %v8343_v39 = vmax.f32 %v15546_v10, 0.0 }
 0xd7c   : > { %v8398_v9 = vpack.c.bf16 %v8342_v12, %v8340_v54 }
 0xd7d   : > { %v8399_v62 = vpack.c.bf16 %v8343_v39, %v8341_v60  ;;  %v8209_v21 = vpop.f32.mrb[120].mxu0 }
 0xd7e   : > { %v15547_v41 = vadd.f32 %v8209_v21, %v6676_v42  ;;  %v8211_v61 = vpop.f32.mrb[121].mxu0 }
 0xd7f   : > { %v15548_v59 = vadd.f32 %v8211_v61, %v6676_v42  ;;  %v8213_v18 = vpop.f32.mrb[122].mxu0  ;;  %13508 = vmatprep.mubr.msk.bf16.mxu1 %vm2582_vm3, %v8399_v62  ;;  %v6716_v62 = vpop.permute.xlu1 %6715 }
 0xd80   : > { %v15549_v7 = vadd.f32 %v8213_v18, %v6681_v51  ;;  %v8215_v8 = vpop.f32.mrb[123].mxu0  ;;  %8632 = vmatmul.mubr.bf16.gmra.mrb[8].mxu1 %v8398_v9  ;;  %v8344_v26 = vmax.f32 %v15547_v41, 0.0 }
 0xd81   : > { %v15550_v11 = vadd.f32 %v8215_v8, %v6681_v51  ;;  %v8345_v19 = vmax.f32 %v15548_v59, 0.0  ;;  %v6721_v59 = vpop.permute.xlu0 %6720 }
 0xd82   : > { %v8346_v20 = vmax.f32 %v15549_v7, 0.0 }
 0xd83   : > { %v8347_v22 = vmax.f32 %v15550_v11, 0.0 }
 0xd84   : > { %v8400_v50 = vpack.c.bf16 %v8346_v20, %v8344_v26 }
 0xd85   : > { %v8401_v23 = vpack.c.bf16 %v8347_v22, %v8345_v19  ;;  %v8219_v52 = vpop.f32.mrb[124].mxu0 }
 0xd86   : > { %v15551_v24 = vadd.f32 %v8219_v52, %v6686_v35  ;;  %v8221_v29 = vpop.f32.mrb[125].mxu0 }
 0xd87   : > { %v15552_v0 = vadd.f32 %v8221_v29, %v6686_v35  ;;  %v8223_v56 = vpop.f32.mrb[126].mxu0  ;;  %13509 = vmatprep.mubr.msk.bf16.mxu1 %vm2582_vm3, %v8401_v23  ;;  %v6726_v23 = vpop.permute.xlu1 %6725 }
 0xd88   : > { %v15553_v32 = vadd.f32 %v8223_v56, %v6691_v48  ;;  %v8225_v2 = vpop.f32.mrb[127].mxu0  ;;  %8640 = vmatmul.mubr.bf16.gmra.mrb[12].mxu1 %v8400_v50  ;;  %v8348_v37 = vmax.f32 %v15551_v24, 0.0 }
 0xd89   : > { %v15554_v34 = vadd.f32 %v8225_v2, %v6691_v48  ;;  %v8349_v36 = vmax.f32 %v15552_v0, 0.0  ;;  %v6731_v0 = vpop.permute.xlu0 %6730 }
 0xd8a   : > { %v8350_v55 = vmax.f32 %v15553_v32, 0.0 }
 0xd8b   : > { %v8351_v63 = vmax.f32 %v15554_v34, 0.0 }
 0xd8c   : > { %v8402_v4 = vpack.c.bf16 %v8350_v55, %v8348_v37 }
 0xd8d   : > { %v8403_v44 = vpack.c.bf16 %v8351_v63, %v8349_v36  ;;  %v8229_v14 = vpop.f32.mrb[128].mxu0 }
 0xd8e   : > { %v15555_v3 = vadd.f32 %v8229_v14, %v6696_v17  ;;  %v8231_v46 = vpop.f32.mrb[129].mxu0 }
 0xd8f   : > { %v15556_v53 = vadd.f32 %v8231_v46, %v6696_v17  ;;  %v8233_v30 = vpop.f32.mrb[130].mxu0  ;;  %13510 = vmatprep.mubr.msk.bf16.mxu1 %vm2582_vm3, %v8403_v44  ;;  %v6736_v44 = vpop.permute.xlu1 %6735 }
 0xd90   : > { %v15557_v38 = vadd.f32 %v8233_v30, %v6701_v15  ;;  %v8235_v1 = vpop.f32.mrb[131].mxu0  ;;  %8648 = vmatmul.mubr.bf16.gmra.mrb[16].mxu1 %v8402_v4  ;;  %v8352_v5 = vmax.f32 %v15555_v3, 0.0 }
 0xd91   : > { %v15558_v25 = vadd.f32 %v8235_v1, %v6701_v15  ;;  %v8353_v16 = vmax.f32 %v15556_v53, 0.0  ;;  %v6741_v53 = vpop.permute.xlu0 %6740 }
 0xd92   : > { %v8354_v13 = vmax.f32 %v15557_v38, 0.0 }
 0xd93   : > { %v8355_v40 = vmax.f32 %v15558_v25, 0.0 }
 0xd94   : > { %v8404_v45 = vpack.c.bf16 %v8354_v13, %v8352_v5 }
 0xd95   : > { %v8405_v27 = vpack.c.bf16 %v8355_v40, %v8353_v16  ;;  %v8239_v47 = vpop.f32.mrb[132].mxu0 }
 0xd96   : > { %v15559_v49 = vadd.f32 %v8239_v47, %v6706_v43  ;;  %v8241_v28 = vpop.f32.mrb[133].mxu0 }
 0xd97   : > { %v15560_v31 = vadd.f32 %v8241_v28, %v6706_v43  ;;  %v8243_v57 = vpop.f32.mrb[134].mxu0  ;;  %13511 = vmatprep.mubr.msk.bf16.mxu1 %vm2582_vm3, %v8405_v27  ;;  %v6746_v27 = vpop.permute.xlu1 %6745 }
 0xd98   : > { %v15561_v6 = vadd.f32 %v8243_v57, %v6711_v33  ;;  %v8245_v10 = vpop.f32.mrb[135].mxu0  ;;  %8656 = vmatmul.mubr.bf16.gmra.mrb[20].mxu1 %v8404_v45  ;;  %v8356_v12 = vmax.f32 %v15559_v49, 0.0 }
 0xd99   : > { %v15562_v54 = vadd.f32 %v8245_v10, %v6711_v33  ;;  %v8357_v39 = vmax.f32 %v15560_v31, 0.0  ;;  %v6751_v31 = vpop.permute.xlu0 %6750 }
 0xd9a   : > { %v8358_v60 = vmax.f32 %v15561_v6, 0.0 }
 0xd9b   : > { %v8359_v9 = vmax.f32 %v15562_v54, 0.0 }
 0xd9c   : > { %v8406_v42 = vpack.c.bf16 %v8358_v60, %v8356_v12 }
 0xd9d   : > { %v8407_v21 = vpack.c.bf16 %v8359_v9, %v8357_v39  ;;  %v8249_v41 = vpop.f32.mrb[136].mxu0 }
 0xd9e   : > { %v15563_v61 = vadd.f32 %v8249_v41, %v6716_v62  ;;  %v8251_v51 = vpop.f32.mrb[137].mxu0 }
 0xd9f   : > { %v15564_v18 = vadd.f32 %v8251_v51, %v6716_v62  ;;  %v8253_v7 = vpop.f32.mrb[138].mxu0  ;;  %13512 = vmatprep.mubr.msk.bf16.mxu1 %vm2582_vm3, %v8407_v21  ;;  %v6756_v21 = vpop.permute.xlu1 %6755 }
 0xda0   : > { %v15565_v8 = vadd.f32 %v8253_v7, %v6721_v59  ;;  %v8255_v11 = vpop.f32.mrb[139].mxu0  ;;  %8664 = vmatmul.mubr.bf16.gmra.mrb[24].mxu1 %v8406_v42  ;;  %v8360_v20 = vmax.f32 %v15563_v61, 0.0 }
 0xda1   : > { %v15566_v26 = vadd.f32 %v8255_v11, %v6721_v59  ;;  %v8361_v22 = vmax.f32 %v15564_v18, 0.0  ;;  %v6761_v18 = vpop.permute.xlu0 %6760 }
 0xda2   : > { %v8362_v19 = vmax.f32 %v15565_v8, 0.0 }
 0xda3   : > { %v8363_v50 = vmax.f32 %v15566_v26, 0.0 }
 0xda4   : > { %v8408_v35 = vpack.c.bf16 %v8362_v19, %v8360_v20 }
 0xda5   : > { %v8409_v52 = vpack.c.bf16 %v8363_v50, %v8361_v22  ;;  %v8259_v24 = vpop.f32.mrb[140].mxu0 }
 0xda6   : > { %v15567_v29 = vadd.f32 %v8259_v24, %v6726_v23  ;;  %v8261_v48 = vpop.f32.mrb[141].mxu0 }
 0xda7   : > { %v15568_v56 = vadd.f32 %v8261_v48, %v6726_v23  ;;  %v8263_v32 = vpop.f32.mrb[142].mxu0  ;;  %13513 = vmatprep.mubr.msk.bf16.mxu1 %vm2582_vm3, %v8409_v52  ;;  %v6766_v52 = vpop.permute.xlu1 %6765 }
 0xda8   : > { %v15569_v2 = vadd.f32 %v8263_v32, %v6731_v0  ;;  %v8265_v34 = vpop.f32.mrb[143].mxu0  ;;  %8672 = vmatmul.mubr.bf16.gmra.mrb[28].mxu1 %v8408_v35  ;;  %v8364_v55 = vmax.f32 %v15567_v29, 0.0 }
 0xda9   : > { %v15570_v37 = vadd.f32 %v8265_v34, %v6731_v0  ;;  %v8365_v63 = vmax.f32 %v15568_v56, 0.0  ;;  %v6771_v56 = vpop.permute.xlu0 %6770 }
 0xdaa   : > { %v8366_v36 = vmax.f32 %v15569_v2, 0.0 }
 0xdab   : > { %v8367_v4 = vmax.f32 %v15570_v37, 0.0 }
 0xdac   : > { %v8410_v17 = vpack.c.bf16 %v8366_v36, %v8364_v55 }
 0xdad   : > { %v8411_v14 = vpack.c.bf16 %v8367_v4, %v8365_v63  ;;  %v8269_v3 = vpop.f32.mrb[144].mxu0 }
 0xdae   : > { %v15571_v46 = vadd.f32 %v8269_v3, %v6736_v44  ;;  %v8271_v15 = vpop.f32.mrb[145].mxu0 }
 0xdaf   : > { %v15572_v30 = vadd.f32 %v8271_v15, %v6736_v44  ;;  %v8273_v38 = vpop.f32.mrb[146].mxu0  ;;  %13514 = vmatprep.mubr.msk.bf16.mxu1 %vm2582_vm3, %v8411_v14  ;;  %v6776_v14 = vpop.permute.xlu1 %6775 }
 0xdb0   : > { %v15573_v1 = vadd.f32 %v8273_v38, %v6741_v53  ;;  %v8275_v25 = vpop.f32.mrb[147].mxu0  ;;  %8680 = vmatmul.mubr.bf16.gmra.mrb[32].mxu1 %v8410_v17  ;;  %v8368_v13 = vmax.f32 %v15571_v46, 0.0 }
 0xdb1   : > { %v15574_v5 = vadd.f32 %v8275_v25, %v6741_v53  ;;  %v8369_v40 = vmax.f32 %v15572_v30, 0.0  ;;  %v6781_v30 = vpop.permute.xlu0 %6780 }
 0xdb2   : > { %v8370_v16 = vmax.f32 %v15573_v1, 0.0 }
 0xdb3   : > { %v8371_v45 = vmax.f32 %v15574_v5, 0.0 }
 0xdb4   : > { %v8412_v43 = vpack.c.bf16 %v8370_v16, %v8368_v13 }
 0xdb5   : > { %v8413_v47 = vpack.c.bf16 %v8371_v45, %v8369_v40  ;;  %v8279_v49 = vpop.f32.mrb[148].mxu0 }
 0xdb6   : > { %v15575_v28 = vadd.f32 %v8279_v49, %v6746_v27  ;;  %v8281_v33 = vpop.f32.mrb[149].mxu0 }
 0xdb7   : > { %v15576_v57 = vadd.f32 %v8281_v33, %v6746_v27  ;;  %v8283_v6 = vpop.f32.mrb[150].mxu0  ;;  %13515 = vmatprep.mubr.msk.bf16.mxu1 %vm2582_vm3, %v8413_v47  ;;  %v6786_v47 = vpop.permute.xlu1 %6785 }
 0xdb8   : > { %v15577_v10 = vadd.f32 %v8283_v6, %v6751_v31  ;;  %v8285_v54 = vpop.f32.mrb[151].mxu0  ;;  %8688 = vmatmul.mubr.bf16.gmra.mrb[36].mxu1 %v8412_v43  ;;  %v8372_v60 = vmax.f32 %v15575_v28, 0.0 }
 0xdb9   : > { %v15578_v12 = vadd.f32 %v8285_v54, %v6751_v31  ;;  %v8373_v9 = vmax.f32 %v15576_v57, 0.0  ;;  %v6791_v57 = vpop.permute.xlu0 %6790 }
 0xdba   : > { %v8374_v39 = vmax.f32 %v15577_v10, 0.0 }
 0xdbb   : > { %v8375_v42 = vmax.f32 %v15578_v12, 0.0 }
 0xdbc   : > { %v8414_v62 = vpack.c.bf16 %v8374_v39, %v8372_v60 }
 0xdbd   : > { %v8415_v41 = vpack.c.bf16 %v8375_v42, %v8373_v9  ;;  %v8289_v61 = vpop.f32.mrb[152].mxu0 }
 0xdbe   : > { %v15579_v51 = vadd.f32 %v8289_v61, %v6756_v21  ;;  %v8291_v59 = vpop.f32.mrb[153].mxu0 }
 0xdbf   : > { %v15580_v7 = vadd.f32 %v8291_v59, %v6756_v21  ;;  %v8293_v8 = vpop.f32.mrb[154].mxu0  ;;  %13516 = vmatprep.mubr.msk.bf16.mxu1 %vm2582_vm3, %v8415_v41 }
 0xdc0   : > { %v15581_v11 = vadd.f32 %v8293_v8, %v6761_v18  ;;  %v8295_v26 = vpop.f32.mrb[155].mxu0  ;;  %8696 = vmatmul.mubr.bf16.gmra.mrb[40].mxu1 %v8414_v62  ;;  %v8376_v19 = vmax.f32 %v15579_v51, 0.0 }
 0xdc1   : > { %v15582_v20 = vadd.f32 %v8295_v26, %v6761_v18  ;;  %v8377_v50 = vmax.f32 %v15580_v7, 0.0 }
 0xdc2   : > { %v8378_v22 = vmax.f32 %v15581_v11, 0.0 }
 0xdc3   : > { %v8379_v35 = vmax.f32 %v15582_v20, 0.0 }
 0xdc4   : > { %v8416_v23 = vpack.c.bf16 %v8378_v22, %v8376_v19 }
 0xdc5   : > { %v8417_v24 = vpack.c.bf16 %v8379_v35, %v8377_v50  ;;  %v8299_v29 = vpop.f32.mrb[156].mxu0 }
 0xdc6   : > { %v15583_v48 = vadd.f32 %v8299_v29, %v6766_v52  ;;  %v8301_v0 = vpop.f32.mrb[157].mxu0 }
 0xdc7   : > { %v15584_v32 = vadd.f32 %v8301_v0, %v6766_v52  ;;  %v8303_v2 = vpop.f32.mrb[158].mxu0  ;;  %13517 = vmatprep.mubr.msk.bf16.mxu1 %vm2582_vm3, %v8417_v24 }
 0xdc8   : > { %v15585_v34 = vadd.f32 %v8303_v2, %v6771_v56  ;;  %v8305_v37 = vpop.f32.mrb[159].mxu0  ;;  %8704 = vmatmul.mubr.bf16.gmra.mrb[44].mxu1 %v8416_v23  ;;  %v8380_v36 = vmax.f32 %v15583_v48, 0.0 }
 0xdc9   : > { %v15586_v55 = vadd.f32 %v8305_v37, %v6771_v56  ;;  %v8381_v4 = vmax.f32 %v15584_v32, 0.0 }
 0xdca   : > { %v8382_v63 = vmax.f32 %v15585_v34, 0.0 }
 0xdcb   : > { %v8383_v17 = vmax.f32 %v15586_v55, 0.0 }
 0xdcc   : > { %v8418_v44 = vpack.c.bf16 %v8382_v63, %v8380_v36 }
 0xdcd   : > { %v8419_v3 = vpack.c.bf16 %v8383_v17, %v8381_v4  ;;  %v8309_v46 = vpop.f32.mrb[160].mxu0 }
 0xdce   : > { %v15587_v15 = vadd.f32 %v8309_v46, %v6776_v14  ;;  %v8311_v53 = vpop.f32.mrb[161].mxu0 }
 0xdcf   : > { %v15588_v38 = vadd.f32 %v8311_v53, %v6776_v14  ;;  %v8313_v1 = vpop.f32.mrb[162].mxu0  ;;  %13518 = vmatprep.mubr.msk.bf16.mxu1 %vm2582_vm3, %v8419_v3 }
 0xdd0   : > { %v15589_v25 = vadd.f32 %v8313_v1, %v6781_v30  ;;  %v8315_v5 = vpop.f32.mrb[163].mxu0  ;;  %8712 = vmatmul.mubr.bf16.gmra.mrb[48].mxu1 %v8418_v44  ;;  %v8384_v16 = vmax.f32 %v15587_v15, 0.0 }
 0xdd1   : > { %v15590_v13 = vadd.f32 %v8315_v5, %v6781_v30  ;;  %v8385_v45 = vmax.f32 %v15588_v38, 0.0 }
 0xdd2   : > { %v8386_v40 = vmax.f32 %v15589_v25, 0.0 }
 0xdd3   : > { %v8387_v43 = vmax.f32 %v15590_v13, 0.0 }
 0xdd4   : > { %v8420_v27 = vpack.c.bf16 %v8386_v40, %v8384_v16 }
 0xdd5   : > { %v8421_v49 = vpack.c.bf16 %v8387_v43, %v8385_v45  ;;  %v8319_v28 = vpop.f32.mrb[164].mxu0 }
 0xdd6   : > { %v15591_v33 = vadd.f32 %v8319_v28, %v6786_v47  ;;  %v8321_v31 = vpop.f32.mrb[165].mxu0 }
 0xdd7   : > { %v15592_v6 = vadd.f32 %v8321_v31, %v6786_v47  ;;  %v8323_v10 = vpop.f32.mrb[166].mxu0  ;;  %13519 = vmatprep.mubr.msk.bf16.mxu1 %vm2582_vm3, %v8421_v49 }
 0xdd8   : > { %v15593_v54 = vadd.f32 %v8323_v10, %v6791_v57  ;;  %v8325_v12 = vpop.f32.mrb[167].mxu0  ;;  %8720 = vmatmul.mubr.bf16.gmra.mrb[52].mxu1 %v8420_v27  ;;  %v8388_v39 = vmax.f32 %v15591_v33, 0.0 }
 0xdd9   : > { %v15594_v60 = vadd.f32 %v8325_v12, %v6791_v57  ;;  %v8389_v42 = vmax.f32 %v15592_v6, 0.0 }
 0xdda   : > { %v8390_v9 = vmax.f32 %v15593_v54, 0.0 }
 0xddb   : > { %v8391_v62 = vmax.f32 %v15594_v60, 0.0 }
 0xddc   : > { %v8422_v21 = vpack.c.bf16 %v8390_v9, %v8388_v39 }
 0xddd   : > { %v8423_v41 = vpack.c.bf16 %v8391_v62, %v8389_v42 }
 0xddf   : > { %13520 = vmatprep.mubr.msk.bf16.mxu1 %vm2582_vm3, %v8423_v41 }
 0xde0   : > { %8728 = vmatmul.mubr.bf16.gmra.mrb[56].mxu1 %v8422_v21 }
 0xe3b   : > { %v8609_v61 = vpop.f32.mrb[252].mxu1 }
 0xe3c   : > { %v8611_v51 = vpop.f32.mrb[253].mxu1 }
 0xe3d   : > { %v8612_v59 = vpop.f32.mrb[254].mxu1 }
 0xe3e   : > { %v19716_v18 = vpack.c.bf16 %v8612_v59, %v8609_v61  ;;  %v8614_v7 = vpop.f32.mrb[255].mxu1 }
 0xe40   : > { %8880 = vrot.lane.b32.xlu0 %v19716_v18, %s21086_s0 }
 0xe43   : > { %v8617_v8 = vpop.f32.mrb[0].mxu1 }
 0xe44   : > { %v8619_v11 = vpop.f32.mrb[1].mxu1 }
 0xe45   : > { %v8620_v26 = vpop.f32.mrb[2].mxu1 }
 0xe46   : > { %v19720_v20 = vpack.c.bf16 %v8620_v26, %v8617_v8  ;;  %v8622_v19 = vpop.f32.mrb[3].mxu1 }
 0xe48   : > { %8882 = vrot.lane.b32.xlu0 %v19720_v20, %s21086_s0 }
 0xe4b   : > { %v8625_v22 = vpop.f32.mrb[4].mxu1 }
 0xe4c   : > { %v8627_v50 = vpop.f32.mrb[5].mxu1 }
 0xe4d   : > { %v8628_v35 = vpop.f32.mrb[6].mxu1 }
 0xe4e   : > { %v19724_v23 = vpack.c.bf16 %v8628_v35, %v8625_v22  ;;  %v8630_v52 = vpop.f32.mrb[7].mxu1  ;;  %v16827_v35 = vld [vmem:[%s21050_s4 + $0x84] ss:$8 sps:$4 sm:$0xff]  }
 0xe4f   : > { %8960 = vmatprep.mubr.bf16.mxu1 %v16827_v35 }
 0xe50   : > { %8884 = vrot.lane.b32.xlu0 %v19724_v23, %s21086_s0 }
 0xe53   : > { %v8633_v24 = vpop.f32.mrb[8].mxu1 }
 0xe54   : > { %v8635_v29 = vpop.f32.mrb[9].mxu1 }
 0xe55   : > { %v8636_v48 = vpop.f32.mrb[10].mxu1 }
 0xe56   : > { %v19728_v0 = vpack.c.bf16 %v8636_v48, %v8633_v24  ;;  %v8638_v56 = vpop.f32.mrb[11].mxu1 }
 0xe58   : > { %8886 = vrot.lane.b32.xlu0 %v19728_v0, %s21086_s0 }
 0xe5b   : > { %v8641_v32 = vpop.f32.mrb[12].mxu1 }
 0xe5c   : > { %v8643_v2 = vpop.f32.mrb[13].mxu1 }
 0xe5d   : > { %v8644_v34 = vpop.f32.mrb[14].mxu1 }
 0xe5e   : > { %v19732_v37 = vpack.c.bf16 %v8644_v34, %v8641_v32  ;;  %v8646_v55 = vpop.f32.mrb[15].mxu1  ;;  %v9974_v34 = vld [vmem:[%s21051_s5 + $0x8] sm:$0xff] }
 0xe5f   : > { %v9976_v55 = vld [vmem:[%s21051_s5 + $0x18] sm:$0xff] }
 0xe60   : > { %8888 = vrot.lane.b32.xlu0 %v19732_v37, %s21086_s0 }
 0xe63   : > { %v8649_v36 = vpop.f32.mrb[16].mxu1 }
 0xe64   : > { %v8651_v63 = vpop.f32.mrb[17].mxu1 }
 0xe65   : > { %v8652_v4 = vpop.f32.mrb[18].mxu1  ;;  %v9980_v63 = vld [vmem:[%s21051_s5 + $0x38] sm:$0xff] }
 0xe66   : > { %v19736_v17 = vpack.c.bf16 %v8652_v4, %v8649_v36  ;;  %v8654_v44 = vpop.f32.mrb[19].mxu1  ;;  %v9978_v36 = vld [vmem:[%s21051_s5 + $0x28] sm:$0xff] }
 0xe67   : > { %v9982_v4 = vld [vmem:[%s21051_s5 + $0x48] sm:$0xff]  ;;  %v9984_v44 = vld [vmem:[%s21051_s5 + $0x58] sm:$0xff] }
 0xe68   : > { %8890 = vrot.lane.b32.xlu0 %v19736_v17, %s21086_s0 }
 0xe6b   : > { %v8657_v14 = vpop.f32.mrb[20].mxu1 }
 0xe6c   : > { %v8659_v3 = vpop.f32.mrb[21].mxu1 }
 0xe6d   : > { %v8660_v46 = vpop.f32.mrb[22].mxu1 }
 0xe6e   : > { %v19740_v15 = vpack.c.bf16 %v8660_v46, %v8657_v14  ;;  %v8662_v53 = vpop.f32.mrb[23].mxu1  ;;  %v9986_v14 = vld [vmem:[%s21051_s5 + $0x68] sm:$0xff] }
 0xe6f   : > { %v9988_v53 = vld [vmem:[%s21051_s5 + $0x78] sm:$0xff] }
 0xe70   : > { %8892 = vrot.lane.b32.xlu0 %v19740_v15, %s21086_s0 }
 0xe73   : > { %v8665_v30 = vpop.f32.mrb[24].mxu1 }
 0xe74   : > { %v8667_v38 = vpop.f32.mrb[25].mxu1 }
 0xe75   : > { %v8668_v1 = vpop.f32.mrb[26].mxu1 }
 0xe76   : > { %v19744_v25 = vpack.c.bf16 %v8668_v1, %v8665_v30  ;;  %v8670_v5 = vpop.f32.mrb[27].mxu1 }
 0xe78   : > { %8894 = vrot.lane.b32.xlu0 %v19744_v25, %s21086_s0 }
 0xe7b   : > { %v8673_v13 = vpop.f32.mrb[28].mxu1 }
 0xe7c   : > { %9298 = vrot.lane.b32.xlu0 %v19716_v18, %s21085_s19  ;;  %v8675_v16 = vpop.f32.mrb[29].mxu1 }
 0xe7d   : > { %v8676_v40 = vpop.f32.mrb[30].mxu1 }
 0xe7e   : > { %v19750_v45 = vpack.c.bf16 %v8676_v40, %v8673_v13  ;;  %v8678_v43 = vpop.f32.mrb[31].mxu1 }
 0xe80   : > { %9300 = vrot.lane.b32.xlu0 %v19720_v20, %s21085_s19  ;;  %8896 = vrot.lane.b32.xlu1 %v19750_v45, %s21086_s0 }
 0xe83   : > { %v8681_v27 = vpop.f32.mrb[32].mxu1 }
 0xe84   : > { %9302 = vrot.lane.b32.xlu0 %v19724_v23, %s21085_s19  ;;  %v8683_v47 = vpop.f32.mrb[33].mxu1 }
 0xe85   : > { %v8684_v49 = vpop.f32.mrb[34].mxu1  ;;  %v9973_v47 = vld [vmem:[%s21051_s5] sm:$0xff] }
 0xe86   : > { %v19758_v28 = vpack.c.bf16 %v8684_v49, %v8681_v27  ;;  %v8686_v33 = vpop.f32.mrb[35].mxu1 }
 0xe87   : > { %v9975_v33 = vld [vmem:[%s21051_s5 + $0x10] sm:$0xff] }
 0xe88   : > { %9304 = vrot.lane.b32.xlu0 %v19728_v0, %s21085_s19  ;;  %8898 = vrot.lane.b32.xlu1 %v19758_v28, %s21086_s0 }
 0xe8b   : > { %v8689_v31 = vpop.f32.mrb[36].mxu1 }
 0xe8c   : > { %9306 = vrot.lane.b32.xlu0 %v19732_v37, %s21085_s19  ;;  %v8691_v57 = vpop.f32.mrb[37].mxu1 }
 0xe8d   : > { %v8692_v6 = vpop.f32.mrb[38].mxu1  ;;  %v9977_v57 = vld [vmem:[%s21051_s5 + $0x20] sm:$0xff] }
 0xe8e   : > { %v19766_v10 = vpack.c.bf16 %v8692_v6, %v8689_v31  ;;  %v8694_v54 = vpop.f32.mrb[39].mxu1 }
 0xe8f   : > { %v9979_v54 = vld [vmem:[%s21051_s5 + $0x30] sm:$0xff] }
 0xe90   : > { %9308 = vrot.lane.b32.xlu0 %v19736_v17, %s21085_s19  ;;  %8900 = vrot.lane.b32.xlu1 %v19766_v10, %s21086_s0 }
 0xe93   : > { %v8697_v12 = vpop.f32.mrb[40].mxu1 }
 0xe94   : > { %9310 = vrot.lane.b32.xlu0 %v19740_v15, %s21085_s19  ;;  %v8699_v60 = vpop.f32.mrb[41].mxu1 }
 0xe95   : > { %v8700_v39 = vpop.f32.mrb[42].mxu1  ;;  %v9981_v60 = vld [vmem:[%s21051_s5 + $0x40] sm:$0xff] }
 0xe96   : > { %v19774_v9 = vpack.c.bf16 %v8700_v39, %v8697_v12  ;;  %v8702_v42 = vpop.f32.mrb[43].mxu1 }
 0xe97   : > { %v16825_v42 = vld [vmem:[%s21050_s4 + $0x80] ss:$8 sps:$4 sm:$0xff]  }
 0xe98   : > { %9312 = vrot.lane.b32.xlu0 %v19744_v25, %s21085_s19  ;;  %8902 = vrot.lane.b32.xlu1 %v19774_v9, %s21086_s0 }
 0xe9b   : > { %v8705_v62 = vpop.f32.mrb[44].mxu1 }
 0xe9c   : > { %9555 = vrot.lane.b32.xlu0 %v19716_v18, %s21087_s22  ;;  %v8707_v21 = vpop.f32.mrb[45].mxu1 }
 0xe9d   : > { %v8708_v41 = vpop.f32.mrb[46].mxu1  ;;  %v9983_v21 = vld [vmem:[%s21051_s5 + $0x50] sm:$0xff] }
 0xe9e   : > { %v19782_v61 = vpack.c.bf16 %v8708_v41, %v8705_v62  ;;  %v8710_v51 = vpop.f32.mrb[47].mxu1  ;;  %v16830_v62 = vld [vmem:[%s21050_s4 + $0x94] ss:$8 sps:$4 sm:$0xff]   ;;  %v9985_v41 = vld [vmem:[%s21051_s5 + $0x60] sm:$0xff] }
 0xe9f   : > { %v16828_v51 = vld [vmem:[%s21050_s4 + $0x90] ss:$8 sps:$4 sm:$0xff]  }
 0xea0   : > { %9557 = vrot.lane.b32.xlu0 %v19720_v20, %s21087_s22  ;;  %8904 = vrot.lane.b32.xlu1 %v19782_v61, %s21086_s0 }
 0xea3   : > { %v8713_v59 = vpop.f32.mrb[48].mxu1 }
 0xea4   : > { %9559 = vrot.lane.b32.xlu0 %v19724_v23, %s21087_s22  ;;  %v8715_v7 = vpop.f32.mrb[49].mxu1 }
 0xea5   : > { %v8716_v8 = vpop.f32.mrb[50].mxu1 }
 0xea6   : > { %v19790_v11 = vpack.c.bf16 %v8716_v8, %v8713_v59  ;;  %v8718_v26 = vpop.f32.mrb[51].mxu1  ;;  %v16846_v8 = vld [vmem:[%s21050_s4 + $0xf0] ss:$8 sps:$4 sm:$0xff]  }
 0xea8   : > { %9561 = vrot.lane.b32.xlu0 %v19728_v0, %s21087_s22  ;;  %8906 = vrot.lane.b32.xlu1 %v19790_v11, %s21086_s0 }
 0xeab   : > { %v8721_v19 = vpop.f32.mrb[52].mxu1 }
 0xeac   : > { %9563 = vrot.lane.b32.xlu0 %v19732_v37, %s21087_s22  ;;  %v8723_v22 = vpop.f32.mrb[53].mxu1 }
 0xead   : > { %v8724_v50 = vpop.f32.mrb[54].mxu1  ;;  %v16849_v22 = vld [vmem:[%s21050_s4] ss:$8 sps:$4 sm:$0xff]  }
 0xeae   : > { %v19801_v52 = vpack.c.bf16 %v8724_v50, %v8721_v19  ;;  %v8726_v24 = vpop.f32.mrb[55].mxu1  ;;  %v16854_v50 = vld [vmem:[%s21050_s4 + $0x14] ss:$8 sps:$4 sm:$0xff]  }
 0xeb0   : > { %9565 = vrot.lane.b32.xlu0 %v19736_v17, %s21087_s22  ;;  %8908 = vrot.lane.b32.xlu1 %v19801_v52, %s21086_s0 }
 0xeb2   : > { %v8881_v46 = vpop.permute.xlu0 %8880 }
 0xeb3   : > { %v8729_v29 = vpop.f32.mrb[56].mxu1 }
 0xeb4   : > { %9567 = vrot.lane.b32.xlu0 %v19740_v15, %s21087_s22  ;;  %v8731_v48 = vpop.f32.mrb[57].mxu1 }
 0xeb5   : > { %v8732_v56 = vpop.f32.mrb[58].mxu1 }
 0xeb6   : > { %v19809_v32 = vpack.c.bf16 %v8732_v56, %v8729_v29  ;;  %v8734_v2 = vpop.f32.mrb[59].mxu1  ;;  %v16852_v29 = vld [vmem:[%s21050_s4 + $0x10] ss:$8 sps:$4 sm:$0xff]   ;;  %v16857_v56 = vld [vmem:[%s21050_s4 + $0x24] ss:$8 sps:$4 sm:$0xff]  }
 0xeb8   : > { %9569 = vrot.lane.b32.xlu0 %v19744_v25, %s21087_s22  ;;  %8910 = vrot.lane.b32.xlu1 %v19809_v32, %s21086_s0 }
 0xeba   : > { %v8883_v38 = vpop.permute.xlu0 %8882 }
 0xebc   : > { %9812 = vrot.lane.b32.xlu0 %v19716_v18, %s21088_s27  ;;  %9314 = vrot.lane.b32.xlu1 %v19750_v45, %s21085_s19 }
 0xec0   : > { %9814 = vrot.lane.b32.xlu0 %v19720_v20, %s21088_s27  ;;  %9316 = vrot.lane.b32.xlu1 %v19758_v28, %s21085_s19 }
 0xec2   : > { %v8885_v5 = vpop.permute.xlu0 %8884 }
 0xec4   : > { %9816 = vrot.lane.b32.xlu0 %v19724_v23, %s21088_s27  ;;  %9318 = vrot.lane.b32.xlu1 %v19766_v10, %s21085_s19 }
 0xec8   : > { %9818 = vrot.lane.b32.xlu0 %v19728_v0, %s21088_s27  ;;  %9320 = vrot.lane.b32.xlu1 %v19774_v9, %s21085_s19 }
 0xeca   : > { %v8887_v16 = vpop.permute.xlu0 %8886 }
 0xecc   : > { %9820 = vrot.lane.b32.xlu0 %v19732_v37, %s21088_s27  ;;  %9322 = vrot.lane.b32.xlu1 %v19782_v61, %s21085_s19 }
 0xed0   : > { %9822 = vrot.lane.b32.xlu0 %v19736_v17, %s21088_s27  ;;  %9324 = vrot.lane.b32.xlu1 %v19790_v11, %s21085_s19 }
 0xed2   : > { %v8889_v43 = vpop.permute.xlu0 %8888 }
 0xed4   : > { %9824 = vrot.lane.b32.xlu0 %v19740_v15, %s21088_s27  ;;  %9326 = vrot.lane.b32.xlu1 %v19801_v52, %s21085_s19 }
 0xed8   : > { %9826 = vrot.lane.b32.xlu0 %v19744_v25, %s21088_s27  ;;  %9328 = vrot.lane.b32.xlu1 %v19809_v32, %s21085_s19 }
 0xeda   : > { %v8891_v49 = vpop.permute.xlu0 %8890 }
 0xedc   : > { %9996 = vperm.xlu0 %15939, %v9974_v34   ;;  %9571 = vrot.lane.b32.xlu1 %v19750_v45, %s21087_s22  ;;  %v16855_v34 = vld [vmem:[%s21050_s4 + $0x20] ss:$8 sps:$4 sm:$0xff]  }
 0xee0   : > { %10006 = vperm.xlu0 %15939, %v9976_v55   ;;  %9573 = vrot.lane.b32.xlu1 %v19758_v28, %s21087_s22  ;;  %v16860_v55 = vld [vmem:[%s21050_s4 + $0x34] ss:$8 sps:$4 sm:$0xff]  }
 0xee2   : > { %v8893_v6 = vpop.permute.xlu0 %8892 }
 0xee4   : > { %10016 = vperm.xlu0 %15939, %v9978_v36   ;;  %9575 = vrot.lane.b32.xlu1 %v19766_v10, %s21087_s22 }
 0xee8   : > { %10026 = vperm.xlu0 %15939, %v9980_v63   ;;  %9577 = vrot.lane.b32.xlu1 %v19774_v9, %s21087_s22 }
 0xeea   : > { %v8895_v39 = vpop.permute.xlu0 %8894 }
 0xeec   : > { %10036 = vperm.xlu0 %15939, %v9982_v4   ;;  %9579 = vrot.lane.b32.xlu1 %v19782_v61, %s21087_s22  ;;  %v16858_v4 = vld [vmem:[%s21050_s4 + $0x30] ss:$8 sps:$4 sm:$0xff]  }
 0xeee   : > { %v9299_v59 = vpop.permute.xlu0 %9298 }
 0xef0   : > { %10046 = vperm.xlu0 %15939, %v9984_v44   ;;  %9581 = vrot.lane.b32.xlu1 %v19790_v11, %s21087_s22  ;;  %v16863_v44 = vld [vmem:[%s21050_s4 + $0x44] ss:$8 sps:$4 sm:$0xff]  }
 0xef2   : > { %v8897_v3 = vpop.permute.xlu1 %8896  ;;  %v9301_v26 = vpop.permute.xlu0 %9300 }
 0xef3   : > { %14642 = vmatprep.subr.bf16.mxu1 %v8897_v3 }
 0xef4   : > { %10056 = vperm.xlu0 %15939, %v9986_v14   ;;  %14643 = vmatpush3.bf16.msra.mxu1 %v8881_v46 }
 0xef5   : > { %9583 = vrot.lane.b32.xlu1 %v19801_v52, %s21087_s22 }
 0xef6   : > { %v9303_v35 = vpop.permute.xlu0 %9302 }
 0xef8   : > { %10066 = vperm.xlu0 %15939, %v9988_v53   ;;  %v16861_v53 = vld [vmem:[%s21050_s4 + $0x40] ss:$8 sps:$4 sm:$0xff]  }
 0xef9   : > { %9585 = vrot.lane.b32.xlu1 %v19809_v32, %s21087_s22  ;;  %s12351_s22 = sshll.u32 %s19451_s24, 4  ;;  %s20994_s22 = int_to_ptr.vmem [resolvable:$true] %s12351_s22 }
 0xefa   : > { %v8899_v30 = vpop.permute.xlu1 %8898  ;;  %v9305_v24 = vpop.permute.xlu0 %9304  ;;  %s17101_s17 = scalar_lea.vmem %s20994_s22, 32 }
 0xefb   : > { %14644 = vmatprep.subr.bf16.mxu1 %v8899_v30  ;;  %p17102_p11 = scmp.ne.s32.totalorder %s20994_s22, %s17101_s17 }
 0xefc   : > { %14645 = vmatpush3.bf16.msra.mxu1 %v8883_v38  ;;  %v16866_v38 = vld [vmem:[%s21050_s4 + $0x54] ss:$8 sps:$4 sm:$0xff]  }
 0xefd   : > { %9828 = vrot.lane.b32.xlu1 %v19750_v45, %s21088_s27  ;;  %p17103_p12 = pnand %p17102_p11, %p17291_p5 }
 0xeff   : > { %p17104_p13 = pneg %p17103_p12 }
 0xf01   : > { %9830 = vrot.lane.b32.xlu1 %v19758_v28, %s21088_s27 }
 0xf02   : > { %v8901_v1 = vpop.permute.xlu1 %8900 }
 0xf03   : > { %14646 = vmatprep.subr.bf16.mxu1 %v8901_v1  ;;  %v16864_v1 = vld [vmem:[%s21050_s4 + $0x50] ss:$8 sps:$4 sm:$0xff]  }
 0xf04   : > { %14647 = vmatpush3.bf16.msra.mxu1 %v8885_v5  ;;  %v16869_v5 = vld [vmem:[%s21050_s4 + $0x64] ss:$8 sps:$4 sm:$0xff]  }
 0xf05   : > { %9832 = vrot.lane.b32.xlu1 %v19766_v10, %s21088_s27 }
 0xf09   : > { %9834 = vrot.lane.b32.xlu1 %v19774_v9, %s21088_s27 }
 0xf0a   : > { %v8903_v13 = vpop.permute.xlu1 %8902 }
 0xf0b   : > { %14648 = vmatprep.subr.bf16.mxu1 %v8903_v13  ;;  %v16867_v13 = vld [vmem:[%s21050_s4 + $0x60] ss:$8 sps:$4 sm:$0xff]  }
 0xf0c   : > { %14649 = vmatpush3.bf16.msra.mxu1 %v8887_v16  ;;  %v16872_v16 = vld [vmem:[%s21050_s4 + $0x74] ss:$8 sps:$4 sm:$0xff]  }
 0xf0d   : > { %9836 = vrot.lane.b32.xlu1 %v19782_v61, %s21088_s27 }
 0xf11   : > { %9838 = vrot.lane.b32.xlu1 %v19790_v11, %s21088_s27 }
 0xf12   : > { %v8905_v40 = vpop.permute.xlu1 %8904 }
 0xf13   : > { %14650 = vmatprep.subr.bf16.mxu1 %v8905_v40 }
 0xf14   : > { %14651 = vmatpush3.bf16.msra.mxu1 %v8889_v43 }
 0xf15   : > { %9840 = vrot.lane.b32.xlu1 %v19801_v52, %s21088_s27 }
 0xf19   : > { %9842 = vrot.lane.b32.xlu1 %v19809_v32, %s21088_s27  ;;  %s21005_s27 = scalar_lea.sflag [#allocation3], %s21092_s15 }
 0xf1a   : > { %v8907_v27 = vpop.permute.xlu1 %8906 }
 0xf1b   : > { %14652 = vmatprep.subr.bf16.mxu1 %v8907_v27  ;;  %v16870_v27 = vld [vmem:[%s21050_s4 + $0x70] ss:$8 sps:$4 sm:$0xff]  }
 0xf1c   : > { %14653 = vmatpush3.bf16.msra.mxu1 %v8891_v49 }
 0xf1d   : > { %9991 = vperm.xlu1 %15940, %v9973_v47   ;;  %v16875_v47 = vld [vmem:[%s21050_s4 + $0x104] ss:$8 sps:$4 sm:$0xff]  }
 0xf21   : > { %10001 = vperm.xlu1 %15940, %v9975_v33  }
 0xf22   : > { %v8909_v31 = vpop.permute.xlu1 %8908 }
 0xf23   : > { %14654 = vmatprep.subr.bf16.mxu1 %v8909_v31  ;;  %v16873_v31 = vld [vmem:[%s21050_s4 + $0x100] ss:$8 sps:$4 sm:$0xff]  }
 0xf24   : > { %14655 = vmatpush3.bf16.msra.mxu1 %v8893_v6 }
 0xf25   : > { %10011 = vperm.xlu1 %15940, %v9977_v57   ;;  %v16878_v57 = vld [vmem:[%s21050_s4 + $0x114] ss:$8 sps:$4 sm:$0xff]  }
 0xf29   : > { %10021 = vperm.xlu1 %15940, %v9979_v54  }
 0xf2a   : > { %v8911_v12 = vpop.permute.xlu1 %8910 }
 0xf2b   : > { %14656 = vmatprep.subr.bf16.mxu1 %v8911_v12 }
 0xf2c   : > { %14657 = vmatpush3.bf16.msra.mxu1 %v8895_v39 }
 0xf2d   : > { %10031 = vperm.xlu1 %15940, %v9981_v60   ;;  %14706 = vmatprep.subr.bf16.mxu1 %v19750_v45  ;;  %v16833_v45 = vld [vmem:[%s21050_s4 + $0xa4] ss:$8 sps:$4 sm:$0xff]   ;;  %v16876_v60 = vld [vmem:[%s21050_s4 + $0x110] ss:$8 sps:$4 sm:$0xff]  }
 0xf2f   : > { %8961 = vmatmul.mubr.bf16.vlgmr.msra.gmra.mrb[60].mxu1 %v16825_v42  ;;  %v16881_v42 = vld [vmem:[%s21050_s4 + $0x124] ss:$8 sps:$4 sm:$0xff]  }
 0xf30   : > { %14707 = vmatpush3.bf16.msra.mxu1 %v19716_v18  ;;  %8968 = vmatprep.mubr.bf16.mxu1 %v16830_v62  ;;  %v9987_v18 = vld [vmem:[%s21051_s5 + $0x70] sm:$0xff] }
 0xf31   : > { %10041 = vperm.xlu1 %15940, %v9983_v21   ;;  %14708 = vmatprep.subr.bf16.mxu1 %v19758_v28  ;;  %v16836_v28 = vld [vmem:[%s21050_s4 + $0xb4] ss:$8 sps:$4 sm:$0xff]  }
 0xf34   : > { %14709 = vmatpush3.bf16.msra.mxu1 %v19720_v20  ;;  %v16831_v20 = vld [vmem:[%s21050_s4 + $0xa0] ss:$8 sps:$4 sm:$0xff]  }
 0xf35   : > { %10051 = vperm.xlu1 %15940, %v9985_v41   ;;  %14710 = vmatprep.subr.bf16.mxu1 %v19766_v10  ;;  %v9315_v10 = vpop.permute.xlu1 %9314  ;;  %v16879_v41 = vld [vmem:[%s21050_s4 + $0x120] ss:$8 sps:$4 sm:$0xff]  }
 0xf37   : > { %8969 = vmatmul.mubr.bf16.gmra.mrb[64].mxu1 %v16828_v51  ;;  %v16884_v51 = vld [vmem:[%s21050_s4 + $0x134] ss:$8 sps:$4 sm:$0xff]  }
 0xf38   : > { %14711 = vmatpush3.bf16.msra.mxu1 %v19724_v23  ;;  %8976 = vmatprep.mubr.bf16.mxu1 %v16833_v45  ;;  %v16834_v23 = vld [vmem:[%s21050_s4 + $0xb0] ss:$8 sps:$4 sm:$0xff]  }
 0xf39   : > { %10061 = vperm.xlu1 %15940, %v9987_v18   ;;  %14712 = vmatprep.subr.bf16.mxu1 %v19774_v9  ;;  %v16845_v9 = vld [vmem:[%s21050_s4 + $0xe4] ss:$8 sps:$4 sm:$0xff]   ;;  %v9317_v7 = vpop.permute.xlu1 %9316 }
 0xf3c   : > { %14713 = vmatpush3.bf16.msra.mxu1 %v19728_v0  ;;  %v16839_v0 = vld [vmem:[%s21050_s4 + $0xc4] ss:$8 sps:$4 sm:$0xff]  }
 0xf3d   : > { %14714 = vmatprep.subr.bf16.mxu1 %v19782_v61  ;;  %v16848_v61 = vld [vmem:[%s21050_s4 + $0xf4] ss:$8 sps:$4 sm:$0xff]   ;;  %v9319_v19 = vpop.permute.xlu1 %9318 }
 0xf3f   : > { %8977 = vmatmul.mubr.bf16.gmra.mrb[68].mxu1 %v16831_v20  ;;  %v16882_v20 = vld [vmem:[%s21050_s4 + $0x130] ss:$8 sps:$4 sm:$0xff]  }
 0xf40   : > { %14715 = vmatpush3.bf16.msra.mxu1 %v19732_v37  ;;  %8984 = vmatprep.mubr.bf16.mxu1 %v16836_v28  ;;  %v16837_v37 = vld [vmem:[%s21050_s4 + $0xc0] ss:$8 sps:$4 sm:$0xff]   ;;  %v16887_v28 = vld [vmem:[%s21050_s4 + $0x144] ss:$8 sps:$4 sm:$0xff]  }
 0xf41   : > { %14716 = vmatprep.subr.bf16.mxu1 %v19790_v11  ;;  %v16851_v11 = vld [vmem:[%s21050_s4 + $0x4] ss:$8 sps:$4 sm:$0xff]  }
 0xf44   : > { %14717 = vmatpush3.bf16.msra.mxu1 %v19736_v17  ;;  %v16842_v17 = vld [vmem:[%s21050_s4 + $0xd4] ss:$8 sps:$4 sm:$0xff]  }
 0xf45   : > { %14718 = vmatprep.subr.bf16.mxu1 %v19801_v52  ;;  %v9321_v52 = vpop.permute.xlu1 %9320 }
 0xf47   : > { %8985 = vmatmul.mubr.bf16.gmra.mrb[72].mxu1 %v16834_v23 }
 0xf48   : > { %14719 = vmatpush3.bf16.msra.mxu1 %v19740_v15  ;;  %8992 = vmatprep.mubr.bf16.mxu1 %v16839_v0  ;;  %v16840_v15 = vld [vmem:[%s21050_s4 + $0xd0] ss:$8 sps:$4 sm:$0xff]  }
 0xf49   : > { %14720 = vmatprep.subr.bf16.mxu1 %v19809_v32  ;;  %v9323_v48 = vpop.permute.xlu1 %9322  ;;  %v9307_v32 = vpop.permute.xlu0 %9306 }
 0xf4c   : > { %14721 = vmatpush3.bf16.msra.mxu1 %v19744_v25  ;;  %v16843_v25 = vld [vmem:[%s21050_s4 + $0xe0] ss:$8 sps:$4 sm:$0xff]  }
 0xf4d   : > { %14770 = vmatprep.subr.bf16.mxu1 %v9315_v10  ;;  %v9325_v2 = vpop.permute.xlu1 %9324  ;;  %v9309_v36 = vpop.permute.xlu0 %9308  ;;  %v16885_v10 = vld [vmem:[%s21050_s4 + $0x140] ss:$8 sps:$4 sm:$0xff]  }
 0xf4f   : > { %8993 = vmatmul.mubr.bf16.gmra.mrb[76].mxu1 %v16837_v37 }
 0xf50   : > { %9000 = vmatprep.mubr.bf16.mxu1 %v16842_v17 }
 0xf51   : > { %v9327_v63 = vpop.permute.xlu1 %9326  ;;  %v9311_v14 = vpop.permute.xlu0 %9310 }
 0xf55   : > { %v9329_v3 = vpop.permute.xlu1 %9328  ;;  %v9313_v46 = vpop.permute.xlu0 %9312 }
 0xf57   : > { %9001 = vmatmul.mubr.bf16.gmra.mrb[80].mxu1 %v16840_v15  ;;  %v16890_v15 = vld [vmem:[%s21050_s4 + $0x154] ss:$8 sps:$4 sm:$0xff]  }
 0xf58   : > { %9008 = vmatprep.mubr.bf16.mxu1 %v16845_v9  ;;  %v16888_v9 = vld [vmem:[%s21050_s4 + $0x150] ss:$8 sps:$4 sm:$0xff]  }
 0xf59   : > { %v9572_v30 = vpop.permute.xlu1 %9571  ;;  %v9556_v40 = vpop.permute.xlu0 %9555 }
 0xf5d   : > { %v9574_v43 = vpop.permute.xlu1 %9573  ;;  %v9558_v49 = vpop.permute.xlu0 %9557 }
 0xf5f   : > { %9009 = vmatmul.mubr.bf16.gmra.mrb[84].mxu1 %v16843_v25  ;;  %v16893_v25 = vld [vmem:[%s21050_s4 + $0x164] ss:$8 sps:$4 sm:$0xff]  }
 0xf60   : > { %9016 = vmatprep.mubr.bf16.mxu1 %v16848_v61  ;;  %v16891_v61 = vld [vmem:[%s21050_s4 + $0x160] ss:$8 sps:$4 sm:$0xff]  }
 0xf61   : > { %v9576_v33 = vpop.permute.xlu1 %9575  ;;  %v9560_v6 = vpop.permute.xlu0 %9559 }
 0xf65   : > { %v9578_v54 = vpop.permute.xlu1 %9577  ;;  %v9562_v12 = vpop.permute.xlu0 %9561 }
 0xf67   : > { %9017 = vmatmul.mubr.bf16.gmra.mrb[88].mxu1 %v16846_v8  ;;  %v16894_v8 = vld [vmem:[%s21050_s4 + $0x170] ss:$8 sps:$4 sm:$0xff]  }
 0xf68   : > { %9137 = vmatprep.mubr.bf16.mxu1 %v16851_v11 }
 0xf69   : > { %v9580_v39 = vpop.permute.xlu1 %9579  ;;  %v9564_v62 = vpop.permute.xlu0 %9563 }
 0xf6d   : > { %v9582_v21 = vpop.permute.xlu1 %9581  ;;  %v9566_v45 = vpop.permute.xlu0 %9565 }
 0xf6f   : > { %9138 = vmatmul.mubr.bf16.vlgmr.msra.gmra.mrb[92].mxu1 %v16849_v22 }
 0xf70   : > { %14771 = vmatpush3.bf16.msra.mxu1 %v9299_v59  ;;  %9145 = vmatprep.mubr.bf16.mxu1 %v16854_v50  ;;  %v16896_v59 = vld [vmem:[%s21050_s4 + $0x174] ss:$8 sps:$4 sm:$0xff]   ;;  %v16897_v50 = vld [vmem:[%s21050_s4 + $0x180] ss:$8 sps:$4 sm:$0xff]  }
 0xf71   : > { %14772 = vmatprep.subr.bf16.mxu1 %v9317_v7  ;;  %v9584_v18 = vpop.permute.xlu1 %9583  ;;  %v9568_v23 = vpop.permute.xlu0 %9567 }
 0xf74   : > { %14773 = vmatpush3.bf16.msra.mxu1 %v9301_v26  ;;  %v16899_v26 = vld [vmem:[%s21050_s4 + $0x184] ss:$8 sps:$4 sm:$0xff]  }
 0xf75   : > { %14774 = vmatprep.subr.bf16.mxu1 %v9319_v19  ;;  %v9586_v0 = vpop.permute.xlu1 %9585  ;;  %v9570_v37 = vpop.permute.xlu0 %9569 }
 0xf77   : > { %9146 = vmatmul.mubr.bf16.gmra.mrb[96].mxu1 %v16852_v29 }
 0xf78   : > { %14775 = vmatpush3.bf16.msra.mxu1 %v9303_v35  ;;  %9153 = vmatprep.mubr.bf16.mxu1 %v16857_v56  ;;  %v16902_v35 = vld [vmem:[%s21050_s4 + $0x194] ss:$8 sps:$4 sm:$0xff]   ;;  %v16905_v56 = vld [vmem:[%s21050_s4 + $0x1a4] ss:$8 sps:$4 sm:$0xff]  }
 0xf79   : > { %14776 = vmatprep.subr.bf16.mxu1 %v9321_v52  ;;  %v9829_v17 = vpop.permute.xlu1 %9828  ;;  %v9813_v7 = vpop.permute.xlu0 %9812 }
 0xf7c   : > { %14777 = vmatpush3.bf16.msra.mxu1 %v9305_v24 }
 0xf7d   : > { %14778 = vmatprep.subr.bf16.mxu1 %v9323_v48  ;;  %v9831_v11 = vpop.permute.xlu1 %9830  ;;  %v9815_v19 = vpop.permute.xlu0 %9814  ;;  %v16900_v48 = vld [vmem:[%s21050_s4 + $0x190] ss:$8 sps:$4 sm:$0xff]  }
 0xf7f   : > { %9154 = vmatmul.mubr.bf16.gmra.mrb[100].mxu1 %v16855_v34  ;;  %v16903_v34 = vld [vmem:[%s21050_s4 + $0x1a0] ss:$8 sps:$4 sm:$0xff]  }
 0xf80   : > { %14779 = vmatpush3.bf16.msra.mxu1 %v9307_v32  ;;  %9161 = vmatprep.mubr.bf16.mxu1 %v16860_v55 }
 0xf81   : > { %14780 = vmatprep.subr.bf16.mxu1 %v9325_v2  ;;  %v9833_v22 = vpop.permute.xlu1 %9832  ;;  %v9817_v52 = vpop.permute.xlu0 %9816 }
 0xf84   : > { %14781 = vmatpush3.bf16.msra.mxu1 %v9309_v36  ;;  %v16908_v36 = vld [vmem:[%s21050_s4 + $0x1b4] ss:$8 sps:$4 sm:$0xff]  }
 0xf85   : > { %14782 = vmatprep.subr.bf16.mxu1 %v9327_v63  ;;  %v9835_v24 = vpop.permute.xlu1 %9834  ;;  %v9819_v29 = vpop.permute.xlu0 %9818 }
 0xf87   : > { %9162 = vmatmul.mubr.bf16.gmra.mrb[104].mxu1 %v16858_v4 }
 0xf88   : > { %14783 = vmatpush3.bf16.msra.mxu1 %v9311_v14  ;;  %9169 = vmatprep.mubr.bf16.mxu1 %v16863_v44  ;;  %v16906_v14 = vld [vmem:[%s21050_s4 + $0x1b0] ss:$8 sps:$4 sm:$0xff]  }
 0xf89   : > { %14784 = vmatprep.subr.bf16.mxu1 %v9329_v3  ;;  %v9837_v32 = vpop.permute.xlu1 %9836  ;;  %v9821_v2 = vpop.permute.xlu0 %9820 }
 0xf8c   : > { %14785 = vmatpush3.bf16.msra.mxu1 %v9313_v46  ;;  %v16911_v46 = vld [vmem:[%s21050_s4 + $0x1c4] ss:$8 sps:$4 sm:$0xff]  }
 0xf8d   : > { %14834 = vmatprep.subr.bf16.mxu1 %v9572_v30  ;;  %v9839_v55 = vpop.permute.xlu1 %9838  ;;  %v9823_v63 = vpop.permute.xlu0 %9822 }
 0xf8f   : > { %9170 = vmatmul.mubr.bf16.gmra.mrb[108].mxu1 %v16861_v53 }
 0xf90   : > { %9177 = vmatprep.mubr.bf16.mxu1 %v16866_v38 }
 0xf91   : > { %v9841_v4 = vpop.permute.xlu1 %9840  ;;  %v9825_v38 = vpop.permute.xlu0 %9824 }
 0xf97   : > { %9178 = vmatmul.mubr.bf16.gmra.mrb[112].mxu1 %v16864_v1 }
 0xf98   : > { %9185 = vmatprep.mubr.bf16.mxu1 %v16869_v5 }
 0xf9f   : > { %9186 = vmatmul.mubr.bf16.gmra.mrb[116].mxu1 %v16867_v13  ;;  %v9843_v13 = vpop.permute.xlu1 %9842 }
 0xfa0   : > { %9193 = vmatprep.mubr.bf16.mxu1 %v16872_v16 }
 0xfa7   : > { %9194 = vmatmul.mubr.bf16.gmra.mrb[120].mxu1 %v16870_v27 }
 0xfa8   : > { %9378 = vmatprep.mubr.bf16.mxu1 %v16875_v47  ;;  %v16914_v47 = vld [vmem:[%s21050_s4 + $0x1d4] ss:$8 sps:$4 sm:$0xff]  }
 0xfaf   : > { %9379 = vmatmul.mubr.bf16.vlgmr.msra.gmra.mrb[124].mxu1 %v16873_v31 }
 0xfb0   : > { %14835 = vmatpush3.bf16.msra.mxu1 %v9556_v40  ;;  %9386 = vmatprep.mubr.bf16.mxu1 %v16878_v57  ;;  %v9827_v40 = vpop.permute.xlu0 %9826 }
 0xfb1   : > { %14836 = vmatprep.subr.bf16.mxu1 %v9574_v43  ;;  %v16909_v43 = vld [vmem:[%s21050_s4 + $0x1c0] ss:$8 sps:$4 sm:$0xff]  }
 0xfb4   : > { %14837 = vmatpush3.bf16.msra.mxu1 %v9558_v49 }
 0xfb5   : > { %14838 = vmatprep.subr.bf16.mxu1 %v9576_v33 }
 0xfb7   : > { %9387 = vmatmul.mubr.bf16.gmra.mrb[128].mxu1 %v16876_v60  ;;  %v16917_v60 = vld [vmem:[%s21050_s4 + $0x1e4] ss:$8 sps:$4 sm:$0xff]  }
 0xfb8   : > { %14839 = vmatpush3.bf16.msra.mxu1 %v9560_v6  ;;  %9394 = vmatprep.mubr.bf16.mxu1 %v16881_v42 }
 0xfb9   : > { %14840 = vmatprep.subr.bf16.mxu1 %v9578_v54  ;;  %v16912_v54 = vld [vmem:[%s21050_s4 + $0x1d0] ss:$8 sps:$4 sm:$0xff]  }
 0xfbc   : > { %14841 = vmatpush3.bf16.msra.mxu1 %v9562_v12 }
 0xfbd   : > { %14842 = vmatprep.subr.bf16.mxu1 %v9580_v39 }
 0xfbf   : > { %9395 = vmatmul.mubr.bf16.gmra.mrb[132].mxu1 %v16879_v41 }
 0xfc0   : > { %14843 = vmatpush3.bf16.msra.mxu1 %v9564_v62  ;;  %9402 = vmatprep.mubr.bf16.mxu1 %v16884_v51  ;;  %v16915_v51 = vld [vmem:[%s21050_s4 + $0x1e0] ss:$8 sps:$4 sm:$0xff]  }
 0xfc1   : > { %14844 = vmatprep.subr.bf16.mxu1 %v9582_v21 }
 0xfc4   : > { %14845 = vmatpush3.bf16.msra.mxu1 %v9566_v45 }
 0xfc5   : > { %14846 = vmatprep.subr.bf16.mxu1 %v9584_v18  ;;  %v16920_v18 = vld [vmem:[%s21050_s4 + $0x1f4] ss:$8 sps:$4 sm:$0xff]  }
 0xfc7   : > { %9403 = vmatmul.mubr.bf16.gmra.mrb[136].mxu1 %v16882_v20 }
 0xfc8   : > { %14847 = vmatpush3.bf16.msra.mxu1 %v9568_v23  ;;  %9410 = vmatprep.mubr.bf16.mxu1 %v16887_v28 }
 0xfc9   : > { %14848 = vmatprep.subr.bf16.mxu1 %v9586_v0 }
 0xfcc   : > { %14849 = vmatpush3.bf16.msra.mxu1 %v9570_v37 }
 0xfcd   : > { %14898 = vmatprep.subr.bf16.mxu1 %v9829_v17 }
 0xfcf   : > { %9411 = vmatmul.mubr.bf16.gmra.mrb[140].mxu1 %v16885_v10  ;;  %v16918_v10 = vld [vmem:[%s21050_s4 + $0x1f0] ss:$8 sps:$4 sm:$0xff]  }
 0xfd0   : > { %9418 = vmatprep.mubr.bf16.mxu1 %v16890_v15  ;;  %v16923_v15 = vld [vmem:[%s21050_s4 + $0x204] ss:$8 sps:$4 sm:$0xff]  }
 0xfd7   : > { %9419 = vmatmul.mubr.bf16.gmra.mrb[144].mxu1 %v16888_v9 }
 0xfd8   : > { %9426 = vmatprep.mubr.bf16.mxu1 %v16893_v25 }
 0xfdf   : > { %9427 = vmatmul.mubr.bf16.gmra.mrb[148].mxu1 %v16891_v61 }
 0xfe0   : > { %9434 = vmatprep.mubr.bf16.mxu1 %v16896_v59 }
 0xfe7   : > { %9435 = vmatmul.mubr.bf16.gmra.mrb[152].mxu1 %v16894_v8  ;;  %v16921_v8 = vld [vmem:[%s21050_s4 + $0x200] ss:$8 sps:$4 sm:$0xff]  }
 0xfe8   : > { %9635 = vmatprep.mubr.bf16.mxu1 %v16899_v26  ;;  %v16926_v26 = vld [vmem:[%s21050_s4 + $0x214] ss:$8 sps:$4 sm:$0xff]  }
 0xfef   : > { %9636 = vmatmul.mubr.bf16.vlgmr.msra.gmra.mrb[156].mxu1 %v16897_v50 }
 0xff0   : > { %14899 = vmatpush3.bf16.msra.mxu1 %v9813_v7  ;;  %9643 = vmatprep.mubr.bf16.mxu1 %v16902_v35 }
 0xff1   : > { %14900 = vmatprep.subr.bf16.mxu1 %v9831_v11 }
 0xff4   : > { %14901 = vmatpush3.bf16.msra.mxu1 %v9815_v19 }
 0xff5   : > { %14902 = vmatprep.subr.bf16.mxu1 %v9833_v22 }
 0xff7   : > { %9644 = vmatmul.mubr.bf16.gmra.mrb[160].mxu1 %v16900_v48 }
 0xff8   : > { %14903 = vmatpush3.bf16.msra.mxu1 %v9817_v52  ;;  %9651 = vmatprep.mubr.bf16.mxu1 %v16905_v56 }
 0xff9   : > { %14904 = vmatprep.subr.bf16.mxu1 %v9835_v24  ;;  %v16924_v24 = vld [vmem:[%s21050_s4 + $0x210] ss:$8 sps:$4 sm:$0xff]  }
 0xffc   : > { %14905 = vmatpush3.bf16.msra.mxu1 %v9819_v29 }
 0xffd   : > { %14906 = vmatprep.subr.bf16.mxu1 %v9837_v32  ;;  %v16929_v32 = vld [vmem:[%s21050_s4 + $0x224] ss:$8 sps:$4 sm:$0xff]  }
 0xfff   : > { %9652 = vmatmul.mubr.bf16.gmra.mrb[164].mxu1 %v16903_v34 }
0x1000   : > { %14907 = vmatpush3.bf16.msra.mxu1 %v9821_v2  ;;  %9659 = vmatprep.mubr.bf16.mxu1 %v16908_v36  ;;  %v16927_v36 = vld [vmem:[%s21050_s4 + $0x220] ss:$8 sps:$4 sm:$0xff]  }
0x1001   : > { %14908 = vmatprep.subr.bf16.mxu1 %v9839_v55 }
0x1002   : > { %v14658_v44 = vpop.f32.mrb[60].mxu1 }
0x1003   : > { %v14659_v3 = vpop.f32.mrb[61].mxu1 }
0x1004   : > { %14909 = vmatpush3.bf16.msra.mxu1 %v9823_v63  ;;  %v20111_v53 = vadd.f32 %v14659_v3, %v14658_v44  ;;  %v14661_v30 = vpop.f32.mrb[62].mxu1 }
0x1005   : > { %14910 = vmatprep.subr.bf16.mxu1 %v9841_v4  ;;  %v14662_v1 = vpop.f32.mrb[63].mxu1 }
0x1006   : > { %v20113_v5 = vadd.f32 %v14662_v1, %v14661_v30  ;;  %v16930_v1 = vld [vmem:[%s21050_s4 + $0x230] ss:$8 sps:$4 sm:$0xff]  }
0x1007   : > { %9660 = vmatmul.mubr.bf16.gmra.mrb[168].mxu1 %v16906_v14  ;;  %v16932_v14 = vld [vmem:[%s21050_s4 + $0x234] ss:$8 sps:$4 sm:$0xff]  }
0x1008   : > { %14911 = vmatpush3.bf16.msra.mxu1 %v9825_v38  ;;  %9667 = vmatprep.mubr.bf16.mxu1 %v16911_v46 }
0x1009   : > { %14912 = vmatprep.subr.bf16.mxu1 %v9843_v13 }
0x100a   : > { %v14664_v16 = vpop.f32.mrb[64].mxu1 }
0x100b   : > { %v14665_v27 = vpop.f32.mrb[65].mxu1 }
0x100c   : > { %14913 = vmatpush3.bf16.msra.mxu1 %v9827_v40  ;;  %v20121_v49 = vadd.f32 %v14665_v27, %v14664_v16  ;;  %v14667_v33 = vpop.f32.mrb[66].mxu1  ;;  %v16935_v40 = vld [vmem:[%s21050_s4 + $0x244] ss:$8 sps:$4 sm:$0xff]  }
0x100d   : > { %v14668_v31 = vpop.f32.mrb[67].mxu1 }
0x100e   : > { %v20123_v57 = vadd.f32 %v14668_v31, %v14667_v33 }
0x100f   : > { %9668 = vmatmul.mubr.bf16.gmra.mrb[172].mxu1 %v16909_v43 }
0x1010   : > { %9675 = vmatprep.mubr.bf16.mxu1 %v16914_v47 }
0x1012   : > { %v14670_v6 = vpop.f32.mrb[68].mxu1 }
0x1013   : > { %v14671_v12 = vpop.f32.mrb[69].mxu1 }
0x1014   : > { %v20131_v39 = vadd.f32 %v14671_v12, %v14670_v6  ;;  %v14673_v42 = vpop.f32.mrb[70].mxu1 }
0x1015   : > { %v14674_v62 = vpop.f32.mrb[71].mxu1 }
0x1016   : > { %v20133_v21 = vadd.f32 %v14674_v62, %v14673_v42  ;;  %v16938_v42 = vld [vmem:[%s21050_s4 + $0x254] ss:$8 sps:$4 sm:$0xff]  }
0x1017   : > { %9676 = vmatmul.mubr.bf16.gmra.mrb[176].mxu1 %v16912_v54  ;;  %v16933_v54 = vld [vmem:[%s21050_s4 + $0x240] ss:$8 sps:$4 sm:$0xff]  }
0x1018   : > { %9683 = vmatprep.mubr.bf16.mxu1 %v16917_v60 }
0x101a   : > { %v14676_v41 = vpop.f32.mrb[72].mxu1 }
0x101b   : > { %v14677_v45 = vpop.f32.mrb[73].mxu1 }
0x101c   : > { %v20141_v20 = vadd.f32 %v14677_v45, %v14676_v41  ;;  %v14679_v28 = vpop.f32.mrb[74].mxu1 }
0x101d   : > { %v14680_v23 = vpop.f32.mrb[75].mxu1 }
0x101e   : > { %v20143_v0 = vadd.f32 %v14680_v23, %v14679_v28 }
0x101f   : > { %9684 = vmatmul.mubr.bf16.gmra.mrb[180].mxu1 %v16915_v51 }
0x1020   : > { %9691 = vmatprep.mubr.bf16.mxu1 %v16920_v18  ;;  %v16936_v18 = vld [vmem:[%s21050_s4 + $0x250] ss:$8 sps:$4 sm:$0xff]  }
0x1022   : > { %v14682_v37 = vpop.f32.mrb[76].mxu1 }
0x1023   : > { %v14683_v17 = vpop.f32.mrb[77].mxu1 }
0x1024   : > { %v20151_v9 = vadd.f32 %v14683_v17, %v14682_v37  ;;  %v14685_v25 = vpop.f32.mrb[78].mxu1  ;;  %v16941_v37 = vld [vmem:[%s21050_s4 + $0x264] ss:$8 sps:$4 sm:$0xff]  }
0x1025   : > { %v14686_v61 = vpop.f32.mrb[79].mxu1 }
0x1026   : > { %v20153_v59 = vadd.f32 %v14686_v61, %v14685_v25  ;;  %v16939_v61 = vld [vmem:[%s21050_s4 + $0x260] ss:$8 sps:$4 sm:$0xff]  }
0x1027   : > { %9692 = vmatmul.mubr.bf16.gmra.mrb[184].mxu1 %v16918_v10 }
0x1028   : > { %9892 = vmatprep.mubr.bf16.mxu1 %v16923_v15 }
0x102a   : > { %v14688_v7 = vpop.f32.mrb[80].mxu1 }
0x102b   : > { %v14689_v11 = vpop.f32.mrb[81].mxu1 }
0x102c   : > { %v20161_v19 = vadd.f32 %v14689_v11, %v14688_v7  ;;  %v14691_v22 = vpop.f32.mrb[82].mxu1  ;;  %v16944_v11 = vld [vmem:[%s21050_s4 + $0x274] ss:$8 sps:$4 sm:$0xff]  }
0x102d   : > { %v14692_v50 = vpop.f32.mrb[83].mxu1 }
0x102e   : > { %v20163_v35 = vadd.f32 %v14692_v50, %v14691_v22 }
0x102f   : > { %9893 = vmatmul.mubr.bf16.vlgmr.msra.gmra.mrb[188].mxu1 %v16921_v8 }
0x1030   : > { %9900 = vmatprep.mubr.bf16.mxu1 %v16926_v26 }
0x1032   : > { %v14694_v52 = vpop.f32.mrb[84].mxu1 }
0x1033   : > { %v14695_v29 = vpop.f32.mrb[85].mxu1 }
0x1034   : > { %v20168_v48 = vadd.f32 %v14695_v29, %v14694_v52  ;;  %v14697_v56 = vpop.f32.mrb[86].mxu1 }
0x1035   : > { %v14698_v2 = vpop.f32.mrb[87].mxu1 }
0x1036   : > { %v20173_v34 = vadd.f32 %v14698_v2, %v14697_v56 }
0x1037   : > { %9901 = vmatmul.mubr.bf16.gmra.mrb[192].mxu1 %v16924_v24  ;;  %v16942_v24 = vld [vmem:[%s21050_s4 + $0x270] ss:$8 sps:$4 sm:$0xff]  }
0x1038   : > { %9908 = vmatprep.mubr.bf16.mxu1 %v16929_v32 }
0x103a   : > { %v14700_v55 = vpop.f32.mrb[88].mxu1 }
0x103b   : > { %v14701_v63 = vpop.f32.mrb[89].mxu1 }
0x103c   : > { %v20178_v4 = vadd.f32 %v14701_v63, %v14700_v55  ;;  %v14703_v44 = vpop.f32.mrb[90].mxu1 }
0x103d   : > { %v14704_v3 = vpop.f32.mrb[91].mxu1 }
0x103e   : > { %v20183_v46 = vadd.f32 %v14704_v3, %v14703_v44 }
0x103f   : > { %9909 = vmatmul.mubr.bf16.gmra.mrb[196].mxu1 %v16927_v36 }
0x1040   : > { %9916 = vmatprep.mubr.bf16.mxu1 %v16932_v14 }
0x1042   : > { %v14722_v30 = vpop.f32.mrb[92].mxu1 }
0x1043   : > { %v14723_v38 = vpop.f32.mrb[93].mxu1 }
0x1044   : > { %v14724_v13 = vadd.f32 %v14723_v38, %v14722_v30  ;;  %v14725_v16 = vpop.f32.mrb[94].mxu1 }
0x1045   : > { %v14726_v43 = vpop.f32.mrb[95].mxu1 }
0x1046   : > { %v20192_v27 = vadd.f32 %v14724_v13, %v20111_v53  ;;  %v14727_v47 = vadd.f32 %v14726_v43, %v14725_v16 }
0x1047   : > { %9917 = vmatmul.mubr.bf16.gmra.mrb[200].mxu1 %v16930_v1 }
0x1048   : > { %v20195_v33 = vadd.f32 %v14727_v47, %v20113_v5  ;;  %9924 = vmatprep.mubr.bf16.mxu1 %v16935_v40  ;;  %v16945_v47 = vld [vmem:[%s21052_s6] sm:$0xff]  }
0x1049   : > { %15335 = vmatprep.subr.bf16.mxu0 %v16945_v47 }
0x104a   : > { %v14728_v31 = vpop.f32.mrb[96].mxu1  ;;  %15336 = vmatpush3.bf16.msra.mxu0 %v16945_v47 }
0x104b   : > { %v14729_v6 = vpop.f32.mrb[97].mxu1 }
0x104c   : > { %v14730_v12 = vadd.f32 %v14729_v6, %v14728_v31  ;;  %v14731_v60 = vpop.f32.mrb[98].mxu1  ;;  %v16946_v6 = vld [vmem:[%s21052_s6 + $0x8] sm:$0xff]  }
0x104d   : > { %v14732_v53 = vpop.f32.mrb[99].mxu1  ;;  %15337 = vmatprep.subr.bf16.mxu0 %v16946_v6 }
0x104e   : > { %v20204_v62 = vadd.f32 %v14730_v12, %v20121_v49  ;;  %v14733_v41 = vadd.f32 %v14732_v53, %v14731_v60  ;;  %15338 = vmatpush3.bf16.msra.mxu0 %v16946_v6 }
0x104f   : > { %9925 = vmatmul.mubr.bf16.gmra.mrb[204].mxu1 %v16933_v54 }
0x1050   : > { %v20207_v5 = vadd.f32 %v14733_v41, %v20123_v57  ;;  %9932 = vmatprep.mubr.bf16.mxu1 %v16938_v42 }
0x1052   : > { %v14734_v51 = vpop.f32.mrb[100].mxu1 }
0x1053   : > { %v14735_v45 = vpop.f32.mrb[101].mxu1 }
0x1054   : > { %v14736_v28 = vadd.f32 %v14735_v45, %v14734_v51  ;;  %v14737_v23 = vpop.f32.mrb[102].mxu1  ;;  %v16948_v45 = vld [vmem:[%s21052_s6 + $0x18] sm:$0xff]  }
0x1055   : > { %v14738_v49 = vpop.f32.mrb[103].mxu1 }
0x1056   : > { %v20216_v10 = vadd.f32 %v14736_v28, %v20131_v39  ;;  %v14739_v17 = vadd.f32 %v14738_v49, %v14737_v23 }
0x1057   : > { %9933 = vmatmul.mubr.bf16.gmra.mrb[208].mxu1 %v16936_v18 }
0x1058   : > { %v20219_v57 = vadd.f32 %v14739_v17, %v20133_v21  ;;  %9940 = vmatprep.mubr.bf16.mxu1 %v16941_v37 }
0x105a   : > { %v14740_v15 = vpop.f32.mrb[104].mxu1 }
0x105b   : > { %v14741_v25 = vpop.f32.mrb[105].mxu1 }
0x105c   : > { %v14742_v7 = vadd.f32 %v14741_v25, %v14740_v15  ;;  %v14743_v8 = vpop.f32.mrb[106].mxu1  ;;  %v16950_v25 = vld [vmem:[%s21052_s6 + $0x28] sm:$0xff]  }
0x105d   : > { %v14744_v39 = vpop.f32.mrb[107].mxu1 }
0x105e   : > { %v20228_v26 = vadd.f32 %v14742_v7, %v20141_v20  ;;  %v14745_v22 = vadd.f32 %v14744_v39, %v14743_v8 }
0x105f   : > { %9941 = vmatmul.mubr.bf16.gmra.mrb[212].mxu1 %v16939_v61 }
0x1060   : > { %v20231_v21 = vadd.f32 %v14745_v22, %v20143_v0  ;;  %9948 = vmatprep.mubr.bf16.mxu1 %v16944_v11 }
0x1062   : > { %v14746_v50 = vpop.f32.mrb[108].mxu1 }
0x1063   : > { %v14747_v52 = vpop.f32.mrb[109].mxu1 }
0x1064   : > { %v14748_v29 = vadd.f32 %v14747_v52, %v14746_v50  ;;  %v14749_v56 = vpop.f32.mrb[110].mxu1  ;;  %v16952_v52 = vld [vmem:[%s21052_s6 + $0x38] sm:$0x3f]  }
0x1065   : > { %v14750_v32 = vpop.f32.mrb[111].mxu1 }
0x1066   : > { %v20237_v2 = vadd.f32 %v14748_v29, %v20151_v9  ;;  %v14751_v20 = vadd.f32 %v14750_v32, %v14749_v56  ;;  %v10197_v56 = vsel %vm1800_vm0, %v16952_v52, 0 }
0x1067   : > { %9949 = vmatmul.mubr.bf16.gmra.mrb[216].mxu1 %v16942_v24 }
0x1068   : > { %v20240_v55 = vadd.f32 %v14751_v20, %v20153_v59 }
0x106a   : > { %v14752_v0 = vpop.f32.mrb[112].mxu1 }
0x106b   : > { %v14753_v36 = vpop.f32.mrb[113].mxu1 }
0x106c   : > { %v14754_v63 = vadd.f32 %v14753_v36, %v14752_v0  ;;  %v14755_v44 = vpop.f32.mrb[114].mxu1 }
0x106d   : > { %v14756_v14 = vpop.f32.mrb[115].mxu1 }
0x106e   : > { %v20243_v3 = vadd.f32 %v14754_v63, %v20161_v19  ;;  %v14757_v30 = vadd.f32 %v14756_v14, %v14755_v44 }
0x1070   : > { %v20246_v38 = vadd.f32 %v14757_v30, %v20163_v35 }
0x1072   : > { %v14758_v1 = vpop.f32.mrb[116].mxu1 }
0x1073   : > { %v14759_v9 = vpop.f32.mrb[117].mxu1 }
0x1074   : > { %v14760_v13 = vadd.f32 %v14759_v9, %v14758_v1  ;;  %v14761_v16 = vpop.f32.mrb[118].mxu1 }
0x1075   : > { %v14762_v40 = vpop.f32.mrb[119].mxu1 }
0x1076   : > { %v20249_v59 = vadd.f32 %v14760_v13, %v20168_v48  ;;  %v14763_v43 = vadd.f32 %v14762_v40, %v14761_v16 }
0x1078   : > { %v20255_v19 = vadd.f32 %v14763_v43, %v20173_v34  ;;  %v16947_v34 = vld [vmem:[%s21052_s6 + $0x10] sm:$0xff]  }
0x1079   : > { %15339 = vmatprep.subr.bf16.mxu0 %v16947_v34 }
0x107a   : > { %v14764_v35 = vpop.f32.mrb[120].mxu1  ;;  %15340 = vmatpush3.bf16.msra.mxu0 %v16947_v34 }
0x107b   : > { %v14765_v31 = vpop.f32.mrb[121].mxu1  ;;  %15341 = vmatprep.subr.bf16.mxu0 %v16948_v45 }
0x107c   : > { %v14766_v54 = vadd.f32 %v14765_v31, %v14764_v35  ;;  %v14767_v12 = vpop.f32.mrb[122].mxu1 }
0x107d   : > { %v14768_v48 = vpop.f32.mrb[123].mxu1 }
0x107e   : > { %v20261_v60 = vadd.f32 %v14766_v54, %v20178_v4  ;;  %v14769_v42 = vadd.f32 %v14768_v48, %v14767_v12  ;;  %15342 = vmatpush3.bf16.msra.mxu0 %v16948_v45 }
0x1080   : > { %v20267_v53 = vadd.f32 %v14769_v42, %v20183_v46  ;;  %v16949_v46 = vld [vmem:[%s21052_s6 + $0x20] sm:$0xff]  }
0x1081   : > { %15343 = vmatprep.subr.bf16.mxu0 %v16949_v46 }
0x1082   : > { %v14786_v41 = vpop.f32.mrb[124].mxu1  ;;  %15344 = vmatpush3.bf16.msra.mxu0 %v16949_v46 }
0x1083   : > { %v14787_v51 = vpop.f32.mrb[125].mxu1  ;;  %15345 = vmatprep.subr.bf16.mxu0 %v16950_v25 }
0x1084   : > { %v14788_v18 = vadd.f32 %v14787_v51, %v14786_v41  ;;  %v14789_v4 = vpop.f32.mrb[126].mxu1 }
0x1085   : > { %v14790_v28 = vpop.f32.mrb[127].mxu1 }
0x1086   : > { %v20273_v23 = vadd.f32 %v14788_v18, %v20192_v27  ;;  %v14791_v37 = vadd.f32 %v14790_v28, %v14789_v4  ;;  %15346 = vmatpush3.bf16.msra.mxu0 %v16950_v25 }
0x1088   : > { %v20279_v49 = vadd.f32 %v14791_v37, %v20195_v33  ;;  %v16951_v33 = vld [vmem:[%s21052_s6 + $0x30] sm:$0xff]  }
0x1089   : > { %15347 = vmatprep.subr.bf16.mxu0 %v16951_v33 }
0x108a   : > { %v14792_v17 = vpop.f32.mrb[128].mxu1  ;;  %15348 = vmatpush3.bf16.msra.mxu0 %v16951_v33 }
0x108b   : > { %v14793_v15 = vpop.f32.mrb[129].mxu1  ;;  %15885 = vmatprep.subr.msk.bf16.mxu0 %vm1800_vm0, %v16952_v52 }
0x108c   : > { %v14794_v61 = vadd.f32 %v14793_v15, %v14792_v17  ;;  %v14795_v27 = vpop.f32.mrb[130].mxu1 }
0x108d   : > { %v14796_v7 = vpop.f32.mrb[131].mxu1 }
0x108e   : > { %v20285_v8 = vadd.f32 %v14794_v61, %v20204_v62  ;;  %v14797_v11 = vadd.f32 %v14796_v7, %v14795_v27  ;;  %15350 = vmatpush3.bf16.msra.mxu0 %v10197_v56 }
0x1090   : > { %v20291_v39 = vadd.f32 %v14797_v11, %v20207_v5 }
0x1092   : > { %v14798_v22 = vpop.f32.mrb[132].mxu1 }
0x1093   : > { %v14799_v50 = vpop.f32.mrb[133].mxu1 }
0x1094   : > { %v14800_v24 = vadd.f32 %v14799_v50, %v14798_v22  ;;  %v14801_v62 = vpop.f32.mrb[134].mxu1 }
0x1095   : > { %v14802_v29 = vpop.f32.mrb[135].mxu1 }
0x1096   : > { %v20299_v32 = vadd.f32 %v14800_v24, %v20216_v10  ;;  %v14803_v5 = vadd.f32 %v14802_v29, %v14801_v62 }
0x1098   : > { %v20302_v20 = vadd.f32 %v14803_v5, %v20219_v57 }
0x109a   : > { %v14804_v0 = vpop.f32.mrb[136].mxu1 }
0x109b   : > { %v14805_v36 = vpop.f32.mrb[137].mxu1 }
0x109c   : > { %v14806_v63 = vadd.f32 %v14805_v36, %v14804_v0  ;;  %v14807_v44 = vpop.f32.mrb[138].mxu1 }
0x109d   : > { %v14808_v14 = vpop.f32.mrb[139].mxu1 }
0x109e   : > { %v20305_v30 = vadd.f32 %v14806_v63, %v20228_v26  ;;  %v14809_v1 = vadd.f32 %v14808_v14, %v14807_v44 }
0x10a0   : > { %v20308_v9 = vadd.f32 %v14809_v1, %v20231_v21 }
0x10a2   : > { %v14810_v13 = vpop.f32.mrb[140].mxu1 }
0x10a3   : > { %v14811_v10 = vpop.f32.mrb[141].mxu1 }
0x10a4   : > { %v14812_v16 = vadd.f32 %v14811_v10, %v14810_v13  ;;  %v14813_v40 = vpop.f32.mrb[142].mxu1 }
0x10a5   : > { %v14814_v43 = vpop.f32.mrb[143].mxu1 }
0x10a6   : > { %v20311_v57 = vadd.f32 %v14812_v16, %v20237_v2  ;;  %v14815_v47 = vadd.f32 %v14814_v43, %v14813_v40 }
0x10a8   : > { %v20314_v35 = vadd.f32 %v14815_v47, %v20240_v55 }
0x10aa   : > { %v14816_v31 = vpop.f32.mrb[144].mxu1 }
0x10ab   : > { %v14817_v6 = vpop.f32.mrb[145].mxu1 }
0x10ac   : > { %v14818_v26 = vadd.f32 %v14817_v6, %v14816_v31  ;;  %v14819_v54 = vpop.f32.mrb[146].mxu1 }
0x10ad   : > { %v14820_v12 = vpop.f32.mrb[147].mxu1 }
0x10ae   : > { %v20317_v21 = vadd.f32 %v14818_v26, %v20243_v3  ;;  %v14821_v48 = vadd.f32 %v14820_v12, %v14819_v54 }
0x10b0   : > { %v20320_v42 = vadd.f32 %v14821_v48, %v20246_v38 }
0x10b2   : > { %v14822_v34 = vpop.f32.mrb[148].mxu1 }
0x10b3   : > { %v14823_v41 = vpop.f32.mrb[149].mxu1 }
0x10b4   : > { %v14824_v2 = vadd.f32 %v14823_v41, %v14822_v34  ;;  %v14825_v51 = vpop.f32.mrb[150].mxu1 }
0x10b5   : > { %v14826_v45 = vpop.f32.mrb[151].mxu1 }
0x10b6   : > { %v20323_v55 = vadd.f32 %v14824_v2, %v20249_v59  ;;  %v14827_v18 = vadd.f32 %v14826_v45, %v14825_v51 }
0x10b8   : > { %v20326_v4 = vadd.f32 %v14827_v18, %v20255_v19 }
0x10ba   : > { %v14828_v28 = vpop.f32.mrb[152].mxu1 }
0x10bb   : > { %v14829_v37 = vpop.f32.mrb[153].mxu1 }
0x10bc   : > { %v14830_v3 = vadd.f32 %v14829_v37, %v14828_v28  ;;  %v14831_v46 = vpop.f32.mrb[154].mxu1 }
0x10bd   : > { %v14832_v17 = vpop.f32.mrb[155].mxu1 }
0x10be   : > { %v20329_v38 = vadd.f32 %v14830_v3, %v20261_v60  ;;  %v14833_v15 = vadd.f32 %v14832_v17, %v14831_v46 }
0x10c0   : > { %v20332_v25 = vadd.f32 %v14833_v15, %v20267_v53 }
0x10c2   : > { %v14850_v61 = vpop.f32.mrb[156].mxu1 }
0x10c3   : > { %v14851_v27 = vpop.f32.mrb[157].mxu1 }
0x10c4   : > { %v14852_v59 = vadd.f32 %v14851_v27, %v14850_v61  ;;  %v14853_v7 = vpop.f32.mrb[158].mxu1 }
0x10c5   : > { %v14854_v11 = vpop.f32.mrb[159].mxu1 }
0x10c6   : > { %v20335_v19 = vadd.f32 %v14852_v59, %v20273_v23  ;;  %v14855_v33 = vadd.f32 %v14854_v11, %v14853_v7 }
0x10c8   : > { %v20338_v22 = vadd.f32 %v14855_v33, %v20279_v49 }
0x10ca   : > { %v14856_v50 = vpop.f32.mrb[160].mxu1 }
0x10cb   : > { %v14857_v52 = vpop.f32.mrb[161].mxu1 }
0x10cc   : > { %v14858_v60 = vadd.f32 %v14857_v52, %v14856_v50  ;;  %v14859_v24 = vpop.f32.mrb[162].mxu1 }
0x10cd   : > { %v14860_v62 = vpop.f32.mrb[163].mxu1 }
0x10ce   : > { %v20341_v53 = vadd.f32 %v14858_v60, %v20285_v8  ;;  %v14861_v29 = vadd.f32 %v14860_v62, %v14859_v24  ;;  %v9992_v62 = vpop.permute.xlu1 %9991 }
0x10d0   : > { %v20344_v56 = vadd.f32 %v14861_v29, %v20291_v39 }
0x10d2   : > { %v14862_v5 = vpop.f32.mrb[164].mxu1 }
0x10d3   : > { %v14863_v0 = vpop.f32.mrb[165].mxu1 }
0x10d4   : > { %v14864_v23 = vadd.f32 %v14863_v0, %v14862_v5  ;;  %v14865_v36 = vpop.f32.mrb[166].mxu1  ;;  %v9997_v0 = vpop.permute.xlu0 %9996 }
0x10d5   : > { %v14866_v63 = vpop.f32.mrb[167].mxu1 }
0x10d6   : > { %v20347_v49 = vadd.f32 %v14864_v23, %v20299_v32  ;;  %v14867_v44 = vadd.f32 %v14866_v63, %v14865_v36 }
0x10d8   : > { %v20350_v14 = vadd.f32 %v14867_v44, %v20302_v20 }
0x10da   : > { %v14868_v1 = vpop.f32.mrb[168].mxu1 }
0x10db   : > { %v14869_v13 = vpop.f32.mrb[169].mxu1 }
0x10dc   : > { %v14870_v8 = vadd.f32 %v14869_v13, %v14868_v1  ;;  %v14871_v10 = vpop.f32.mrb[170].mxu1 }
0x10dd   : > { %v14872_v16 = vpop.f32.mrb[171].mxu1 }
0x10de   : > { %v20353_v39 = vadd.f32 %v14870_v8, %v20305_v30  ;;  %v14873_v40 = vadd.f32 %v14872_v16, %v14871_v10 }
0x10e0   : > { %v20356_v43 = vadd.f32 %v14873_v40, %v20308_v9  ;;  %v10002_v40 = vpop.permute.xlu1 %10001 }
0x10e2   : > { %v14874_v47 = vpop.f32.mrb[172].mxu1 }
0x10e3   : > { %v14875_v31 = vpop.f32.mrb[173].mxu1 }
0x10e4   : > { %v14876_v32 = vadd.f32 %v14875_v31, %v14874_v47  ;;  %v14877_v6 = vpop.f32.mrb[174].mxu1 }
0x10e5   : > { %v14878_v26 = vpop.f32.mrb[175].mxu1 }
0x10e6   : > { %v20359_v20 = vadd.f32 %v14876_v32, %v20311_v57  ;;  %v14879_v54 = vadd.f32 %v14878_v26, %v14877_v6 }
0x10e8   : > { %v20362_v12 = vadd.f32 %v14879_v54, %v20314_v35 }
0x10ea   : > { %v14880_v48 = vpop.f32.mrb[176].mxu1 }
0x10eb   : > { %v14881_v34 = vpop.f32.mrb[177].mxu1 }
0x10ec   : > { %v14882_v30 = vadd.f32 %v14881_v34, %v14880_v48  ;;  %v14883_v41 = vpop.f32.mrb[178].mxu1 }
0x10ed   : > { %v14884_v2 = vpop.f32.mrb[179].mxu1 }
0x10ee   : > { %v20365_v9 = vadd.f32 %v14882_v30, %v20317_v21  ;;  %v14885_v51 = vadd.f32 %v14884_v2, %v14883_v41 }
0x10f0   : > { %v20368_v45 = vadd.f32 %v14885_v51, %v20320_v42  ;;  %v10012_v51 = vpop.permute.xlu1 %10011 }
0x10f2   : > { %v14886_v18 = vpop.f32.mrb[180].mxu1 }
0x10f3   : > { %v14887_v28 = vpop.f32.mrb[181].mxu1 }
0x10f4   : > { %v14888_v57 = vadd.f32 %v14887_v28, %v14886_v18  ;;  %v14889_v37 = vpop.f32.mrb[182].mxu1 }
0x10f5   : > { %v14890_v3 = vpop.f32.mrb[183].mxu1 }
0x10f6   : > { %v20371_v35 = vadd.f32 %v14888_v57, %v20323_v55  ;;  %v14891_v46 = vadd.f32 %v14890_v3, %v14889_v37 }
0x10f8   : > { %v20374_v17 = vadd.f32 %v14891_v46, %v20326_v4 }
0x10fa   : > { %v14892_v15 = vpop.f32.mrb[184].mxu1 }
0x10fb   : > { %v14893_v61 = vpop.f32.mrb[185].mxu1 }
0x10fc   : > { %v14894_v21 = vadd.f32 %v14893_v61, %v14892_v15  ;;  %v14895_v27 = vpop.f32.mrb[186].mxu1 }
0x10fd   : > { %v14896_v59 = vpop.f32.mrb[187].mxu1 }
0x10fe   : > { %v20377_v42 = vadd.f32 %v14894_v21, %v20329_v38  ;;  %v14897_v7 = vadd.f32 %v14896_v59, %v14895_v27 }
0x1100   : > { %v20380_v11 = vadd.f32 %v14897_v7, %v20332_v25 }
0x1102   : > { %v14914_v33 = vpop.f32.mrb[188].mxu1 }
0x1103   : > { %v14915_v50 = vpop.f32.mrb[189].mxu1 }
0x1104   : > { %v14916_v55 = vadd.f32 %v14915_v50, %v14914_v33  ;;  %v14917_v52 = vpop.f32.mrb[190].mxu1  ;;  %v10022_v33 = vpop.permute.xlu1 %10021 }
0x1105   : > { %v14918_v60 = vpop.f32.mrb[191].mxu1 }
0x1106   : > { %v9957_v4 = vadd.f32 %v14916_v55, %v20335_v19  ;;  %v14919_v24 = vadd.f32 %v14918_v60, %v14917_v52 }
0x1108   : > { %v10069_v29 = vadd.f32 %v9992_v62, %v9957_v4  ;;  %v9958_v5 = vadd.f32 %v14919_v24, %v20338_v22  ;;  %v10007_v22 = vpop.permute.xlu0 %10006 }
0x110a   : > { %v10070_v23 = vadd.f32 %v9997_v0, %v9958_v5  ;;  %v14920_v38 = vpop.f32.mrb[192].mxu1  ;;  %v10085_v63 = vmax.f32 %v10069_v29, 0.0 }
0x110b   : > { %v14921_v36 = vpop.f32.mrb[193].mxu1 }
0x110c   : > { %v10086_v44 = vmax.f32 %v10070_v23, 0.0  ;;  %v14922_v25 = vadd.f32 %v14921_v36, %v14920_v38  ;;  %v14923_v1 = vpop.f32.mrb[194].mxu1  ;;  %v10032_v36 = vpop.permute.xlu1 %10031 }
0x110d   : > { %v14924_v13 = vpop.f32.mrb[195].mxu1 }
0x110e   : > { %v10101_v8 = vpack.c.bf16 %v10086_v44, %v10085_v63  ;;  %v9959_v10 = vadd.f32 %v14922_v25, %v20341_v53  ;;  %v14925_v16 = vadd.f32 %v14924_v13, %v14923_v1 }
0x1110   : > { %v10071_v19 = vadd.f32 %v10002_v40, %v9959_v10  ;;  %v9960_v47 = vadd.f32 %v14925_v16, %v20344_v56  ;;  %15351 = vmatprep.mubr.msk.bf16.mxu0 %vm4236_vm4, %v10101_v8  ;;  %v10017_v56 = vpop.permute.xlu0 %10016 }
0x1112   : > { %v10072_v31 = vadd.f32 %v10007_v22, %v9960_v47  ;;  %v14926_v32 = vpop.f32.mrb[196].mxu1  ;;  %v10087_v26 = vmax.f32 %v10071_v19, 0.0 }
0x1113   : > { %v14927_v6 = vpop.f32.mrb[197].mxu1 }
0x1114   : > { %v10088_v54 = vmax.f32 %v10072_v31, 0.0  ;;  %v14928_v48 = vadd.f32 %v14927_v6, %v14926_v32  ;;  %v14929_v34 = vpop.f32.mrb[198].mxu1  ;;  %v10042_v31 = vpop.permute.xlu1 %10041 }
0x1115   : > { %v14930_v30 = vpop.f32.mrb[199].mxu1 }
0x1116   : > { %v10102_v41 = vpack.c.bf16 %v10088_v54, %v10087_v26  ;;  %v9961_v2 = vadd.f32 %v14928_v48, %v20347_v49  ;;  %v14931_v53 = vadd.f32 %v14930_v30, %v14929_v34 }
0x1118   : > { %v10073_v18 = vadd.f32 %v10012_v51, %v9961_v2  ;;  %v9962_v28 = vadd.f32 %v14931_v53, %v20350_v14  ;;  %15352 = vmatmul.mubr.msk.bf16.vlgmr.msra.gmra.mrb[168].mxu0 %vm4236_vm4, %v10102_v41  ;;  %v10027_v14 = vpop.permute.xlu0 %10026 }
0x111a   : > { %v10074_v57 = vadd.f32 %v10017_v56, %v9962_v28  ;;  %v14932_v37 = vpop.f32.mrb[200].mxu1  ;;  %v10089_v46 = vmax.f32 %v10073_v18, 0.0  ;;  %v10052_v28 = vpop.permute.xlu1 %10051 }
0x111b   : > { %v14933_v3 = vpop.f32.mrb[201].mxu1 }
0x111c   : > { %v10090_v15 = vmax.f32 %v10074_v57, 0.0  ;;  %v14934_v61 = vadd.f32 %v14933_v3, %v14932_v37  ;;  %v14935_v21 = vpop.f32.mrb[202].mxu1 }
0x111d   : > { %v14936_v27 = vpop.f32.mrb[203].mxu1 }
0x111e   : > { %v10103_v59 = vpack.c.bf16 %v10090_v15, %v10089_v46  ;;  %v9963_v7 = vadd.f32 %v14934_v61, %v20353_v39  ;;  %v14937_v49 = vadd.f32 %v14936_v27, %v14935_v21 }
0x1120   : > { %v10075_v50 = vadd.f32 %v10022_v33, %v9963_v7  ;;  %v9964_v55 = vadd.f32 %v14937_v49, %v20356_v43  ;;  %15355 = vmatprep.mubr.msk.bf16.mxu0 %vm4236_vm4, %v10103_v59  ;;  %v10037_v43 = vpop.permute.xlu0 %10036  ;;  %v10062_v33 = vpop.permute.xlu1 %10061 }
0x1122   : > { %v10076_v52 = vadd.f32 %v10027_v14, %v9964_v55  ;;  %v14938_v60 = vpop.f32.mrb[204].mxu1  ;;  %v10091_v24 = vmax.f32 %v10075_v50, 0.0 }
0x1123   : > { %v14939_v4 = vpop.f32.mrb[205].mxu1 }
0x1124   : > { %v10092_v62 = vmax.f32 %v10076_v52, 0.0  ;;  %v14940_v29 = vadd.f32 %v14939_v4, %v14938_v60  ;;  %v14941_v5 = vpop.f32.mrb[206].mxu1 }
0x1125   : > { %v14942_v0 = vpop.f32.mrb[207].mxu1 }
0x1126   : > { %v10104_v23 = vpack.c.bf16 %v10092_v62, %v10091_v24  ;;  %v9965_v38 = vadd.f32 %v14940_v29, %v20359_v20  ;;  %v14943_v39 = vadd.f32 %v14942_v0, %v14941_v5 }
0x1128   : > { %v10077_v63 = vadd.f32 %v10032_v36, %v9965_v38  ;;  %v9966_v44 = vadd.f32 %v14943_v39, %v20362_v12  ;;  %15356 = vmatmul.mubr.msk.bf16.gmra.mrb[172].mxu0 %vm4236_vm4, %v10104_v23  ;;  %v10047_v12 = vpop.permute.xlu0 %10046 }
0x112a   : > { %v10078_v25 = vadd.f32 %v10037_v43, %v9966_v44  ;;  %v14944_v1 = vpop.f32.mrb[208].mxu1  ;;  %v10093_v8 = vmax.f32 %v10077_v63, 0.0 }
0x112b   : > { %v14945_v13 = vpop.f32.mrb[209].mxu1 }
0x112c   : > { %v10094_v10 = vmax.f32 %v10078_v25, 0.0  ;;  %v14946_v16 = vadd.f32 %v14945_v13, %v14944_v1  ;;  %v14947_v40 = vpop.f32.mrb[210].mxu1 }
0x112d   : > { %v14948_v19 = vpop.f32.mrb[211].mxu1 }
0x112e   : > { %v10105_v47 = vpack.c.bf16 %v10094_v10, %v10093_v8  ;;  %v9967_v22 = vadd.f32 %v14946_v16, %v20365_v9  ;;  %v14949_v20 = vadd.f32 %v14948_v19, %v14947_v40  ;;  %v16953_v16 = vld [vmem:[%s21053_s7 + $0x20] sm:$0xff]  }
0x1130   : > { %v10079_v32 = vadd.f32 %v10042_v31, %v9967_v22  ;;  %v9968_v6 = vadd.f32 %v14949_v20, %v20368_v45  ;;  %15359 = vmatprep.mubr.msk.bf16.mxu0 %vm4236_vm4, %v10105_v47  ;;  %v10057_v45 = vpop.permute.xlu0 %10056  ;;  %v10660_v31 = vld [vmem:[%s21054_s8 + $0x8] sm:$0xff] }
0x1132   : > { %v10080_v26 = vadd.f32 %v10047_v12, %v9968_v6  ;;  %v14950_v54 = vpop.f32.mrb[212].mxu1  ;;  %v10095_v34 = vmax.f32 %v10079_v32, 0.0  ;;  %v10659_v32 = vld [vmem:[%s21054_s8] sm:$0xff]  ;;  %v10662_v6 = vld [vmem:[%s21054_s8 + $0x18] sm:$0xff]  ;;  %v10661_v12 = vld [vmem:[%s21054_s8 + $0x10] sm:$0xff] }
0x1133   : > { %v14951_v48 = vpop.f32.mrb[213].mxu1 }
0x1134   : > { %v10096_v30 = vmax.f32 %v10080_v26, 0.0  ;;  %v14952_v41 = vadd.f32 %v14951_v48, %v14950_v54  ;;  %v14953_v2 = vpop.f32.mrb[214].mxu1  ;;  %v10664_v26 = vld [vmem:[%s21054_s8 + $0x28] sm:$0xff]  ;;  %v10663_v54 = vld [vmem:[%s21054_s8 + $0x20] sm:$0xff]  ;;  %v10666_v48 = vld [vmem:[%s21054_s8 + $0x38] sm:$0xff] }
0x1135   : > { %v14954_v53 = vpop.f32.mrb[215].mxu1 }
0x1136   : > { %v10106_v51 = vpack.c.bf16 %v10096_v30, %v10095_v34  ;;  %v9969_v18 = vadd.f32 %v14952_v41, %v20371_v35  ;;  %v14955_v9 = vadd.f32 %v14954_v53, %v14953_v2  ;;  %v10665_v34 = vld [vmem:[%s21054_s8 + $0x30] sm:$0xff]  ;;  %v16965_v41 = vld [vmem:[%s21055_s9] sm:$0xff]   ;;  %v16966_v2 = vld [vmem:[%s21055_s9 + $0x8] sm:$0xff]  }
0x1137   : > { %15439 = vmatprep.subr.bf16.mxu1 %v16965_v41 }
0x1138   : > { %v10081_v56 = vadd.f32 %v10052_v28, %v9969_v18  ;;  %v9970_v57 = vadd.f32 %v14955_v9, %v20374_v17  ;;  %15360 = vmatmul.mubr.msk.bf16.gmra.mrb[176].mxu0 %vm4236_vm4, %v10106_v51  ;;  %v10067_v17 = vpop.permute.xlu0 %10066  ;;  %15440 = vmatpush3.bf16.msra.mxu1 %v16965_v41 }
0x1139   : > { %15441 = vmatprep.subr.bf16.mxu1 %v16966_v2 }
0x113a   : > { %v10082_v37 = vadd.f32 %v10057_v45, %v9970_v57  ;;  %v14956_v3 = vpop.f32.mrb[216].mxu1  ;;  %v10097_v15 = vmax.f32 %v10081_v56, 0.0  ;;  %v16954_v45 = vld [vmem:[%s21053_s7 + $0x28] sm:$0xff]  }
0x113b   : > { %v14957_v46 = vpop.f32.mrb[217].mxu1 }
0x113c   : > { %v10098_v61 = vmax.f32 %v10082_v37, 0.0  ;;  %v14958_v21 = vadd.f32 %v14957_v46, %v14956_v3  ;;  %v14959_v27 = vpop.f32.mrb[218].mxu1  ;;  %15442 = vmatpush3.bf16.msra.mxu1 %v16966_v2  ;;  %v16955_v37 = vld [vmem:[%s21053_s7 + $0x30] sm:$0xff]   ;;  %v16956_v3 = vld [vmem:[%s21053_s7 + $0x38] sm:$0xff]   ;;  %v16957_v46 = vld [vmem:[%s21053_s7] sm:$0xff]  }
0x113d   : > { %v14960_v59 = vpop.f32.mrb[219].mxu1 }
0x113e   : > { %v10107_v7 = vpack.c.bf16 %v10098_v61, %v10097_v15  ;;  %v9971_v49 = vadd.f32 %v14958_v21, %v20377_v42  ;;  %v14961_v35 = vadd.f32 %v14960_v59, %v14959_v27  ;;  %v16958_v15 = vld [vmem:[%s21053_s7 + $0x8] sm:$0xff]   ;;  %v16959_v21 = vld [vmem:[%s21053_s7 + $0x10] sm:$0xff]   ;;  %v16960_v59 = vld [vmem:[%s21053_s7 + $0x18] sm:$0xff]  }
0x1140   : > { %v10083_v50 = vadd.f32 %v10062_v33, %v9971_v49  ;;  %v9972_v55 = vadd.f32 %v14961_v35, %v20380_v11  ;;  %15363 = vmatprep.mubr.msk.bf16.mxu0 %vm4236_vm4, %v10107_v7  ;;  %v16961_v49 = vld [vmem:[%s21053_s7 + $0x40] sm:$0xff]  }
0x1142   : > { %v10084_v14 = vadd.f32 %v10067_v17, %v9972_v55  ;;  %v10099_v52 = vmax.f32 %v10083_v50, 0.0 }
0x1144   : > { %v10100_v60 = vmax.f32 %v10084_v14, 0.0  ;;  %v16962_v14 = vld [vmem:[%s21053_s7 + $0x48] sm:$0xff]  }
0x1146   : > { %v10108_v4 = vpack.c.bf16 %v10100_v60, %v10099_v52  ;;  %v16963_v52 = vld [vmem:[%s21053_s7 + $0x50] sm:$0xff]   ;;  %v16964_v60 = vld [vmem:[%s21053_s7 + $0x58] sm:$0xff]  }
0x1148   : > { %15364 = vmatmul.mubr.msk.bf16.gmra.mrb[180].mxu0 %vm4236_vm4, %v10108_v4  ;;  %v16967_v4 = vld [vmem:[%s21055_s9 + $0x10] sm:$0xff]  }
0x1149   : > { %15383 = vmatprep.mubr.bf16.mxu0 %v16953_v16  ;;  %15443 = vmatprep.subr.bf16.mxu1 %v16967_v4 }
0x114a   : > { %15444 = vmatpush3.bf16.msra.mxu1 %v16967_v4  ;;  %v16992_v4 = vld [vmem:[%s21056_s10 + $0x128] sm:$0xff]  }
0x11eb   : > { %v15353_v24 = vpop.f32.mrb[168].mxu0 }
0x11ec   : > { %v10233_v62 = vpop.f32.mrb[169].mxu0 }
0x11ed   : > { %v15354_v29 = vpop.f32.mrb[170].mxu0 }
0x11ee   : > { %v20406_v5 = vpack.c.bf16 %v15354_v29, %v15353_v24  ;;  %v10236_v42 = vpop.f32.mrb[171].mxu0  ;;  %v16968_v24 = vld [vmem:[%s21055_s9 + $0x18] sm:$0x7f]  }
0x11ef   : > { %v20408_v0 = vpack.c.bf16 %v10236_v42, %v10233_v62  ;;  %15886 = vmatprep.subr.msk.bf16.mxu1 %vm4838_vm5, %v16968_v24  ;;  %v10771_v62 = vsel %vm4838_vm5, %v16968_v24, 0 }
0x11f0   : > { %10354 = vrot.lane.b32.xlu0 %v20406_v5, %s21086_s0  ;;  %15446 = vmatpush3.bf16.msra.mxu1 %v10771_v62  ;;  %v16993_v62 = vld [vmem:[%s21056_s10 + $0x70] sm:$0xff]  }
0x11f1   : > { %10352 = vrot.lane.b32.xlu1 %v20408_v0, %s21086_s0 }
0x11fb   : > { %v15357_v11 = vpop.f32.mrb[172].mxu0 }
0x11fc   : > { %v10249_v23 = vpop.f32.mrb[173].mxu0 }
0x11fd   : > { %v15358_v38 = vpop.f32.mrb[174].mxu0 }
0x11fe   : > { %v20414_v39 = vpack.c.bf16 %v15358_v38, %v15357_v11  ;;  %v10252_v36 = vpop.f32.mrb[175].mxu0 }
0x11ff   : > { %v20416_v63 = vpack.c.bf16 %v10252_v36, %v10249_v23 }
0x1200   : > { %10358 = vrot.lane.b32.xlu0 %v20414_v39, %s21086_s0 }
0x1201   : > { %10356 = vrot.lane.b32.xlu1 %v20416_v63, %s21086_s0 }
0x120b   : > { %v15361_v44 = vpop.f32.mrb[176].mxu0 }
0x120c   : > { %v10265_v43 = vpop.f32.mrb[177].mxu0 }
0x120d   : > { %v15362_v25 = vpop.f32.mrb[178].mxu0 }
0x120e   : > { %v20422_v1 = vpack.c.bf16 %v15362_v25, %v15361_v44  ;;  %v10268_v13 = vpop.f32.mrb[179].mxu0 }
0x120f   : > { %v20424_v8 = vpack.c.bf16 %v10268_v13, %v10265_v43 }
0x1210   : > { %10362 = vrot.lane.b32.xlu0 %v20422_v1, %s21086_s0 }
0x1211   : > { %10360 = vrot.lane.b32.xlu1 %v20424_v8, %s21086_s0 }
0x121b   : > { %v15365_v10 = vpop.f32.mrb[180].mxu0 }
0x121c   : > { %v10281_v40 = vpop.f32.mrb[181].mxu0 }
0x121d   : > { %v15366_v19 = vpop.f32.mrb[182].mxu0 }
0x121e   : > { %v20433_v47 = vpack.c.bf16 %v15366_v19, %v15365_v10  ;;  %v10284_v22 = vpop.f32.mrb[183].mxu0 }
0x121f   : > { %v20435_v20 = vpack.c.bf16 %v10284_v22, %v10281_v40 }
0x1220   : > { %10366 = vrot.lane.b32.xlu0 %v20433_v47, %s21086_s0 }
0x1221   : > { %10364 = vrot.lane.b32.xlu1 %v20435_v20, %s21086_s0 }
0x1224   : > { %10564 = vrot.lane.b32.xlu0 %v20406_v5, %s21085_s19 }
0x1225   : > { %10562 = vrot.lane.b32.xlu1 %v20408_v0, %s21085_s19 }
0x1228   : > { %10568 = vrot.lane.b32.xlu0 %v20414_v39, %s21085_s19 }
0x1229   : > { %10566 = vrot.lane.b32.xlu1 %v20416_v63, %s21085_s19 }
0x122c   : > { %10572 = vrot.lane.b32.xlu0 %v20422_v1, %s21085_s19 }
0x122d   : > { %10570 = vrot.lane.b32.xlu1 %v20424_v8, %s21085_s19 }
0x1230   : > { %10576 = vrot.lane.b32.xlu0 %v20433_v47, %s21085_s19 }
0x1231   : > { %10574 = vrot.lane.b32.xlu1 %v20435_v20, %s21085_s19 }
0x1234   : > { %10674 = vperm.xlu0 %15939, %v10660_v31  }
0x1235   : > { %10669 = vperm.xlu1 %15940, %v10659_v32  }
0x1238   : > { %10684 = vperm.xlu0 %15939, %v10662_v6  }
0x1239   : > { %10679 = vperm.xlu1 %15940, %v10661_v12  }
0x123c   : > { %10694 = vperm.xlu0 %15939, %v10664_v26  }
0x123d   : > { %10689 = vperm.xlu1 %15940, %v10663_v54  }
0x1240   : > { %10704 = vperm.xlu0 %15939, %v10666_v48  }
0x1241   : > { %10699 = vperm.xlu1 %15940, %v10665_v34  }
0x1262   : > { %v10355_v53 = vpop.permute.xlu0 %10354 }
0x1263   : > { %v10353_v30 = vpop.permute.xlu1 %10352 }
0x1264   : > { %15367 = vmatprep.subr.bf16.mxu0 %v10353_v30 }
0x1265   : > { %15368 = vmatpush3.bf16.msra.mxu0 %v10353_v30 }
0x1266   : > { %15369 = vmatprep.subr.bf16.mxu0 %v10355_v53 }
0x1269   : > { %15370 = vmatpush3.bf16.msra.mxu0 %v10355_v53 }
0x1272   : > { %v10359_v18 = vpop.permute.xlu0 %10358 }
0x1273   : > { %v10357_v51 = vpop.permute.xlu1 %10356 }
0x1274   : > { %15371 = vmatprep.subr.bf16.mxu0 %v10357_v51 }
0x1275   : > { %15372 = vmatpush3.bf16.msra.mxu0 %v10357_v51 }
0x1276   : > { %15373 = vmatprep.subr.bf16.mxu0 %v10359_v18 }
0x1279   : > { %15374 = vmatpush3.bf16.msra.mxu0 %v10359_v18  ;;  %v16969_v18 = vld [vmem:[%s21056_s10 + $0x40] sm:$0xff]  }
0x127a   : > { %15022 = vmatprep.subr.bf16.mxu1 %v16969_v18  ;;  %v17005_v18 = vld [vmem:[%s21056_s10 + $0xc8] sm:$0xff]  }
0x1282   : > { %v10363_v28 = vpop.permute.xlu0 %10362 }
0x1283   : > { %v10361_v9 = vpop.permute.xlu1 %10360 }
0x1284   : > { %15375 = vmatprep.subr.bf16.mxu0 %v10361_v9 }
0x1285   : > { %15376 = vmatpush3.bf16.msra.mxu0 %v10361_v9  ;;  %v16970_v9 = vld [vmem:[%s21056_s10] sm:$0xff]  }
0x1286   : > { %15377 = vmatprep.subr.bf16.mxu0 %v10363_v28 }
0x1289   : > { %15378 = vmatpush3.bf16.msra.mxu0 %v10363_v28  ;;  %v16971_v28 = vld [vmem:[%s21056_s10 + $0x140] sm:$0xff]  }
0x1292   : > { %v10367_v57 = vpop.permute.xlu0 %10366 }
0x1293   : > { %v10365_v56 = vpop.permute.xlu1 %10364 }
0x1294   : > { %15379 = vmatprep.subr.bf16.mxu0 %v10365_v56 }
0x1295   : > { %15380 = vmatpush3.bf16.msra.mxu0 %v10365_v56  ;;  %v16972_v56 = vld [vmem:[%s21056_s10 + $0x100] sm:$0xff]  }
0x1296   : > { %15381 = vmatprep.subr.bf16.mxu0 %v10367_v57  ;;  %v10565_v27 = vpop.permute.xlu0 %10564 }
0x1297   : > { %v10563_v61 = vpop.permute.xlu1 %10562 }
0x1299   : > { %15382 = vmatpush3.bf16.msra.mxu0 %v10367_v57  ;;  %v16973_v57 = vld [vmem:[%s21056_s10 + $0x48] sm:$0xff]  }
0x129a   : > { %15391 = vmatprep.subr.bf16.mxu0 %v20408_v0  ;;  %v10569_v35 = vpop.permute.xlu0 %10568 }
0x129b   : > { %v10567_v7 = vpop.permute.xlu1 %10566 }
0x129c   : > { %15384 = vmatmul.mubr.bf16.vlgmr.msra.gmra.mrb[184].mxu0 %v16954_v45  ;;  %v16975_v45 = vld [vmem:[%s21056_s10 + $0x148] sm:$0xff]  }
0x129d   : > { %15392 = vmatpush3.bf16.msra.mxu0 %v20408_v0  ;;  %15387 = vmatprep.mubr.bf16.mxu0 %v16955_v37  ;;  %v16974_v37 = vld [vmem:[%s21056_s10 + $0x8] sm:$0xff]  }
0x129e   : > { %15393 = vmatprep.subr.bf16.mxu0 %v20406_v5  ;;  %v10573_v50 = vpop.permute.xlu0 %10572 }
0x129f   : > { %v10571_v33 = vpop.permute.xlu1 %10570 }
0x12a1   : > { %15394 = vmatpush3.bf16.msra.mxu0 %v20406_v5 }
0x12a2   : > { %15395 = vmatprep.subr.bf16.mxu0 %v20416_v63  ;;  %v10577_v17 = vpop.permute.xlu0 %10576 }
0x12a3   : > { %v10575_v55 = vpop.permute.xlu1 %10574 }
0x12a4   : > { %15388 = vmatmul.mubr.bf16.gmra.mrb[188].mxu0 %v16956_v3  ;;  %v16976_v3 = vld [vmem:[%s21056_s10 + $0x108] sm:$0xff]  }
0x12a5   : > { %15396 = vmatpush3.bf16.msra.mxu0 %v20416_v63  ;;  %15407 = vmatprep.mubr.bf16.mxu0 %v16957_v46  ;;  %v16977_v46 = vld [vmem:[%s21056_s10 + $0x50] sm:$0xff]  }
0x12a6   : > { %15397 = vmatprep.subr.bf16.mxu0 %v20414_v39 }
0x12a9   : > { %15398 = vmatpush3.bf16.msra.mxu0 %v20414_v39 }
0x12aa   : > { %15399 = vmatprep.subr.bf16.mxu0 %v20424_v8 }
0x12ad   : > { %15400 = vmatpush3.bf16.msra.mxu0 %v20424_v8 }
0x12ae   : > { %15401 = vmatprep.subr.bf16.mxu0 %v20422_v1 }
0x12b1   : > { %15402 = vmatpush3.bf16.msra.mxu0 %v20422_v1 }
0x12b2   : > { %15403 = vmatprep.subr.bf16.mxu0 %v20435_v20 }
0x12b3   : > { %v10675_v5 = vpop.permute.xlu0 %10674 }
0x12b4   : > { %v10670_v29 = vpop.permute.xlu1 %10669 }
0x12b5   : > { %15404 = vmatpush3.bf16.msra.mxu0 %v20435_v20 }
0x12b6   : > { %15405 = vmatprep.subr.bf16.mxu0 %v20433_v47 }
0x12b7   : > { %v10685_v0 = vpop.permute.xlu0 %10684 }
0x12b8   : > { %v10680_v42 = vpop.permute.xlu1 %10679 }
0x12b9   : > { %15406 = vmatpush3.bf16.msra.mxu0 %v20433_v47 }
0x12ba   : > { %15415 = vmatprep.subr.bf16.mxu0 %v10563_v61 }
0x12bb   : > { %v10695_v25 = vpop.permute.xlu0 %10694 }
0x12bc   : > { %15408 = vmatmul.mubr.bf16.vlgmr.msra.gmra.mrb[184].mxu0 %v16958_v15  ;;  %v10690_v39 = vpop.permute.xlu1 %10689  ;;  %v16979_v15 = vld [vmem:[%s21056_s10 + $0x150] sm:$0xff]  }
0x12bd   : > { %15416 = vmatpush3.bf16.msra.mxu0 %v10563_v61  ;;  %15411 = vmatprep.mubr.bf16.mxu0 %v16959_v21  ;;  %v16978_v61 = vld [vmem:[%s21056_s10 + $0x10] sm:$0xff]  }
0x12be   : > { %15417 = vmatprep.subr.bf16.mxu0 %v10565_v27  ;;  %v16980_v21 = vld [vmem:[%s21056_s10 + $0x110] sm:$0xff]  }
0x12bf   : > { %v10705_v32 = vpop.permute.xlu0 %10704 }
0x12c0   : > { %v10700_v19 = vpop.permute.xlu1 %10699 }
0x12c1   : > { %15418 = vmatpush3.bf16.msra.mxu0 %v10565_v27  ;;  %v16981_v27 = vld [vmem:[%s21056_s10 + $0x58] sm:$0xff]  }
0x12c2   : > { %15419 = vmatprep.subr.bf16.mxu0 %v10567_v7 }
0x12c4   : > { %15412 = vmatmul.mubr.bf16.gmra.mrb[188].mxu0 %v16960_v59  ;;  %v16983_v59 = vld [vmem:[%s21056_s10 + $0x158] sm:$0xff]  }
0x12c5   : > { %15420 = vmatpush3.bf16.msra.mxu0 %v10567_v7  ;;  %15431 = vmatprep.mubr.bf16.mxu0 %v16961_v49  ;;  %v16982_v7 = vld [vmem:[%s21056_s10 + $0x18] sm:$0xff]  }
0x12c6   : > { %15421 = vmatprep.subr.bf16.mxu0 %v10569_v35  ;;  %v16984_v49 = vld [vmem:[%s21056_s10 + $0x118] sm:$0xff]  }
0x12c9   : > { %15422 = vmatpush3.bf16.msra.mxu0 %v10569_v35  ;;  %v16985_v35 = vld [vmem:[%s21056_s10 + $0x60] sm:$0xff]  }
0x12ca   : > { %15423 = vmatprep.subr.bf16.mxu0 %v10571_v33 }
0x12cd   : > { %15424 = vmatpush3.bf16.msra.mxu0 %v10571_v33  ;;  %v16987_v33 = vld [vmem:[%s21056_s10 + $0x160] sm:$0xff]  }
0x12ce   : > { %15425 = vmatprep.subr.bf16.mxu0 %v10573_v50 }
0x12d1   : > { %15426 = vmatpush3.bf16.msra.mxu0 %v10573_v50  ;;  %v16986_v50 = vld [vmem:[%s21056_s10 + $0x20] sm:$0xff]  }
0x12d2   : > { %15427 = vmatprep.subr.bf16.mxu0 %v10575_v55 }
0x12d5   : > { %15428 = vmatpush3.bf16.msra.mxu0 %v10575_v55  ;;  %v16988_v55 = vld [vmem:[%s21056_s10 + $0x120] sm:$0xff]  }
0x12d6   : > { %15429 = vmatprep.subr.bf16.mxu0 %v10577_v17 }
0x12d9   : > { %15430 = vmatpush3.bf16.msra.mxu0 %v10577_v17  ;;  %v16989_v17 = vld [vmem:[%s21056_s10 + $0x68] sm:$0xff]  }
0x12da   : > { %15066 = vmatprep.subr.bf16.mxu0 %v16971_v28 }
0x12dc   : > { %15432 = vmatmul.mubr.bf16.vlgmr.msra.gmra.mrb[184].mxu0 %v16962_v14  ;;  %v16990_v14 = vld [vmem:[%s21056_s10 + $0x28] sm:$0xff]  }
0x12dd   : > { %15435 = vmatprep.mubr.bf16.mxu0 %v16963_v52  ;;  %15067 = vmatpush3.bf16.msra.mxu0 %v16972_v56  ;;  %v16991_v52 = vld [vmem:[%s21056_s10 + $0x168] sm:$0xff]  }
0x12de   : > { %15068 = vmatprep.subr.bf16.mxu0 %v16975_v45  ;;  %v17006_v45 = vld [vmem:[%s21056_s10 + $0x88] sm:$0xff]  }
0x12e1   : > { %15069 = vmatpush3.bf16.msra.mxu0 %v16976_v3 }
0x12e2   : > { %15070 = vmatprep.subr.bf16.mxu0 %v16979_v15  ;;  %v17008_v15 = vld [vmem:[%s21056_s10 + $0x208] sm:$0xff]  }
0x12e4   : > { %15436 = vmatmul.mubr.bf16.gmra.mrb[188].mxu0 %v16964_v60 }
0x12e5   : > { %15071 = vmatpush3.bf16.msra.mxu0 %v16980_v21  ;;  %v17011_v21 = vld [vmem:[%s21056_s10 + $0x250] sm:$0xff]  }
0x12e6   : > { %15072 = vmatprep.subr.bf16.mxu0 %v16983_v59  ;;  %v17012_v59 = vld [vmem:[%s21056_s10 + $0x210] sm:$0xff]  }
0x12e9   : > { %15073 = vmatpush3.bf16.msra.mxu0 %v16984_v49  ;;  %v17015_v49 = vld [vmem:[%s21056_s10 + $0x258] sm:$0xff]  }
0x12ea   : > { %15074 = vmatprep.subr.bf16.mxu0 %v16987_v33  ;;  %v17016_v33 = vld [vmem:[%s21056_s10 + $0x218] sm:$0xff]  }
0x12ed   : > { %15075 = vmatpush3.bf16.msra.mxu0 %v16988_v55  ;;  %v17019_v55 = vld [vmem:[%s21056_s10 + $0x260] sm:$0xff]  }
0x12ee   : > { %15076 = vmatprep.subr.bf16.mxu0 %v16991_v52  ;;  %v17022_v52 = vld [vmem:[%s21056_s10 + $0xa8] sm:$0xff]  }
0x12f1   : > { %15077 = vmatpush3.bf16.msra.mxu0 %v16992_v4  ;;  %v17025_v4 = vld [vmem:[%s21056_s10 + $0xf0] sm:$0xff]  }
0x13af   : > { %v15433_v11 = vpop.f32.mrb[184].mxu0 }
0x13b0   : > { %v10709_v23 = vadd.f32 %v15433_v11, %v10680_v42  ;;  %v10620_v38 = vpop.f32.mrb[185].mxu0  ;;  %v16996_v11 = vld [vmem:[%s21056_s10 + $0x130] sm:$0xff]  }
0x13b1   : > { %v10707_v36 = vadd.f32 %v10670_v29, %v10620_v38  ;;  %v15434_v63 = vpop.f32.mrb[186].mxu0  ;;  %v16998_v38 = vld [vmem:[%s21056_s10 + $0x38] sm:$0xff]  }
0x13b2   : > { %v10710_v44 = vadd.f32 %v15434_v63, %v10685_v0  ;;  %v10623_v43 = vpop.f32.mrb[187].mxu0  ;;  %v10717_v13 = vmax.f32 %v10709_v23, 0.0  ;;  %v16995_v0 = vld [vmem:[%s21056_s10 + $0x170] sm:$0xff]   ;;  %v16997_v23 = vld [vmem:[%s21056_s10 + $0x78] sm:$0xff]  }
0x13b3   : > { %v10708_v1 = vadd.f32 %v10675_v5, %v10623_v43  ;;  %v10715_v10 = vmax.f32 %v10707_v36, 0.0  ;;  %v16994_v5 = vld [vmem:[%s21056_s10 + $0x30] sm:$0xff]   ;;  %15078 = vmatprep.subr.bf16.mxu0 %v16995_v0  ;;  %v17000_v63 = vld [vmem:[%s21056_s10 + $0x138] sm:$0xff]  }
0x13b4   : > { %v10718_v8 = vmax.f32 %v10710_v44, 0.0  ;;  %15079 = vmatpush3.bf16.msra.mxu0 %v16996_v11  ;;  %v17030_v0 = vld [vmem:[%s21056_s10 + $0xb8] sm:$0xff]  }
0x13b5   : > { %v10716_v16 = vmax.f32 %v10708_v1, 0.0  ;;  %v17031_v11 = vld [vmem:[%s21056_s10 + $0x278] sm:$0xff]  }
0x13b6   : > { %v10724_v40 = vpack.c.bf16 %v10718_v8, %v10717_v13 }
0x13b7   : > { %v10723_v47 = vpack.c.bf16 %v10716_v16, %v10715_v10  ;;  %v15437_v22 = vpop.f32.mrb[188].mxu0  ;;  %v17003_v10 = vld [vmem:[%s21056_s10 + $0x240] sm:$0xff]  }
0x13b8   : > { %v10713_v20 = vadd.f32 %v15437_v22, %v10700_v19  ;;  %v10636_v31 = vpop.f32.mrb[189].mxu0 }
0x13b9   : > { %v10711_v6 = vadd.f32 %v10690_v39, %v10636_v31  ;;  %v15438_v12 = vpop.f32.mrb[190].mxu0  ;;  %15447 = vmatprep.mubr.msk.bf16.mxu1 %vm4825_vm6, %v10723_v47  ;;  %v16999_v39 = vld [vmem:[%s21056_s10 + $0x178] sm:$0xff]  }
0x13ba   : > { %v10714_v26 = vadd.f32 %v15438_v12, %v10705_v32  ;;  %v10639_v54 = vpop.f32.mrb[191].mxu0  ;;  %15448 = vmatmul.mubr.msk.bf16.vlgmr.msra.gmra.mrb[220].mxu1 %vm4825_vm6, %v10724_v40  ;;  %v10721_v34 = vmax.f32 %v10713_v20, 0.0  ;;  %15080 = vmatprep.subr.bf16.mxu0 %v16999_v39  ;;  %v17034_v39 = vld [vmem:[%s21056_s10 + $0x180] sm:$0xff]  }
0x13bb   : > { %v10712_v48 = vadd.f32 %v10695_v25, %v10639_v54  ;;  %v10719_v41 = vmax.f32 %v10711_v6, 0.0  ;;  %15023 = vmatpush3.bf16.msra.mxu1 %v16970_v9  ;;  %v17001_v25 = vld [vmem:[%s21056_s10 + $0xc0] sm:$0xff]   ;;  %15081 = vmatpush3.bf16.msra.mxu0 %v17000_v63 }
0x13bc   : > { %v10722_v30 = vmax.f32 %v10714_v26, 0.0  ;;  %15024 = vmatprep.subr.bf16.mxu1 %v16973_v57  ;;  %15110 = vmatprep.subr.bf16.mxu0 %v17003_v10  ;;  %v17004_v57 = vld [vmem:[%s21056_s10 + $0x200] sm:$0xff]  }
0x13bd   : > { %v10720_v2 = vmax.f32 %v10712_v48, 0.0  ;;  %v17035_v63 = vld [vmem:[%s21056_s10 + $0x340] sm:$0xff]  }
0x13be   : > { %v10726_v53 = vpack.c.bf16 %v10722_v30, %v10721_v34 }
0x13bf   : > { %v10725_v51 = vpack.c.bf16 %v10720_v2, %v10719_v41  ;;  %15025 = vmatpush3.bf16.msra.mxu1 %v16974_v37  ;;  %v17007_v37 = vld [vmem:[%s21056_s10 + $0x248] sm:$0xff]  }
0x13c0   : > { %15026 = vmatprep.subr.bf16.mxu1 %v16977_v46  ;;  %v17009_v46 = vld [vmem:[%s21056_s10 + $0xd0] sm:$0xff]  }
0x13c1   : > { %15451 = vmatprep.mubr.msk.bf16.mxu1 %vm4825_vm6, %v10725_v51  ;;  %v17002_v51 = vld [vmem:[%s21056_s10 + $0x80] sm:$0xff]  }
0x13c2   : > { %15452 = vmatmul.mubr.msk.bf16.gmra.mrb[224].mxu1 %vm4825_vm6, %v10726_v53 }
0x13c3   : > { %15027 = vmatpush3.bf16.msra.mxu1 %v16978_v61  ;;  %v17010_v61 = vld [vmem:[%s21056_s10 + $0x90] sm:$0xff]  }
0x13c4   : > { %15028 = vmatprep.subr.bf16.mxu1 %v16981_v27  ;;  %v17013_v27 = vld [vmem:[%s21056_s10 + $0xd8] sm:$0xff]  }
0x13c7   : > { %15029 = vmatpush3.bf16.msra.mxu1 %v16982_v7  ;;  %v17014_v7 = vld [vmem:[%s21056_s10 + $0x98] sm:$0xff]  }
0x13c8   : > { %15030 = vmatprep.subr.bf16.mxu1 %v16985_v35  ;;  %v17017_v35 = vld [vmem:[%s21056_s10 + $0xe0] sm:$0xff]  }
0x13cb   : > { %15031 = vmatpush3.bf16.msra.mxu1 %v16986_v50  ;;  %v17018_v50 = vld [vmem:[%s21056_s10 + $0xa0] sm:$0xff]  }
0x13cc   : > { %15032 = vmatprep.subr.bf16.mxu1 %v16989_v17  ;;  %v17021_v17 = vld [vmem:[%s21056_s10 + $0xe8] sm:$0xff]  }
0x13cf   : > { %15033 = vmatpush3.bf16.msra.mxu1 %v16990_v14  ;;  %v17020_v14 = vld [vmem:[%s21056_s10 + $0x220] sm:$0xff]  }
0x13d0   : > { %15034 = vmatprep.subr.bf16.mxu1 %v16993_v62  ;;  %v17026_v62 = vld [vmem:[%s21056_s10 + $0xb0] sm:$0xff]  }
0x13d3   : > { %15035 = vmatpush3.bf16.msra.mxu1 %v16994_v5  ;;  %v17029_v5 = vld [vmem:[%s21056_s10 + $0xf8] sm:$0xff]  }
0x13d4   : > { %15036 = vmatprep.subr.bf16.mxu1 %v16997_v23  ;;  %v17033_v23 = vld [vmem:[%s21056_s10 + $0x1c0] sm:$0xff]  }
0x13d7   : > { %15037 = vmatpush3.bf16.msra.mxu1 %v16998_v38  ;;  %v17032_v38 = vld [vmem:[%s21056_s10 + $0x238] sm:$0xff]  }
0x13d8   : > { %15044 = vmatprep.subr.bf16.mxu1 %v17001_v25  ;;  %v17036_v25 = vld [vmem:[%s21056_s10 + $0x300] sm:$0xff]  }
0x148d   : > { %v15449_v60 = vpop.f32.mrb[220].mxu1 }
0x148e   : > { %v10807_v24 = vpop.f32.mrb[221].mxu1 }
0x148f   : > { %v15450_v29 = vpop.f32.mrb[222].mxu1 }
0x1490   : > { %v10810_v42 = vpop.f32.mrb[223].mxu1 }
0x1495   : > { %v15453_v36 = vpop.f32.mrb[224].mxu1 }
0x1496   : > { %v15961_v44 = vpack.i.bf16 %v15449_v60, %v15453_v36  ;;  %v10823_v43 = vpop.f32.mrb[225].mxu1  ;;  %v17023_v60 = vld [vmem:[%s21056_s10 + $0x268] sm:$0xff]  }
0x1497   : > { %v15454_v1 = vpop.f32.mrb[226].mxu1 }
0x1498   : > { %v15966_v13 = vpack.i.bf16 %v15450_v29, %v15454_v1  ;;  %15962 = vrot.lane.b32.xlu0 %v15961_v44, %s21089_s20  ;;  %v10826_v8 = vpop.f32.mrb[227].mxu1  ;;  %v17027_v29 = vld [vmem:[%s21056_s10 + $0x270] sm:$0xff]   ;;  %v17037_v44 = vld [vmem:[%s21056_s10 + $0x1c8] sm:$0xff]   ;;  %s20999_s20 = scalar_lea.hbm %s21060_s14, %s14080_s25 }
0x1499   : > { %v15956_v16 = vpack.i.bf16 %v10810_v42, %v10826_v8  ;;  %v17028_v42 = vld [vmem:[%s21056_s10 + $0x230] sm:$0xff]   ;;  %v17039_v8 = vld [vmem:[%s21056_s10 + $0x348] sm:$0xff]  }
0x149b   : > { %15957 = vrot.lane.b32.xlu1 %v15956_v16, %s21090_s18  ;;  %v17041_v16 = vld [vmem:[%s21056_s10 + $0x1d0] sm:$0xff]   ;;  %s17175_s18 = smov [#allocation2]  }
0x149f   : > { %15967 = vrot.lane.b32.xlu1 %v15966_v13, %s21091_s28  ;;  %v17038_v13 = vld [vmem:[%s21056_s10 + $0x188] sm:$0xff]   ;;  %s17105_s28 = sshll.u32 %s17175_s18, 4  ;;  %s17106_s28 = int_to_ptr.vmem [resolvable:$false] %s17105_s28 }
0x14a0   : > { %s17107_s19 = scalar_lea.vmem %s17106_s28, 64  ;;  %p17108_p0 = scmp.lt.s32.totalorder %s20994_s22, %s17106_s28 }
0x14a1   : > { %p17109_p1 = scmp.lt.s32.totalorder %s17107_s19, %s17101_s17 }
0x14a3   : > { %p17110_p2 = por %p17109_p1, %p17108_p0 }
0x14a5   : > { %p17111_p3 = pnand %p17110_p2, %p17104_p13 }
0x150a   : > { %v15963_v19 = vpop.permute.xlu0 %15962 }
0x150b   : > { %v15965_v32 = vunpack.i.h.bf16 %v15963_v19  ;;  %v15964_v6 = vunpack.i.l.bf16 %v15963_v19  ;;  %v17042_v19 = vld [vmem:[%s21056_s10 + $0x190] sm:$0xff]  }
0x150d   : > { %v15958_v40 = vpop.permute.xlu1 %15957 }
0x150e   : > { %v15960_v47 = vunpack.i.h.bf16 %v15958_v40  ;;  %v15959_v22 = vunpack.i.l.bf16 %v15958_v40  ;;  %v17040_v40 = vld [vmem:[%s21056_s10 + $0x308] sm:$0xff]  }
0x1510   : > { %v10862_v20 = vsel %vm4931_vm7, %v10807_v24, %v15960_v47  ;;  %v10865_v31 = vsel %vm4931_vm7, %v10823_v43, %v15959_v22  ;;  %v17024_v24 = vld [vmem:[%s21056_s10 + $0x228] sm:$0xff]   ;;  %v17043_v47 = vld [vmem:[%s21056_s10 + $0x350] sm:$0xff]   ;;  %v17045_v22 = vld [vmem:[%s21056_s10 + $0x1d8] sm:$0xff]  }
0x1511   : > { %v15968_v12 = vpop.permute.xlu1 %15967  ;;  %v10863_v48 = vsel %vm4933_vm8, %v10862_v20, %v15965_v32  ;;  %v10866_v34 = vsel %vm4933_vm8, %v10865_v31, %v15964_v6  ;;  %v17044_v20 = vld [vmem:[%s21056_s10 + $0x310] sm:$0xff]   ;;  %v17046_v31 = vld [vmem:[%s21056_s10 + $0x198] sm:$0xff]   ;;  %v17049_v6 = vld [vmem:[%s21056_s10 + $0x1e0] sm:$0xff]  }
0x1512   : > { %v15970_v26 = vunpack.i.h.bf16 %v15968_v12  ;;  %v15969_v54 = vunpack.i.l.bf16 %v15968_v12  ;;  %v17047_v32 = vld [vmem:[%s21056_s10 + $0x358] sm:$0xff]  }
0x1513   : > { %v17048_v12 = vld [vmem:[%s21056_s10 + $0x318] sm:$0xff]  }
0x1514   : > { %v10864_v30 = vsel %vm4935_vm9, %v10863_v48, %v15970_v26  ;;  %v10867_v41 = vsel %vm4935_vm9, %v10866_v34, %v15969_v54  ;;  %v17050_v26 = vld [vmem:[%s21056_s10 + $0x1a0] sm:$0xff]   ;;  %v17053_v48 = vld [vmem:[%s21056_s10 + $0x1e8] sm:$0xff]  }
0x1515   : > { %v20659_v2 = vpack.c.bf16 %v10864_v30, %v10864_v30  ;;  %v20661_v53 = vpack.c.bf16 %v10867_v41, %v10867_v41  ;;  %v17051_v54 = vld [vmem:[%s21056_s10 + $0x360] sm:$0xff]   ;;  %v17054_v30 = vld [vmem:[%s21056_s10 + $0x1a8] sm:$0xff]  }
0x1516   : > { %v17052_v34 = vld [vmem:[%s21056_s10 + $0x320] sm:$0xff]   ;;  %v17055_v41 = vld [vmem:[%s21056_s10 + $0x368] sm:$0xff]  }
0x1517   : > { %11031 = vmatprep.mubr.bf16.mxu1 %v20661_v53  ;;  %v20671_v9 = vshrl.u32 %v20661_v53, 16  ;;  %v11252_v28 = vrot.slane %v20661_v53, 1  ;;  %v11251_v56 = vrot.slane %v20659_v2, 1  ;;  %v11598_v3 = vrot.slane %v20661_v53, 2 }
0x1518   : > { %11032 = vmatmul.mubr.bf16.vlgmr.msra.gmra.mrb[228].mxu1 %v20659_v2  ;;  %v20769_v36 = vshrl.u32 %v20659_v2, 16  ;;  %v11597_v1 = vrot.slane %v20659_v2, 2  ;;  %v11944_v10 = vrot.slane %v20661_v53, 3  ;;  %v17057_v53 = vld [vmem:[%s21056_s10 + $0x1f0] sm:$0xff]  }
0x1519   : > { %15045 = vmatpush3.bf16.msra.mxu1 %v17002_v51  ;;  %11208 = vmatprep.mubr.bf16.mxu1 %v20671_v9  ;;  %v11425_v43 = vrot.slane %v20671_v9, 1  ;;  %v17056_v51 = vld [vmem:[%s21056_s10 + $0x328] sm:$0xff]  }
0x151a   : > { %11383 = vmatprep.mubr.bf16.mxu0 %v11252_v28  ;;  %15046 = vmatprep.subr.bf16.mxu1 %v17005_v18  ;;  %v17058_v18 = vld [vmem:[%s21056_s10 + $0x1b0] sm:$0xff]  }
0x151b   : > { %11384 = vmatmul.mubr.bf16.vlgmr.msra.gmra.mrb[192].mxu0 %v11251_v56  ;;  %v17059_v28 = vld [vmem:[%s21056_s10 + $0x370] sm:$0xff]   ;;  %v17061_v56 = vld [vmem:[%s21056_s10 + $0x1f8] sm:$0xff]  }
0x151c   : > { %15111 = vmatpush3.bf16.msra.mxu0 %v17004_v57  ;;  %11729 = vmatprep.mubr.bf16.mxu0 %v11598_v3  ;;  %v17060_v57 = vld [vmem:[%s21056_s10 + $0x330] sm:$0xff]   ;;  %v17065_v3 = vld [vmem:[%s21056_s10 + $0x2c0] sm:$0xff]  }
0x151d   : > { %15047 = vmatpush3.bf16.msra.mxu1 %v17006_v45  ;;  %15112 = vmatprep.subr.bf16.mxu0 %v17007_v37  ;;  %v17062_v45 = vld [vmem:[%s21056_s10 + $0x1b8] sm:$0xff]  }
0x151e   : > { %15048 = vmatprep.subr.bf16.mxu1 %v17009_v46  ;;  %v17063_v37 = vld [vmem:[%s21056_s10 + $0x378] sm:$0xff]  }
0x151f   : > { %v17064_v46 = vld [vmem:[%s21056_s10 + $0x338] sm:$0xff]  }
0x1520   : > { %15113 = vmatpush3.bf16.msra.mxu0 %v17008_v15  ;;  %v17066_v15 = vld [vmem:[%s21056_s10 + $0x280] sm:$0xff]  }
0x1521   : > { %15049 = vmatpush3.bf16.msra.mxu1 %v17010_v61  ;;  %15114 = vmatprep.subr.bf16.mxu0 %v17011_v21  ;;  %v11424_v61 = vrot.slane %v20769_v36, 1  ;;  %v17067_v21 = vld [vmem:[%s21056_s10 + $0x2c8] sm:$0xff]  }
0x1522   : > { %15050 = vmatprep.subr.bf16.mxu1 %v17013_v27  ;;  %v11771_v27 = vrot.slane %v20671_v9, 2 }
0x1524   : > { %15115 = vmatpush3.bf16.msra.mxu0 %v17012_v59  ;;  %v11943_v59 = vrot.slane %v20659_v2, 3  ;;  %v17070_v2 = vld [vmem:[%s21056_s10 + $0x290] sm:$0xff]  }
0x1525   : > { %15051 = vmatpush3.bf16.msra.mxu1 %v17014_v7  ;;  %15116 = vmatprep.subr.bf16.mxu0 %v17015_v49  ;;  %v17068_v7 = vld [vmem:[%s21056_s10 + $0x288] sm:$0xff]   ;;  %v17069_v49 = vld [vmem:[%s21056_s10 + $0x2d0] sm:$0xff]  }
0x1526   : > { %15052 = vmatprep.subr.bf16.mxu1 %v17017_v35  ;;  %v17071_v35 = vld [vmem:[%s21056_s10 + $0x2d8] sm:$0xff]  }
0x1528   : > { %15117 = vmatpush3.bf16.msra.mxu0 %v17016_v33  ;;  %v17072_v33 = vld [vmem:[%s21056_s10 + $0x298] sm:$0xff]  }
0x1529   : > { %15053 = vmatpush3.bf16.msra.mxu1 %v17018_v50  ;;  %15118 = vmatprep.subr.bf16.mxu0 %v17019_v55  ;;  %v17073_v50 = vld [vmem:[%s21056_s10 + $0x2e0] sm:$0xff]  }
0x152a   : > { %15054 = vmatprep.subr.bf16.mxu1 %v17021_v17  ;;  %v17074_v55 = vld [vmem:[%s21056_s10 + $0x2a0] sm:$0xff]   ;;  %v17075_v17 = vld [vmem:[%s21056_s10 + $0x2e8] sm:$0xff]  }
0x152c   : > { %15119 = vmatpush3.bf16.msra.mxu0 %v17020_v14  ;;  %v17076_v14 = vld [vmem:[%s21056_s10 + $0x2a8] sm:$0xff]  }
0x152d   : > { %15055 = vmatpush3.bf16.msra.mxu1 %v17022_v52  ;;  %15120 = vmatprep.subr.bf16.mxu0 %v17023_v60  ;;  %v17077_v52 = vld [vmem:[%s21056_s10 + $0x2f0] sm:$0xff]  }
0x152e   : > { %15056 = vmatprep.subr.bf16.mxu1 %v17025_v4  ;;  %v17078_v60 = vld [vmem:[%s21056_s10 + $0x2b0] sm:$0xff]   ;;  %v17079_v4 = vld [vmem:[%s21056_s10 + $0x2f8] sm:$0xff]  }
0x1530   : > { %15121 = vmatpush3.bf16.msra.mxu0 %v17024_v24  ;;  %v17080_v24 = vld [vmem:[%s21056_s10 + $0x2b8] sm:$0xff]  }
0x1531   : > { %15057 = vmatpush3.bf16.msra.mxu1 %v17026_v62  ;;  %15122 = vmatprep.subr.bf16.mxu0 %v17027_v29  ;;  %v17081_v62 = vld [vmem:[%s21056_s10 + $0x3c0] sm:$0xff]  }
0x1532   : > { %15058 = vmatprep.subr.bf16.mxu1 %v17029_v5  ;;  %v17082_v29 = vld [vmem:[%s21056_s10 + $0x380] sm:$0xff]   ;;  %v11770_v5 = vrot.slane %v20769_v36, 2 }
0x1534   : > { %15123 = vmatpush3.bf16.msra.mxu0 %v17028_v42  ;;  %v17083_v42 = vld [vmem:[%s21056_s10 + $0x3c8] sm:$0xff]  }
0x1535   : > { %15059 = vmatpush3.bf16.msra.mxu1 %v17030_v0  ;;  %15124 = vmatprep.subr.bf16.mxu0 %v17031_v11  ;;  %v12117_v0 = vrot.slane %v20671_v9, 3  ;;  %v17084_v11 = vld [vmem:[%s21056_s10 + $0x388] sm:$0xff]   ;;  %v17087_v9 = vld [vmem:[%s21056_s10 + $0x3d8] sm:$0xff]  }
0x1536   : > { %15088 = vmatprep.subr.bf16.mxu1 %v17033_v23  ;;  %v17085_v23 = vld [vmem:[%s21056_s10 + $0x3d0] sm:$0xff]  }
0x1538   : > { %15125 = vmatpush3.bf16.msra.mxu0 %v17032_v38  ;;  %11209 = vmatmul.mubr.bf16.vlgmr.msra.gmra.mrb[232].mxu1 %v20769_v36  ;;  %v17086_v38 = vld [vmem:[%s21056_s10 + $0x390] sm:$0xff]  }
0x1539   : > { %15089 = vmatpush3.bf16.msra.mxu1 %v17034_v39  ;;  %11556 = vmatprep.mubr.bf16.mxu1 %v11425_v43  ;;  %v17088_v39 = vld [vmem:[%s21056_s10 + $0x398] sm:$0xff]   ;;  %v17091_v43 = vld [vmem:[%s21056_s10 + $0x3e8] sm:$0xff]  }
0x153a   : > { %15154 = vmatprep.subr.bf16.mxu0 %v17035_v63  ;;  %15090 = vmatprep.subr.bf16.mxu1 %v17037_v44  ;;  %v17089_v63 = vld [vmem:[%s21056_s10 + $0x3e0] sm:$0xff]  }
0x153b   : > { %11730 = vmatmul.mubr.bf16.vlgmr.msra.gmra.mrb[196].mxu0 %v11597_v1  ;;  %v17090_v44 = vld [vmem:[%s21056_s10 + $0x3a0] sm:$0xff]   ;;  %v17093_v1 = vld [vmem:[%s21056_s10 + $0x3f0] sm:$0xff]  }
0x153c   : > { %15155 = vmatpush3.bf16.msra.mxu0 %v17036_v25  ;;  %12075 = vmatprep.mubr.bf16.mxu0 %v11944_v10  ;;  %v17092_v25 = vld [vmem:[%s21056_s10 + $0x3a8] sm:$0xff]   ;;  %v17096_v10 = vld [vmem:[%s21056_s10 + $0x3b8] sm:$0xff]  }
0x153d   : > { %15091 = vmatpush3.bf16.msra.mxu1 %v17038_v13  ;;  %15156 = vmatprep.subr.bf16.mxu0 %v17039_v8  ;;  %v17094_v13 = vld [vmem:[%s21056_s10 + $0x3b0] sm:$0xff]   ;;  %v17095_v8 = vld [vmem:[%s21056_s10 + $0x3f8] sm:$0xff]  }
0x153e   : > { %15092 = vmatprep.subr.bf16.mxu1 %v17041_v16  ;;  %v12116_v16 = vrot.slane %v20769_v36, 3  ;;  %v17099_v36 = vld [vmem:[%s21058_s12 + $0x10] sm:$0xff]  }
0x1540   : > { %15157 = vmatpush3.bf16.msra.mxu0 %v17040_v40  ;;  %v17097_v40 = vld [vmem:[%s21058_s12] sm:$0xff]  }
0x1541   : > { %15093 = vmatpush3.bf16.msra.mxu1 %v17042_v19  ;;  %15158 = vmatprep.subr.bf16.mxu0 %v17043_v47  ;;  %v17098_v19 = vld [vmem:[%s21058_s12 + $0x8] sm:$0xff]  }
0x1542   : > { %15094 = vmatprep.subr.bf16.mxu1 %v17045_v22 }
0x1544   : > { %15159 = vmatpush3.bf16.msra.mxu0 %v17044_v20 }
0x1545   : > { %15095 = vmatpush3.bf16.msra.mxu1 %v17046_v31  ;;  %15160 = vmatprep.subr.bf16.mxu0 %v17047_v32 }
0x1546   : > { %15096 = vmatprep.subr.bf16.mxu1 %v17049_v6 }
0x1548   : > { %15161 = vmatpush3.bf16.msra.mxu0 %v17048_v12 }
0x1549   : > { %15097 = vmatpush3.bf16.msra.mxu1 %v17050_v26  ;;  %15162 = vmatprep.subr.bf16.mxu0 %v17051_v54 }
0x154a   : > { %15098 = vmatprep.subr.bf16.mxu1 %v17053_v48 }
0x154c   : > { %15163 = vmatpush3.bf16.msra.mxu0 %v17052_v34  ;;  %v17100_v34 = vld [vmem:[%s21058_s12 + $0x18] sm:$0xff]  }
0x154d   : > { %15099 = vmatpush3.bf16.msra.mxu1 %v17054_v30  ;;  %15164 = vmatprep.subr.bf16.mxu0 %v17055_v41  ;;  %v10870_v30 = vld [vmem:[%s21057_s11] sm:$0x1] }
0x154e   : > { %15100 = vmatprep.subr.bf16.mxu1 %v17057_v53 }
0x1550   : > { %15165 = vmatpush3.bf16.msra.mxu0 %v17056_v51 }
0x1551   : > { %15101 = vmatpush3.bf16.msra.mxu1 %v17058_v18  ;;  %15166 = vmatprep.subr.bf16.mxu0 %v17059_v28 }
0x1552   : > { %15102 = vmatprep.subr.bf16.mxu1 %v17061_v56 }
0x1554   : > { %15167 = vmatpush3.bf16.msra.mxu0 %v17060_v57 }
0x1555   : > { %15103 = vmatpush3.bf16.msra.mxu1 %v17062_v45  ;;  %15168 = vmatprep.subr.bf16.mxu0 %v17063_v37 }
0x1556   : > { %15132 = vmatprep.subr.bf16.mxu1 %v17065_v3 }
0x1558   : > { %15169 = vmatpush3.bf16.msra.mxu0 %v17064_v46  ;;  %11557 = vmatmul.mubr.bf16.vlgmr.msra.gmra.mrb[236].mxu1 %v11424_v61 }
0x1559   : > { %15133 = vmatpush3.bf16.msra.mxu1 %v17066_v15  ;;  %11902 = vmatprep.mubr.bf16.mxu1 %v11771_v27 }
0x155a   : > { %15134 = vmatprep.subr.bf16.mxu1 %v17067_v21  ;;  %15455 = vmatprep.subr.bf16.mxu0 %v17173_v58 }
0x155b   : > { %12076 = vmatmul.mubr.bf16.vlgmr.msra.gmra.mrb[200].mxu0 %v11943_v59 }
0x155c   : > { %15463 = vmatprep.mubr.msk.bf16.mxu0 %vm17174_vm10, %v17173_v58  ;;  %15456 = vmatpush3.bf16.msra.mxu0 %v17097_v40 }
0x155d   : > { %15135 = vmatpush3.bf16.msra.mxu1 %v17068_v7  ;;  %15457 = vmatprep.subr.bf16.mxu0 %v17173_v58 }
0x155e   : > { %15136 = vmatprep.subr.bf16.mxu1 %v17069_v49 }
0x1560   : > { %15458 = vmatpush3.bf16.msra.mxu0 %v17098_v19 }
0x1561   : > { %15137 = vmatpush3.bf16.msra.mxu1 %v17070_v2  ;;  %15459 = vmatprep.subr.bf16.mxu0 %v17173_v58 }
0x1562   : > { %15138 = vmatprep.subr.bf16.mxu1 %v17071_v35 }
0x1564   : > { %15460 = vmatpush3.bf16.msra.mxu0 %v17099_v36 }
0x1565   : > { %15139 = vmatpush3.bf16.msra.mxu1 %v17072_v33  ;;  %15461 = vmatprep.subr.bf16.mxu0 %v17173_v58 }
0x1566   : > { %15140 = vmatprep.subr.bf16.mxu1 %v17073_v50 }
0x1568   : > { %15462 = vmatpush3.bf16.msra.mxu0 %v17100_v34 }
0x1569   : > { %15141 = vmatpush3.bf16.msra.mxu1 %v17074_v55 }
0x156a   : > { %15142 = vmatprep.subr.bf16.mxu1 %v17075_v17 }
0x156d   : > { %15143 = vmatpush3.bf16.msra.mxu1 %v17076_v14 }
0x156e   : > { %15144 = vmatprep.subr.bf16.mxu1 %v17077_v52 }
0x1571   : > { %15145 = vmatpush3.bf16.msra.mxu1 %v17078_v60 }
0x1572   : > { %15146 = vmatprep.subr.bf16.mxu1 %v17079_v4 }
0x1575   : > { %15147 = vmatpush3.bf16.msra.mxu1 %v17080_v24 }
0x1576   : > { %15176 = vmatprep.subr.bf16.mxu1 %v17081_v62 }
0x1578   : > { %11903 = vmatmul.mubr.bf16.vlgmr.msra.gmra.mrb[240].mxu1 %v11770_v5 }
0x1579   : > { %15177 = vmatpush3.bf16.msra.mxu1 %v17082_v29  ;;  %12248 = vmatprep.mubr.bf16.mxu1 %v12117_v0 }
0x157a   : > { %15178 = vmatprep.subr.bf16.mxu1 %v17083_v42 }
0x157d   : > { %15179 = vmatpush3.bf16.msra.mxu1 %v17084_v11 }
0x157e   : > { %15180 = vmatprep.subr.bf16.mxu1 %v17085_v23 }
0x1581   : > { %15181 = vmatpush3.bf16.msra.mxu1 %v17086_v38 }
0x1582   : > { %15182 = vmatprep.subr.bf16.mxu1 %v17087_v9 }
0x1585   : > { %15183 = vmatpush3.bf16.msra.mxu1 %v17088_v39 }
0x1586   : > { %15184 = vmatprep.subr.bf16.mxu1 %v17089_v63  ;;  %v12267_v63 = vld [vmem:[%s21059_s13] sm:$0x1] }
0x1589   : > { %15185 = vmatpush3.bf16.msra.mxu1 %v17090_v44 }
0x158a   : > { %15186 = vmatprep.subr.bf16.mxu1 %v17091_v43 }
0x158d   : > { %15187 = vmatpush3.bf16.msra.mxu1 %v17092_v25 }
0x158e   : > { %15188 = vmatprep.subr.bf16.mxu1 %v17093_v1 }
0x1591   : > { %15189 = vmatpush3.bf16.msra.mxu1 %v17094_v13 }
0x1592   : > { %15190 = vmatprep.subr.bf16.mxu1 %v17095_v8 }
0x1595   : > { %15191 = vmatpush3.bf16.msra.mxu1 %v17096_v10 }
0x1598   : > { %12249 = vmatmul.mubr.bf16.vlgmr.msra.gmra.mrb[244].mxu1 %v12116_v16 }
0x15eb   : > { %v15038_v47 = vpop.f32.mrb[228].mxu1 }
0x15ec   : > { %v15039_v22 = vpop.f32.mrb[229].mxu1 }
0x15ed   : > { %v15040_v20 = vadd.f32 %v15039_v22, %v15038_v47  ;;  %v15041_v31 = vpop.f32.mrb[230].mxu1 }
0x15ee   : > { %v15082_v32 = vpop.f32.mrb[192].mxu0  ;;  %v15042_v6 = vpop.f32.mrb[231].mxu1 }
0x15ef   : > { %v15083_v12 = vpop.f32.mrb[193].mxu0  ;;  %v11039_v51 = vadd.f32 %v15040_v20, %v10870_v30 }
0x15f0   : > { %v15084_v26 = vadd.f32 %v15083_v12, %v15082_v32  ;;  %v15085_v54 = vpop.f32.mrb[194].mxu0 }
0x15f1   : > { %v15086_v48 = vpop.f32.mrb[195].mxu0 }
0x160b   : > { %v15060_v41 = vpop.f32.mrb[232].mxu1 }
0x160c   : > { %v15061_v53 = vpop.f32.mrb[233].mxu1 }
0x160d   : > { %v15062_v18 = vadd.f32 %v15061_v53, %v15060_v41  ;;  %v15063_v28 = vpop.f32.mrb[234].mxu1 }
0x160e   : > { %v15126_v56 = vpop.f32.mrb[196].mxu0  ;;  %v15064_v57 = vpop.f32.mrb[235].mxu1 }
0x160f   : > { %v11216_v45 = vadd.f32 %v15062_v18, %v11039_v51  ;;  %v15127_v37 = vpop.f32.mrb[197].mxu0 }
0x1610   : > { %v15128_v58 = vadd.f32 %v15127_v37, %v15126_v56  ;;  %v15129_v3 = vpop.f32.mrb[198].mxu0 }
0x1611   : > { %v15130_v46 = vpop.f32.mrb[199].mxu0  ;;  %v11391_v15 = vadd.f32 %v15084_v26, %v11216_v45 }
0x162b   : > { %v15104_v61 = vpop.f32.mrb[236].mxu1 }
0x162c   : > { %v15105_v21 = vpop.f32.mrb[237].mxu1 }
0x162d   : > { %v15106_v27 = vadd.f32 %v15105_v21, %v15104_v61  ;;  %v15107_v59 = vpop.f32.mrb[238].mxu1 }
0x162e   : > { %v15170_v7 = vpop.f32.mrb[200].mxu0  ;;  %v15108_v49 = vpop.f32.mrb[239].mxu1 }
0x162f   : > { %v11564_v2 = vadd.f32 %v15106_v27, %v11391_v15  ;;  %v15171_v35 = vpop.f32.mrb[201].mxu0 }
0x1630   : > { %v15172_v33 = vadd.f32 %v15171_v35, %v15170_v7  ;;  %v15173_v50 = vpop.f32.mrb[202].mxu0 }
0x1631   : > { %v15174_v55 = vpop.f32.mrb[203].mxu0  ;;  %v11737_v17 = vadd.f32 %v15128_v58, %v11564_v2 }
0x164b   : > { %v15148_v14 = vpop.f32.mrb[240].mxu1 }
0x164c   : > { %v15149_v52 = vpop.f32.mrb[241].mxu1 }
0x164d   : > { %v15150_v60 = vadd.f32 %v15149_v52, %v15148_v14  ;;  %v15151_v4 = vpop.f32.mrb[242].mxu1 }
0x164e   : > { %v15152_v24 = vpop.f32.mrb[243].mxu1 }
0x164f   : > { %v11910_v62 = vadd.f32 %v15150_v60, %v11737_v17 }
0x1651   : > { %v12083_v29 = vadd.f32 %v15172_v33, %v11910_v62 }
0x166b   : > { %v15192_v5 = vpop.f32.mrb[244].mxu1 }
0x166c   : > { %v15193_v42 = vpop.f32.mrb[245].mxu1 }
0x166d   : > { %v15194_v0 = vadd.f32 %v15193_v42, %v15192_v5  ;;  %v15195_v11 = vpop.f32.mrb[246].mxu1 }
0x166e   : > { %v15196_v23 = vpop.f32.mrb[247].mxu1 }
0x166f   : > { %v12256_v38 = vadd.f32 %v15194_v0, %v12083_v29 }
0x1671   : > { %v12257_v9 = vmax.f32 %v12256_v38, 0.0 }
0x1673   : > { %v12258_v39 = vpack.c.bf16 %v12257_v9, %v12257_v9 }
0x1675   : > { %15464 = vmatmul.mubr.msk.bf16.vlgmr.msra.gmra.mrb[204].mxu0 %vm4933_vm8, %v12258_v39 }
0x1748   : > { %v12329_v44 = vpop.f32.mrb[204].mxu0 }
0x1749   : > { %v12330_v43 = vadd.f32 %v12329_v44, %v12267_v63  ;;  %v15465_v25 = vpop.f32.mrb[205].mxu0 }
0x174a   : > { %v12332_v1 = vpop.f32.mrb[206].mxu0 }
0x174b   : > { %14074 = vst.msk [vmem:[%s19451_s24 + $0x1] sm:$0x1] %vm6414_vm11, %v12330_v43  ;;  %v15466_v13 = vpop.f32.mrb[207].mxu0 }
0x174c   : > { %17114 = shalt.err (!%p17111_p3)
}
0x174d   : > { %s17115_s24 = scalar_lea.hbm %s20999_s20, 32  ;;  %s17119_s0 = scalar_lea.hbm %s21060_s14, 64 }
0x174e   : > { %p17116_p4 = scmp.ne.s32.totalorder %s20999_s20, %s17115_s24  ;;  %p17120_p9 = scmp.lt.u32.totalorder %s20999_s20, %s21060_s14 }
0x174f   : > { %p17121_p10 = scmp.lt.u32.totalorder %s17119_s0, %s17115_s24  ;;  %p17123_p12 = scmp.lt.u32.totalorder %s17115_s24, %s20999_s20 }
0x1750   : > { %p17117_p7 = pnand %p17116_p4, %p17291_p5 }
0x1751   : > { %p17122_p11 = por %p17121_p10, %p17120_p9 }
0x1752   : > { %p17118_p8 = pneg %p17117_p7 }
0x1753   : > { %p17124_p13 = por %p17123_p12, %p17122_p11 }
0x1755   : > { %p17125_p0 = pnand %p17124_p13, %p17118_p8 }
0x1757   : > { %17128 = shalt.err (!%p17125_p0)
}
0x1758   : > { %s17176_s17 = smov 16   ;;  %s17177_s18 = smov 1  }
0x1759   : > { %15888 = dma.vmem_to_hbm [thread:$0]  (%p17291_p5), %s20994_s22, 32, %s20999_s20, %s21005_s27, %s17176_s17, %s17176_s17, %s17177_s18  }
0x175a PF: > { %p15894_p1 = scmp.ge.s32.totalorder %s17163_s16, 2  ;;  %s12366_s19 = sand.u32 1, %s17151_s29  }
0x175b   : > { %s12367_s24 = scalar_lea.sflag [#allocation3], %s12366_s19 }
0x175c   : > { %p15891_p2 = pnand %p15894_p1, %p17295_p6 }
0x175e   : > { %17146 = dma.done.wait (!%p15891_p2), %s12367_s24, 32  }
0x175f   : > { %17148 = vsyncadd (!%p15891_p2), %s12367_s24, 4294967264  ;;  %s21094_s16 = sld [smem:[#allocation6_spill]]  ;;  %s21095_s21 = sld [smem:[#allocation5_spill]] }
0x1760   : > { %s21096_s15 = sld [smem:[#allocation7_spill]]  ;;  %s21097_s29 = smov %s17155_s30 }
0x1765   : > { %p24_p3 = scmp.ge.s32.totalorder %s21094_s16, 4   ;;  %s21098_s30 = smov %s21095_s21 }
0x1767   :  { %26 = sbr.rel (!%p24_p3) target bundleno = 5 (0x5), region = 126 }
0x176e   :  { %12372 = vsyncpa [#allocation3], 1 }
0x176f   :  { %12374 = vsyncpa [#allocation3 + $0x1], 1 }

</bundles_post_ra>
